<compile_context>
chip_gen: v7x
topology: tpu7x:2x2x1
jax: 0.10.0
libtpu: 0.0.40
codegen_flags: <defaults>
</compile_context>

<pallas_src>
import jax
import jax.numpy as jnp
from jax.experimental import pallas as pl
from jax.experimental.pallas import tpu as pltpu


# ----------------------------- Pallas kernel ------------------------------ #
def _poly_conv_kernel(coef_ref, adj_hbm_ref, x_ref, o_ref, adj_vmem, adj_sem):
    """Grid step f: emit ALL Jacobi basis levels for feature tile f.

    coef_ref    : SMEM (depth+1, 3) f32 recurrence coefficients (scalar prefetch)
    adj_hbm_ref : ANY/HBM (N, N)    dense adjacency (not auto-pipelined)
    x_ref       : VMEM (N, tf)      feature tile of the node embeddings
    o_ref       : VMEM (N, depth+1, tf) output tile (all levels for this tile)
    adj_vmem    : VMEM (N, N)       single-buffered resident adjacency
    adj_sem     : DMA semaphore for the one-time adjacency copy
    """
    # Load the dense adjacency once; it persists in scratch across feature tiles.
    @pl.when(pl.program_id(0) == 0)
    def _load_adj():
        cp = pltpu.make_async_copy(adj_hbm_ref, adj_vmem, adj_sem)
        cp.start()
        cp.wait()

    depth = o_ref.shape[1] - 1
    adj_dt = adj_vmem.dtype
    adj = adj_vmem[...]

    x_raw = x_ref[...]
    o_ref[:, 0, :] = x_raw.astype(o_ref.dtype)          # level 0: x itself

    cur = x_raw.astype(jnp.float32)                      # f32 recurrence state
    prev = jnp.zeros_like(cur)
    cur_mxu = x_raw if x_raw.dtype == adj_dt else x_raw.astype(adj_dt)

    # depth is a small static int -> fully unrolled level loop; the recurrence
    # state stays in plain values (no rotating scratch, no dead final store).
    for L in range(1, depth + 1):
        # MXU matmul in the adjacency dtype (bf16 stays bf16), f32 accumulate.
        ax = jnp.dot(adj, cur_mxu, preferred_element_type=jnp.float32)
        c0 = coef_ref[L, 0]
        c1 = coef_ref[L, 1]
        c2 = coef_ref[L, 2]
        nxt = c0 * ax + c1 * cur + c2 * prev             # f32 axpy on the VPU

        nxt_store = nxt.astype(o_ref.dtype)
        o_ref[:, L, :] = nxt_store                       # lane-dense (tf % 128 == 0)

        if L < depth:                                    # no dead work after last level
            cur_mxu = nxt_store if o_ref.dtype == adj_dt else nxt.astype(adj_dt)
            prev, cur = cur, nxt


# ------------------------------ JAX wrapper ------------------------------- #
def _jacobi_coef_table(raw_alphas, depth, basealpha, a, b, l, r):
    """Build (depth+1, 3) table: x_L = c0*(A@x_{L-1}) + c1*x_{L-1} + c2*x_{L-2}."""
    alphas = basealpha * jnp.tanh(raw_alphas.astype(jnp.float32))  # (depth+1,)
    zero = jnp.zeros((), jnp.float32)
    rows = [jnp.stack([zero, zero, zero])]  # L = 0 (unused: x_0 = x)

    if depth >= 1:
        coef1 = (a - b) / 2 - (a + b + 2) / 2 * (l + r) / (r - l)
        coef2 = (a + b + 2) / (r - l)
        rows.append(jnp.stack([alphas[0] * coef2, alphas[0] * coef1, zero]))

    for L in range(2, depth + 1):
        coef_l = 2 * L * (L + a + b) * (2 * L - 2 + a + b)
        coef_lm1_1 = (2 * L + a + b - 1) * (2 * L + a + b) * (2 * L + a + b - 2)
        coef_lm1_2 = (2 * L + a + b - 1) * (a ** 2 - b ** 2)
        coef_lm2 = 2 * (L - 1 + a) * (L - 1 + b) * (2 * L + a + b)
        tmp1 = alphas[L - 1] * (coef_lm1_1 / coef_l)
        tmp2 = alphas[L - 1] * (coef_lm1_2 / coef_l)
        tmp3 = alphas[L - 1] * alphas[L - 2] * (coef_lm2 / coef_l)
        tmp1_2 = tmp1 * (2 / (r - l))
        tmp2_2 = tmp1 * ((r + l) / (r - l)) + tmp2
        rows.append(jnp.stack([tmp1_2, -tmp2_2, -tmp3]))

    return jnp.stack(rows).astype(jnp.float32)


def poly_conv_frame(x, adj, raw_alphas, *, depth=3, basealpha=1.0,
                    a=1.0, b=1.0, l=-1.0, r=1.0, feat_tile=None, out_dtype=None):
    """PolyConvFrame.forward: returns (N, depth+1, F)."""
    N, F = x.shape
    assert adj.shape == (N, N), adj.shape
    out_dtype = x.dtype if out_dtype is None else jnp.dtype(out_dtype)
    out_isize = jnp.dtype(out_dtype).itemsize

    coef = _jacobi_coef_table(raw_alphas, depth, basealpha, a, b, l, r)

    # --- VMEM capacity (v5e/v6e: 128 MiB, v7x: 64 MiB per TensorCore) ---------
    try:
        vmem_cap = int(pltpu.get_tpu_info().vmem_capacity_bytes)
    except Exception:
        # Hardware query unavailable (e.g. interpret mode); this fallback only
        # affects the sizing heuristic, never the kernel itself.
        vmem_cap = 128 << 20
    budget = int(vmem_cap * 0.85)

    def _need_bytes(tf, adj_dt):
        adj_b = N * N * jnp.dtype(adj_dt).itemsize                  # resident, 1 buffer
        x_b = 2 * N * tf * jnp.dtype(x.dtype).itemsize              # double-buffered in
        o_b = 2 * N * (depth + 1) * tf * out_isize                  # double-buffered out
        tmp_b = 6 * N * tf * 4                                      # f32 cur/prev/ax/nxt + casts
        return adj_b + x_b + o_b + tmp_b

    # --- feature tile: largest 128-multiple divisor of F that fits VMEM -------
    cands = [d for d in range(128, F + 1, 128) if F % d == 0]
    if not cands:
        cands = [F]                               # block == full dim is always legal
    if feat_tile is not None:
        capped = [d for d in cands if d <= feat_tile]
        cands = capped or [min(cands)]
    cands = sorted(set(cands), reverse=True)

    # --- adjacency compute dtype: keep native; downcast to bf16 only if needed
    adj_dtype_cands = [adj.dtype]
    if adj.dtype == jnp.float32:
        adj_dtype_cands.append(jnp.dtype(jnp.bfloat16))

    chosen = None
    for adj_dt in adj_dtype_cands:
        for tf in cands:
            if _need_bytes(tf, adj_dt) <= budget:
                chosen = (tf, jnp.dtype(adj_dt))
                break
        if chosen is not None:
            break
    if chosen is None:
        # TODO(synk): stream the adjacency in (row, col) tiles with
        # pltpu.emit_pipeline + a K-reduction accumulator for graphs whose dense
        # (N, N) adjacency cannot be resident (matters most on v7x's 64 MiB VMEM).
        raise ValueError(
            f"dense adjacency ({N}x{N}) plus tiles does not fit TPU VMEM "
            f"({vmem_cap >> 20} MiB); a node-tiled streaming variant is required")

    tf, adj_dt = chosen
    n_ft = F // tf
    adj_in = adj if adj.dtype == adj_dt else adj.astype(adj_dt)

    need = _need_bytes(tf, adj_dt)
    vmem_limit = min(max(int(need * 1.3) + (4 << 20), 32 << 20), int(vmem_cap * 0.9))

    grid_spec = pltpu.PrefetchScalarGridSpec(
        num_scalar_prefetch=1,                       # coef table -> SMEM
        grid=(n_ft,),                                # level loop is inside the kernel
        in_specs=[
            pl.BlockSpec(memory_space=pl.ANY),       # adjacency stays in HBM; manual DMA
            pl.BlockSpec((N, tf), lambda f, coef_s: (0, f)),
        ],
        out_specs=pl.BlockSpec((N, depth + 1, tf), lambda f, coef_s: (0, 0, f)),
        scratch_shapes=[
            pltpu.VMEM((N, N), adj_dt),              # single-buffered resident adjacency
            pltpu.SemaphoreType.DMA(()),
        ],
    )

    # Note: the feature axis is marked "arbitrary" because the adjacency scratch
    # is only filled at grid step 0 and persists across steps.  Splitting this
    # axis across v7x TensorCores (CORE_PARALLEL / core_map) would require a
    # per-core adjacency copy in each 64 MiB VMEM.
    out = pl.pallas_call(
        _poly_conv_kernel,
        out_shape=jax.ShapeDtypeStruct((N, depth + 1, F), out_dtype),
        grid_spec=grid_spec,
        compiler_params=pltpu.CompilerParams(
            dimension_semantics=("arbitrary",),
            vmem_limit_bytes=vmem_limit),
    )(coef, adj_in, x)
    return out


# ------------------------- pure-JAX reference ------------------------------ #
def poly_conv_frame_ref(x, adj, raw_alphas, *, depth=3, basealpha=1.0,
                        a=1.0, b=1.0, l=-1.0, r=1.0):
    alphas = [basealpha * jnp.tanh(t) for t in raw_alphas.astype(jnp.float32)]
    hp = jax.lax.Precision.HIGHEST

    def jacobi(L, xs):
        if L == 0:
            return xs[0]
        if L == 1:
            coef1 = ((a - b) / 2 - (a + b + 2) / 2 * (l + r) / (r - l)) * alphas[0]
            coef2 = ((a + b + 2) / (r - l)) * alphas[0]
            return coef1 * xs[-1] + coef2 * jnp.dot(adj, xs[-1], precision=hp)
        coef_l = 2 * L * (L + a + b) * (2 * L - 2 + a + b)
        coef_lm1_1 = (2 * L + a + b - 1) * (2 * L + a + b) * (2 * L + a + b - 2)
        coef_lm1_2 = (2 * L + a + b - 1) * (a ** 2 - b ** 2)
        coef_lm2 = 2 * (L - 1 + a) * (L - 1 + b) * (2 * L + a + b)
        tmp1 = alphas[L - 1] * (coef_lm1_1 / coef_l)
        tmp2 = alphas[L - 1] * (coef_lm1_2 / coef_l)
        tmp3 = alphas[L - 1] * alphas[L - 2] * (coef_lm2 / coef_l)
        tmp1_2 = tmp1 * (2 / (r - l))
        tmp2_2 = tmp1 * ((r + l) / (r - l)) + tmp2
        return (tmp1_2 * jnp.dot(adj, xs[-1], precision=hp)
                - tmp2_2 * xs[-1] - tmp3 * xs[-2])

    xs = [jacobi(0, [x])]
    for L in range(1, depth + 1):
        xs.append(jacobi(L, xs))
    return jnp.stack(xs, axis=1)   # (N, depth+1, F)


# --------------------------------- main ------------------------------------ #
if __name__ == "__main__":
    depth = 3
    basealpha = 1.0
    # N multiple of 128 keeps the MXU sublane dim full; F=512 gives a single
    # 512-wide lane-dense feature tile (multiples of 256 suit v6e/v7x MXUs).
    N, F = 128, 512

    key = jax.random.PRNGKey(0)
    kx, ka = jax.random.split(key)
    x = jax.random.normal(kx, (N, F), dtype=jnp.float32)
    adj = jax.random.normal(ka, (N, N), dtype=jnp.float32) / jnp.sqrt(N)

    # nn.Parameter init: tensor(min(1/alpha, 1)) for each of depth+1 params.
    raw_alphas = jnp.full((depth + 1,), min(1.0 / basealpha, 1.0), jnp.float32)

    # f32 path (checked against the pure-JAX reference).
    out = poly_conv_frame(x, adj, raw_alphas, depth=depth, basealpha=basealpha)
    out = jax.block_until_ready(out)
    ref = poly_conv_frame_ref(x, adj, raw_alphas, depth=depth, basealpha=basealpha)
    assert out.shape == (N, depth + 1, F), out.shape
    assert jnp.allclose(out, ref, atol=2e-3, rtol=2e-3), \
        float(jnp.max(jnp.abs(out - ref)))

    # bf16 operand path: bf16 adj/x reach the MXU in bf16 (f32 accumulation),
    # halving adjacency VMEM and doubling MXU throughput on v6e/v7x.
    x16 = x.astype(jnp.bfloat16)
    adj16 = adj.astype(jnp.bfloat16)
    out16 = poly_conv_frame(x16, adj16, raw_alphas, depth=depth, basealpha=basealpha)
    out16 = jax.block_until_ready(out16)
    ref16 = poly_conv_frame_ref(x16.astype(jnp.float32), adj16.astype(jnp.float32),
                                raw_alphas, depth=depth, basealpha=basealpha)
    rel = (jnp.linalg.norm(out16.astype(jnp.float32) - ref16)
           / jnp.linalg.norm(ref16))
    assert out16.dtype == jnp.bfloat16 and float(rel) < 5e-2, float(rel)

    print("KERNEL_OK")
</pallas_src>

<mosaic_0001>
module attributes {stable_mosaic.version = 11 : i64} {
  func.func @_poly_conv_kernel(%arg0: i32, %arg1: memref<4x3xf32, #tpu.memory_space<smem>>, %arg2: memref<128x128xf32, #tpu.memory_space<any>>, %arg3: memref<128x512xf32, #tpu.memory_space<vmem>>, %arg4: memref<128x4x512xf32, #tpu.memory_space<vmem>>, %arg5: memref<128x128xf32, #tpu.memory_space<vmem>>, %arg6: memref<!tpu.dma_semaphore, #tpu.memory_space<semaphore_mem>>) attributes {dimension_semantics = [#tpu.dimension_semantics<arbitrary>], iteration_bounds = array<i64: 1>, scalar_prefetch = 1 : i64, scratch_operands = 2 : i64, tpu.core_type = #tpu.core_type<tc>, window_params = [{}, {transform_indices = @transform_1, window_bounds = array<i64: 128, 512>}, {transform_indices = @transform_2, window_bounds = array<i64: 128, 4, 512>}]} {
    %c0_i32 = arith.constant 0 : i32
    %0 = arith.cmpi eq, %arg0, %c0_i32 : i32
    %1 = arith.extui %0 : i1 to i32
    %c0_i32_0 = arith.constant 0 : i32
    %2 = arith.cmpi ne, %1, %c0_i32_0 : i32
    scf.if %2 {
      tpu.enqueue_dma source(%arg2 : memref<128x128xf32, #tpu.memory_space<any>>) target(%arg5 : memref<128x128xf32, #tpu.memory_space<vmem>>) target_semaphore(%arg6 : memref<!tpu.dma_semaphore, #tpu.memory_space<semaphore_mem>>)
      tpu.wait_dma2 semaphore(%arg6 : memref<!tpu.dma_semaphore, #tpu.memory_space<semaphore_mem>>) src(%arg2 : memref<128x128xf32, #tpu.memory_space<any>>) dst(%arg5 : memref<128x128xf32, #tpu.memory_space<vmem>>)
    } else {
    }
    %c0 = arith.constant 0 : index
    %c0_1 = arith.constant 0 : index
    %3 = vector.load %arg5[%c0, %c0_1] : memref<128x128xf32, #tpu.memory_space<vmem>>, vector<128x128xf32>
    %c0_2 = arith.constant 0 : index
    %c0_3 = arith.constant 0 : index
    %4 = vector.load %arg3[%c0_2, %c0_3] : memref<128x512xf32, #tpu.memory_space<vmem>>, vector<128x512xf32>
    %c0_4 = arith.constant 0 : index
    %c0_5 = arith.constant 0 : index
    %c0_6 = arith.constant 0 : index
    %5 = vector.load %arg4[%c0_4, %c0_5, %c0_6] : memref<128x4x512xf32, #tpu.memory_space<vmem>>, vector<128x1x512xf32>
    %6 = vector.shape_cast %5 : vector<128x1x512xf32> to vector<128x512xf32>
    %7 = vector.shape_cast %4 : vector<128x512xf32> to vector<128x1x512xf32>
    tpu.vector_store %arg4[%c0_4, %c0_5, %c0_6], %7 {strides = array<i32>} : memref<128x4x512xf32, #tpu.memory_space<vmem>>, vector<128x1x512xf32>,
    %cst = arith.constant 0.000000e+00 : f32
    %8 = vector.broadcast %cst : f32 to vector<128x512xf32>
    %cst_7 = arith.constant dense<0.000000e+00> : vector<128x512xf32>
    %9 = tpu.matmul %3, %4, %cst_7 {dimension_numbers = #tpu.dot_dimension_numbers<[1], [0], [0], [1], [0, 0, 1, 1], [], []>} : vector<128x128xf32>, vector<128x512xf32>, vector<128x512xf32> -> vector<128x512xf32>
    %c1 = arith.constant 1 : index
    %c0_8 = arith.constant 0 : index
    %10 = memref.load %arg1[%c1, %c0_8] : memref<4x3xf32, #tpu.memory_space<smem>>
    %c1_9 = arith.constant 1 : index
    %c1_10 = arith.constant 1 : index
    %11 = memref.load %arg1[%c1_9, %c1_10] : memref<4x3xf32, #tpu.memory_space<smem>>
    %c1_11 = arith.constant 1 : index
    %c2 = arith.constant 2 : index
    %12 = memref.load %arg1[%c1_11, %c2] : memref<4x3xf32, #tpu.memory_space<smem>>
    %13 = vector.broadcast %10 : f32 to vector<128x512xf32>
    %14 = arith.mulf %13, %9 : vector<128x512xf32>
    %15 = vector.broadcast %11 : f32 to vector<128x512xf32>
    %16 = arith.mulf %15, %4 : vector<128x512xf32>
    %17 = arith.addf %14, %16 : vector<128x512xf32>
    %18 = vector.broadcast %12 : f32 to vector<128x512xf32>
    %19 = arith.mulf %18, %8 : vector<128x512xf32>
    %20 = arith.addf %17, %19 : vector<128x512xf32>
    %c0_12 = arith.constant 0 : index
    %c1_13 = arith.constant 1 : index
    %c0_14 = arith.constant 0 : index
    %21 = vector.load %arg4[%c0_12, %c1_13, %c0_14] : memref<128x4x512xf32, #tpu.memory_space<vmem>>, vector<128x1x512xf32>
    %22 = vector.shape_cast %21 : vector<128x1x512xf32> to vector<128x512xf32>
    %23 = vector.shape_cast %20 : vector<128x512xf32> to vector<128x1x512xf32>
    tpu.vector_store %arg4[%c0_12, %c1_13, %c0_14], %23 {strides = array<i32>} : memref<128x4x512xf32, #tpu.memory_space<vmem>>, vector<128x1x512xf32>,
    %cst_15 = arith.constant dense<0.000000e+00> : vector<128x512xf32>
    %24 = tpu.matmul %3, %20, %cst_15 {dimension_numbers = #tpu.dot_dimension_numbers<[1], [0], [0], [1], [0, 0, 1, 1], [], []>} : vector<128x128xf32>, vector<128x512xf32>, vector<128x512xf32> -> vector<128x512xf32>
    %c2_16 = arith.constant 2 : index
    %c0_17 = arith.constant 0 : index
    %25 = memref.load %arg1[%c2_16, %c0_17] : memref<4x3xf32, #tpu.memory_space<smem>>
    %c2_18 = arith.constant 2 : index
    %c1_19 = arith.constant 1 : index
    %26 = memref.load %arg1[%c2_18, %c1_19] : memref<4x3xf32, #tpu.memory_space<smem>>
    %c2_20 = arith.constant 2 : index
    %c2_21 = arith.constant 2 : index
    %27 = memref.load %arg1[%c2_20, %c2_21] : memref<4x3xf32, #tpu.memory_space<smem>>
    %28 = vector.broadcast %25 : f32 to vector<128x512xf32>
    %29 = arith.mulf %28, %24 : vector<128x512xf32>
    %30 = vector.broadcast %26 : f32 to vector<128x512xf32>
    %31 = arith.mulf %30, %20 : vector<128x512xf32>
    %32 = arith.addf %29, %31 : vector<128x512xf32>
    %33 = vector.broadcast %27 : f32 to vector<128x512xf32>
    %34 = arith.mulf %33, %4 : vector<128x512xf32>
    %35 = arith.addf %32, %34 : vector<128x512xf32>
    %c0_22 = arith.constant 0 : index
    %c2_23 = arith.constant 2 : index
    %c0_24 = arith.constant 0 : index
    %36 = vector.load %arg4[%c0_22, %c2_23, %c0_24] : memref<128x4x512xf32, #tpu.memory_space<vmem>>, vector<128x1x512xf32>
    %37 = vector.shape_cast %36 : vector<128x1x512xf32> to vector<128x512xf32>
    %38 = vector.shape_cast %35 : vector<128x512xf32> to vector<128x1x512xf32>
    tpu.vector_store %arg4[%c0_22, %c2_23, %c0_24], %38 {strides = array<i32>} : memref<128x4x512xf32, #tpu.memory_space<vmem>>, vector<128x1x512xf32>,
    %cst_25 = arith.constant dense<0.000000e+00> : vector<128x512xf32>
    %39 = tpu.matmul %3, %35, %cst_25 {dimension_numbers = #tpu.dot_dimension_numbers<[1], [0], [0], [1], [0, 0, 1, 1], [], []>} : vector<128x128xf32>, vector<128x512xf32>, vector<128x512xf32> -> vector<128x512xf32>
    %c3 = arith.constant 3 : index
    %c0_26 = arith.constant 0 : index
    %40 = memref.load %arg1[%c3, %c0_26] : memref<4x3xf32, #tpu.memory_space<smem>>
    %c3_27 = arith.constant 3 : index
    %c1_28 = arith.constant 1 : index
    %41 = memref.load %arg1[%c3_27, %c1_28] : memref<4x3xf32, #tpu.memory_space<smem>>
    %c3_29 = arith.constant 3 : index
    %c2_30 = arith.constant 2 : index
    %42 = memref.load %arg1[%c3_29, %c2_30] : memref<4x3xf32, #tpu.memory_space<smem>>
    %43 = vector.broadcast %40 : f32 to vector<128x512xf32>
    %44 = arith.mulf %43, %39 : vector<128x512xf32>
    %45 = vector.broadcast %41 : f32 to vector<128x512xf32>
    %46 = arith.mulf %45, %35 : vector<128x512xf32>
    %47 = arith.addf %44, %46 : vector<128x512xf32>
    %48 = vector.broadcast %42 : f32 to vector<128x512xf32>
    %49 = arith.mulf %48, %20 : vector<128x512xf32>
    %50 = arith.addf %47, %49 : vector<128x512xf32>
    %c0_31 = arith.constant 0 : index
    %c3_32 = arith.constant 3 : index
    %c0_33 = arith.constant 0 : index
    %51 = vector.load %arg4[%c0_31, %c3_32, %c0_33] : memref<128x4x512xf32, #tpu.memory_space<vmem>>, vector<128x1x512xf32>
    %52 = vector.shape_cast %51 : vector<128x1x512xf32> to vector<128x512xf32>
    %53 = vector.shape_cast %50 : vector<128x512xf32> to vector<128x1x512xf32>
    tpu.vector_store %arg4[%c0_31, %c3_32, %c0_33], %53 {strides = array<i32>} : memref<128x4x512xf32, #tpu.memory_space<vmem>>, vector<128x1x512xf32>,
    return
  }
  func.func @transform_1(%arg0: i32, %arg1: memref<4x3xf32, #tpu.memory_space<smem>>) -> (i32, i32) {
    %c0_i32 = arith.constant 0 : i32
    %c0_i32_0 = arith.constant 0 : i32
    return %c0_i32, %arg0 : i32, i32
  }
  func.func @transform_2(%arg0: i32, %arg1: memref<4x3xf32, #tpu.memory_space<smem>>) -> (i32, i32, i32) {
    %c0_i32 = arith.constant 0 : i32
    %c0_i32_0 = arith.constant 0 : i32
    %c0_i32_1 = arith.constant 0 : i32
    return %c0_i32, %c0_i32_0, %arg0 : i32, i32, i32
  }
}

</mosaic_0001>

<bundles_post_ra>
// kernel: tpu_custom_call.1
= control target key start
LH: loop header
LB: loop body
LE: loop exit
PB: predicated region body
PF: predicated region fallthrough
CT: control target
= control target key end

     0   :  { %s13487_s0 = inlined_call_operand.hbm [shape: f32[4,3], index: 0, kind: input, shape index: {}]   ;;  %s13488_s1 = inlined_call_operand.hbm [shape: f32[128,128], index: 1, kind: input, shape index: {}]   ;;  %s13489_s2 = inlined_call_operand.hbm [shape: f32[128,512], index: 2, kind: input, shape index: {}]   ;;  %s13490_s3 = inlined_call_operand.hbm [shape: f32[128,4,512], index: 3, kind: output, shape index: {}]  }
   0x1   :  { %s8578_s14 = scalar_lea.hbm %s13487_s0, 64 }
   0x2   :  { %p8579_p0 = scmp.ne.s32.totalorder %s13487_s0, %s8578_s14  ;;  %p8582_p1 = scmp.lt.u32.totalorder %s8578_s14, %s13487_s0 }
   0x4   :  { %p8584_p2 = pnand %p8582_p1, %p8579_p0 }
   0x6   :  { %8587 = shalt.err (!%p8584_p2)  }
   0x7   :  { %s8662_s19 = smov [#allocation5]  }
   0x8   :  { %9 = dma.hbm_to_smem %s13487_s0, 64, %s8662_s19, [#allocation4] }
   0x9   :  { %8654 = dma.done.wait [#allocation4], 64 }
   0xa   :  { %8655 = vsyncadd [#allocation4], 4294967232 }
   0xb   :  { %11 = sfence }
   0xc   :  { %12 = vsyncpa [#allocation7], 0 }
   0xd   :  { %13 = vsyncpa [#allocation8], 0  ;;  %s8663_s22 = smov [#allocation6]   ;;  %s8588_s26 = scalar_lea.hbm %s13489_s2, 8192 }
   0xe   :  { %s19_s23 = sshll.u32 %s8663_s22, 4  ;;  %p8589_p3 = scmp.ne.s32.totalorder %s13489_s2, %s8588_s26  ;;  %s20_s23 = int_to_ptr.vmem [resolvable:$true] %s19_s23 }
   0xf   :  { %p8592_p4 = scmp.lt.u32.totalorder %s8588_s26, %s13489_s2 }
  0x11   :  { %p8594_p5 = pnand %p8592_p4, %p8589_p3 }
  0x13   :  { %8597 = shalt.err (!%p8594_p5)
}
  0x14   :  { %s8598_s0 = scalar_lea.vmem %s20_s23, 8192  ;;  %p8603_p7 = scmp.lt.s32.totalorder %s20_s23, %s20_s23 }
  0x15   :  { %p8599_p6 = scmp.ne.s32.totalorder %s20_s23, %s8598_s0  ;;  %p8604_p8 = scmp.lt.s32.totalorder %s8598_s0, %s8598_s0 }
  0x17   :  { %p8605_p9 = por %p8604_p8, %p8603_p7 }
  0x19   :  { %p8606_p10 = pnand %p8605_p9, %p8599_p6 }
  0x1b   :  { %8609 = shalt.err (!%p8606_p10)
}
  0x1c   :  { %s8664_s4 = smov 512   ;;  %s8665_s5 = smov 32  }
  0x1d   :  { %25 = dma.hbm_to_vmem [thread:$0]  %s13489_s2, 8192, %s20_s23, [#allocation7], %s8664_s4, %s8664_s4, %s8665_s5  }
  0x1e   :  { %8656 = dma.done.wait [#allocation7], 8192  }
  0x1f   :  { %8657 = vsyncadd [#allocation7], 4294959104  ;;  %s8666_s8 = smov [#allocation2]   ;;  %s8610_s12 = scalar_lea.hbm %s13488_s1, 2048 }
  0x20   :  { %s40_s9 = sshll.u32 %s8666_s8, 4  ;;  %p8611_p11 = scmp.ne.s32.totalorder %s13488_s1, %s8610_s12  ;;  %s41_s9 = int_to_ptr.vmem [resolvable:$true] %s40_s9 }
  0x21   :  { %p8614_p12 = scmp.lt.u32.totalorder %s8610_s12, %s13488_s1 }
  0x23   :  { %p8616_p13 = pnand %p8614_p12, %p8611_p11 }
  0x25   :  { %8619 = shalt.err (!%p8616_p13)  }
  0x26   :  { %s8620_s2 = scalar_lea.vmem %s41_s9, 2048  ;;  %p8625_p1 = scmp.lt.s32.totalorder %s41_s9, %s41_s9 }
  0x27   :  { %p8621_p0 = scmp.ne.s32.totalorder %s41_s9, %s8620_s2  ;;  %p8626_p2 = scmp.lt.s32.totalorder %s8620_s2, %s8620_s2 }
  0x29   :  { %p8627_p3 = por %p8626_p2, %p8625_p1 }
  0x2b   :  { %p8628_p4 = pnand %p8627_p3, %p8621_p0 }
  0x2d   :  { %8631 = shalt.err (!%p8628_p4)  }
  0x2e   :  { %43 = dma.hbm_to_vmem [thread:$0]  %s13488_s1, 2048, %s41_s9, [#allocation3] }
  0x2f   :  { %8658 = dma.done.wait [#allocation3], 2048 }
  0x30   :  { %8659 = vsyncadd [#allocation3], 4294965248  ;;  %v198_v0 = vlaneseq  ;;  %v8667_v1 = vmov 1966171168   ;;  %v13491_v3 = vmov 0.0   ;;  %v64_v6 = vld [vmem:[#allocation6 + $0x8] sm:$0xff] }
  0x31   :  { %v196_v2 = vunpack.c.l.s4 %v8667_v1  ;;  %1730 = vmatprep.mubr.f32.mxu0 %v13491_v3  ;;  %1891 = vmatprep.mubr.f32.mxu1 %v13491_v3  ;;  %v68_v7 = vld [vmem:[#allocation6 + $0x28] sm:$0xff]  ;;  %v66_v8 = vld [vmem:[#allocation6 + $0x18] sm:$0xff]  ;;  %v63_v11 = vld [vmem:[#allocation6] sm:$0xff]  ;;  %v13602_v47 = vmov 0  ;;  %s8179_s1 = sld [smem:[#allocation5 + $0x81]]  ;;  %s8180_s19 = sld [smem:[#allocation5 + $0x82]] }
  0x32   :  { %v199_v5 = vshrl.u32 %v198_v0, 7  ;;  %v8188_v9 = vpack.c.bf16 %v68_v7, %v64_v6  ;;  %v70_v10 = vld [vmem:[#allocation6 + $0x38] sm:$0xff]  ;;  %v67_v12 = vld [vmem:[#allocation6 + $0x20] sm:$0xff]  ;;  %v191_v15 = vcombine.low %v63_v11, %v64_v6  ;;  %v192_v16 = vcombine.high %v63_v11, %v64_v6  ;;  %v65_v18 = vld [vmem:[#allocation6 + $0x10] sm:$0xff]  ;;  %s8178_s20 = sld [smem:[#allocation5 + $0x80]]  ;;  %s8186_s21 = sld [smem:[#allocation5 + $0x182]] }
  0x33   :  { %v197_v4 = vunpack.c.0.s8 %v196_v2  ;;  %v8220_v14 = vpack.c.bf16 %v70_v10, %v66_v8  ;;  %v259_v17 = vcombine.low %v67_v12, %v68_v7  ;;  %v69_v19 = vld [vmem:[#allocation6 + $0x30] sm:$0xff]  ;;  %v8732_v20 = vld [vmem:[#allocation6 + $0x48] sm:$0xff]  ;;  %v260_v21 = vcombine.high %v67_v12, %v68_v7  ;;  %v8736_v26 = vld [vmem:[#allocation6 + $0x58] sm:$0xff]  ;;  %s8182_s22 = sld [smem:[#allocation5 + $0x101]]  ;;  %s10861_s23 = sld [smem:[#allocation5 + $0x102]] }
  0x34   :  { %8189 = vmatprep.subr.bf16.mxu0 %v8188_v9  ;;  %v8190_v22 = vpack.c.bf16 %v67_v12, %v63_v11  ;;  %v193_v23 = vcombine.low %v65_v18, %v66_v8  ;;  %v194_v24 = vcombine.high %v65_v18, %v66_v8  ;;  %v8734_v25 = vld [vmem:[#allocation6 + $0x68] sm:$0xff]  ;;  %v8738_v27 = vld [vmem:[#allocation6 + $0x78] sm:$0xff]  ;;  %v261_v31 = vcombine.low %v69_v19, %v70_v10  ;;  %v71_v60 = vld [vmem:[#allocation6 + $0x40] sm:$0xff]  ;;  %s10911_s24 = sld [smem:[#allocation5 + $0x100]]  ;;  %s12317_s25 = sld [smem:[#allocation5 + $0x181]] }
  0x35   :  { %v8730_v13 = vsub.s32 %v197_v4, %v199_v5  ;;  %8221 = vmatprep.subr.bf16.mxu1 %v8220_v14  ;;  %v262_v35 = vcombine.high %v69_v19, %v70_v10  ;;  %v8222_v37 = vpack.c.bf16 %v69_v19, %v65_v18  ;;  %v8192_v38 = vpack.c.bf16 %v8734_v25, %v8732_v20  ;;  %v75_v61 = vld [vmem:[#allocation6 + $0x60] sm:$0xff]  ;;  %v73_v7 = vld [vmem:[#allocation6 + $0x50] sm:$0xff]  ;;  %v8788_v9 = vld [vmem:[#allocation6 + $0x88] sm:$0xff]  ;;  %s12542_s26 = sld [smem:[#allocation5 + $0x180]]  ;;  %s8669_s27 = smov [#allocation9]  }
  0x36   :  { %8191 = vmatpush1.bf16.msra.mxu0 %v8190_v22  ;;  %v8224_v39 = vpack.c.bf16 %v8738_v27, %v8736_v26  ;;  %vm8752_vm0 = vcmp.lt.s32.totalorder %v198_v0, 512  ;;  %v327_v2 = vcombine.low %v71_v60, %v8732_v20  ;;  %v328_v4 = vcombine.high %v71_v60, %v8732_v20  ;;  %v77_v8 = vld [vmem:[#allocation6 + $0x70] sm:$0xff]  ;;  %s8160_s28 = sshll.u32 %s8669_s27, 4  ;;  %s8161_s28 = int_to_ptr.vmem [resolvable:$true] %s8160_s28 }
  0x37   :  { %13601 = vst [vmem:[#allocation18_spill] sm:$0xff] %v8730_v13  ;;  %v201_v28 = vrot.slane %v191_v15, %v8730_v13  ;;  %v208_v29 = vrot.slane %v192_v16, %v8730_v13  ;;  %v269_v30 = vrot.slane %v259_v17, %v8730_v13  ;;  %v276_v32 = vrot.slane %v260_v21, %v8730_v13  ;;  %v8799_v15 = vld [vmem:[#allocation6 + $0xa8] sm:$0xff]  ;;  %v8801_v16 = vld [vmem:[#allocation6 + $0x98] sm:$0xff]  ;;  %s8632_s29 = scalar_lea.vmem %s8161_s28, 32768  ;;  %p8637_p6 = scmp.lt.s32.totalorder %s8161_s28, %s8161_s28 }
  0x38   :  { %v215_v33 = vrot.slane %v193_v23, %v8730_v13  ;;  %v222_v34 = vrot.slane %v194_v24, %v8730_v13  ;;  %v283_v36 = vrot.slane %v261_v31, %v8730_v13  ;;  %v290_v44 = vrot.slane %v262_v35, %v8730_v13  ;;  %8223 = vmatpush1.bf16.msra.mxu1 %v8222_v37  ;;  %v8803_v17 = vld [vmem:[#allocation6 + $0xb8] sm:$0xff]  ;;  %p8633_p5 = scmp.ne.s32.totalorder %s8161_s28, %s8632_s29  ;;  %p8638_p7 = scmp.lt.s32.totalorder %s8632_s29, %s8632_s29 }
  0x39   :  { %v13603_v47 = vsel %vm8752_vm0, 4294967295, %v13602_v47  ;;  %8193 = vmatprep.subr.bf16.mxu0 %v8192_v38  ;;  %8225 = vmatprep.subr.bf16.mxu1 %v8224_v39  ;;  %v395_v5 = vcombine.low %v75_v61, %v8734_v25  ;;  %v396_v6 = vcombine.high %v75_v61, %v8734_v25  ;;  %v8194_v12 = vpack.c.bf16 %v75_v61, %v71_v60  ;;  %v81_v60 = vld [vmem:[#allocation6 + $0x90] sm:$0xff] }
  0x3a   :  { %v223_v40 = vcombine.low %v201_v28, %v215_v33  ;;  %v224_v41 = vcombine.high %v201_v28, %v215_v33  ;;  %v225_v42 = vcombine.low %v208_v29, %v222_v34  ;;  %v226_v43 = vcombine.high %v208_v29, %v222_v34  ;;  %13604 = vst [vmem:[#allocation19_spill] sm:$0xff] %v13603_v47  ;;  %v8817_v28 = vld [vmem:[#allocation6 + $0x80] sm:$0xff]  ;;  %v85_v61 = vld [vmem:[#allocation6 + $0xb0] sm:$0xff]  ;;  %p8639_p8 = por %p8638_p7, %p8637_p6 }
  0x3b   :  { %v291_v45 = vcombine.low %v269_v30, %v283_v36  ;;  %v292_v46 = vcombine.high %v269_v30, %v283_v36  ;;  %v293_v52 = vcombine.low %v276_v32, %v290_v44  ;;  %v294_v53 = vcombine.high %v276_v32, %v290_v44  ;;  %8195 = vmatpush1.bf16.msra.mxu0 %v8194_v12 }
  0x3c   :  { %v233_v48 = vrot.slane %v223_v40, %v8730_v13  ;;  %v240_v49 = vrot.slane %v225_v42, %v8730_v13  ;;  %v247_v50 = vrot.slane %v224_v41, %v8730_v13  ;;  %v254_v51 = vrot.slane %v226_v43, %v8730_v13  ;;  %p8640_p9 = pnand %p8639_p8, %p8633_p5 }
  0x3d   :  { %v301_v54 = vrot.slane %v291_v45, %v8730_v13  ;;  %v315_v55 = vrot.slane %v292_v46, %v8730_v13  ;;  %v308_v62 = vrot.slane %v293_v52, %v8730_v13  ;;  %v322_v63 = vrot.slane %v294_v53, %v8730_v13 }
  0x3e   :  { %v255_v56 = vcombine.high %v233_v48, %v233_v48  ;;  %v256_v57 = vcombine.high %v240_v49, %v240_v49  ;;  %v257_v58 = vcombine.high %v247_v50, %v247_v50  ;;  %v258_v59 = vcombine.high %v254_v51, %v254_v51  ;;  %1411 = vst.msk [vmem:[#allocation9] ss:$4 sm:$0xf] %vm8752_vm0, %v233_v48 }
  0x3f   :  { %1413 = vst.msk [vmem:[#allocation9 + $0x10] ss:$4 sm:$0xf] %vm8752_vm0, %v247_v50  ;;  %1419 = vst.msk [vmem:[#allocation9 + $0x40] ss:$4 sm:$0xf] %vm8752_vm0, %v240_v49  ;;  %v323_v0 = vcombine.high %v301_v54, %v301_v54  ;;  %v325_v1 = vcombine.high %v315_v55, %v315_v55  ;;  %v324_v10 = vcombine.high %v308_v62, %v308_v62 }
  0x40   :  { %1421 = vst.msk [vmem:[#allocation9 + $0x50] ss:$4 sm:$0xf] %vm8752_vm0, %v254_v51  ;;  %1427 = vst.msk [vmem:[#allocation9 + $0x80] ss:$4 sm:$0xf] %vm8752_vm0, %v301_v54  ;;  %v326_v11 = vcombine.high %v322_v63, %v322_v63  ;;  %v329_v14 = vcombine.low %v73_v7, %v8736_v26  ;;  %v337_v18 = vrot.slane %v327_v2, %v8730_v13 }
  0x41   :  { %1429 = vst.msk [vmem:[#allocation9 + $0x90] ss:$4 sm:$0xf] %vm8752_vm0, %v315_v55  ;;  %1415 = vst.msk [vmem:[#allocation9 + $0x20] ss:$4 sm:$0xf] %vm8752_vm0, %v255_v56  ;;  %v344_v19 = vrot.slane %v328_v4, %v8730_v13  ;;  %v405_v20 = vrot.slane %v395_v5, %v8730_v13  ;;  %v412_v21 = vrot.slane %v396_v6, %v8730_v13 }
  0x42   :  { %1417 = vst.msk [vmem:[#allocation9 + $0x30] ss:$4 sm:$0xf] %vm8752_vm0, %v257_v58  ;;  %1423 = vst.msk [vmem:[#allocation9 + $0x60] ss:$4 sm:$0xf] %vm8752_vm0, %v256_v57  ;;  %v330_v22 = vcombine.high %v73_v7, %v8736_v26  ;;  %v351_v23 = vrot.slane %v329_v14, %v8730_v13  ;;  %v397_v24 = vcombine.low %v77_v8, %v8738_v27 }
  0x43   :  { %1425 = vst.msk [vmem:[#allocation9 + $0x70] ss:$4 sm:$0xf] %vm8752_vm0, %v258_v59  ;;  %1431 = vst.msk [vmem:[#allocation9 + $0xa0] ss:$4 sm:$0xf] %vm8752_vm0, %v323_v0  ;;  %v398_v25 = vcombine.high %v77_v8, %v8738_v27  ;;  %v8226_v29 = vpack.c.bf16 %v77_v8, %v73_v7  ;;  %v8196_v30 = vpack.c.bf16 %v8799_v15, %v8788_v9 }
  0x44   :  { %1433 = vst.msk [vmem:[#allocation9 + $0xb0] ss:$4 sm:$0xf] %vm8752_vm0, %v325_v1  ;;  %1435 = vst.msk [vmem:[#allocation9 + $0xc0] ss:$4 sm:$0xf] %vm8752_vm0, %v308_v62  ;;  %v8228_v31 = vpack.c.bf16 %v8803_v17, %v8801_v16  ;;  %v463_v32 = vcombine.low %v8817_v28, %v8788_v9  ;;  %v358_v26 = vrot.slane %v330_v22, %v8730_v13 }
  0x45   :  { %1437 = vst.msk [vmem:[#allocation9 + $0xd0] ss:$4 sm:$0xf] %vm8752_vm0, %v322_v63  ;;  %1439 = vst.msk [vmem:[#allocation9 + $0xe0] ss:$4 sm:$0xf] %vm8752_vm0, %v324_v10  ;;  %v359_v33 = vcombine.low %v337_v18, %v351_v23  ;;  %v360_v34 = vcombine.high %v337_v18, %v351_v23  ;;  %v419_v35 = vrot.slane %v397_v24, %v8730_v13  ;;  %8227 = vmatpush1.bf16.msra.mxu1 %v8226_v29 }
  0x46   :  { %1441 = vst.msk [vmem:[#allocation9 + $0xf0] ss:$4 sm:$0xf] %vm8752_vm0, %v326_v11  ;;  %v426_v27 = vrot.slane %v398_v25, %v8730_v13  ;;  %8197 = vmatprep.subr.bf16.mxu0 %v8196_v30  ;;  %v464_v36 = vcombine.high %v8817_v28, %v8788_v9  ;;  %v8831_v37 = vrot.slane %v463_v32, %v8730_v13  ;;  %v83_v55 = vld [vmem:[#allocation6 + $0xa0] sm:$0xff]  ;;  %v8855_v62 = vld [vmem:[#allocation6 + $0xc8] sm:$0xff]  ;;  %v8867_v5 = vld [vmem:[#allocation6 + $0xd8] sm:$0xff] }
  0x47   :  { %v361_v38 = vcombine.low %v344_v19, %v358_v26  ;;  %v362_v39 = vcombine.high %v344_v19, %v358_v26  ;;  %v369_v40 = vrot.slane %v359_v33, %v8730_v13  ;;  %v383_v41 = vrot.slane %v360_v34, %v8730_v13  ;;  %8229 = vmatprep.subr.bf16.mxu1 %v8228_v31  ;;  %v8865_v4 = vld [vmem:[#allocation6 + $0xe8] sm:$0xff]  ;;  %v8869_v6 = vld [vmem:[#allocation6 + $0xf8] sm:$0xff]  ;;  %v8896_v22 = vld [vmem:[#allocation6 + $0xc0] sm:$0xff] }
  0x48   :  { %v427_v42 = vcombine.low %v405_v20, %v419_v35  ;;  %v428_v43 = vcombine.high %v405_v20, %v419_v35  ;;  %v429_v44 = vcombine.low %v412_v21, %v426_v27  ;;  %v430_v45 = vcombine.high %v412_v21, %v426_v27 }
  0x49   :  { %v376_v46 = vrot.slane %v361_v38, %v8730_v13  ;;  %v390_v48 = vrot.slane %v362_v39, %v8730_v13  ;;  %v391_v49 = vcombine.high %v369_v40, %v369_v40  ;;  %v393_v50 = vcombine.high %v383_v41, %v383_v41  ;;  %1443 = vst.msk [vmem:[#allocation9 + $0x100] ss:$4 sm:$0xf] %vm8752_vm0, %v369_v40 }
  0x4a   :  { %1445 = vst.msk [vmem:[#allocation9 + $0x110] ss:$4 sm:$0xf] %vm8752_vm0, %v383_v41  ;;  %v437_v51 = vrot.slane %v427_v42, %v8730_v13  ;;  %v444_v52 = vrot.slane %v429_v44, %v8730_v13  ;;  %v451_v53 = vrot.slane %v428_v43, %v8730_v13  ;;  %v458_v54 = vrot.slane %v430_v45, %v8730_v13  ;;  %v8919_v44 = vld [vmem:[#allocation6 + $0xe0] sm:$0xff] }
  0x4b   :  { %v392_v56 = vcombine.high %v376_v46, %v376_v46  ;;  %v394_v57 = vcombine.high %v390_v48, %v390_v48  ;;  %1447 = vst.msk [vmem:[#allocation9 + $0x120] ss:$4 sm:$0xf] %vm8752_vm0, %v391_v49  ;;  %1449 = vst.msk [vmem:[#allocation9 + $0x130] ss:$4 sm:$0xf] %vm8752_vm0, %v393_v50  ;;  %v480_v58 = vrot.slane %v464_v36, %v8730_v13 }
  0x4c   :  { %1451 = vst.msk [vmem:[#allocation9 + $0x140] ss:$4 sm:$0xf] %vm8752_vm0, %v376_v46  ;;  %1453 = vst.msk [vmem:[#allocation9 + $0x150] ss:$4 sm:$0xf] %vm8752_vm0, %v390_v48  ;;  %v531_v59 = vcombine.low %v83_v55, %v8799_v15  ;;  %v459_v63 = vcombine.high %v437_v51, %v437_v51  ;;  %v460_v0 = vcombine.high %v444_v52, %v444_v52 }
  0x4d   :  { %v461_v1 = vcombine.high %v451_v53, %v451_v53  ;;  %v462_v2 = vcombine.high %v458_v54, %v458_v54  ;;  %1459 = vst.msk [vmem:[#allocation9 + $0x180] ss:$4 sm:$0xf] %vm8752_vm0, %v437_v51  ;;  %1461 = vst.msk [vmem:[#allocation9 + $0x190] ss:$4 sm:$0xf] %vm8752_vm0, %v451_v53  ;;  %v532_v7 = vcombine.high %v83_v55, %v8799_v15 }
  0x4e   :  { %1467 = vst.msk [vmem:[#allocation9 + $0x1c0] ss:$4 sm:$0xf] %vm8752_vm0, %v444_v52  ;;  %1469 = vst.msk [vmem:[#allocation9 + $0x1d0] ss:$4 sm:$0xf] %vm8752_vm0, %v458_v54  ;;  %v541_v8 = vrot.slane %v531_v59, %v8730_v13  ;;  %v8198_v9 = vpack.c.bf16 %v83_v55, %v8817_v28  ;;  %v465_v10 = vcombine.low %v81_v60, %v8801_v16 }
  0x4f   :  { %1455 = vst.msk [vmem:[#allocation9 + $0x160] ss:$4 sm:$0xf] %vm8752_vm0, %v392_v56  ;;  %1457 = vst.msk [vmem:[#allocation9 + $0x170] ss:$4 sm:$0xf] %vm8752_vm0, %v394_v57  ;;  %v466_v11 = vcombine.high %v81_v60, %v8801_v16  ;;  %v533_v12 = vcombine.low %v85_v61, %v8803_v17  ;;  %v534_v14 = vcombine.high %v85_v61, %v8803_v17 }
  0x50   :  { %1463 = vst.msk [vmem:[#allocation9 + $0x1a0] ss:$4 sm:$0xf] %vm8752_vm0, %v459_v63  ;;  %1465 = vst.msk [vmem:[#allocation9 + $0x1b0] ss:$4 sm:$0xf] %vm8752_vm0, %v461_v1  ;;  %v8230_v15 = vpack.c.bf16 %v85_v61, %v81_v60  ;;  %v548_v18 = vrot.slane %v532_v7, %v8730_v13  ;;  %8199 = vmatpush1.bf16.msra.mxu0 %v8198_v9  ;;  %v487_v19 = vrot.slane %v465_v10, %v8730_v13 }
  0x51   :  { %1471 = vst.msk [vmem:[#allocation9 + $0x1e0] ss:$4 sm:$0xf] %vm8752_vm0, %v460_v0  ;;  %1473 = vst.msk [vmem:[#allocation9 + $0x1f0] ss:$4 sm:$0xf] %vm8752_vm0, %v462_v2  ;;  %v8200_v20 = vpack.c.bf16 %v8865_v4, %v8855_v62  ;;  %v8232_v21 = vpack.c.bf16 %v8869_v6, %v8867_v5  ;;  %v494_v16 = vrot.slane %v466_v11, %v8730_v13 }
  0x52   :  { %v555_v23 = vrot.slane %v533_v12, %v8730_v13  ;;  %v562_v17 = vrot.slane %v534_v14, %v8730_v13  ;;  %8231 = vmatpush1.bf16.msra.mxu1 %v8230_v15  ;;  %v599_v24 = vcombine.low %v8896_v22, %v8855_v62  ;;  %v495_v25 = vcombine.low %v8831_v37, %v487_v19  ;;  %v8929_v50 = vld [vmem:[#allocation6 + $0xd0] sm:$0xff]  ;;  %v8943_v56 = vld [vmem:[#allocation6 + $0x108] sm:$0xff]  ;;  %v8965_v63 = vld [vmem:[#allocation6 + $0x138] sm:$0xff] }
  0x53   :  { %v496_v28 = vcombine.high %v8831_v37, %v487_v19  ;;  %8201 = vmatprep.subr.bf16.mxu0 %v8200_v20  ;;  %8233 = vmatprep.subr.bf16.mxu1 %v8232_v21  ;;  %v600_v29 = vcombine.high %v8896_v22, %v8855_v62  ;;  %v497_v30 = vcombine.low %v480_v58, %v494_v16  ;;  %v8931_v51 = vld [vmem:[#allocation6 + $0xf0] sm:$0xff]  ;;  %v8945_v57 = vld [vmem:[#allocation6 + $0x128] sm:$0xff]  ;;  %v8963_v62 = vld [vmem:[#allocation6 + $0x118] sm:$0xff] }
  0x54   :  { %v498_v31 = vcombine.high %v480_v58, %v494_v16  ;;  %v563_v32 = vcombine.low %v541_v8, %v555_v23  ;;  %v564_v26 = vcombine.high %v541_v8, %v555_v23  ;;  %v505_v33 = vrot.slane %v495_v25, %v8730_v13  ;;  %v8989_v14 = vld [vmem:[#allocation6 + $0x100] sm:$0xff] }
  0x55   :  { %v519_v34 = vrot.slane %v496_v28, %v8730_v13  ;;  %v565_v35 = vcombine.low %v548_v18, %v562_v17  ;;  %v566_v27 = vcombine.high %v548_v18, %v562_v17  ;;  %v512_v36 = vrot.slane %v497_v30, %v8730_v13 }
  0x56   :  { %v526_v38 = vrot.slane %v498_v31, %v8730_v13  ;;  %v573_v37 = vrot.slane %v563_v32, %v8730_v13  ;;  %v587_v39 = vrot.slane %v564_v26, %v8730_v13  ;;  %v527_v40 = vcombine.high %v505_v33, %v505_v33  ;;  %1475 = vst.msk [vmem:[#allocation9 + $0x200] ss:$4 sm:$0xf] %vm8752_vm0, %v505_v33 }
  0x57   :  { %v529_v41 = vcombine.high %v519_v34, %v519_v34  ;;  %v580_v42 = vrot.slane %v565_v35, %v8730_v13  ;;  %v594_v43 = vrot.slane %v566_v27, %v8730_v13  ;;  %1477 = vst.msk [vmem:[#allocation9 + $0x210] ss:$4 sm:$0xf] %vm8752_vm0, %v519_v34  ;;  %v528_v45 = vcombine.high %v512_v36, %v512_v36 }
  0x58   :  { %v530_v46 = vcombine.high %v526_v38, %v526_v38  ;;  %v595_v48 = vcombine.high %v573_v37, %v573_v37  ;;  %v597_v49 = vcombine.high %v587_v39, %v587_v39  ;;  %1483 = vst.msk [vmem:[#allocation9 + $0x240] ss:$4 sm:$0xf] %vm8752_vm0, %v512_v36  ;;  %1485 = vst.msk [vmem:[#allocation9 + $0x250] ss:$4 sm:$0xf] %vm8752_vm0, %v526_v38 }
  0x59   :  { %1491 = vst.msk [vmem:[#allocation9 + $0x280] ss:$4 sm:$0xf] %vm8752_vm0, %v573_v37  ;;  %1493 = vst.msk [vmem:[#allocation9 + $0x290] ss:$4 sm:$0xf] %vm8752_vm0, %v587_v39  ;;  %v596_v52 = vcombine.high %v580_v42, %v580_v42  ;;  %v598_v53 = vcombine.high %v594_v43, %v594_v43  ;;  %v609_v54 = vrot.slane %v599_v24, %v8730_v13 }
  0x5a   :  { %1479 = vst.msk [vmem:[#allocation9 + $0x220] ss:$4 sm:$0xf] %vm8752_vm0, %v527_v40  ;;  %1481 = vst.msk [vmem:[#allocation9 + $0x230] ss:$4 sm:$0xf] %vm8752_vm0, %v529_v41  ;;  %v616_v55 = vrot.slane %v600_v29, %v8730_v13  ;;  %v667_v58 = vcombine.low %v8919_v44, %v8865_v4  ;;  %v668_v59 = vcombine.high %v8919_v44, %v8865_v4 }
  0x5b   :  { %1499 = vst.msk [vmem:[#allocation9 + $0x2c0] ss:$4 sm:$0xf] %vm8752_vm0, %v580_v42  ;;  %1501 = vst.msk [vmem:[#allocation9 + $0x2d0] ss:$4 sm:$0xf] %vm8752_vm0, %v594_v43  ;;  %v8202_v60 = vpack.c.bf16 %v8919_v44, %v8896_v22  ;;  %v601_v61 = vcombine.low %v8929_v50, %v8867_v5  ;;  %v602_v0 = vcombine.high %v8929_v50, %v8867_v5 }
  0x5c   :  { %1487 = vst.msk [vmem:[#allocation9 + $0x260] ss:$4 sm:$0xf] %vm8752_vm0, %v528_v45  ;;  %1489 = vst.msk [vmem:[#allocation9 + $0x270] ss:$4 sm:$0xf] %vm8752_vm0, %v530_v46  ;;  %v669_v1 = vcombine.low %v8931_v51, %v8869_v6  ;;  %v670_v2 = vcombine.high %v8931_v51, %v8869_v6  ;;  %v8234_v4 = vpack.c.bf16 %v8931_v51, %v8929_v50 }
  0x5d   :  { %1495 = vst.msk [vmem:[#allocation9 + $0x2a0] ss:$4 sm:$0xf] %vm8752_vm0, %v595_v48  ;;  %1497 = vst.msk [vmem:[#allocation9 + $0x2b0] ss:$4 sm:$0xf] %vm8752_vm0, %v597_v49  ;;  %v677_v7 = vrot.slane %v667_v58, %v8730_v13  ;;  %v684_v8 = vrot.slane %v668_v59, %v8730_v13  ;;  %8203 = vmatpush1.bf16.msra.mxu0 %v8202_v60  ;;  %v623_v9 = vrot.slane %v601_v61, %v8730_v13 }
  0x5e   :  { %1503 = vst.msk [vmem:[#allocation9 + $0x2e0] ss:$4 sm:$0xf] %vm8752_vm0, %v596_v52  ;;  %1505 = vst.msk [vmem:[#allocation9 + $0x2f0] ss:$4 sm:$0xf] %vm8752_vm0, %v598_v53  ;;  %v8204_v10 = vpack.c.bf16 %v8945_v57, %v8943_v56  ;;  %v630_v5 = vrot.slane %v602_v0, %v8730_v13  ;;  %v691_v11 = vrot.slane %v669_v1, %v8730_v13  ;;  %8235 = vmatpush1.bf16.msra.mxu1 %v8234_v4 }
  0x5f   :  { %v698_v12 = vrot.slane %v670_v2, %v8730_v13  ;;  %v8236_v6 = vpack.c.bf16 %v8965_v63, %v8963_v62  ;;  %v631_v15 = vcombine.low %v609_v54, %v623_v9  ;;  %v632_v18 = vcombine.high %v609_v54, %v623_v9  ;;  %v9007_v36 = vld [vmem:[#allocation6 + $0x120] sm:$0xff]  ;;  %v9017_v41 = vld [vmem:[#allocation6 + $0x110] sm:$0xff]  ;;  %v9031_v49 = vld [vmem:[#allocation6 + $0x148] sm:$0xff] }
  0x60   :  { %8205 = vmatprep.subr.bf16.mxu0 %v8204_v10  ;;  %v735_v19 = vcombine.low %v8989_v14, %v8943_v56  ;;  %v736_v20 = vcombine.high %v8989_v14, %v8943_v56  ;;  %v633_v21 = vcombine.low %v616_v55, %v630_v5  ;;  %v634_v16 = vcombine.high %v616_v55, %v630_v5  ;;  %v9019_v42 = vld [vmem:[#allocation6 + $0x130] sm:$0xff]  ;;  %v9033_v52 = vld [vmem:[#allocation6 + $0x168] sm:$0xff]  ;;  %v9051_v59 = vld [vmem:[#allocation6 + $0x158] sm:$0xff] }
  0x61   :  { %v699_v23 = vcombine.low %v677_v7, %v691_v11  ;;  %v700_v17 = vcombine.high %v677_v7, %v691_v11  ;;  %8237 = vmatprep.subr.bf16.mxu1 %v8236_v6  ;;  %v641_v24 = vrot.slane %v631_v15, %v8730_v13  ;;  %v655_v25 = vrot.slane %v632_v18, %v8730_v13  ;;  %v9053_v60 = vld [vmem:[#allocation6 + $0x178] sm:$0xff]  ;;  %v9077_v6 = vld [vmem:[#allocation6 + $0x140] sm:$0xff] }
  0x62   :  { %v701_v28 = vcombine.low %v684_v8, %v698_v12  ;;  %v702_v29 = vcombine.high %v684_v8, %v698_v12  ;;  %v648_v30 = vrot.slane %v633_v21, %v8730_v13  ;;  %v662_v31 = vrot.slane %v634_v16, %v8730_v13 }
  0x63   :  { %v709_v32 = vrot.slane %v699_v23, %v8730_v13  ;;  %v723_v26 = vrot.slane %v700_v17, %v8730_v13  ;;  %v663_v33 = vcombine.high %v641_v24, %v641_v24  ;;  %v665_v34 = vcombine.high %v655_v25, %v655_v25  ;;  %1507 = vst.msk [vmem:[#allocation9 + $0x300] ss:$4 sm:$0xf] %vm8752_vm0, %v641_v24 }
  0x64   :  { %v716_v35 = vrot.slane %v701_v28, %v8730_v13  ;;  %v730_v27 = vrot.slane %v702_v29, %v8730_v13  ;;  %1509 = vst.msk [vmem:[#allocation9 + $0x310] ss:$4 sm:$0xf] %vm8752_vm0, %v655_v25  ;;  %v664_v38 = vcombine.high %v648_v30, %v648_v30  ;;  %v666_v37 = vcombine.high %v662_v31, %v662_v31 }
  0x65   :  { %v731_v39 = vcombine.high %v709_v32, %v709_v32  ;;  %v733_v40 = vcombine.high %v723_v26, %v723_v26  ;;  %1515 = vst.msk [vmem:[#allocation9 + $0x340] ss:$4 sm:$0xf] %vm8752_vm0, %v648_v30  ;;  %1517 = vst.msk [vmem:[#allocation9 + $0x350] ss:$4 sm:$0xf] %vm8752_vm0, %v662_v31  ;;  %v745_v46 = vrot.slane %v735_v19, %v8730_v13 }
  0x66   :  { %1523 = vst.msk [vmem:[#allocation9 + $0x380] ss:$4 sm:$0xf] %vm8752_vm0, %v709_v32  ;;  %1525 = vst.msk [vmem:[#allocation9 + $0x390] ss:$4 sm:$0xf] %vm8752_vm0, %v723_v26  ;;  %v732_v43 = vcombine.high %v716_v35, %v716_v35  ;;  %v734_v45 = vcombine.high %v730_v27, %v730_v27  ;;  %v752_v48 = vrot.slane %v736_v20, %v8730_v13 }
  0x67   :  { %1511 = vst.msk [vmem:[#allocation9 + $0x320] ss:$4 sm:$0xf] %vm8752_vm0, %v663_v33  ;;  %1513 = vst.msk [vmem:[#allocation9 + $0x330] ss:$4 sm:$0xf] %vm8752_vm0, %v665_v34  ;;  %v803_v53 = vcombine.low %v9007_v36, %v8945_v57  ;;  %v804_v54 = vcombine.high %v9007_v36, %v8945_v57  ;;  %v8206_v55 = vpack.c.bf16 %v9007_v36, %v8989_v14 }
  0x68   :  { %1531 = vst.msk [vmem:[#allocation9 + $0x3c0] ss:$4 sm:$0xf] %vm8752_vm0, %v716_v35  ;;  %1533 = vst.msk [vmem:[#allocation9 + $0x3d0] ss:$4 sm:$0xf] %vm8752_vm0, %v730_v27  ;;  %v737_v58 = vcombine.low %v9017_v41, %v8963_v62  ;;  %v738_v61 = vcombine.high %v9017_v41, %v8963_v62  ;;  %v805_v0 = vcombine.low %v9019_v42, %v8965_v63 }
  0x69   :  { %1519 = vst.msk [vmem:[#allocation9 + $0x360] ss:$4 sm:$0xf] %vm8752_vm0, %v664_v38  ;;  %1521 = vst.msk [vmem:[#allocation9 + $0x370] ss:$4 sm:$0xf] %vm8752_vm0, %v666_v37  ;;  %v806_v1 = vcombine.high %v9019_v42, %v8965_v63  ;;  %v8238_v2 = vpack.c.bf16 %v9019_v42, %v9017_v41  ;;  %v813_v4 = vrot.slane %v803_v53, %v8730_v13  ;;  %8207 = vmatpush1.bf16.msra.mxu0 %v8206_v55 }
  0x6a   :  { %1527 = vst.msk [vmem:[#allocation9 + $0x3a0] ss:$4 sm:$0xf] %vm8752_vm0, %v731_v39  ;;  %1529 = vst.msk [vmem:[#allocation9 + $0x3b0] ss:$4 sm:$0xf] %vm8752_vm0, %v733_v40  ;;  %v820_v7 = vrot.slane %v804_v54, %v8730_v13  ;;  %v759_v8 = vrot.slane %v737_v58, %v8730_v13  ;;  %v8208_v9 = vpack.c.bf16 %v9033_v52, %v9031_v49 }
  0x6b   :  { %1535 = vst.msk [vmem:[#allocation9 + $0x3e0] ss:$4 sm:$0xf] %vm8752_vm0, %v732_v43  ;;  %1537 = vst.msk [vmem:[#allocation9 + $0x3f0] ss:$4 sm:$0xf] %vm8752_vm0, %v734_v45  ;;  %v766_v10 = vrot.slane %v738_v61, %v8730_v13  ;;  %v827_v5 = vrot.slane %v805_v0, %v8730_v13  ;;  %v834_v11 = vrot.slane %v806_v1, %v8730_v13  ;;  %8239 = vmatpush1.bf16.msra.mxu1 %v8238_v2 }
  0x6c   :  { %v8240_v12 = vpack.c.bf16 %v9053_v60, %v9051_v59  ;;  %v767_v15 = vcombine.low %v745_v46, %v759_v8  ;;  %v768_v18 = vcombine.high %v745_v46, %v759_v8  ;;  %8209 = vmatprep.subr.bf16.mxu0 %v8208_v9  ;;  %v871_v19 = vcombine.low %v9077_v6, %v9031_v49  ;;  %v9095_v38 = vld [vmem:[#allocation6 + $0x160] sm:$0xff]  ;;  %v9105_v45 = vld [vmem:[#allocation6 + $0x150] sm:$0xff]  ;;  %v9119_v58 = vld [vmem:[#allocation6 + $0x188] sm:$0xff] }
  0x6d   :  { %v872_v20 = vcombine.high %v9077_v6, %v9031_v49  ;;  %v769_v21 = vcombine.low %v752_v48, %v766_v10  ;;  %v770_v16 = vcombine.high %v752_v48, %v766_v10  ;;  %v835_v23 = vcombine.low %v813_v4, %v827_v5  ;;  %v9107_v46 = vld [vmem:[#allocation6 + $0x170] sm:$0xff]  ;;  %v9121_v61 = vld [vmem:[#allocation6 + $0x1a8] sm:$0xff]  ;;  %v9141_v8 = vld [vmem:[#allocation6 + $0x1b8] sm:$0xff] }
  0x6e   :  { %v836_v17 = vcombine.high %v813_v4, %v827_v5  ;;  %8241 = vmatprep.subr.bf16.mxu1 %v8240_v12  ;;  %v777_v24 = vrot.slane %v767_v15, %v8730_v13  ;;  %v791_v25 = vrot.slane %v768_v18, %v8730_v13  ;;  %v837_v28 = vcombine.low %v820_v7, %v834_v11 }
  0x6f   :  { %v838_v29 = vcombine.high %v820_v7, %v834_v11  ;;  %v784_v30 = vrot.slane %v769_v21, %v8730_v13  ;;  %v798_v31 = vrot.slane %v770_v16, %v8730_v13  ;;  %v845_v32 = vrot.slane %v835_v23, %v8730_v13  ;;  %v9139_v7 = vld [vmem:[#allocation6 + $0x198] sm:$0xff] }
  0x70   :  { %v859_v26 = vrot.slane %v836_v17, %v8730_v13  ;;  %v799_v33 = vcombine.high %v777_v24, %v777_v24  ;;  %v801_v34 = vcombine.high %v791_v25, %v791_v25  ;;  %v852_v35 = vrot.slane %v837_v28, %v8730_v13  ;;  %1539 = vst.msk [vmem:[#allocation9 + $0x400] ss:$4 sm:$0xf] %vm8752_vm0, %v777_v24  ;;  %v9165_v17 = vld [vmem:[#allocation6 + $0x180] sm:$0xff] }
  0x71   :  { %v866_v27 = vrot.slane %v838_v29, %v8730_v13  ;;  %1541 = vst.msk [vmem:[#allocation9 + $0x410] ss:$4 sm:$0xf] %vm8752_vm0, %v791_v25  ;;  %v800_v37 = vcombine.high %v784_v30, %v784_v30  ;;  %v802_v39 = vcombine.high %v798_v31, %v798_v31  ;;  %v867_v40 = vcombine.high %v845_v32, %v845_v32 }
  0x72   :  { %v869_v43 = vcombine.high %v859_v26, %v859_v26  ;;  %1547 = vst.msk [vmem:[#allocation9 + $0x440] ss:$4 sm:$0xf] %vm8752_vm0, %v784_v30  ;;  %1549 = vst.msk [vmem:[#allocation9 + $0x450] ss:$4 sm:$0xf] %vm8752_vm0, %v798_v31  ;;  %v868_v48 = vcombine.high %v852_v35, %v852_v35  ;;  %v881_v54 = vrot.slane %v871_v19, %v8730_v13 }
  0x73   :  { %1555 = vst.msk [vmem:[#allocation9 + $0x480] ss:$4 sm:$0xf] %vm8752_vm0, %v845_v32  ;;  %1557 = vst.msk [vmem:[#allocation9 + $0x490] ss:$4 sm:$0xf] %vm8752_vm0, %v859_v26  ;;  %v870_v53 = vcombine.high %v866_v27, %v866_v27  ;;  %v888_v55 = vrot.slane %v872_v20, %v8730_v13  ;;  %v939_v0 = vcombine.low %v9095_v38, %v9033_v52 }
  0x74   :  { %1543 = vst.msk [vmem:[#allocation9 + $0x420] ss:$4 sm:$0xf] %vm8752_vm0, %v799_v33  ;;  %1545 = vst.msk [vmem:[#allocation9 + $0x430] ss:$4 sm:$0xf] %vm8752_vm0, %v801_v34  ;;  %v940_v1 = vcombine.high %v9095_v38, %v9033_v52  ;;  %v8210_v2 = vpack.c.bf16 %v9095_v38, %v9077_v6  ;;  %v873_v4 = vcombine.low %v9105_v45, %v9051_v59 }
  0x75   :  { %1563 = vst.msk [vmem:[#allocation9 + $0x4c0] ss:$4 sm:$0xf] %vm8752_vm0, %v852_v35  ;;  %1565 = vst.msk [vmem:[#allocation9 + $0x4d0] ss:$4 sm:$0xf] %vm8752_vm0, %v866_v27  ;;  %v874_v9 = vcombine.high %v9105_v45, %v9051_v59  ;;  %v941_v10 = vcombine.low %v9107_v46, %v9053_v60  ;;  %v942_v5 = vcombine.high %v9107_v46, %v9053_v60 }
  0x76   :  { %1551 = vst.msk [vmem:[#allocation9 + $0x460] ss:$4 sm:$0xf] %vm8752_vm0, %v800_v37  ;;  %1553 = vst.msk [vmem:[#allocation9 + $0x470] ss:$4 sm:$0xf] %vm8752_vm0, %v802_v39  ;;  %v8242_v11 = vpack.c.bf16 %v9107_v46, %v9105_v45  ;;  %v949_v12 = vrot.slane %v939_v0, %v8730_v13  ;;  %v956_v15 = vrot.slane %v940_v1, %v8730_v13  ;;  %8211 = vmatpush1.bf16.msra.mxu0 %v8210_v2 }
  0x77   :  { %1559 = vst.msk [vmem:[#allocation9 + $0x4a0] ss:$4 sm:$0xf] %vm8752_vm0, %v867_v40  ;;  %1561 = vst.msk [vmem:[#allocation9 + $0x4b0] ss:$4 sm:$0xf] %vm8752_vm0, %v869_v43  ;;  %v895_v18 = vrot.slane %v873_v4, %v8730_v13  ;;  %v8212_v19 = vpack.c.bf16 %v9121_v61, %v9119_v58  ;;  %v902_v20 = vrot.slane %v874_v9, %v8730_v13 }
  0x78   :  { %1567 = vst.msk [vmem:[#allocation9 + $0x4e0] ss:$4 sm:$0xf] %vm8752_vm0, %v868_v48  ;;  %1569 = vst.msk [vmem:[#allocation9 + $0x4f0] ss:$4 sm:$0xf] %vm8752_vm0, %v870_v53  ;;  %v963_v21 = vrot.slane %v941_v10, %v8730_v13  ;;  %v970_v16 = vrot.slane %v942_v5, %v8730_v13  ;;  %8243 = vmatpush1.bf16.msra.mxu1 %v8242_v11  ;;  %v8244_v23 = vpack.c.bf16 %v9141_v8, %v9139_v7 }
  0x79   :  { %v903_v24 = vcombine.low %v881_v54, %v895_v18  ;;  %v904_v25 = vcombine.high %v881_v54, %v895_v18  ;;  %8213 = vmatprep.subr.bf16.mxu0 %v8212_v19  ;;  %v1007_v28 = vcombine.low %v9165_v17, %v9119_v58  ;;  %v1008_v29 = vcombine.high %v9165_v17, %v9119_v58  ;;  %v9183_v0 = vld [vmem:[#allocation6 + $0x1a0] sm:$0xff]  ;;  %v9193_v10 = vld [vmem:[#allocation6 + $0x190] sm:$0xff]  ;;  %v9207_v19 = vld [vmem:[#allocation6 + $0x1c8] sm:$0xff] }
  0x7a   :  { %v905_v30 = vcombine.low %v888_v55, %v902_v20  ;;  %v906_v31 = vcombine.high %v888_v55, %v902_v20  ;;  %v971_v32 = vcombine.low %v949_v12, %v963_v21  ;;  %v972_v26 = vcombine.high %v949_v12, %v963_v21  ;;  %8245 = vmatprep.subr.bf16.mxu1 %v8244_v23  ;;  %v9195_v5 = vld [vmem:[#allocation6 + $0x1b0] sm:$0xff]  ;;  %v9209_v20 = vld [vmem:[#allocation6 + $0x1e8] sm:$0xff] }
  0x7b   :  { %v913_v33 = vrot.slane %v903_v24, %v8730_v13  ;;  %v927_v34 = vrot.slane %v904_v25, %v8730_v13  ;;  %v973_v35 = vcombine.low %v956_v15, %v970_v16  ;;  %v974_v27 = vcombine.high %v956_v15, %v970_v16  ;;  %v9227_v25 = vld [vmem:[#allocation6 + $0x1d8] sm:$0xff] }
  0x7c   :  { %v920_v37 = vrot.slane %v905_v30, %v8730_v13  ;;  %v934_v39 = vrot.slane %v906_v31, %v8730_v13  ;;  %v981_v40 = vrot.slane %v971_v32, %v8730_v13  ;;  %v995_v43 = vrot.slane %v972_v26, %v8730_v13 }
  0x7d   :  { %v935_v48 = vcombine.high %v913_v33, %v913_v33  ;;  %v937_v53 = vcombine.high %v927_v34, %v927_v34  ;;  %v988_v54 = vrot.slane %v973_v35, %v8730_v13  ;;  %v1002_v55 = vrot.slane %v974_v27, %v8730_v13  ;;  %1571 = vst.msk [vmem:[#allocation9 + $0x500] ss:$4 sm:$0xf] %vm8752_vm0, %v913_v33 }
  0x7e   :  { %1573 = vst.msk [vmem:[#allocation9 + $0x510] ss:$4 sm:$0xf] %vm8752_vm0, %v927_v34  ;;  %v936_v1 = vcombine.high %v920_v37, %v920_v37  ;;  %v938_v2 = vcombine.high %v934_v39, %v934_v39  ;;  %v1003_v4 = vcombine.high %v981_v40, %v981_v40  ;;  %v1005_v9 = vcombine.high %v995_v43, %v995_v43 }
  0x7f   :  { %1579 = vst.msk [vmem:[#allocation9 + $0x540] ss:$4 sm:$0xf] %vm8752_vm0, %v920_v37  ;;  %1581 = vst.msk [vmem:[#allocation9 + $0x550] ss:$4 sm:$0xf] %vm8752_vm0, %v934_v39  ;;  %v1004_v11 = vcombine.high %v988_v54, %v988_v54  ;;  %v1006_v12 = vcombine.high %v1002_v55, %v1002_v55  ;;  %v1017_v15 = vrot.slane %v1007_v28, %v8730_v13 }
  0x80   :  { %1587 = vst.msk [vmem:[#allocation9 + $0x580] ss:$4 sm:$0xf] %vm8752_vm0, %v981_v40  ;;  %1589 = vst.msk [vmem:[#allocation9 + $0x590] ss:$4 sm:$0xf] %vm8752_vm0, %v995_v43  ;;  %v1024_v18 = vrot.slane %v1008_v29, %v8730_v13  ;;  %v1075_v21 = vcombine.low %v9183_v0, %v9121_v61  ;;  %v1076_v16 = vcombine.high %v9183_v0, %v9121_v61 }
  0x81   :  { %1575 = vst.msk [vmem:[#allocation9 + $0x520] ss:$4 sm:$0xf] %vm8752_vm0, %v935_v48  ;;  %1577 = vst.msk [vmem:[#allocation9 + $0x530] ss:$4 sm:$0xf] %vm8752_vm0, %v937_v53  ;;  %v8214_v23 = vpack.c.bf16 %v9183_v0, %v9165_v17  ;;  %v1009_v24 = vcombine.low %v9193_v10, %v9139_v7  ;;  %v1010_v29 = vcombine.high %v9193_v10, %v9139_v7 }
  0x82   :  { %1595 = vst.msk [vmem:[#allocation9 + $0x5c0] ss:$4 sm:$0xf] %vm8752_vm0, %v988_v54  ;;  %1597 = vst.msk [vmem:[#allocation9 + $0x5d0] ss:$4 sm:$0xf] %vm8752_vm0, %v1002_v55  ;;  %v1077_v30 = vcombine.low %v9195_v5, %v9141_v8  ;;  %v1078_v31 = vcombine.high %v9195_v5, %v9141_v8  ;;  %v8246_v32 = vpack.c.bf16 %v9195_v5, %v9193_v10 }
  0x83   :  { %1583 = vst.msk [vmem:[#allocation9 + $0x560] ss:$4 sm:$0xf] %vm8752_vm0, %v936_v1  ;;  %1585 = vst.msk [vmem:[#allocation9 + $0x570] ss:$4 sm:$0xf] %vm8752_vm0, %v938_v2  ;;  %v1085_v26 = vrot.slane %v1075_v21, %v8730_v13  ;;  %v1092_v33 = vrot.slane %v1076_v16, %v8730_v13  ;;  %8215 = vmatpush1.bf16.msra.mxu0 %v8214_v23  ;;  %v1031_v34 = vrot.slane %v1009_v24, %v8730_v13 }
  0x84   :  { %1591 = vst.msk [vmem:[#allocation9 + $0x5a0] ss:$4 sm:$0xf] %vm8752_vm0, %v1003_v4  ;;  %1593 = vst.msk [vmem:[#allocation9 + $0x5b0] ss:$4 sm:$0xf] %vm8752_vm0, %v1005_v9  ;;  %v8216_v35 = vpack.c.bf16 %v9209_v20, %v9207_v19  ;;  %v1038_v27 = vrot.slane %v1010_v29, %v8730_v13  ;;  %v1099_v37 = vrot.slane %v1077_v30, %v8730_v13  ;;  %8247 = vmatpush1.bf16.msra.mxu1 %v8246_v32 }
  0x85   :  { %v9229_v28 = vld [vmem:[#allocation6 + $0x1f8] sm:$0xff]  ;;  %1599 = vst.msk [vmem:[#allocation9 + $0x5e0] ss:$4 sm:$0xf] %vm8752_vm0, %v1004_v11  ;;  %v1106_v39 = vrot.slane %v1078_v31, %v8730_v13  ;;  %v9253_v43 = vld [vmem:[#allocation6 + $0x1c0] sm:$0xff]  ;;  %v1039_v48 = vcombine.low %v1017_v15, %v1031_v34  ;;  %v1040_v53 = vcombine.high %v1017_v15, %v1031_v34 }
  0x86   :  { %1601 = vst.msk [vmem:[#allocation9 + $0x5f0] ss:$4 sm:$0xf] %vm8752_vm0, %v1006_v12  ;;  %v8248_v40 = vpack.c.bf16 %v9229_v28, %v9227_v25  ;;  %8217 = vmatprep.subr.bf16.mxu0 %v8216_v35  ;;  %v1143_v54 = vcombine.low %v9253_v43, %v9207_v19  ;;  %v1144_v55 = vcombine.high %v9253_v43, %v9207_v19 }
  0x87   :  { %v1041_v1 = vcombine.low %v1024_v18, %v1038_v27  ;;  %v1042_v2 = vcombine.high %v1024_v18, %v1038_v27  ;;  %v1107_v4 = vcombine.low %v1085_v26, %v1099_v37  ;;  %v1108_v9 = vcombine.high %v1085_v26, %v1099_v37  ;;  %v9271_v26 = vld [vmem:[#allocation6 + $0x1e0] sm:$0xff]  ;;  %v9281_v37 = vld [vmem:[#allocation6 + $0x1d0] sm:$0xff] }
  0x88   :  { %8249 = vmatprep.subr.bf16.mxu1 %v8248_v40  ;;  %v1049_v11 = vrot.slane %v1039_v48, %v8730_v13  ;;  %v1063_v12 = vrot.slane %v1040_v53, %v8730_v13  ;;  %v1109_v21 = vcombine.low %v1092_v33, %v1106_v39  ;;  %v1110_v16 = vcombine.high %v1092_v33, %v1106_v39  ;;  %v9283_v39 = vld [vmem:[#allocation6 + $0x1f0] sm:$0xff] }
  0x89   :  { %v1056_v15 = vrot.slane %v1041_v1, %v8730_v13  ;;  %v1070_v23 = vrot.slane %v1042_v2, %v8730_v13  ;;  %v1117_v24 = vrot.slane %v1107_v4, %v8730_v13  ;;  %v1131_v29 = vrot.slane %v1108_v9, %v8730_v13 }
  0x8a   :  { %v1071_v30 = vcombine.high %v1049_v11, %v1049_v11  ;;  %v1073_v31 = vcombine.high %v1063_v12, %v1063_v12  ;;  %v1124_v18 = vrot.slane %v1109_v21, %v8730_v13  ;;  %v1138_v32 = vrot.slane %v1110_v16, %v8730_v13  ;;  %1603 = vst.msk [vmem:[#allocation9 + $0x600] ss:$4 sm:$0xf] %vm8752_vm0, %v1049_v11 }
  0x8b   :  { %1605 = vst.msk [vmem:[#allocation9 + $0x610] ss:$4 sm:$0xf] %vm8752_vm0, %v1063_v12  ;;  %v1072_v33 = vcombine.high %v1056_v15, %v1056_v15  ;;  %v1074_v34 = vcombine.high %v1070_v23, %v1070_v23  ;;  %v1139_v35 = vcombine.high %v1117_v24, %v1117_v24  ;;  %v1141_v27 = vcombine.high %v1131_v29, %v1131_v29 }
  0x8c   :  { %1611 = vst.msk [vmem:[#allocation9 + $0x640] ss:$4 sm:$0xf] %vm8752_vm0, %v1056_v15  ;;  %1613 = vst.msk [vmem:[#allocation9 + $0x650] ss:$4 sm:$0xf] %vm8752_vm0, %v1070_v23  ;;  %v1140_v40 = vcombine.high %v1124_v18, %v1124_v18  ;;  %v1142_v48 = vcombine.high %v1138_v32, %v1138_v32  ;;  %v1153_v53 = vrot.slane %v1143_v54, %v8730_v13 }
  0x8d   :  { %1619 = vst.msk [vmem:[#allocation9 + $0x680] ss:$4 sm:$0xf] %vm8752_vm0, %v1117_v24  ;;  %1621 = vst.msk [vmem:[#allocation9 + $0x690] ss:$4 sm:$0xf] %vm8752_vm0, %v1131_v29  ;;  %v1160_v1 = vrot.slane %v1144_v55, %v8730_v13  ;;  %v1211_v2 = vcombine.low %v9271_v26, %v9209_v20  ;;  %v1212_v54 = vcombine.high %v9271_v26, %v9209_v20 }
  0x8e   :  { %1607 = vst.msk [vmem:[#allocation9 + $0x620] ss:$4 sm:$0xf] %vm8752_vm0, %v1071_v30  ;;  %1609 = vst.msk [vmem:[#allocation9 + $0x630] ss:$4 sm:$0xf] %vm8752_vm0, %v1073_v31  ;;  %v8218_v55 = vpack.c.bf16 %v9271_v26, %v9253_v43  ;;  %v1145_v4 = vcombine.low %v9281_v37, %v9227_v25  ;;  %v1146_v9 = vcombine.high %v9281_v37, %v9227_v25 }
  0x8f   :  { %1627 = vst.msk [vmem:[#allocation9 + $0x6c0] ss:$4 sm:$0xf] %vm8752_vm0, %v1124_v18  ;;  %1629 = vst.msk [vmem:[#allocation9 + $0x6d0] ss:$4 sm:$0xf] %vm8752_vm0, %v1138_v32  ;;  %v1213_v11 = vcombine.low %v9283_v39, %v9229_v28  ;;  %v1214_v12 = vcombine.high %v9283_v39, %v9229_v28  ;;  %v8250_v21 = vpack.c.bf16 %v9283_v39, %v9281_v37 }
  0x90   :  { %1615 = vst.msk [vmem:[#allocation9 + $0x660] ss:$4 sm:$0xf] %vm8752_vm0, %v1072_v33  ;;  %1617 = vst.msk [vmem:[#allocation9 + $0x670] ss:$4 sm:$0xf] %vm8752_vm0, %v1074_v34  ;;  %v1221_v16 = vrot.slane %v1211_v2, %v8730_v13  ;;  %v1228_v15 = vrot.slane %v1212_v54, %v8730_v13  ;;  %8219 = vmatpush1.bf16.msra.mxu0 %v8218_v55  ;;  %v1167_v23 = vrot.slane %v1145_v4, %v8730_v13 }
  0x91   :  { %1623 = vst.msk [vmem:[#allocation9 + $0x6a0] ss:$4 sm:$0xf] %vm8752_vm0, %v1139_v35  ;;  %1625 = vst.msk [vmem:[#allocation9 + $0x6b0] ss:$4 sm:$0xf] %vm8752_vm0, %v1141_v27  ;;  %v1174_v29 = vrot.slane %v1146_v9, %v8730_v13  ;;  %v1235_v30 = vrot.slane %v1213_v11, %v8730_v13  ;;  %v1242_v31 = vrot.slane %v1214_v12, %v8730_v13  ;;  %8251 = vmatpush1.bf16.msra.mxu1 %v8250_v21 }
  0x92   :  { %1631 = vst.msk [vmem:[#allocation9 + $0x6e0] ss:$4 sm:$0xf] %vm8752_vm0, %v1140_v40  ;;  %1633 = vst.msk [vmem:[#allocation9 + $0x6f0] ss:$4 sm:$0xf] %vm8752_vm0, %v1142_v48  ;;  %v1175_v18 = vcombine.low %v1153_v53, %v1167_v23  ;;  %v1176_v32 = vcombine.high %v1153_v53, %v1167_v23 }
  0x93   :  { %v47_v24 = vld [vmem:[#allocation2] sm:$0xff]  ;;  %v1177_v33 = vcombine.low %v1160_v1, %v1174_v29  ;;  %v1178_v34 = vcombine.high %v1160_v1, %v1174_v29  ;;  %v1243_v35 = vcombine.low %v1221_v16, %v1235_v30  ;;  %v1244_v27 = vcombine.high %v1221_v16, %v1235_v30  ;;  %v48_v55 = vld [vmem:[#allocation2 + $0x8] sm:$0xff] }
  0x94   :  { %1731 = vmatmul.mubr.f32.vlgmr.msra.gmra.mrb[0].mxu0 %v47_v24  ;;  %v1185_v40 = vrot.slane %v1175_v18, %v8730_v13  ;;  %v1199_v48 = vrot.slane %v1176_v32, %v8730_v13  ;;  %v1245_v2 = vcombine.low %v1228_v15, %v1242_v31  ;;  %v1246_v54 = vcombine.high %v1228_v15, %v1242_v31  ;;  %v49_v18 = vld [vmem:[#allocation2 + $0x10] sm:$0xff]  ;;  %v50_v32 = vld [vmem:[#allocation2 + $0x18] sm:$0xff] }
  0x95   :  { %1892 = vmatmul.mubr.f32.vlgmr.msra.gmra.mrb[0].mxu1 %v47_v24  ;;  %v1192_v4 = vrot.slane %v1177_v33, %v8730_v13  ;;  %v1206_v9 = vrot.slane %v1178_v34, %v8730_v13  ;;  %v1253_v11 = vrot.slane %v1243_v35, %v8730_v13  ;;  %v1267_v53 = vrot.slane %v1244_v27, %v8730_v13  ;;  %v51_v33 = vld [vmem:[#allocation2 + $0x20] sm:$0xff]  ;;  %v52_v34 = vld [vmem:[#allocation2 + $0x28] sm:$0xff]  ;;  %v53_v35 = vld [vmem:[#allocation2 + $0x30] sm:$0xff] }
  0x96   :  { %1736 = vmatprep.mubr.f32.mxu0 %v13491_v3  ;;  %v1207_v1 = vcombine.high %v1185_v40, %v1185_v40  ;;  %v1209_v12 = vcombine.high %v1199_v48, %v1199_v48  ;;  %v1260_v21 = vrot.slane %v1245_v2, %v8730_v13  ;;  %v1274_v16 = vrot.slane %v1246_v54, %v8730_v13  ;;  %v54_v27 = vld [vmem:[#allocation2 + $0x38] sm:$0xff]  ;;  %v57_v2 = vld [vmem:[#allocation2 + $0x50] sm:$0xff] }
  0x97   :  { %1635 = vst.msk [vmem:[#allocation9 + $0x700] ss:$4 sm:$0xf] %vm8752_vm0, %v1185_v40  ;;  %1637 = vst.msk [vmem:[#allocation9 + $0x710] ss:$4 sm:$0xf] %vm8752_vm0, %v1199_v48  ;;  %1897 = vmatprep.mubr.f32.mxu1 %v13491_v3  ;;  %v1208_v15 = vcombine.high %v1192_v4, %v1192_v4  ;;  %v1210_v23 = vcombine.high %v1206_v9, %v1206_v9  ;;  %v1275_v24 = vcombine.high %v1253_v11, %v1253_v11 }
  0x98   :  { %v1277_v29 = vcombine.high %v1267_v53, %v1267_v53  ;;  %1643 = vst.msk [vmem:[#allocation9 + $0x740] ss:$4 sm:$0xf] %vm8752_vm0, %v1192_v4  ;;  %1645 = vst.msk [vmem:[#allocation9 + $0x750] ss:$4 sm:$0xf] %vm8752_vm0, %v1206_v9  ;;  %1737 = vmatmul.mubr.f32.gmra.mrb[2].mxu0 %v48_v55  ;;  %v1276_v30 = vcombine.high %v1260_v21, %v1260_v21  ;;  %v1278_v31 = vcombine.high %v1274_v16, %v1274_v16 }
  0x99   :  { %1651 = vst.msk [vmem:[#allocation9 + $0x780] ss:$4 sm:$0xf] %vm8752_vm0, %v1253_v11  ;;  %1653 = vst.msk [vmem:[#allocation9 + $0x790] ss:$4 sm:$0xf] %vm8752_vm0, %v1267_v53  ;;  %1898 = vmatmul.mubr.f32.gmra.mrb[2].mxu1 %v48_v55  ;;  %1742 = vmatprep.mubr.f32.mxu0 %v13491_v3  ;;  %v9401_v53 = vstv %s8179_s1 }
  0x9a   :  { %1639 = vst.msk [vmem:[#allocation9 + $0x720] ss:$4 sm:$0xf] %vm8752_vm0, %v1207_v1  ;;  %1641 = vst.msk [vmem:[#allocation9 + $0x730] ss:$4 sm:$0xf] %vm8752_vm0, %v1209_v12  ;;  %1903 = vmatprep.mubr.f32.mxu1 %v13491_v3  ;;  %v2185_v1 = vstv %s8180_s19  ;;  %v9403_v12 = vstv %s8178_s20 }
  0x9b   :  { %1659 = vst.msk [vmem:[#allocation9 + $0x7c0] ss:$4 sm:$0xf] %vm8752_vm0, %v1260_v21  ;;  %1661 = vst.msk [vmem:[#allocation9 + $0x7d0] ss:$4 sm:$0xf] %vm8752_vm0, %v1274_v16 }
  0x9c   :  { %1647 = vst.msk [vmem:[#allocation9 + $0x760] ss:$4 sm:$0xf] %vm8752_vm0, %v1208_v15  ;;  %1649 = vst.msk [vmem:[#allocation9 + $0x770] ss:$4 sm:$0xf] %vm8752_vm0, %v1210_v23  ;;  %1743 = vmatmul.mubr.f32.gmra.mrb[4].mxu0 %v49_v18 }
  0x9d   :  { %1655 = vst.msk [vmem:[#allocation9 + $0x7a0] ss:$4 sm:$0xf] %vm8752_vm0, %v1275_v24  ;;  %1657 = vst.msk [vmem:[#allocation9 + $0x7b0] ss:$4 sm:$0xf] %vm8752_vm0, %v1277_v29  ;;  %1904 = vmatmul.mubr.f32.gmra.mrb[4].mxu1 %v49_v18  ;;  %1748 = vmatprep.mubr.f32.mxu0 %v13491_v3 }
  0x9e   :  { %1663 = vst.msk [vmem:[#allocation9 + $0x7e0] ss:$4 sm:$0xf] %vm8752_vm0, %v1276_v30  ;;  %1665 = vst.msk [vmem:[#allocation9 + $0x7f0] ss:$4 sm:$0xf] %vm8752_vm0, %v1278_v31  ;;  %1909 = vmatprep.mubr.f32.mxu1 %v13491_v3 }
  0x9f   :  { %v55_v40 = vld [vmem:[#allocation2 + $0x40] sm:$0xff]  ;;  %v56_v48 = vld [vmem:[#allocation2 + $0x48] sm:$0xff]  ;;  %v58_v54 = vld [vmem:[#allocation2 + $0x58] sm:$0xff]  ;;  %v9411_v24 = vmul.f32 0.0, %v2185_v1 }
  0xa0   :  { %1749 = vmatmul.mubr.f32.gmra.mrb[6].mxu0 %v50_v32  ;;  %v59_v55 = vld [vmem:[#allocation2 + $0x60] sm:$0xff]  ;;  %v60_v4 = vld [vmem:[#allocation2 + $0x68] sm:$0xff]  ;;  %v61_v9 = vld [vmem:[#allocation2 + $0x70] sm:$0xff] }
  0xa1   :  { %1910 = vmatmul.mubr.f32.gmra.mrb[6].mxu1 %v50_v32  ;;  %1754 = vmatprep.mubr.f32.mxu0 %v13491_v3  ;;  %v62_v11 = vld [vmem:[#allocation2 + $0x78] sm:$0xff]  ;;  %v8454_v21 = vld [vmem:[#allocation6] sm:$0xff]  ;;  %v8455_v15 = vld [vmem:[#allocation6 + $0x10] sm:$0xff] }
  0xa2   :  { %1915 = vmatprep.mubr.f32.mxu1 %v13491_v3  ;;  %v9406_v16 = vmul.f32 %v8454_v21, %v9401_v53  ;;  %v9409_v23 = vmul.f32 %v8455_v15, %v9401_v53  ;;  %v8456_v29 = vld [vmem:[#allocation6 + $0x8] sm:$0xff]  ;;  %v8457_v31 = vld [vmem:[#allocation6 + $0x18] sm:$0xff]  ;;  %v8458_v32 = vld [vmem:[#allocation6 + $0x20] sm:$0xff] }
  0xa3   :  { %v9414_v30 = vmul.f32 %v8456_v29, %v9401_v53  ;;  %v9417_v18 = vmul.f32 %v8457_v31, %v9401_v53  ;;  %v8465_v21 = vld [vmem:[#allocation6 + $0x58] sm:$0xff]  ;;  %v8466_v29 = vld [vmem:[#allocation6 + $0x60] sm:$0xff] }
  0xa4   :  { %1755 = vmatmul.mubr.f32.gmra.mrb[8].mxu0 %v51_v33  ;;  %v9441_v15 = vmul.f32 %v8465_v21, %v9401_v53  ;;  %v9444_v31 = vmul.f32 %v8466_v29, %v9401_v53 }
  0xa5   :  { %1916 = vmatmul.mubr.f32.gmra.mrb[8].mxu1 %v51_v33  ;;  %1760 = vmatprep.mubr.f32.mxu0 %v13491_v3  ;;  %v9420_v33 = vmul.f32 %v8458_v32, %v9401_v53  ;;  %v8467_v32 = vld [vmem:[#allocation6 + $0x70] sm:$0xff] }
  0xa6   :  { %1921 = vmatprep.mubr.f32.mxu1 %v13491_v3  ;;  %13605 = vst [vmem:[#allocation20_spill] sm:$0xff] %v9444_v31  ;;  %v8472_v31 = vld [vmem:[#allocation6 + $0x88] sm:$0xff] }
  0xa8   :  { %1761 = vmatmul.mubr.f32.gmra.mrb[10].mxu0 %v52_v34 }
  0xa9   :  { %1922 = vmatmul.mubr.f32.gmra.mrb[10].mxu1 %v52_v34  ;;  %1766 = vmatprep.mubr.f32.mxu0 %v13491_v3  ;;  %v8459_v34 = vld [vmem:[#allocation6 + $0x30] sm:$0xff] }
  0xaa   :  { %1927 = vmatprep.mubr.f32.mxu1 %v13491_v3 }
  0xac   :  { %1767 = vmatmul.mubr.f32.gmra.mrb[12].mxu0 %v53_v35 }
  0xad   :  { %1928 = vmatmul.mubr.f32.gmra.mrb[12].mxu1 %v53_v35  ;;  %1772 = vmatprep.mubr.f32.mxu0 %v13491_v3  ;;  %v9423_v35 = vmul.f32 %v8459_v34, %v9401_v53  ;;  %v9447_v34 = vmul.f32 %v8467_v32, %v9401_v53  ;;  %v9462_v32 = vmul.f32 %v8472_v31, %v9401_v53 }
  0xae   :  { %1933 = vmatprep.mubr.f32.mxu1 %v13491_v3 }
  0xaf   :  { %13606 = vst [vmem:[#allocation21_spill] sm:$0xff] %v9447_v34  ;;  %v8473_v34 = vld [vmem:[#allocation6 + $0x98] sm:$0xff] }
  0xb0   :  { %1773 = vmatmul.mubr.f32.gmra.mrb[14].mxu0 %v54_v27 }
  0xb1   :  { %1934 = vmatmul.mubr.f32.gmra.mrb[14].mxu1 %v54_v27  ;;  %1778 = vmatprep.mubr.f32.mxu0 %v13491_v3  ;;  %v8460_v27 = vld [vmem:[#allocation6 + $0x28] sm:$0xff] }
  0xb2   :  { %1939 = vmatprep.mubr.f32.mxu1 %v13491_v3 }
  0xb4   :  { %1779 = vmatmul.mubr.f32.gmra.mrb[16].mxu0 %v55_v40 }
  0xb5   :  { %1940 = vmatmul.mubr.f32.gmra.mrb[16].mxu1 %v55_v40  ;;  %1784 = vmatprep.mubr.f32.mxu0 %v13491_v3  ;;  %v9426_v40 = vmul.f32 %v8460_v27, %v9401_v53  ;;  %v8468_v27 = vld [vmem:[#allocation6 + $0x68] sm:$0xff] }
  0xb6   :  { %1945 = vmatprep.mubr.f32.mxu1 %v13491_v3 }
  0xb8   :  { %1785 = vmatmul.mubr.f32.gmra.mrb[18].mxu0 %v56_v48 }
  0xb9   :  { %1946 = vmatmul.mubr.f32.gmra.mrb[18].mxu1 %v56_v48  ;;  %1790 = vmatprep.mubr.f32.mxu0 %v13491_v3  ;;  %v8461_v48 = vld [vmem:[#allocation6 + $0x38] sm:$0xff] }
  0xba   :  { %1951 = vmatprep.mubr.f32.mxu1 %v13491_v3 }
  0xbc   :  { %1791 = vmatmul.mubr.f32.gmra.mrb[20].mxu0 %v57_v2 }
  0xbd   :  { %1952 = vmatmul.mubr.f32.gmra.mrb[20].mxu1 %v57_v2  ;;  %1796 = vmatprep.mubr.f32.mxu0 %v13491_v3  ;;  %v9429_v2 = vmul.f32 %v8461_v48, %v9401_v53  ;;  %v9450_v48 = vmul.f32 %v8468_v27, %v9401_v53  ;;  %v9465_v27 = vmul.f32 %v8473_v34, %v9401_v53 }
  0xbe   :  { %1957 = vmatprep.mubr.f32.mxu1 %v13491_v3  ;;  %v9481_v34 = vmul.f32 %v9401_v53, %v8896_v22  ;;  %v9499_v22 = vmul.f32 %v9401_v53, %v8931_v51  ;;  %v9517_v51 = vmul.f32 %v9401_v53, %v8943_v56  ;;  %v9537_v56 = vmul.f32 %v9401_v53, %v8965_v63 }
  0xbf   :  { %13607 = vst [vmem:[#allocation22_spill] sm:$0xff] %v9450_v48  ;;  %v8474_v48 = vld [vmem:[#allocation6 + $0xa0] sm:$0xff]  ;;  %v9557_v63 = vmul.f32 %v9401_v53, %v9095_v38  ;;  %v9577_v38 = vmul.f32 %v9401_v53, %v9193_v10  ;;  %v9594_v10 = vmul.f32 %v9401_v53, %v9195_v5  ;;  %v9612_v5 = vmul.f32 %v9401_v53, %v9281_v37 }
  0xc0   :  { %1797 = vmatmul.mubr.f32.gmra.mrb[22].mxu0 %v58_v54  ;;  %13613 = vst [vmem:[#allocation28_spill] sm:$0xff] %v9481_v34  ;;  %v8480_v34 = vld [vmem:[#allocation6 + $0xe8] sm:$0xff]  ;;  %13618 = vst [vmem:[#allocation33_spill] sm:$0xff] %v9537_v56  ;;  %v9628_v37 = vmul.f32 %v9401_v53, %v9271_v26 }
  0xc1   :  { %1958 = vmatmul.mubr.f32.gmra.mrb[22].mxu1 %v58_v54  ;;  %1802 = vmatprep.mubr.f32.mxu0 %v13491_v3  ;;  %v8462_v54 = vld [vmem:[#allocation6 + $0x40] sm:$0xff]  ;;  %13623 = vst [vmem:[#allocation38_spill] sm:$0xff] %v9557_v63  ;;  %13628 = vst [vmem:[#allocation43_spill] sm:$0xff] %v9577_v38 }
  0xc2   :  { %1963 = vmatprep.mubr.f32.mxu1 %v13491_v3  ;;  %13632 = vst [vmem:[#allocation47_spill] sm:$0xff] %v9594_v10  ;;  %13636 = vst [vmem:[#allocation51_spill] sm:$0xff] %v9612_v5 }
  0xc3   :  { %13639 = vst [vmem:[#allocation54_spill] sm:$0xff] %v9628_v37 }
  0xc4   :  { %1803 = vmatmul.mubr.f32.gmra.mrb[24].mxu0 %v59_v55 }
  0xc5   :  { %1964 = vmatmul.mubr.f32.gmra.mrb[24].mxu1 %v59_v55  ;;  %1808 = vmatprep.mubr.f32.mxu0 %v13491_v3  ;;  %v9432_v55 = vmul.f32 %v8462_v54, %v9401_v53  ;;  %v8469_v54 = vld [vmem:[#allocation6 + $0x78] sm:$0xff] }
  0xc6   :  { %1969 = vmatprep.mubr.f32.mxu1 %v13491_v3 }
  0xc8   :  { %1809 = vmatmul.mubr.f32.gmra.mrb[26].mxu0 %v60_v4 }
  0xc9   :  { %1970 = vmatmul.mubr.f32.gmra.mrb[26].mxu1 %v60_v4  ;;  %1814 = vmatprep.mubr.f32.mxu0 %v13491_v3  ;;  %v8463_v4 = vld [vmem:[#allocation6 + $0x50] sm:$0xff] }
  0xca   :  { %1975 = vmatprep.mubr.f32.mxu1 %v13491_v3 }
  0xcc   :  { %1815 = vmatmul.mubr.f32.gmra.mrb[28].mxu0 %v61_v9 }
  0xcd   :  { %1976 = vmatmul.mubr.f32.gmra.mrb[28].mxu1 %v61_v9  ;;  %1820 = vmatprep.mubr.f32.mxu0 %v13491_v3  ;;  %v9435_v9 = vmul.f32 %v8463_v4, %v9401_v53  ;;  %v9453_v4 = vmul.f32 %v8469_v54, %v9401_v53  ;;  %v9468_v54 = vmul.f32 %v8474_v48, %v9401_v53 }
  0xce   :  { %1981 = vmatprep.mubr.f32.mxu1 %v13491_v3  ;;  %v9485_v48 = vmul.f32 %v9401_v53, %v8929_v50  ;;  %v9502_v50 = vmul.f32 %v8480_v34, %v9401_v53  ;;  %v9521_v34 = vmul.f32 %v9401_v53, %v8963_v62  ;;  %v9541_v62 = vmul.f32 %v9401_v53, %v9077_v6 }
  0xcf   :  { %13608 = vst [vmem:[#allocation23_spill] sm:$0xff] %v9453_v4  ;;  %13611 = vst [vmem:[#allocation26_spill] sm:$0xff] %v9468_v54  ;;  %v8475_v4 = vld [vmem:[#allocation6 + $0xb0] sm:$0xff]  ;;  %v8478_v54 = vld [vmem:[#allocation6 + $0xc8] sm:$0xff]  ;;  %v9561_v6 = vmul.f32 %v9401_v53, %v9107_v46  ;;  %v9581_v46 = vmul.f32 %v9401_v53, %v9119_v58  ;;  %v9598_v58 = vmul.f32 %v9401_v53, %v9121_v61 }
  0xd0   :  { %1821 = vmatmul.mubr.f32.gmra.mrb[30].mxu0 %v62_v11  ;;  %13614 = vst [vmem:[#allocation29_spill] sm:$0xff] %v9485_v48  ;;  %v8481_v48 = vld [vmem:[#allocation6 + $0xf8] sm:$0xff]  ;;  %13619 = vst [vmem:[#allocation34_spill] sm:$0xff] %v9541_v62 }
  0xd1   :  { %1982 = vmatmul.mubr.f32.gmra.mrb[30].mxu1 %v62_v11  ;;  %3851 = vmatprep.mubr.f32.mxu0 %v13491_v3  ;;  %v8464_v11 = vld [vmem:[#allocation6 + $0x48] sm:$0xff]  ;;  %13624 = vst [vmem:[#allocation39_spill] sm:$0xff] %v9561_v6  ;;  %13629 = vst [vmem:[#allocation44_spill] sm:$0xff] %v9581_v46 }
  0xd2   :  { %4012 = vmatprep.mubr.f32.mxu1 %v13491_v3  ;;  %v9438_v1 = vmul.f32 %v8464_v11, %v9401_v53  ;;  %v8470_v11 = vld [vmem:[#allocation6 + $0x80] sm:$0xff]  ;;  %v8471_v3 = vld [vmem:[#allocation6 + $0x90] sm:$0xff]  ;;  %13633 = vst [vmem:[#allocation48_spill] sm:$0xff] %v9598_v58 }
  0xd3   :  { %v9456_v21 = vmul.f32 %v8470_v11, %v9401_v53  ;;  %v9459_v29 = vmul.f32 %v8471_v3, %v9401_v53  ;;  %v9471_v11 = vmul.f32 %v8475_v4, %v9401_v53  ;;  %v9488_v4 = vmul.f32 %v8478_v54, %v9401_v53 }
  0xd4   :  { %v9505_v54 = vmul.f32 %v8481_v48, %v9401_v53  ;;  %v9525_v48 = vmul.f32 %v9401_v53, %v9007_v36  ;;  %v9545_v36 = vmul.f32 %v9401_v53, %v9105_v45  ;;  %v9565_v45 = vmul.f32 %v9401_v53, %v9033_v52 }
  0xd5   :  { %13609 = vst [vmem:[#allocation24_spill] sm:$0xff] %v9456_v21  ;;  %13610 = vst [vmem:[#allocation25_spill] sm:$0xff] %v9459_v29  ;;  %v8476_v21 = vld [vmem:[#allocation6 + $0xa8] sm:$0xff]  ;;  %v8477_v29 = vld [vmem:[#allocation6 + $0xb8] sm:$0xff]  ;;  %v9585_v52 = vmul.f32 %v9401_v53, %v9139_v7  ;;  %v9602_v7 = vmul.f32 %v9401_v53, %v9141_v8  ;;  %v9618_v8 = vmul.f32 %v9401_v53, %v9207_v19 }
  0xd6   :  { %13612 = vst [vmem:[#allocation27_spill] sm:$0xff] %v9471_v11  ;;  %v9474_v3 = vmul.f32 %v8476_v21, %v9401_v53  ;;  %v9477_v31 = vmul.f32 %v8477_v29, %v9401_v53  ;;  %v8479_v11 = vld [vmem:[#allocation6 + $0xd8] sm:$0xff]  ;;  %v9495_v29 = vmul.f32 %v9401_v53, %v8919_v44  ;;  %v9513_v44 = vmul.f32 %v9401_v53, %v9017_v41 }
  0xd7   :  { %v9491_v21 = vmul.f32 %v8479_v11, %v9401_v53  ;;  %v9509_v11 = vmul.f32 %v9401_v53, %v8989_v14  ;;  %13615 = vst [vmem:[#allocation30_spill] sm:$0xff] %v9525_v48  ;;  %v9529_v14 = vmul.f32 %v9401_v53, %v9019_v42  ;;  %v9533_v41 = vmul.f32 %v9401_v53, %v8945_v57 }
  0xd8   :  { %13620 = vst [vmem:[#allocation35_spill] sm:$0xff] %v9545_v36  ;;  %v9549_v42 = vmul.f32 %v9401_v53, %v9031_v49  ;;  %v9553_v57 = vmul.f32 %v9401_v53, %v9051_v59  ;;  %13625 = vst [vmem:[#allocation40_spill] sm:$0xff] %v9565_v45  ;;  %v9569_v49 = vmul.f32 %v9401_v53, %v9053_v60 }
  0xd9   :  { %13616 = vst [vmem:[#allocation31_spill] sm:$0xff] %v9529_v14  ;;  %13617 = vst [vmem:[#allocation32_spill] sm:$0xff] %v9533_v41  ;;  %v9573_v59 = vmul.f32 %v9401_v53, %v9165_v17  ;;  %v9589_v60 = vmul.f32 %v9401_v53, %v9183_v0 }
  0xda   :  { %13621 = vst [vmem:[#allocation36_spill] sm:$0xff] %v9549_v42  ;;  %13622 = vst [vmem:[#allocation37_spill] sm:$0xff] %v9553_v57 }
  0xdb   :  { %13626 = vst [vmem:[#allocation41_spill] sm:$0xff] %v9569_v49  ;;  %13627 = vst [vmem:[#allocation42_spill] sm:$0xff] %v9573_v59 }
  0xdc   :  { %13630 = vst [vmem:[#allocation45_spill] sm:$0xff] %v9585_v52  ;;  %13631 = vst [vmem:[#allocation46_spill] sm:$0xff] %v9589_v60 }
  0xdd   :  { %13634 = vst [vmem:[#allocation49_spill] sm:$0xff] %v9602_v7  ;;  %13637 = vst [vmem:[#allocation52_spill] sm:$0xff] %v9618_v8 }
 0x167   :  { %v1732_v57 = vpop.f32.mrb[0].mxu0 }
 0x168   :  { %v1992_v17 = vmul.f32 %v9403_v12, %v1732_v57  ;;  %v1893_v59 = vpop.f32.mrb[0].mxu1  ;;  %v1734_v49 = vpop.f32.mrb[1].mxu0  ;;  %v9608_v57 = vmul.f32 %v9401_v53, %v9253_v43 }
 0x169   :  { %v1994_v52 = vmul.f32 %v9403_v12, %v1893_v59  ;;  %v1993_v0 = vmul.f32 %v9403_v12, %v1734_v49  ;;  %v1895_v60 = vpop.f32.mrb[1].mxu1  ;;  %v9622_v49 = vmul.f32 %v9401_v53, %v9227_v25 }
 0x16a   :  { %13635 = vst [vmem:[#allocation50_spill] sm:$0xff] %v9608_v57  ;;  %v2121_v61 = vadd.f32 %v9406_v16, %v1992_v17  ;;  %v1995_v58 = vmul.f32 %v9403_v12, %v1895_v60  ;;  %v9632_v16 = vmul.f32 %v9401_v53, %v9283_v39 }
 0x16b   :  { %13638 = vst [vmem:[#allocation53_spill] sm:$0xff] %v9622_v49  ;;  %v2123_v59 = vadd.f32 %v9409_v23, %v1994_v52  ;;  %v2122_v43 = vadd.f32 %v9414_v30, %v1993_v0  ;;  %v1738_v57 = vpop.f32.mrb[2].mxu0  ;;  %v9641_v30 = vmul.f32 %v9401_v53, %v9209_v20  ;;  %v9658_v20 = vmul.f32 %v9401_v53, %v9229_v28 }
 0x16c   :  { %13640 = vst [vmem:[#allocation55_spill] sm:$0xff] %v9632_v16  ;;  %v9635_v19 = vadd.f32 %v9411_v24, %v2121_v61  ;;  %v2124_v60 = vadd.f32 %v9417_v18, %v1995_v58  ;;  %v1996_v25 = vmul.f32 %v9403_v12, %v1738_v57  ;;  %v1899_v17 = vpop.f32.mrb[2].mxu1  ;;  %v1740_v23 = vpop.f32.mrb[3].mxu0 }
 0x16d   :  { %13642 = vst [vmem:[#allocation57_spill] sm:$0xff] %v9641_v30  ;;  %v9644_v26 = vadd.f32 %v9411_v24, %v2123_v59  ;;  %v9647_v52 = vadd.f32 %v9411_v24, %v2122_v43  ;;  %v1998_v39 = vmul.f32 %v9403_v12, %v1899_v17  ;;  %v1997_v0 = vmul.f32 %v9403_v12, %v1740_v23  ;;  %v1901_v61 = vpop.f32.mrb[3].mxu1 }
 0x16e   :  { %13641 = vst [vmem:[#allocation56_spill] sm:$0xff] %v9635_v19  ;;  %v9652_v18 = vadd.f32 %v9411_v24, %v2124_v60  ;;  %v2125_v58 = vadd.f32 %v9420_v33, %v1996_v25  ;;  %v1999_v57 = vmul.f32 %v9403_v12, %v1901_v61  ;;  %13646 = vst [vmem:[#allocation61_spill] sm:$0xff] %v9658_v20 }
 0x16f   :  { %13643 = vst [vmem:[#allocation58_spill] sm:$0xff] %v9644_v26  ;;  %13644 = vst [vmem:[#allocation59_spill] sm:$0xff] %v9647_v52  ;;  %v2315_v59 = vcombine.low %v9635_v19, %v9647_v52  ;;  %v2316_v43 = vcombine.high %v9635_v19, %v9647_v52  ;;  %v2127_v17 = vadd.f32 %v9423_v35, %v1998_v39  ;;  %v1744_v60 = vpop.f32.mrb[4].mxu0 }
 0x170   :  { %13645 = vst [vmem:[#allocation60_spill] sm:$0xff] %v9652_v18  ;;  %v2126_v23 = vadd.f32 %v9426_v40, %v1997_v0  ;;  %v2317_v33 = vcombine.low %v9644_v26, %v9652_v18  ;;  %v2318_v25 = vcombine.high %v9644_v26, %v9652_v18  ;;  %v9671_v28 = vadd.f32 %v9411_v24, %v2125_v58  ;;  %v1905_v61 = vpop.f32.mrb[4].mxu1  ;;  %v1746_v20 = vpop.f32.mrb[5].mxu0 }
 0x171   :  { %v2128_v53 = vadd.f32 %v9429_v2, %v1999_v57  ;;  %v2325_v30 = vrot.slane %v2315_v59, %v8730_v13  ;;  %v2332_v35 = vrot.slane %v2316_v43, %v8730_v13  ;;  %v9677_v40 = vadd.f32 %v9411_v24, %v2127_v17  ;;  %v1907_v0 = vpop.f32.mrb[5].mxu1 }
 0x172   :  { %13647 = vst [vmem:[#allocation62_spill] sm:$0xff] %v9671_v28  ;;  %v9680_v39 = vadd.f32 %v9411_v24, %v2126_v23  ;;  %v2339_v16 = vrot.slane %v2317_v33, %v8730_v13  ;;  %v2346_v58 = vrot.slane %v2318_v25, %v8730_v13  ;;  %v2000_v2 = vmul.f32 %v9403_v12, %v1744_v60 }
 0x173   :  { %13648 = vst [vmem:[#allocation63_spill] sm:$0xff] %v9677_v40  ;;  %v9685_v37 = vadd.f32 %v9411_v24, %v2128_v53  ;;  %v2002_v43 = vmul.f32 %v9403_v12, %v1905_v61  ;;  %v2001_v17 = vmul.f32 %v9403_v12, %v1746_v20  ;;  %v1750_v23 = vpop.f32.mrb[6].mxu0 }
 0x174   :  { %13649 = vst [vmem:[#allocation64_spill] sm:$0xff] %v9680_v39  ;;  %v2383_v57 = vcombine.low %v9671_v28, %v9680_v39  ;;  %v2384_v59 = vcombine.high %v9671_v28, %v9680_v39  ;;  %v2347_v49 = vcombine.low %v2325_v30, %v2339_v16  ;;  %v2348_v33 = vcombine.high %v2325_v30, %v2339_v16  ;;  %v1911_v5 = vpop.f32.mrb[6].mxu1  ;;  %v9694_v53 = vpop.f32.mrb[7].mxu0 }
 0x175   :  { %13650 = vst [vmem:[#allocation65_spill] sm:$0xff] %v9685_v37  ;;  %v2349_v8 = vcombine.low %v2332_v35, %v2346_v58  ;;  %v2350_v25 = vcombine.high %v2332_v35, %v2346_v58  ;;  %v2385_v10 = vcombine.low %v9677_v40, %v9685_v37  ;;  %v2386_v61 = vcombine.high %v9677_v40, %v9685_v37  ;;  %v9702_v46 = vpop.f32.mrb[7].mxu1 }
 0x176   :  { %v2393_v60 = vrot.slane %v2383_v57, %v8730_v13  ;;  %v2400_v7 = vrot.slane %v2384_v59, %v8730_v13  ;;  %v2357_v20 = vrot.slane %v2347_v49, %v8730_v13  ;;  %v2371_v30 = vrot.slane %v2348_v33, %v8730_v13 }
 0x177   :  { %v2364_v16 = vrot.slane %v2349_v8, %v8730_v13  ;;  %v2378_v35 = vrot.slane %v2350_v25, %v8730_v13  ;;  %v2407_v58 = vrot.slane %v2385_v10, %v8730_v13  ;;  %v2414_v57 = vrot.slane %v2386_v61, %v8730_v13  ;;  %v9712_v45 = vpop.f32.mrb[8].mxu0 }
 0x178   :  { %v2129_v59 = vadd.f32 %v9432_v55, %v2000_v2  ;;  %v2131_v38 = vadd.f32 %v9435_v9, %v2002_v43  ;;  %v2379_v6 = vcombine.high %v2357_v20, %v2357_v20  ;;  %v2381_v42 = vcombine.high %v2371_v30, %v2371_v30  ;;  %3532 = vst.msk [vmem:[#allocation9 + $0x1] ss:$4 sm:$0xf] %vm8752_vm0, %v2357_v20  ;;  %v9722_v55 = vpop.f32.mrb[8].mxu1  ;;  %v9724_v9 = vpop.f32.mrb[9].mxu0 }
 0x179   :  { %v2380_v63 = vcombine.high %v2364_v16, %v2364_v16  ;;  %v2382_v49 = vcombine.high %v2378_v35, %v2378_v35  ;;  %3534 = vst.msk [vmem:[#allocation9 + $0x11] ss:$4 sm:$0xf] %vm8752_vm0, %v2371_v30  ;;  %3540 = vst.msk [vmem:[#allocation9 + $0x41] ss:$4 sm:$0xf] %vm8752_vm0, %v2364_v16  ;;  %v2415_v10 = vcombine.low %v2393_v60, %v2407_v58 }
 0x17a   :  { %3542 = vst.msk [vmem:[#allocation9 + $0x51] ss:$4 sm:$0xf] %vm8752_vm0, %v2378_v35  ;;  %v2416_v8 = vcombine.high %v2393_v60, %v2407_v58  ;;  %v2417_v2 = vcombine.low %v2400_v7, %v2414_v57  ;;  %v2418_v43 = vcombine.high %v2400_v7, %v2414_v57  ;;  %v9726_v33 = vpop.f32.mrb[9].mxu1  ;;  %v9737_v25 = vadd.f32 %v9411_v24, %v2129_v59 }
 0x17b   :  { %3536 = vst.msk [vmem:[#allocation9 + $0x21] ss:$4 sm:$0xf] %vm8752_vm0, %v2379_v6  ;;  %3538 = vst.msk [vmem:[#allocation9 + $0x31] ss:$4 sm:$0xf] %vm8752_vm0, %v2381_v42  ;;  %v9740_v60 = vadd.f32 %v9411_v24, %v2131_v38  ;;  %v2130_v7 = vadd.f32 %v9438_v1, %v2001_v17  ;;  %v2003_v61 = vmul.f32 %v9403_v12, %v1907_v0 }
 0x17c   :  { %3544 = vst.msk [vmem:[#allocation9 + $0x61] ss:$4 sm:$0xf] %vm8752_vm0, %v2380_v63  ;;  %3546 = vst.msk [vmem:[#allocation9 + $0x71] ss:$4 sm:$0xf] %vm8752_vm0, %v2382_v49  ;;  %v2425_v6 = vrot.slane %v2415_v10, %v8730_v13  ;;  %v2432_v42 = vrot.slane %v2417_v2, %v8730_v13  ;;  %v2439_v20 = vrot.slane %v2416_v8, %v8730_v13 }
 0x17d   :  { %13651 = vst [vmem:[#allocation66_spill] sm:$0xff] %v9737_v25  ;;  %13652 = vst [vmem:[#allocation67_spill] sm:$0xff] %v9740_v60  ;;  %v2446_v63 = vrot.slane %v2418_v43, %v8730_v13  ;;  %v9748_v16 = vpop.f32.mrb[10].mxu0  ;;  %v9751_v30 = vadd.f32 %v9411_v24, %v2130_v7  ;;  %v2132_v38 = vadd.f32 %v9441_v15, %v2003_v61  ;;  %v9756_v0 = vpop.f32.mrb[10].mxu1  ;;  %v13655_v8 = vld [vmem:[#allocation20_spill] sm:$0xff]  ;;  %v13656_v43 = vld [vmem:[#allocation21_spill] sm:$0xff] }
 0x17e   :  { %v2004_v35 = vmul.f32 %v9403_v12, %v1750_v23  ;;  %v2006_v1 = vmul.f32 %v9403_v12, %v1911_v5  ;;  %v9758_v17 = vpop.f32.mrb[11].mxu0  ;;  %v2447_v58 = vcombine.high %v2425_v6, %v2425_v6  ;;  %v2448_v57 = vcombine.high %v2432_v42, %v2432_v42  ;;  %3548 = vst.msk [vmem:[#allocation9 + $0x81] ss:$4 sm:$0xf] %vm8752_vm0, %v2425_v6  ;;  %v9768_v15 = vpop.f32.mrb[11].mxu1 }
 0x17f   :  { %13653 = vst [vmem:[#allocation68_spill] sm:$0xff] %v9751_v30  ;;  %v2449_v59 = vcombine.high %v2439_v20, %v2439_v20  ;;  %v2450_v49 = vcombine.high %v2446_v63, %v2446_v63  ;;  %3550 = vst.msk [vmem:[#allocation9 + $0x91] ss:$4 sm:$0xf] %vm8752_vm0, %v2439_v20  ;;  %v2451_v5 = vcombine.low %v9737_v25, %v9751_v30  ;;  %v9793_v20 = vpop.f32.mrb[12].mxu0 }
 0x180   :  { %3556 = vst.msk [vmem:[#allocation9 + $0xc1] ss:$4 sm:$0xf] %vm8752_vm0, %v2432_v42  ;;  %3558 = vst.msk [vmem:[#allocation9 + $0xd1] ss:$4 sm:$0xf] %vm8752_vm0, %v2446_v63  ;;  %v2452_v23 = vcombine.high %v9737_v25, %v9751_v30  ;;  %v9775_v10 = vadd.f32 %v9411_v24, %v2132_v38  ;;  %v2133_v2 = vadd.f32 %v13655_v8, %v2004_v35 }
 0x181   :  { %3552 = vst.msk [vmem:[#allocation9 + $0xa1] ss:$4 sm:$0xf] %vm8752_vm0, %v2447_v58  ;;  %3554 = vst.msk [vmem:[#allocation9 + $0xb1] ss:$4 sm:$0xf] %vm8752_vm0, %v2449_v59  ;;  %v2135_v7 = vadd.f32 %v13656_v43, %v2006_v1  ;;  %v2005_v61 = vmul.f32 %v9403_v12, %v9694_v53  ;;  %v2007_v6 = vmul.f32 %v9403_v12, %v9702_v46 }
 0x182   :  { %13654 = vst [vmem:[#allocation69_spill] sm:$0xff] %v9775_v10  ;;  %3560 = vst.msk [vmem:[#allocation9 + $0xe1] ss:$4 sm:$0xf] %vm8752_vm0, %v2448_v57  ;;  %v8252_v42 = vpack.c.bf16 %v9680_v39, %v9647_v52  ;;  %v2461_v63 = vrot.slane %v2451_v5, %v8730_v13  ;;  %v2468_v38 = vrot.slane %v2452_v23, %v8730_v13  ;;  %v9801_v58 = vpop.f32.mrb[12].mxu1  ;;  %v9803_v53 = vpop.f32.mrb[13].mxu0 }
 0x183   :  { %3562 = vst.msk [vmem:[#allocation9 + $0xf1] ss:$4 sm:$0xf] %vm8752_vm0, %v2450_v49  ;;  %v2453_v35 = vcombine.low %v9740_v60, %v9775_v10  ;;  %v2454_v1 = vcombine.high %v9740_v60, %v9775_v10  ;;  %v9806_v46 = vadd.f32 %v9411_v24, %v2133_v2  ;;  %v9809_v57 = vadd.f32 %v9411_v24, %v2135_v7  ;;  %v13659_v59 = vld [vmem:[#allocation22_spill] sm:$0xff]  ;;  %v13660_v5 = vld [vmem:[#allocation23_spill] sm:$0xff]  ;;  %v9813_v8 = vpop.f32.mrb[13].mxu1 }
 0x184   :  { %v2134_v49 = vadd.f32 %v13659_v59, %v2005_v61  ;;  %v2136_v23 = vadd.f32 %v13660_v5, %v2007_v6  ;;  %8253 = vmatprep.subr.bf16.mxu0 %v8252_v42  ;;  %v8284_v52 = vpack.c.bf16 %v9685_v37, %v9652_v18  ;;  %v8254_v2 = vpack.c.bf16 %v9671_v28, %v9635_v19  ;;  %v9833_v28 = vpop.f32.mrb[14].mxu1 }
 0x185   :  { %13657 = vst [vmem:[#allocation20_spill] sm:$0xff] %v9806_v46  ;;  %13658 = vst [vmem:[#allocation21_spill] sm:$0xff] %v9809_v57  ;;  %v2475_v43 = vrot.slane %v2453_v35, %v8730_v13  ;;  %v2482_v39 = vrot.slane %v2454_v1, %v8730_v13  ;;  %v8286_v6 = vpack.c.bf16 %v9677_v40, %v9644_v26  ;;  %v9831_v35 = vpop.f32.mrb[14].mxu0 }
 0x186   :  { %v9822_v7 = vadd.f32 %v9411_v24, %v2134_v49  ;;  %v9825_v61 = vadd.f32 %v9411_v24, %v2136_v23  ;;  %v2008_v42 = vmul.f32 %v9403_v12, %v9712_v45  ;;  %8285 = vmatprep.subr.bf16.mxu1 %v8284_v52  ;;  %v9835_v49 = vpop.f32.mrb[15].mxu0  ;;  %8255 = vmatpush1.bf16.msra.mxu0 %v8254_v2 }
 0x187   :  { %v2483_v1 = vcombine.low %v2461_v63, %v2475_v43  ;;  %v2484_v59 = vcombine.high %v2461_v63, %v2475_v43  ;;  %v2485_v5 = vcombine.low %v2468_v38, %v2482_v39  ;;  %v2486_v37 = vcombine.high %v2468_v38, %v2482_v39  ;;  %v9845_v63 = vpop.f32.mrb[15].mxu1  ;;  %8287 = vmatpush1.bf16.msra.mxu1 %v8286_v6  ;;  %v9855_v2 = vpop.f32.mrb[16].mxu0 }
 0x188   :  { %13661 = vst [vmem:[#allocation22_spill] sm:$0xff] %v9822_v7  ;;  %13662 = vst [vmem:[#allocation23_spill] sm:$0xff] %v9825_v61  ;;  %v2519_v23 = vcombine.low %v9806_v46, %v9822_v7  ;;  %v2520_v40 = vcombine.high %v9806_v46, %v9822_v7  ;;  %v2521_v45 = vcombine.low %v9809_v57, %v9825_v61 }
 0x189   :  { %v2522_v18 = vcombine.high %v9809_v57, %v9825_v61  ;;  %v2493_v52 = vrot.slane %v2483_v1, %v8730_v13  ;;  %v2500_v39 = vrot.slane %v2485_v5, %v8730_v13  ;;  %v2507_v38 = vrot.slane %v2484_v59, %v8730_v13 }
 0x18a   :  { %v2514_v43 = vrot.slane %v2486_v37, %v8730_v13  ;;  %v2529_v26 = vrot.slane %v2519_v23, %v8730_v13  ;;  %v2536_v19 = vrot.slane %v2520_v40, %v8730_v13  ;;  %v2543_v36 = vrot.slane %v2521_v45, %v8730_v13  ;;  %v9865_v37 = vpop.f32.mrb[16].mxu1  ;;  %v13663_v45 = vld [vmem:[#allocation24_spill] sm:$0xff] }
 0x18b   :  { %v2550_v62 = vrot.slane %v2522_v18, %v8730_v13  ;;  %v2515_v56 = vcombine.high %v2493_v52, %v2493_v52  ;;  %v2516_v41 = vcombine.high %v2500_v39, %v2500_v39  ;;  %v2517_v1 = vcombine.high %v2507_v38, %v2507_v38  ;;  %3564 = vst.msk [vmem:[#allocation9 + $0x101] ss:$4 sm:$0xf] %vm8752_vm0, %v2493_v52  ;;  %v9867_v18 = vpop.f32.mrb[17].mxu0  ;;  %v9869_v23 = vpop.f32.mrb[17].mxu1 }
 0x18c   :  { %v2518_v14 = vcombine.high %v2514_v43, %v2514_v43  ;;  %3566 = vst.msk [vmem:[#allocation9 + $0x111] ss:$4 sm:$0xf] %vm8752_vm0, %v2507_v38  ;;  %3572 = vst.msk [vmem:[#allocation9 + $0x141] ss:$4 sm:$0xf] %vm8752_vm0, %v2500_v39  ;;  %v2551_v40 = vcombine.low %v2529_v26, %v2543_v36  ;;  %v2552_v6 = vcombine.high %v2529_v26, %v2543_v36 }
 0x18d   :  { %3574 = vst.msk [vmem:[#allocation9 + $0x151] ss:$4 sm:$0xf] %vm8752_vm0, %v2514_v43  ;;  %v2553_v59 = vcombine.low %v2536_v19, %v2550_v62  ;;  %v2554_v5 = vcombine.high %v2536_v19, %v2550_v62  ;;  %3568 = vst.msk [vmem:[#allocation9 + $0x121] ss:$4 sm:$0xf] %vm8752_vm0, %v2515_v56  ;;  %v2137_v52 = vadd.f32 %v13663_v45, %v2008_v42 }
 0x18e   :  { %3570 = vst.msk [vmem:[#allocation9 + $0x131] ss:$4 sm:$0xf] %vm8752_vm0, %v2517_v1  ;;  %3576 = vst.msk [vmem:[#allocation9 + $0x161] ss:$4 sm:$0xf] %vm8752_vm0, %v2516_v41  ;;  %v2010_v36 = vmul.f32 %v9403_v12, %v9722_v55  ;;  %v2009_v62 = vmul.f32 %v9403_v12, %v9724_v9  ;;  %v2011_v56 = vmul.f32 %v9403_v12, %v9726_v33 }
 0x18f   :  { %3578 = vst.msk [vmem:[#allocation9 + $0x171] ss:$4 sm:$0xf] %vm8752_vm0, %v2518_v14  ;;  %v2561_v19 = vrot.slane %v2551_v40, %v8730_v13  ;;  %v2568_v26 = vrot.slane %v2553_v59, %v8730_v13  ;;  %v2575_v41 = vrot.slane %v2552_v6, %v8730_v13  ;;  %v2582_v39 = vrot.slane %v2554_v5, %v8730_v13  ;;  %v9890_v14 = vpop.f32.mrb[18].mxu0  ;;  %v13665_v55 = vld [vmem:[#allocation25_spill] sm:$0xff]  ;;  %v9898_v33 = vpop.f32.mrb[18].mxu1 }
 0x190   :  { %v9893_v42 = vadd.f32 %v9411_v24, %v2137_v52  ;;  %v2139_v38 = vadd.f32 %v13665_v55, %v2010_v36  ;;  %v2138_v9 = vadd.f32 %v9462_v32, %v2009_v62  ;;  %v2140_v43 = vadd.f32 %v9465_v27, %v2011_v56  ;;  %v9900_v1 = vpop.f32.mrb[19].mxu0  ;;  %v9910_v32 = vpop.f32.mrb[19].mxu1 }
 0x191   :  { %v2583_v40 = vcombine.high %v2561_v19, %v2561_v19  ;;  %v2584_v59 = vcombine.high %v2568_v26, %v2568_v26  ;;  %v2585_v6 = vcombine.high %v2575_v41, %v2575_v41  ;;  %v2586_v45 = vcombine.high %v2582_v39, %v2582_v39  ;;  %3580 = vst.msk [vmem:[#allocation9 + $0x181] ss:$4 sm:$0xf] %vm8752_vm0, %v2561_v19  ;;  %v9949_v55 = vpop.f32.mrb[20].mxu1 }
 0x192   :  { %13664 = vst [vmem:[#allocation24_spill] sm:$0xff] %v9893_v42  ;;  %3582 = vst.msk [vmem:[#allocation9 + $0x191] ss:$4 sm:$0xf] %vm8752_vm0, %v2575_v41  ;;  %v9913_v27 = vadd.f32 %v9411_v24, %v2139_v38  ;;  %v9916_v5 = vadd.f32 %v9411_v24, %v2138_v9  ;;  %v9919_v52 = vadd.f32 %v9411_v24, %v2140_v43  ;;  %v13672_v38 = vld [vmem:[#allocation26_spill] sm:$0xff]  ;;  %v13673_v43 = vld [vmem:[#allocation27_spill] sm:$0xff] }
 0x193   :  { %3588 = vst.msk [vmem:[#allocation9 + $0x1c1] ss:$4 sm:$0xf] %vm8752_vm0, %v2568_v26  ;;  %3590 = vst.msk [vmem:[#allocation9 + $0x1d1] ss:$4 sm:$0xf] %vm8752_vm0, %v2582_v39  ;;  %v2012_v36 = vmul.f32 %v9403_v12, %v9748_v16  ;;  %v2014_v62 = vmul.f32 %v9403_v12, %v9756_v0  ;;  %v2013_v56 = vmul.f32 %v9403_v12, %v9758_v17 }
 0x194   :  { %13666 = vst [vmem:[#allocation25_spill] sm:$0xff] %v9913_v27  ;;  %13667 = vst [vmem:[#allocation70_spill] sm:$0xff] %v9916_v5  ;;  %v2015_v16 = vmul.f32 %v9403_v12, %v9768_v15  ;;  %v8256_v19 = vpack.c.bf16 %v9822_v7, %v9751_v30  ;;  %v9939_v26 = vpop.f32.mrb[20].mxu0  ;;  %v2587_v41 = vcombine.low %v9893_v42, %v9916_v5 }
 0x195   :  { %13668 = vst [vmem:[#allocation71_spill] sm:$0xff] %v9919_v52  ;;  %3584 = vst.msk [vmem:[#allocation9 + $0x1a1] ss:$4 sm:$0xf] %vm8752_vm0, %v2583_v40  ;;  %v2588_v39 = vcombine.high %v9893_v42, %v9916_v5  ;;  %v2589_v0 = vcombine.low %v9913_v27, %v9919_v52  ;;  %v2590_v17 = vcombine.high %v9913_v27, %v9919_v52  ;;  %v9951_v15 = vpop.f32.mrb[21].mxu0 }
 0x196   :  { %3586 = vst.msk [vmem:[#allocation9 + $0x1b1] ss:$4 sm:$0xf] %vm8752_vm0, %v2585_v6  ;;  %3592 = vst.msk [vmem:[#allocation9 + $0x1e1] ss:$4 sm:$0xf] %vm8752_vm0, %v2584_v59  ;;  %v2141_v9 = vadd.f32 %v13672_v38, %v2012_v36  ;;  %v2143_v40 = vadd.f32 %v13673_v43, %v2014_v62  ;;  %v2142_v59 = vadd.f32 %v9474_v3, %v2013_v56  ;;  %8257 = vmatprep.subr.bf16.mxu0 %v8256_v19 }
 0x197   :  { %3594 = vst.msk [vmem:[#allocation9 + $0x1f1] ss:$4 sm:$0xf] %vm8752_vm0, %v2586_v45  ;;  %13669 = vst [vmem:[#allocation72_spill] sm:$0xff] %v9939_v26  ;;  %v2144_v6 = vadd.f32 %v9477_v31, %v2015_v16  ;;  %v9957_v45 = vpop.f32.mrb[21].mxu1  ;;  %v2597_v7 = vrot.slane %v2587_v41, %v8730_v13  ;;  %v2604_v30 = vrot.slane %v2588_v39, %v8730_v13  ;;  %v9975_v62 = vpop.f32.mrb[22].mxu0 }
 0x198   :  { %13670 = vst [vmem:[#allocation73_spill] sm:$0xff] %v9949_v55  ;;  %13671 = vst [vmem:[#allocation74_spill] sm:$0xff] %v9951_v15  ;;  %v2611_v26 = vrot.slane %v2589_v0, %v8730_v13  ;;  %v2618_v55 = vrot.slane %v2590_v17, %v8730_v13  ;;  %v9964_v15 = vadd.f32 %v9411_v24, %v2141_v9  ;;  %v9977_v39 = vpop.f32.mrb[22].mxu1  ;;  %v9979_v0 = vpop.f32.mrb[23].mxu0 }
 0x199   :  { %13674 = vst [vmem:[#allocation26_spill] sm:$0xff] %v9957_v45  ;;  %v9967_v36 = vadd.f32 %v9411_v24, %v2143_v40  ;;  %v9970_v3 = vadd.f32 %v9411_v24, %v2142_v59  ;;  %v9973_v31 = vadd.f32 %v9411_v24, %v2144_v6  ;;  %13679 = vst [vmem:[#allocation78_spill] sm:$0xff] %v9975_v62  ;;  %v9989_v40 = vpop.f32.mrb[23].mxu1  ;;  %v9999_v62 = vpop.f32.mrb[24].mxu0 }
 0x19a   :  { %13675 = vst [vmem:[#allocation27_spill] sm:$0xff] %v9964_v15  ;;  %v2619_v56 = vcombine.low %v2597_v7, %v2611_v26  ;;  %v2620_v16 = vcombine.high %v2597_v7, %v2611_v26  ;;  %v2621_v19 = vcombine.low %v2604_v30, %v2618_v55  ;;  %v2622_v41 = vcombine.high %v2604_v30, %v2618_v55 }
 0x19b   :  { %13676 = vst [vmem:[#allocation75_spill] sm:$0xff] %v9967_v36  ;;  %13677 = vst [vmem:[#allocation76_spill] sm:$0xff] %v9970_v3  ;;  %v2655_v17 = vcombine.low %v9964_v15, %v9970_v3  ;;  %v2656_v38 = vcombine.high %v9964_v15, %v9970_v3  ;;  %v2657_v9 = vcombine.low %v9967_v36, %v9973_v31 }
 0x19c   :  { %13678 = vst [vmem:[#allocation77_spill] sm:$0xff] %v9973_v31  ;;  %13680 = vst [vmem:[#allocation79_spill] sm:$0xff] %v9977_v39  ;;  %v2658_v43 = vcombine.high %v9967_v36, %v9973_v31  ;;  %v2629_v30 = vrot.slane %v2619_v56, %v8730_v13  ;;  %v2636_v7 = vrot.slane %v2621_v19, %v8730_v13  ;;  %v10011_v19 = vpop.f32.mrb[25].mxu0 }
 0x19d   :  { %13681 = vst [vmem:[#allocation80_spill] sm:$0xff] %v9979_v0  ;;  %13682 = vst [vmem:[#allocation81_spill] sm:$0xff] %v9989_v40  ;;  %v2643_v26 = vrot.slane %v2620_v16, %v8730_v13  ;;  %v2650_v55 = vrot.slane %v2622_v41, %v8730_v13  ;;  %v2665_v59 = vrot.slane %v2655_v17, %v8730_v13  ;;  %v10009_v16 = vpop.f32.mrb[24].mxu1 }
 0x19e   :  { %v2672_v6 = vrot.slane %v2656_v38, %v8730_v13  ;;  %v2679_v0 = vrot.slane %v2657_v9, %v8730_v13  ;;  %v2686_v39 = vrot.slane %v2658_v43, %v8730_v13  ;;  %v2651_v45 = vcombine.high %v2629_v30, %v2629_v30  ;;  %3596 = vst.msk [vmem:[#allocation9 + $0x201] ss:$4 sm:$0xf] %vm8752_vm0, %v2629_v30  ;;  %v10013_v43 = vpop.f32.mrb[25].mxu1 }
 0x19f   :  { %v2652_v40 = vcombine.high %v2636_v7, %v2636_v7  ;;  %v2653_v48 = vcombine.high %v2643_v26, %v2643_v26  ;;  %v2654_v56 = vcombine.high %v2650_v55, %v2650_v55  ;;  %3598 = vst.msk [vmem:[#allocation9 + $0x211] ss:$4 sm:$0xf] %vm8752_vm0, %v2643_v26  ;;  %3604 = vst.msk [vmem:[#allocation9 + $0x241] ss:$4 sm:$0xf] %vm8752_vm0, %v2636_v7 }
 0x1a0   :  { %3606 = vst.msk [vmem:[#allocation9 + $0x251] ss:$4 sm:$0xf] %vm8752_vm0, %v2650_v55  ;;  %v2687_v41 = vcombine.low %v2665_v59, %v2679_v0  ;;  %v2688_v17 = vcombine.high %v2665_v59, %v2679_v0  ;;  %v2689_v38 = vcombine.low %v2672_v6, %v2686_v39  ;;  %v2690_v9 = vcombine.high %v2672_v6, %v2686_v39  ;;  %v10035_v55 = vpop.f32.mrb[26].mxu0  ;;  %v13683_v59 = vld [vmem:[#allocation28_spill] sm:$0xff] }
 0x1a1   :  { %3600 = vst.msk [vmem:[#allocation9 + $0x221] ss:$4 sm:$0xf] %vm8752_vm0, %v2651_v45  ;;  %3602 = vst.msk [vmem:[#allocation9 + $0x231] ss:$4 sm:$0xf] %vm8752_vm0, %v2653_v48  ;;  %v8288_v30 = vpack.c.bf16 %v9825_v61, %v9775_v10  ;;  %v8258_v39 = vpack.c.bf16 %v9806_v46, %v9737_v25  ;;  %v8290_v0 = vpack.c.bf16 %v9809_v57, %v9740_v60 }
 0x1a2   :  { %3608 = vst.msk [vmem:[#allocation9 + $0x261] ss:$4 sm:$0xf] %vm8752_vm0, %v2652_v40  ;;  %3610 = vst.msk [vmem:[#allocation9 + $0x271] ss:$4 sm:$0xf] %vm8752_vm0, %v2654_v56  ;;  %v2016_v45 = vmul.f32 %v9403_v12, %v9793_v20  ;;  %v2697_v48 = vrot.slane %v2687_v41, %v8730_v13  ;;  %v2704_v7 = vrot.slane %v2689_v38, %v8730_v13 }
 0x1a3   :  { %v2711_v40 = vrot.slane %v2688_v17, %v8730_v13  ;;  %v2718_v26 = vrot.slane %v2690_v9, %v8730_v13  ;;  %8289 = vmatprep.subr.bf16.mxu1 %v8288_v30  ;;  %8259 = vmatpush1.bf16.msra.mxu0 %v8258_v39  ;;  %v2018_v56 = vmul.f32 %v9403_v12, %v9801_v58  ;;  %v10042_v61 = vpop.f32.mrb[26].mxu1  ;;  %v10044_v41 = vpop.f32.mrb[27].mxu0  ;;  %v13685_v30 = vld [vmem:[#allocation29_spill] sm:$0xff] }
 0x1a4   :  { %v2145_v6 = vadd.f32 %v13683_v59, %v2016_v45  ;;  %v2017_v20 = vmul.f32 %v9403_v12, %v9803_v53  ;;  %v2719_v38 = vcombine.high %v2697_v48, %v2697_v48  ;;  %v2720_v17 = vcombine.high %v2704_v7, %v2704_v7  ;;  %3612 = vst.msk [vmem:[#allocation9 + $0x281] ss:$4 sm:$0xf] %vm8752_vm0, %v2697_v48  ;;  %v10054_v58 = vpop.f32.mrb[27].mxu1 }
 0x1a5   :  { %v2721_v57 = vcombine.high %v2711_v40, %v2711_v40  ;;  %v2722_v9 = vcombine.high %v2718_v26, %v2718_v26  ;;  %3614 = vst.msk [vmem:[#allocation9 + $0x291] ss:$4 sm:$0xf] %vm8752_vm0, %v2711_v40  ;;  %3620 = vst.msk [vmem:[#allocation9 + $0x2c1] ss:$4 sm:$0xf] %vm8752_vm0, %v2704_v7  ;;  %8291 = vmatpush1.bf16.msra.mxu1 %v8290_v0  ;;  %v2147_v39 = vadd.f32 %v13685_v30, %v2018_v56 }
 0x1a6   :  { %3622 = vst.msk [vmem:[#allocation9 + $0x2d1] ss:$4 sm:$0xf] %vm8752_vm0, %v2718_v26  ;;  %v10057_v53 = vadd.f32 %v9411_v24, %v2145_v6  ;;  %v2146_v45 = vadd.f32 %v9488_v4, %v2017_v20  ;;  %v2019_v48 = vmul.f32 %v9403_v12, %v9813_v8  ;;  %3616 = vst.msk [vmem:[#allocation9 + $0x2a1] ss:$4 sm:$0xf] %vm8752_vm0, %v2719_v38 }
 0x1a7   :  { %3618 = vst.msk [vmem:[#allocation9 + $0x2b1] ss:$4 sm:$0xf] %vm8752_vm0, %v2721_v57  ;;  %3624 = vst.msk [vmem:[#allocation9 + $0x2e1] ss:$4 sm:$0xf] %vm8752_vm0, %v2720_v17  ;;  %v2020_v0 = vmul.f32 %v9403_v12, %v9831_v35  ;;  %v2022_v4 = vmul.f32 %v9403_v12, %v9833_v28  ;;  %v2021_v8 = vmul.f32 %v9403_v12, %v9835_v49 }
 0x1a8   :  { %13684 = vst [vmem:[#allocation28_spill] sm:$0xff] %v10057_v53  ;;  %3626 = vst.msk [vmem:[#allocation9 + $0x2f1] ss:$4 sm:$0xf] %vm8752_vm0, %v2722_v9  ;;  %v2023_v7 = vmul.f32 %v9403_v12, %v9845_v63  ;;  %v10079_v40 = vpop.f32.mrb[28].mxu0  ;;  %v10082_v57 = vadd.f32 %v9411_v24, %v2147_v39  ;;  %v10085_v26 = vadd.f32 %v9411_v24, %v2146_v45  ;;  %v10090_v28 = vpop.f32.mrb[28].mxu1 }
 0x1a9   :  { %v2148_v59 = vadd.f32 %v9491_v21, %v2019_v48  ;;  %v8260_v35 = vpack.c.bf16 %v9970_v3, %v9916_v5  ;;  %v10092_v6 = vpop.f32.mrb[29].mxu0  ;;  %v2149_v49 = vadd.f32 %v9495_v29, %v2020_v0  ;;  %v2151_v63 = vadd.f32 %v9499_v22, %v2022_v4  ;;  %v10098_v38 = vpop.f32.mrb[29].mxu1 }
 0x1aa   :  { %13686 = vst [vmem:[#allocation29_spill] sm:$0xff] %v10082_v57  ;;  %13687 = vst [vmem:[#allocation82_spill] sm:$0xff] %v10085_v26  ;;  %v2150_v56 = vadd.f32 %v9502_v50, %v2021_v8  ;;  %v2152_v20 = vadd.f32 %v9505_v54, %v2023_v7  ;;  %v2723_v21 = vcombine.low %v10057_v53, %v10085_v26  ;;  %v10121_v39 = vpop.f32.mrb[30].mxu0  ;;  %v10129_v8 = vpop.f32.mrb[30].mxu1 }
 0x1ab   :  { %v2724_v17 = vcombine.high %v10057_v53, %v10085_v26  ;;  %v10105_v9 = vadd.f32 %v9411_v24, %v2148_v59  ;;  %8261 = vmatprep.subr.bf16.mxu0 %v8260_v35  ;;  %v8292_v29 = vpack.c.bf16 %v9973_v31, %v9919_v52  ;;  %v10110_v22 = vadd.f32 %v9411_v24, %v2149_v49  ;;  %v10131_v7 = vpop.f32.mrb[31].mxu0 }
 0x1ac   :  { %v10113_v50 = vadd.f32 %v9411_v24, %v2151_v63  ;;  %v10116_v54 = vadd.f32 %v9411_v24, %v2150_v56  ;;  %v10119_v30 = vadd.f32 %v9411_v24, %v2152_v20  ;;  %v2733_v45 = vrot.slane %v2723_v21, %v8730_v13  ;;  %v10141_v56 = vpop.f32.mrb[31].mxu1 }
 0x1ad   :  { %13688 = vst [vmem:[#allocation83_spill] sm:$0xff] %v10105_v9  ;;  %13689 = vst [vmem:[#allocation84_spill] sm:$0xff] %v10110_v22  ;;  %v2740_v48 = vrot.slane %v2724_v17, %v8730_v13  ;;  %v2725_v0 = vcombine.low %v10082_v57, %v10105_v9  ;;  %v2726_v4 = vcombine.high %v10082_v57, %v10105_v9  ;;  %8293 = vmatprep.subr.bf16.mxu1 %v8292_v29 }
 0x1ae   :  { %13690 = vst [vmem:[#allocation85_spill] sm:$0xff] %v10113_v50  ;;  %13691 = vst [vmem:[#allocation86_spill] sm:$0xff] %v10116_v54  ;;  %v2791_v59 = vcombine.low %v10110_v22, %v10116_v54  ;;  %v2792_v35 = vcombine.high %v10110_v22, %v10116_v54  ;;  %v2793_v49 = vcombine.low %v10113_v50, %v10119_v30 }
 0x1af   :  { %13692 = vst [vmem:[#allocation87_spill] sm:$0xff] %v10119_v30  ;;  %v2794_v63 = vcombine.high %v10113_v50, %v10119_v30  ;;  %13693 = vst [vmem:[#allocation88_spill] sm:$0xff] %v10141_v56  ;;  %v2747_v20 = vrot.slane %v2725_v0, %v8730_v13  ;;  %v2754_v21 = vrot.slane %v2726_v4, %v8730_v13 }
 0x1b0   :  { %v8262_v17 = vpack.c.bf16 %v9964_v15, %v9893_v42  ;;  %v8294_v29 = vpack.c.bf16 %v9967_v36, %v9913_v27  ;;  %v2801_v31 = vrot.slane %v2791_v59, %v8730_v13  ;;  %v2808_v3 = vrot.slane %v2792_v35, %v8730_v13 }
 0x1b1   :  { %v2815_v52 = vrot.slane %v2793_v49, %v8730_v13  ;;  %v2822_v5 = vrot.slane %v2794_v63, %v8730_v13  ;;  %v2755_v46 = vcombine.low %v2733_v45, %v2747_v20  ;;  %v2756_v10 = vcombine.high %v2733_v45, %v2747_v20 }
 0x1b2   :  { %v2757_v60 = vcombine.low %v2740_v48, %v2754_v21  ;;  %v2758_v0 = vcombine.high %v2740_v48, %v2754_v21  ;;  %8263 = vmatpush1.bf16.msra.mxu0 %v8262_v17  ;;  %8295 = vmatpush1.bf16.msra.mxu1 %v8294_v29  ;;  %v2027_v21 = vmul.f32 %v9403_v12, %v9869_v23 }
 0x1b3   :  { %v2823_v4 = vcombine.low %v2801_v31, %v2815_v52  ;;  %v2824_v25 = vcombine.high %v2801_v31, %v2815_v52  ;;  %v2825_v56 = vcombine.low %v2808_v3, %v2822_v5  ;;  %v2826_v15 = vcombine.high %v2808_v3, %v2822_v5 }
 0x1b4   :  { %v2765_v36 = vrot.slane %v2755_v46, %v8730_v13  ;;  %v2772_v59 = vrot.slane %v2757_v60, %v8730_v13  ;;  %v2779_v35 = vrot.slane %v2756_v10, %v8730_v13  ;;  %v2786_v49 = vrot.slane %v2758_v0, %v8730_v13 }
 0x1b5   :  { %v2833_v63 = vrot.slane %v2823_v4, %v8730_v13  ;;  %v2840_v45 = vrot.slane %v2825_v56, %v8730_v13  ;;  %v2847_v48 = vrot.slane %v2824_v25, %v8730_v13  ;;  %v2854_v20 = vrot.slane %v2826_v15, %v8730_v13 }
 0x1b6   :  { %v2787_v52 = vcombine.high %v2765_v36, %v2765_v36  ;;  %v2788_v31 = vcombine.high %v2772_v59, %v2772_v59  ;;  %v2789_v5 = vcombine.high %v2779_v35, %v2779_v35  ;;  %v2790_v3 = vcombine.high %v2786_v49, %v2786_v49  ;;  %3628 = vst.msk [vmem:[#allocation9 + $0x301] ss:$4 sm:$0xf] %vm8752_vm0, %v2765_v36 }
 0x1b7   :  { %3630 = vst.msk [vmem:[#allocation9 + $0x311] ss:$4 sm:$0xf] %vm8752_vm0, %v2779_v35  ;;  %3636 = vst.msk [vmem:[#allocation9 + $0x341] ss:$4 sm:$0xf] %vm8752_vm0, %v2772_v59  ;;  %v2855_v60 = vcombine.high %v2833_v63, %v2833_v63  ;;  %v2856_v25 = vcombine.high %v2840_v45, %v2840_v45  ;;  %v2857_v10 = vcombine.high %v2847_v48, %v2847_v48 }
 0x1b8   :  { %3638 = vst.msk [vmem:[#allocation9 + $0x351] ss:$4 sm:$0xf] %vm8752_vm0, %v2786_v49  ;;  %v2858_v46 = vcombine.high %v2854_v20, %v2854_v20  ;;  %3644 = vst.msk [vmem:[#allocation9 + $0x381] ss:$4 sm:$0xf] %vm8752_vm0, %v2833_v63  ;;  %v2024_v15 = vmul.f32 %v9403_v12, %v9855_v2  ;;  %v2026_v36 = vmul.f32 %v9403_v12, %v9865_v37 }
 0x1b9   :  { %3646 = vst.msk [vmem:[#allocation9 + $0x391] ss:$4 sm:$0xf] %vm8752_vm0, %v2847_v48  ;;  %3652 = vst.msk [vmem:[#allocation9 + $0x3c1] ss:$4 sm:$0xf] %vm8752_vm0, %v2840_v45  ;;  %v2025_v56 = vmul.f32 %v9403_v12, %v9867_v18  ;;  %v2028_v2 = vmul.f32 %v9403_v12, %v9890_v14  ;;  %v2030_v37 = vmul.f32 %v9403_v12, %v9898_v33 }
 0x1ba   :  { %3654 = vst.msk [vmem:[#allocation9 + $0x3d1] ss:$4 sm:$0xf] %vm8752_vm0, %v2854_v20  ;;  %3632 = vst.msk [vmem:[#allocation9 + $0x321] ss:$4 sm:$0xf] %vm8752_vm0, %v2787_v52  ;;  %v2029_v18 = vmul.f32 %v9403_v12, %v9900_v1  ;;  %v2031_v23 = vmul.f32 %v9403_v12, %v9910_v32  ;;  %v2153_v17 = vadd.f32 %v9509_v11, %v2024_v15 }
 0x1bb   :  { %3634 = vst.msk [vmem:[#allocation9 + $0x331] ss:$4 sm:$0xf] %vm8752_vm0, %v2789_v5  ;;  %3640 = vst.msk [vmem:[#allocation9 + $0x361] ss:$4 sm:$0xf] %vm8752_vm0, %v2788_v31  ;;  %v2155_v29 = vadd.f32 %v9513_v44, %v2026_v36  ;;  %v2154_v0 = vadd.f32 %v9517_v51, %v2025_v56  ;;  %v2156_v4 = vadd.f32 %v9521_v34, %v2027_v21 }
 0x1bc   :  { %3642 = vst.msk [vmem:[#allocation9 + $0x371] ss:$4 sm:$0xf] %vm8752_vm0, %v2790_v3  ;;  %3648 = vst.msk [vmem:[#allocation9 + $0x3a1] ss:$4 sm:$0xf] %vm8752_vm0, %v2855_v60  ;;  %v10218_v1 = vadd.f32 %v9411_v24, %v2153_v17 }
 0x1bd   :  { %3650 = vst.msk [vmem:[#allocation9 + $0x3b1] ss:$4 sm:$0xf] %vm8752_vm0, %v2857_v10  ;;  %3656 = vst.msk [vmem:[#allocation9 + $0x3e1] ss:$4 sm:$0xf] %vm8752_vm0, %v2856_v25  ;;  %v10221_v32 = vadd.f32 %v9411_v24, %v2155_v29  ;;  %v10224_v11 = vadd.f32 %v9411_v24, %v2154_v0  ;;  %v10227_v44 = vadd.f32 %v9411_v24, %v2156_v4 }
 0x1be   :  { %3658 = vst.msk [vmem:[#allocation9 + $0x3f1] ss:$4 sm:$0xf] %vm8752_vm0, %v2858_v46  ;;  %v13694_v59 = vld [vmem:[#allocation30_spill] sm:$0xff]  ;;  %v13695_v14 = vld [vmem:[#allocation31_spill] sm:$0xff]  ;;  %v13696_v63 = vld [vmem:[#allocation32_spill] sm:$0xff] }
 0x1bf   :  { %v2157_v35 = vadd.f32 %v13694_v59, %v2028_v2  ;;  %v2159_v49 = vadd.f32 %v13695_v14, %v2030_v37  ;;  %v2158_v33 = vadd.f32 %v13696_v63, %v2029_v18  ;;  %v13697_v45 = vld [vmem:[#allocation33_spill] sm:$0xff]  ;;  %13698 = vst [vmem:[#allocation30_spill] sm:$0xff] %v10218_v1  ;;  %13699 = vst [vmem:[#allocation31_spill] sm:$0xff] %v10221_v32 }
 0x1c0   :  { %v2160_v48 = vadd.f32 %v13697_v45, %v2031_v23  ;;  %13700 = vst [vmem:[#allocation32_spill] sm:$0xff] %v10224_v11  ;;  %13701 = vst [vmem:[#allocation33_spill] sm:$0xff] %v10227_v44  ;;  %v2859_v31 = vcombine.low %v10218_v1, %v10224_v11  ;;  %v2860_v5 = vcombine.high %v10218_v1, %v10224_v11 }
 0x1c1   :  { %v10230_v51 = vadd.f32 %v9411_v24, %v2157_v35  ;;  %v10233_v34 = vadd.f32 %v9411_v24, %v2159_v49  ;;  %v10236_v20 = vadd.f32 %v9411_v24, %v2158_v33  ;;  %v2861_v3 = vcombine.low %v10221_v32, %v10227_v44 }
 0x1c2   :  { %v10239_v52 = vadd.f32 %v9411_v24, %v2160_v48  ;;  %v2862_v60 = vcombine.high %v10221_v32, %v10227_v44  ;;  %v2869_v36 = vrot.slane %v2859_v31, %v8730_v13  ;;  %v2876_v56 = vrot.slane %v2860_v5, %v8730_v13 }
 0x1c3   :  { %13702 = vst [vmem:[#allocation89_spill] sm:$0xff] %v10230_v51  ;;  %13703 = vst [vmem:[#allocation90_spill] sm:$0xff] %v10233_v34  ;;  %v2927_v25 = vcombine.low %v10230_v51, %v10236_v20  ;;  %v2928_v10 = vcombine.high %v10230_v51, %v10236_v20  ;;  %v2883_v21 = vrot.slane %v2861_v3, %v8730_v13 }
 0x1c4   :  { %13704 = vst [vmem:[#allocation91_spill] sm:$0xff] %v10236_v20  ;;  %13705 = vst [vmem:[#allocation92_spill] sm:$0xff] %v10239_v52  ;;  %v2929_v46 = vcombine.low %v10233_v34, %v10239_v52  ;;  %v2930_v15 = vcombine.high %v10233_v34, %v10239_v52  ;;  %v2890_v2 = vrot.slane %v2862_v60, %v8730_v13 }
 0x1c5   :  { %v2937_v37 = vrot.slane %v2927_v25, %v8730_v13  ;;  %v2944_v18 = vrot.slane %v2928_v10, %v8730_v13  ;;  %v2891_v29 = vcombine.low %v2869_v36, %v2883_v21  ;;  %v2892_v0 = vcombine.high %v2869_v36, %v2883_v21 }
 0x1c6   :  { %v2951_v23 = vrot.slane %v2929_v46, %v8730_v13  ;;  %v2958_v17 = vrot.slane %v2930_v15, %v8730_v13  ;;  %v2893_v4 = vcombine.low %v2876_v56, %v2890_v2  ;;  %v2894_v59 = vcombine.high %v2876_v56, %v2890_v2 }
 0x1c7   :  { %v2901_v33 = vrot.slane %v2891_v29, %v8730_v13  ;;  %v2915_v48 = vrot.slane %v2892_v0, %v8730_v13  ;;  %v8298_v29 = vpack.c.bf16 %v10113_v50, %v10082_v57  ;;  %v13706_v0 = vld [vmem:[#allocation72_spill] sm:$0xff] }
 0x1c8   :  { %v2959_v35 = vcombine.low %v2937_v37, %v2951_v23  ;;  %v2960_v14 = vcombine.high %v2937_v37, %v2951_v23  ;;  %v2961_v49 = vcombine.low %v2944_v18, %v2958_v17  ;;  %v2962_v63 = vcombine.high %v2944_v18, %v2958_v17 }
 0x1c9   :  { %v2908_v45 = vrot.slane %v2893_v4, %v8730_v13  ;;  %v2922_v31 = vrot.slane %v2894_v59, %v8730_v13  ;;  %v2923_v10 = vcombine.high %v2901_v33, %v2901_v33  ;;  %v2925_v15 = vcombine.high %v2915_v48, %v2915_v48  ;;  %3660 = vst.msk [vmem:[#allocation9 + $0x401] ss:$4 sm:$0xf] %vm8752_vm0, %v2901_v33  ;;  %v13707_v59 = vld [vmem:[#allocation73_spill] sm:$0xff] }
 0x1ca   :  { %v2969_v5 = vrot.slane %v2959_v35, %v8730_v13  ;;  %v2976_v3 = vrot.slane %v2961_v49, %v8730_v13  ;;  %v2983_v60 = vrot.slane %v2960_v14, %v8730_v13  ;;  %v2990_v25 = vrot.slane %v2962_v63, %v8730_v13  ;;  %3662 = vst.msk [vmem:[#allocation9 + $0x411] ss:$4 sm:$0xf] %vm8752_vm0, %v2915_v48  ;;  %v13708_v14 = vld [vmem:[#allocation74_spill] sm:$0xff] }
 0x1cb   :  { %v2924_v46 = vcombine.high %v2908_v45, %v2908_v45  ;;  %v2926_v36 = vcombine.high %v2922_v31, %v2922_v31  ;;  %3668 = vst.msk [vmem:[#allocation9 + $0x441] ss:$4 sm:$0xf] %vm8752_vm0, %v2908_v45  ;;  %3670 = vst.msk [vmem:[#allocation9 + $0x451] ss:$4 sm:$0xf] %vm8752_vm0, %v2922_v31  ;;  %v8264_v18 = vpack.c.bf16 %v10116_v54, %v10085_v26 }
 0x1cc   :  { %v2991_v56 = vcombine.high %v2969_v5, %v2969_v5  ;;  %v2992_v21 = vcombine.high %v2976_v3, %v2976_v3  ;;  %v2993_v2 = vcombine.high %v2983_v60, %v2983_v60  ;;  %v2994_v37 = vcombine.high %v2990_v25, %v2990_v25  ;;  %3676 = vst.msk [vmem:[#allocation9 + $0x481] ss:$4 sm:$0xf] %vm8752_vm0, %v2969_v5  ;;  %v13709_v63 = vld [vmem:[#allocation26_spill] sm:$0xff]  ;;  %v13711_v31 = vld [vmem:[#allocation79_spill] sm:$0xff] }
 0x1cd   :  { %3678 = vst.msk [vmem:[#allocation9 + $0x491] ss:$4 sm:$0xf] %vm8752_vm0, %v2983_v60  ;;  %3684 = vst.msk [vmem:[#allocation9 + $0x4c1] ss:$4 sm:$0xf] %vm8752_vm0, %v2976_v3  ;;  %v8296_v23 = vpack.c.bf16 %v10119_v30, %v10105_v9  ;;  %v8266_v17 = vpack.c.bf16 %v10110_v22, %v10057_v53  ;;  %v2032_v4 = vmul.f32 %v9403_v12, %v13706_v0  ;;  %8265 = vmatprep.subr.bf16.mxu0 %v8264_v18 }
 0x1ce   :  { %3686 = vst.msk [vmem:[#allocation9 + $0x4d1] ss:$4 sm:$0xf] %vm8752_vm0, %v2990_v25  ;;  %3664 = vst.msk [vmem:[#allocation9 + $0x421] ss:$4 sm:$0xf] %vm8752_vm0, %v2923_v10  ;;  %v2034_v35 = vmul.f32 %v9403_v12, %v13707_v59  ;;  %v2033_v49 = vmul.f32 %v9403_v12, %v13708_v14  ;;  %v2035_v33 = vmul.f32 %v9403_v12, %v13709_v63 }
 0x1cf   :  { %3666 = vst.msk [vmem:[#allocation9 + $0x431] ss:$4 sm:$0xf] %vm8752_vm0, %v2925_v15  ;;  %3672 = vst.msk [vmem:[#allocation9 + $0x461] ss:$4 sm:$0xf] %vm8752_vm0, %v2924_v46  ;;  %8297 = vmatprep.subr.bf16.mxu1 %v8296_v23  ;;  %v2038_v5 = vmul.f32 %v9403_v12, %v13711_v31  ;;  %8267 = vmatpush1.bf16.msra.mxu0 %v8266_v17 }
 0x1d0   :  { %3674 = vst.msk [vmem:[#allocation9 + $0x471] ss:$4 sm:$0xf] %vm8752_vm0, %v2926_v36  ;;  %3680 = vst.msk [vmem:[#allocation9 + $0x4a1] ss:$4 sm:$0xf] %vm8752_vm0, %v2991_v56  ;;  %8299 = vmatpush1.bf16.msra.mxu1 %v8298_v29 }
 0x1d1   :  { %3682 = vst.msk [vmem:[#allocation9 + $0x4b1] ss:$4 sm:$0xf] %vm8752_vm0, %v2993_v2  ;;  %3688 = vst.msk [vmem:[#allocation9 + $0x4e1] ss:$4 sm:$0xf] %vm8752_vm0, %v2992_v21 }
 0x1d2   :  { %3690 = vst.msk [vmem:[#allocation9 + $0x4f1] ss:$4 sm:$0xf] %vm8752_vm0, %v2994_v37  ;;  %v13710_v45 = vld [vmem:[#allocation78_spill] sm:$0xff]  ;;  %v13712_v3 = vld [vmem:[#allocation80_spill] sm:$0xff]  ;;  %v13714_v46 = vld [vmem:[#allocation35_spill] sm:$0xff] }
 0x1d3   :  { %v2036_v48 = vmul.f32 %v9403_v12, %v13710_v45  ;;  %v2037_v60 = vmul.f32 %v9403_v12, %v13712_v3  ;;  %v13713_v25 = vld [vmem:[#allocation34_spill] sm:$0xff]  ;;  %v2163_v15 = vadd.f32 %v13714_v46, %v2034_v35  ;;  %v13715_v36 = vld [vmem:[#allocation36_spill] sm:$0xff]  ;;  %v13716_v21 = vld [vmem:[#allocation37_spill] sm:$0xff] }
 0x1d4   :  { %v2161_v10 = vadd.f32 %v13713_v25, %v2032_v4  ;;  %v2162_v56 = vadd.f32 %v13715_v36, %v2033_v49  ;;  %v2164_v2 = vadd.f32 %v13716_v21, %v2035_v33  ;;  %v13717_v37 = vld [vmem:[#allocation38_spill] sm:$0xff]  ;;  %v13718_v23 = vld [vmem:[#allocation39_spill] sm:$0xff]  ;;  %v13719_v59 = vld [vmem:[#allocation40_spill] sm:$0xff]  ;;  %v8268_v25 = vpack.c.bf16 %v10236_v20, %v10224_v11 }
 0x1d5   :  { %v2165_v18 = vadd.f32 %v13717_v37, %v2036_v48  ;;  %v2167_v0 = vadd.f32 %v13718_v23, %v2038_v5  ;;  %v2166_v14 = vadd.f32 %v13719_v59, %v2037_v60  ;;  %v10338_v17 = vadd.f32 %v9411_v24, %v2163_v15  ;;  %v13723_v4 = vld [vmem:[#allocation81_spill] sm:$0xff] }
 0x1d6   :  { %v10335_v63 = vadd.f32 %v9411_v24, %v2161_v10  ;;  %v10341_v29 = vadd.f32 %v9411_v24, %v2162_v56  ;;  %v2039_v35 = vmul.f32 %v9403_v12, %v13723_v4  ;;  %v10346_v49 = vadd.f32 %v9411_v24, %v2164_v2  ;;  %v13728_v3 = vld [vmem:[#allocation41_spill] sm:$0xff]  ;;  %8269 = vmatprep.subr.bf16.mxu0 %v8268_v25 }
 0x1d7   :  { %13721 = vst [vmem:[#allocation73_spill] sm:$0xff] %v10338_v17  ;;  %v10349_v33 = vadd.f32 %v9411_v24, %v2165_v18  ;;  %v10352_v45 = vadd.f32 %v9411_v24, %v2167_v0  ;;  %v10355_v48 = vadd.f32 %v9411_v24, %v2166_v14  ;;  %v8300_v37 = vpack.c.bf16 %v10239_v52, %v10227_v44 }
 0x1d8   :  { %13720 = vst [vmem:[#allocation72_spill] sm:$0xff] %v10335_v63  ;;  %13722 = vst [vmem:[#allocation74_spill] sm:$0xff] %v10341_v29  ;;  %v2995_v31 = vcombine.low %v10335_v63, %v10341_v29  ;;  %v2996_v5 = vcombine.high %v10335_v63, %v10341_v29  ;;  %v2168_v60 = vadd.f32 %v13728_v3, %v2039_v35 }
 0x1d9   :  { %13724 = vst [vmem:[#allocation26_spill] sm:$0xff] %v10346_v49  ;;  %13725 = vst [vmem:[#allocation78_spill] sm:$0xff] %v10349_v33  ;;  %v2997_v10 = vcombine.low %v10338_v17, %v10346_v49  ;;  %v2998_v46 = vcombine.high %v10338_v17, %v10346_v49  ;;  %v3063_v15 = vcombine.low %v10349_v33, %v10355_v48  ;;  %8301 = vmatprep.subr.bf16.mxu1 %v8300_v37 }
 0x1da   :  { %13726 = vst [vmem:[#allocation79_spill] sm:$0xff] %v10352_v45  ;;  %13727 = vst [vmem:[#allocation80_spill] sm:$0xff] %v10355_v48  ;;  %v3064_v36 = vcombine.high %v10349_v33, %v10355_v48  ;;  %v3005_v56 = vrot.slane %v2995_v31, %v8730_v13  ;;  %v3012_v21 = vrot.slane %v2996_v5, %v8730_v13 }
 0x1db   :  { %v10375_v2 = vadd.f32 %v9411_v24, %v2168_v60  ;;  %v3019_v18 = vrot.slane %v2997_v10, %v8730_v13  ;;  %v3026_v23 = vrot.slane %v2998_v46, %v8730_v13  ;;  %v3073_v0 = vrot.slane %v3063_v15, %v8730_v13 }
 0x1dc   :  { %v3080_v59 = vrot.slane %v3064_v36, %v8730_v13  ;;  %v8270_v35 = vpack.c.bf16 %v10230_v51, %v10218_v1  ;;  %v8302_v31 = vpack.c.bf16 %v10233_v34, %v10221_v32  ;;  %v2040_v15 = vmul.f32 %v9403_v12, %v9999_v62 }
 0x1dd   :  { %13729 = vst [vmem:[#allocation34_spill] sm:$0xff] %v10375_v2  ;;  %v3065_v14 = vcombine.low %v10352_v45, %v10375_v2  ;;  %v3066_v4 = vcombine.high %v10352_v45, %v10375_v2  ;;  %v3027_v5 = vcombine.low %v3005_v56, %v3019_v18  ;;  %v3028_v3 = vcombine.high %v3005_v56, %v3019_v18 }
 0x1de   :  { %v3029_v60 = vcombine.low %v3012_v21, %v3026_v23  ;;  %v3030_v25 = vcombine.high %v3012_v21, %v3026_v23  ;;  %8271 = vmatpush1.bf16.msra.mxu0 %v8270_v35  ;;  %8303 = vmatpush1.bf16.msra.mxu1 %v8302_v31 }
 0x1df   :  { %v3087_v10 = vrot.slane %v3065_v14, %v8730_v13  ;;  %v3094_v46 = vrot.slane %v3066_v4, %v8730_v13  ;;  %v3037_v36 = vrot.slane %v3027_v5, %v8730_v13  ;;  %v3051_v52 = vrot.slane %v3028_v3, %v8730_v13 }
 0x1e0   :  { %v3044_v37 = vrot.slane %v3029_v60, %v8730_v13  ;;  %v3058_v20 = vrot.slane %v3030_v25, %v8730_v13  ;;  %v2042_v5 = vmul.f32 %v9403_v12, %v10009_v16  ;;  %v2041_v3 = vmul.f32 %v9403_v12, %v10011_v19  ;;  %v13731_v19 = vld [vmem:[#allocation43_spill] sm:$0xff] }
 0x1e1   :  { %v3095_v56 = vcombine.low %v3073_v0, %v3087_v10  ;;  %v3096_v18 = vcombine.high %v3073_v0, %v3087_v10  ;;  %v3097_v21 = vcombine.low %v3080_v59, %v3094_v46  ;;  %v3098_v23 = vcombine.high %v3080_v59, %v3094_v46  ;;  %3692 = vst.msk [vmem:[#allocation9 + $0x501] ss:$4 sm:$0xf] %vm8752_vm0, %v3037_v36 }
 0x1e2   :  { %v3059_v14 = vcombine.high %v3037_v36, %v3037_v36  ;;  %v3060_v34 = vcombine.high %v3044_v37, %v3044_v37  ;;  %v3061_v4 = vcombine.high %v3051_v52, %v3051_v52  ;;  %v3062_v35 = vcombine.high %v3058_v20, %v3058_v20  ;;  %3694 = vst.msk [vmem:[#allocation9 + $0x511] ss:$4 sm:$0xf] %vm8752_vm0, %v3051_v52 }
 0x1e3   :  { %3700 = vst.msk [vmem:[#allocation9 + $0x541] ss:$4 sm:$0xf] %vm8752_vm0, %v3044_v37  ;;  %3702 = vst.msk [vmem:[#allocation9 + $0x551] ss:$4 sm:$0xf] %vm8752_vm0, %v3058_v20  ;;  %v3105_v62 = vrot.slane %v3095_v56, %v8730_v13  ;;  %v3112_v0 = vrot.slane %v3097_v21, %v8730_v13  ;;  %v3119_v59 = vrot.slane %v3096_v18, %v8730_v13 }
 0x1e4   :  { %v3126_v31 = vrot.slane %v3098_v23, %v8730_v13  ;;  %3696 = vst.msk [vmem:[#allocation9 + $0x521] ss:$4 sm:$0xf] %vm8752_vm0, %v3059_v14  ;;  %3698 = vst.msk [vmem:[#allocation9 + $0x531] ss:$4 sm:$0xf] %vm8752_vm0, %v3061_v4  ;;  %v2043_v60 = vmul.f32 %v9403_v12, %v10013_v43  ;;  %v2171_v43 = vadd.f32 %v13731_v19, %v2042_v5 }
 0x1e5   :  { %3704 = vst.msk [vmem:[#allocation9 + $0x561] ss:$4 sm:$0xf] %vm8752_vm0, %v3060_v34  ;;  %3706 = vst.msk [vmem:[#allocation9 + $0x571] ss:$4 sm:$0xf] %vm8752_vm0, %v3062_v35  ;;  %v3127_v25 = vcombine.high %v3105_v62, %v3105_v62  ;;  %v3128_v10 = vcombine.high %v3112_v0, %v3112_v0  ;;  %v3129_v46 = vcombine.high %v3119_v59, %v3119_v59 }
 0x1e6   :  { %v13730_v20 = vld [vmem:[#allocation42_spill] sm:$0xff]  ;;  %v3130_v36 = vcombine.high %v3126_v31, %v3126_v31  ;;  %3708 = vst.msk [vmem:[#allocation9 + $0x581] ss:$4 sm:$0xf] %vm8752_vm0, %v3105_v62  ;;  %v13732_v34 = vld [vmem:[#allocation44_spill] sm:$0xff]  ;;  %v13733_v37 = vld [vmem:[#allocation45_spill] sm:$0xff]  ;;  %v2044_v18 = vmul.f32 %v9403_v12, %v10035_v55  ;;  %v2046_v21 = vmul.f32 %v9403_v12, %v10042_v61  ;;  %v2045_v23 = vmul.f32 %v9403_v12, %v10044_v41 }
 0x1e7   :  { %v2169_v52 = vadd.f32 %v13730_v20, %v2040_v15  ;;  %3710 = vst.msk [vmem:[#allocation9 + $0x591] ss:$4 sm:$0xf] %vm8752_vm0, %v3119_v59  ;;  %3716 = vst.msk [vmem:[#allocation9 + $0x5c1] ss:$4 sm:$0xf] %vm8752_vm0, %v3112_v0  ;;  %v2170_v15 = vadd.f32 %v13732_v34, %v2041_v3  ;;  %v2172_v56 = vadd.f32 %v13733_v37, %v2043_v60 }
 0x1e8   :  { %3718 = vst.msk [vmem:[#allocation9 + $0x5d1] ss:$4 sm:$0xf] %vm8752_vm0, %v3126_v31  ;;  %3712 = vst.msk [vmem:[#allocation9 + $0x5a1] ss:$4 sm:$0xf] %vm8752_vm0, %v3127_v25  ;;  %v2047_v14 = vmul.f32 %v9403_v12, %v10054_v58  ;;  %v10457_v4 = vadd.f32 %v9411_v24, %v2171_v43  ;;  %v8272_v55 = vpack.c.bf16 %v10355_v48, %v10341_v29 }
 0x1e9   :  { %v10435_v16 = vadd.f32 %v9411_v24, %v2169_v52  ;;  %3714 = vst.msk [vmem:[#allocation9 + $0x5b1] ss:$4 sm:$0xf] %vm8752_vm0, %v3129_v46  ;;  %3720 = vst.msk [vmem:[#allocation9 + $0x5e1] ss:$4 sm:$0xf] %vm8752_vm0, %v3128_v10  ;;  %v10460_v35 = vadd.f32 %v9411_v24, %v2170_v15  ;;  %v10463_v62 = vadd.f32 %v9411_v24, %v2172_v56 }
 0x1ea   :  { %3722 = vst.msk [vmem:[#allocation9 + $0x5f1] ss:$4 sm:$0xf] %vm8752_vm0, %v3130_v36  ;;  %v13734_v0 = vld [vmem:[#allocation46_spill] sm:$0xff]  ;;  %v13735_v59 = vld [vmem:[#allocation47_spill] sm:$0xff]  ;;  %v13736_v41 = vld [vmem:[#allocation48_spill] sm:$0xff]  ;;  %8273 = vmatprep.subr.bf16.mxu0 %v8272_v55 }
 0x1eb   :  { %v2173_v61 = vadd.f32 %v13734_v0, %v2044_v18  ;;  %v2175_v31 = vadd.f32 %v13735_v59, %v2046_v21  ;;  %v2174_v20 = vadd.f32 %v13736_v41, %v2045_v23  ;;  %v13737_v52 = vld [vmem:[#allocation49_spill] sm:$0xff]  ;;  %v3131_v5 = vcombine.low %v10435_v16, %v10460_v35 }
 0x1ec   :  { %v2176_v58 = vadd.f32 %v13737_v52, %v2047_v14  ;;  %v3132_v3 = vcombine.high %v10435_v16, %v10460_v35  ;;  %v3133_v60 = vcombine.low %v10457_v4, %v10463_v62  ;;  %v3134_v25 = vcombine.high %v10457_v4, %v10463_v62 }
 0x1ed   :  { %v10480_v10 = vadd.f32 %v9411_v24, %v2173_v61  ;;  %v10483_v46 = vadd.f32 %v9411_v24, %v2175_v31  ;;  %v10486_v36 = vadd.f32 %v9411_v24, %v2174_v20  ;;  %v3141_v43 = vrot.slane %v3131_v5, %v8730_v13 }
 0x1ee   :  { %v10489_v19 = vadd.f32 %v9411_v24, %v2176_v58  ;;  %v3148_v34 = vrot.slane %v3132_v3, %v8730_v13  ;;  %v3155_v15 = vrot.slane %v3133_v60, %v8730_v13  ;;  %v3162_v37 = vrot.slane %v3134_v25, %v8730_v13 }
 0x1ef   :  { %v3199_v56 = vcombine.low %v10480_v10, %v10486_v36  ;;  %v3200_v18 = vcombine.high %v10480_v10, %v10486_v36 }
 0x1f0   :  { %v3201_v21 = vcombine.low %v10483_v46, %v10489_v19  ;;  %v3202_v23 = vcombine.high %v10483_v46, %v10489_v19  ;;  %v3163_v14 = vcombine.low %v3141_v43, %v3155_v15  ;;  %v3164_v55 = vcombine.high %v3141_v43, %v3155_v15 }
 0x1f1   :  { %v3165_v0 = vcombine.low %v3148_v34, %v3162_v37  ;;  %v3166_v61 = vcombine.high %v3148_v34, %v3162_v37  ;;  %v3209_v59 = vrot.slane %v3199_v56, %v8730_v13  ;;  %v3216_v31 = vrot.slane %v3200_v18, %v8730_v13 }
 0x1f2   :  { %v3223_v41 = vrot.slane %v3201_v21, %v8730_v13  ;;  %v3230_v20 = vrot.slane %v3202_v23, %v8730_v13  ;;  %v3173_v52 = vrot.slane %v3163_v14, %v8730_v13  ;;  %v3187_v5 = vrot.slane %v3164_v55, %v8730_v13 }
 0x1f3   :  { %v3180_v58 = vrot.slane %v3165_v0, %v8730_v13  ;;  %v3194_v3 = vrot.slane %v3166_v61, %v8730_v13  ;;  %v8304_v0 = vpack.c.bf16 %v10375_v2, %v10346_v49  ;;  %v8274_v61 = vpack.c.bf16 %v10349_v33, %v10335_v63 }
 0x1f4   :  { %v3231_v60 = vcombine.low %v3209_v59, %v3223_v41  ;;  %v3232_v25 = vcombine.high %v3209_v59, %v3223_v41  ;;  %v3233_v43 = vcombine.low %v3216_v31, %v3230_v20  ;;  %v3234_v34 = vcombine.high %v3216_v31, %v3230_v20  ;;  %3724 = vst.msk [vmem:[#allocation9 + $0x601] ss:$4 sm:$0xf] %vm8752_vm0, %v3173_v52 }
 0x1f5   :  { %v3195_v15 = vcombine.high %v3173_v52, %v3173_v52  ;;  %v3196_v37 = vcombine.high %v3180_v58, %v3180_v58  ;;  %v3197_v56 = vcombine.high %v3187_v5, %v3187_v5  ;;  %v3198_v18 = vcombine.high %v3194_v3, %v3194_v3  ;;  %3726 = vst.msk [vmem:[#allocation9 + $0x611] ss:$4 sm:$0xf] %vm8752_vm0, %v3187_v5  ;;  %v13738_v5 = vld [vmem:[#allocation50_spill] sm:$0xff] }
 0x1f6   :  { %3732 = vst.msk [vmem:[#allocation9 + $0x641] ss:$4 sm:$0xf] %vm8752_vm0, %v3180_v58  ;;  %3734 = vst.msk [vmem:[#allocation9 + $0x651] ss:$4 sm:$0xf] %vm8752_vm0, %v3194_v3  ;;  %v3241_v21 = vrot.slane %v3231_v60, %v8730_v13  ;;  %v3248_v23 = vrot.slane %v3233_v43, %v8730_v13  ;;  %v3255_v14 = vrot.slane %v3232_v25, %v8730_v13  ;;  %8305 = vmatprep.subr.bf16.mxu1 %v8304_v0 }
 0x1f7   :  { %v3262_v55 = vrot.slane %v3234_v34, %v8730_v13  ;;  %3728 = vst.msk [vmem:[#allocation9 + $0x621] ss:$4 sm:$0xf] %vm8752_vm0, %v3195_v15  ;;  %3730 = vst.msk [vmem:[#allocation9 + $0x631] ss:$4 sm:$0xf] %vm8752_vm0, %v3197_v56  ;;  %v8306_v59 = vpack.c.bf16 %v10352_v45, %v10338_v17  ;;  %v2048_v31 = vmul.f32 %v9403_v12, %v10079_v40  ;;  %8275 = vmatpush1.bf16.msra.mxu0 %v8274_v61 }
 0x1f8   :  { %3736 = vst.msk [vmem:[#allocation9 + $0x661] ss:$4 sm:$0xf] %vm8752_vm0, %v3196_v37  ;;  %3738 = vst.msk [vmem:[#allocation9 + $0x671] ss:$4 sm:$0xf] %vm8752_vm0, %v3198_v18  ;;  %v3263_v41 = vcombine.high %v3241_v21, %v3241_v21  ;;  %v3264_v20 = vcombine.high %v3248_v23, %v3248_v23  ;;  %v3265_v52 = vcombine.high %v3255_v14, %v3255_v14 }
 0x1f9   :  { %v3266_v58 = vcombine.high %v3262_v55, %v3262_v55  ;;  %3740 = vst.msk [vmem:[#allocation9 + $0x681] ss:$4 sm:$0xf] %vm8752_vm0, %v3241_v21  ;;  %3742 = vst.msk [vmem:[#allocation9 + $0x691] ss:$4 sm:$0xf] %vm8752_vm0, %v3255_v14  ;;  %v2177_v40 = vadd.f32 %v13738_v5, %v2048_v31  ;;  %v2050_v3 = vmul.f32 %v9403_v12, %v10090_v28  ;;  %8307 = vmatpush1.bf16.msra.mxu1 %v8306_v59 }
 0x1fa   :  { %3748 = vst.msk [vmem:[#allocation9 + $0x6c1] ss:$4 sm:$0xf] %vm8752_vm0, %v3248_v23  ;;  %3750 = vst.msk [vmem:[#allocation9 + $0x6d1] ss:$4 sm:$0xf] %vm8752_vm0, %v3262_v55  ;;  %v2049_v60 = vmul.f32 %v9403_v12, %v10092_v6  ;;  %v2051_v25 = vmul.f32 %v9403_v12, %v10098_v38  ;;  %v2052_v28 = vmul.f32 %v9403_v12, %v10121_v39 }
 0x1fb   :  { %3744 = vst.msk [vmem:[#allocation9 + $0x6a1] ss:$4 sm:$0xf] %vm8752_vm0, %v3263_v41  ;;  %3746 = vst.msk [vmem:[#allocation9 + $0x6b1] ss:$4 sm:$0xf] %vm8752_vm0, %v3265_v52  ;;  %v2054_v6 = vmul.f32 %v9403_v12, %v10129_v8  ;;  %v2053_v43 = vmul.f32 %v9403_v12, %v10131_v7  ;;  %v10569_v34 = vadd.f32 %v9411_v24, %v2177_v40 }
 0x1fc   :  { %3752 = vst.msk [vmem:[#allocation9 + $0x6e1] ss:$4 sm:$0xf] %vm8752_vm0, %v3264_v20  ;;  %3754 = vst.msk [vmem:[#allocation9 + $0x6f1] ss:$4 sm:$0xf] %vm8752_vm0, %v3266_v58  ;;  %v8276_v52 = vpack.c.bf16 %v10486_v36, %v10460_v35 }
 0x1fd   :  { %v13739_v15 = vld [vmem:[#allocation51_spill] sm:$0xff]  ;;  %v13740_v56 = vld [vmem:[#allocation52_spill] sm:$0xff]  ;;  %v13742_v38 = vld [vmem:[#allocation53_spill] sm:$0xff] }
 0x1fe   :  { %v2179_v37 = vadd.f32 %v13739_v15, %v2050_v3  ;;  %v2178_v18 = vadd.f32 %v13740_v56, %v2049_v60  ;;  %v13741_v21 = vld [vmem:[#allocation88_spill] sm:$0xff]  ;;  %v2180_v14 = vadd.f32 %v13742_v38, %v2051_v25  ;;  %v13743_v55 = vld [vmem:[#allocation54_spill] sm:$0xff]  ;;  %v13744_v0 = vld [vmem:[#allocation55_spill] sm:$0xff]  ;;  %8277 = vmatprep.subr.bf16.mxu0 %v8276_v52 }
 0x1ff   :  { %v2055_v23 = vmul.f32 %v9403_v12, %v13741_v21  ;;  %v2181_v39 = vadd.f32 %v13743_v55, %v2052_v28  ;;  %v2183_v61 = vadd.f32 %v13744_v0, %v2054_v6  ;;  %v13745_v8 = vld [vmem:[#allocation57_spill] sm:$0xff]  ;;  %v8308_v28 = vpack.c.bf16 %v10489_v19, %v10463_v62 }
 0x200   :  { %v2182_v59 = vadd.f32 %v13745_v8, %v2053_v43  ;;  %v10580_v7 = vadd.f32 %v9411_v24, %v2179_v37  ;;  %v10583_v31 = vadd.f32 %v9411_v24, %v2178_v18  ;;  %v13746_v41 = vld [vmem:[#allocation61_spill] sm:$0xff]  ;;  %v10589_v12 = vadd.f32 %v9411_v24, %v2180_v14 }
 0x201   :  { %v2184_v20 = vadd.f32 %v13746_v41, %v2055_v23  ;;  %v10592_v58 = vadd.f32 %v9411_v24, %v2181_v39  ;;  %v10595_v5 = vadd.f32 %v9411_v24, %v2183_v61  ;;  %8309 = vmatprep.subr.bf16.mxu1 %v8308_v28  ;;  %v8278_v61 = vpack.c.bf16 %v10480_v10, %v10435_v16 }
 0x202   :  { %v10598_v40 = vadd.f32 %v9411_v24, %v2182_v59  ;;  %v3267_v3 = vcombine.low %v10569_v34, %v10583_v31  ;;  %v3268_v60 = vcombine.high %v10569_v34, %v10583_v31  ;;  %v3269_v6 = vcombine.low %v10580_v7, %v10589_v12 }
 0x203   :  { %v10605_v25 = vadd.f32 %v9411_v24, %v2184_v20  ;;  %v3270_v43 = vcombine.high %v10580_v7, %v10589_v12  ;;  %v8310_v8 = vpack.c.bf16 %v10483_v46, %v10457_v4  ;;  %8279 = vmatpush1.bf16.msra.mxu0 %v8278_v61 }
 0x204   :  { %v3335_v15 = vcombine.low %v10592_v58, %v10598_v40  ;;  %v3336_v37 = vcombine.high %v10592_v58, %v10598_v40  ;;  %v3277_v56 = vrot.slane %v3267_v3, %v8730_v13  ;;  %v3284_v24 = vrot.slane %v3268_v60, %v8730_v13 }
 0x205   :  { %v3337_v18 = vcombine.low %v10595_v5, %v10605_v25  ;;  %v3338_v21 = vcombine.high %v10595_v5, %v10605_v25  ;;  %v3291_v23 = vrot.slane %v3269_v6, %v8730_v13  ;;  %v3298_v38 = vrot.slane %v3270_v43, %v8730_v13  ;;  %8311 = vmatpush1.bf16.msra.mxu1 %v8310_v8 }
 0x206   :  { %v3345_v14 = vrot.slane %v3335_v15, %v8730_v13  ;;  %v3352_v55 = vrot.slane %v3336_v37, %v8730_v13 }
 0x207   :  { %v3359_v39 = vrot.slane %v3337_v18, %v8730_v13  ;;  %v3366_v0 = vrot.slane %v3338_v21, %v8730_v13  ;;  %v3299_v59 = vcombine.low %v3277_v56, %v3291_v23  ;;  %v3300_v41 = vcombine.high %v3277_v56, %v3291_v23 }
 0x208   :  { %v3301_v20 = vcombine.low %v3284_v24, %v3298_v38  ;;  %v3302_v52 = vcombine.high %v3284_v24, %v3298_v38 }
 0x209   :  { %v3367_v3 = vcombine.low %v3345_v14, %v3359_v39  ;;  %v3368_v60 = vcombine.high %v3345_v14, %v3359_v39  ;;  %v3369_v28 = vcombine.low %v3352_v55, %v3366_v0  ;;  %v3370_v6 = vcombine.high %v3352_v55, %v3366_v0 }
 0x20a   :  { %v3309_v43 = vrot.slane %v3299_v59, %v8730_v13  ;;  %v3316_v15 = vrot.slane %v3301_v20, %v8730_v13  ;;  %v3323_v37 = vrot.slane %v3300_v41, %v8730_v13  ;;  %v3330_v18 = vrot.slane %v3302_v52, %v8730_v13 }
 0x20b   :  { %v3377_v21 = vrot.slane %v3367_v3, %v8730_v13  ;;  %v3384_v56 = vrot.slane %v3369_v28, %v8730_v13  ;;  %v3391_v24 = vrot.slane %v3368_v60, %v8730_v13  ;;  %v3398_v23 = vrot.slane %v3370_v6, %v8730_v13  ;;  %v8482_v60 = vld [vmem:[#allocation2] sm:$0xff]  ;;  %v8483_v6 = vld [vmem:[#allocation2 + $0x8] sm:$0xff] }
 0x20c   :  { %v3331_v38 = vcombine.high %v3309_v43, %v3309_v43  ;;  %v3332_v14 = vcombine.high %v3316_v15, %v3316_v15  ;;  %v3333_v55 = vcombine.high %v3323_v37, %v3323_v37  ;;  %v3334_v39 = vcombine.high %v3330_v18, %v3330_v18  ;;  %3756 = vst.msk [vmem:[#allocation9 + $0x701] ss:$4 sm:$0xf] %vm8752_vm0, %v3309_v43  ;;  %v8484_v43 = vld [vmem:[#allocation2 + $0x10] sm:$0xff] }
 0x20d   :  { %3758 = vst.msk [vmem:[#allocation9 + $0x711] ss:$4 sm:$0xf] %vm8752_vm0, %v3323_v37  ;;  %3764 = vst.msk [vmem:[#allocation9 + $0x741] ss:$4 sm:$0xf] %vm8752_vm0, %v3316_v15  ;;  %v3399_v0 = vcombine.high %v3377_v21, %v3377_v21  ;;  %v3400_v61 = vcombine.high %v3384_v56, %v3384_v56  ;;  %v3401_v8 = vcombine.high %v3391_v24, %v3391_v24 }
 0x20e   :  { %3766 = vst.msk [vmem:[#allocation9 + $0x751] ss:$4 sm:$0xf] %vm8752_vm0, %v3330_v18  ;;  %v3402_v59 = vcombine.high %v3398_v23, %v3398_v23  ;;  %3772 = vst.msk [vmem:[#allocation9 + $0x781] ss:$4 sm:$0xf] %vm8752_vm0, %v3377_v21  ;;  %v8280_v41 = vpack.c.bf16 %v10598_v40, %v10583_v31  ;;  %v8312_v20 = vpack.c.bf16 %v10605_v25, %v10589_v12 }
 0x20f   :  { %3774 = vst.msk [vmem:[#allocation9 + $0x791] ss:$4 sm:$0xf] %vm8752_vm0, %v3391_v24  ;;  %3780 = vst.msk [vmem:[#allocation9 + $0x7c1] ss:$4 sm:$0xf] %vm8752_vm0, %v3384_v56  ;;  %v8282_v52 = vpack.c.bf16 %v10592_v58, %v10569_v34  ;;  %v8314_v3 = vpack.c.bf16 %v10595_v5, %v10580_v7  ;;  %v10695_v56 = vstv %s8186_s21 }
 0x210   :  { %3782 = vst.msk [vmem:[#allocation9 + $0x7d1] ss:$4 sm:$0xf] %vm8752_vm0, %v3398_v23  ;;  %3760 = vst.msk [vmem:[#allocation9 + $0x721] ss:$4 sm:$0xf] %vm8752_vm0, %v3331_v38  ;;  %8281 = vmatprep.subr.bf16.mxu0 %v8280_v41  ;;  %8313 = vmatprep.subr.bf16.mxu1 %v8312_v20  ;;  %v10699_v24 = vmul.f32 %v10695_v56, %v10435_v16  ;;  %v10703_v23 = vmul.f32 %v10695_v56, %v10457_v4 }
 0x211   :  { %3762 = vst.msk [vmem:[#allocation9 + $0x731] ss:$4 sm:$0xf] %vm8752_vm0, %v3333_v55  ;;  %3768 = vst.msk [vmem:[#allocation9 + $0x761] ss:$4 sm:$0xf] %vm8752_vm0, %v3332_v14  ;;  %8283 = vmatpush1.bf16.msra.mxu0 %v8282_v52  ;;  %8315 = vmatpush1.bf16.msra.mxu1 %v8314_v3  ;;  %v10707_v38 = vmul.f32 %v10695_v56, %v10460_v35  ;;  %v10711_v14 = vmul.f32 %v10695_v56, %v10463_v62 }
 0x212   :  { %3770 = vst.msk [vmem:[#allocation9 + $0x771] ss:$4 sm:$0xf] %vm8752_vm0, %v3334_v39  ;;  %3776 = vst.msk [vmem:[#allocation9 + $0x7a1] ss:$4 sm:$0xf] %vm8752_vm0, %v3399_v0  ;;  %v10715_v55 = vmul.f32 %v10695_v56, %v10480_v10  ;;  %v10719_v0 = vmul.f32 %v10695_v56, %v10483_v46  ;;  %v10737_v41 = vmul.f32 %v10695_v56, %v10580_v7 }
 0x213   :  { %3778 = vst.msk [vmem:[#allocation9 + $0x7b1] ss:$4 sm:$0xf] %vm8752_vm0, %v3401_v8  ;;  %3784 = vst.msk [vmem:[#allocation9 + $0x7e1] ss:$4 sm:$0xf] %vm8752_vm0, %v3400_v61  ;;  %v10723_v61 = vmul.f32 %v10695_v56, %v10486_v36  ;;  %v10727_v8 = vmul.f32 %v10695_v56, %v10489_v19  ;;  %v10741_v20 = vmul.f32 %v10695_v56, %v10583_v31 }
 0x214   :  { %3786 = vst.msk [vmem:[#allocation9 + $0x7f1] ss:$4 sm:$0xf] %vm8752_vm0, %v3402_v59  ;;  %3852 = vmatmul.mubr.f32.vlgmr.msra.gmra.mrb[32].mxu0 %v8482_v60  ;;  %4013 = vmatmul.mubr.f32.vlgmr.msra.gmra.mrb[32].mxu1 %v8482_v60  ;;  %v13747_v28 = vmov 0.0   ;;  %v8485_v15 = vld [vmem:[#allocation2 + $0x18] sm:$0xff]  ;;  %v8486_v37 = vld [vmem:[#allocation2 + $0x20] sm:$0xff]  ;;  %v10733_v59 = vmul.f32 %v10695_v56, %v10569_v34  ;;  %v10745_v52 = vmul.f32 %v10695_v56, %v10589_v12 }
 0x215   :  { %3857 = vmatprep.mubr.f32.mxu0 %v13747_v28  ;;  %4018 = vmatprep.mubr.f32.mxu1 %v13747_v28  ;;  %v8487_v18 = vld [vmem:[#allocation2 + $0x28] sm:$0xff]  ;;  %v8488_v21 = vld [vmem:[#allocation2 + $0x30] sm:$0xff]  ;;  %13748 = vst [vmem:[#allocation35_spill] sm:$0xff] %v10695_v56  ;;  %13749 = vst [vmem:[#allocation36_spill] sm:$0xff] %v10699_v24  ;;  %v10749_v3 = vmul.f32 %v10695_v56, %v10592_v58  ;;  %v10753_v60 = vmul.f32 %v10695_v56, %v10595_v5 }
 0x216   :  { %13750 = vst [vmem:[#allocation37_spill] sm:$0xff] %v10703_v23  ;;  %13751 = vst [vmem:[#allocation38_spill] sm:$0xff] %v10707_v38  ;;  %v8489_v39 = vld [vmem:[#allocation2 + $0x38] sm:$0xff]  ;;  %v13774_v23 = vld [vmem:[#allocation67_spill] sm:$0xff] }
 0x217   :  { %13752 = vst [vmem:[#allocation39_spill] sm:$0xff] %v10711_v14  ;;  %13753 = vst [vmem:[#allocation40_spill] sm:$0xff] %v10715_v55  ;;  %v13773_v14 = vld [vmem:[#allocation66_spill] sm:$0xff] }
 0x218   :  { %3858 = vmatmul.mubr.f32.gmra.mrb[34].mxu0 %v8483_v6  ;;  %4019 = vmatmul.mubr.f32.gmra.mrb[34].mxu1 %v8483_v6  ;;  %13754 = vst [vmem:[#allocation81_spill] sm:$0xff] %v10719_v0  ;;  %13755 = vst [vmem:[#allocation41_spill] sm:$0xff] %v10723_v61  ;;  %v10757_v6 = vmul.f32 %v10695_v56, %v10598_v40  ;;  %v13772_v0 = vld [vmem:[#allocation65_spill] sm:$0xff] }
 0x219   :  { %3863 = vmatprep.mubr.f32.mxu0 %v13747_v28  ;;  %4024 = vmatprep.mubr.f32.mxu1 %v13747_v28  ;;  %13756 = vst [vmem:[#allocation42_spill] sm:$0xff] %v10727_v8  ;;  %13757 = vst [vmem:[#allocation43_spill] sm:$0xff] %v10733_v59  ;;  %v13771_v8 = vld [vmem:[#allocation64_spill] sm:$0xff] }
 0x21a   :  { %13758 = vst [vmem:[#allocation44_spill] sm:$0xff] %v10737_v41  ;;  %13759 = vst [vmem:[#allocation45_spill] sm:$0xff] %v10741_v20  ;;  %v13770_v41 = vld [vmem:[#allocation63_spill] sm:$0xff] }
 0x21b   :  { %13760 = vst [vmem:[#allocation46_spill] sm:$0xff] %v10745_v52  ;;  %13761 = vst [vmem:[#allocation47_spill] sm:$0xff] %v10749_v3  ;;  %v13769_v52 = vld [vmem:[#allocation62_spill] sm:$0xff] }
 0x21c   :  { %3864 = vmatmul.mubr.f32.gmra.mrb[36].mxu0 %v8484_v43  ;;  %4025 = vmatmul.mubr.f32.gmra.mrb[36].mxu1 %v8484_v43  ;;  %13762 = vst [vmem:[#allocation48_spill] sm:$0xff] %v10753_v60  ;;  %13763 = vst [vmem:[#allocation49_spill] sm:$0xff] %v10757_v6  ;;  %v10761_v43 = vmul.f32 %v10695_v56, %v10605_v25  ;;  %v13767_v6 = vld [vmem:[#allocation59_spill] sm:$0xff]  ;;  %v13780_v56 = vld [vmem:[#allocation22_spill] sm:$0xff] }
 0x21d   :  { %3869 = vmatprep.mubr.f32.mxu0 %v13747_v28  ;;  %4030 = vmatprep.mubr.f32.mxu1 %v13747_v28 }
 0x21e   :  { %13764 = vst [vmem:[#allocation50_spill] sm:$0xff] %v10761_v43  ;;  %v13766_v43 = vld [vmem:[#allocation58_spill] sm:$0xff] }
 0x220   :  { %3870 = vmatmul.mubr.f32.gmra.mrb[38].mxu0 %v8485_v15  ;;  %4031 = vmatmul.mubr.f32.gmra.mrb[38].mxu1 %v8485_v15  ;;  %v8490_v15 = vld [vmem:[#allocation2 + $0x40] sm:$0xff] }
 0x221   :  { %3875 = vmatprep.mubr.f32.mxu0 %v13747_v28  ;;  %4036 = vmatprep.mubr.f32.mxu1 %v13747_v28 }
 0x224   :  { %3876 = vmatmul.mubr.f32.gmra.mrb[40].mxu0 %v8486_v37  ;;  %4037 = vmatmul.mubr.f32.gmra.mrb[40].mxu1 %v8486_v37  ;;  %v8491_v37 = vld [vmem:[#allocation2 + $0x48] sm:$0xff] }
 0x225   :  { %3881 = vmatprep.mubr.f32.mxu0 %v13747_v28  ;;  %4042 = vmatprep.mubr.f32.mxu1 %v13747_v28 }
 0x228   :  { %3882 = vmatmul.mubr.f32.gmra.mrb[42].mxu0 %v8487_v18  ;;  %4043 = vmatmul.mubr.f32.gmra.mrb[42].mxu1 %v8487_v18  ;;  %v8492_v18 = vld [vmem:[#allocation2 + $0x50] sm:$0xff] }
 0x229   :  { %3887 = vmatprep.mubr.f32.mxu0 %v13747_v28  ;;  %4048 = vmatprep.mubr.f32.mxu1 %v13747_v28 }
 0x22c   :  { %3888 = vmatmul.mubr.f32.gmra.mrb[44].mxu0 %v8488_v21  ;;  %4049 = vmatmul.mubr.f32.gmra.mrb[44].mxu1 %v8488_v21  ;;  %v8493_v21 = vld [vmem:[#allocation2 + $0x58] sm:$0xff] }
 0x22d   :  { %3893 = vmatprep.mubr.f32.mxu0 %v13747_v28  ;;  %4054 = vmatprep.mubr.f32.mxu1 %v13747_v28 }
 0x230   :  { %3894 = vmatmul.mubr.f32.gmra.mrb[46].mxu0 %v8489_v39  ;;  %4055 = vmatmul.mubr.f32.gmra.mrb[46].mxu1 %v8489_v39  ;;  %v8494_v39 = vld [vmem:[#allocation2 + $0x60] sm:$0xff] }
 0x231   :  { %3899 = vmatprep.mubr.f32.mxu0 %v13747_v28  ;;  %4060 = vmatprep.mubr.f32.mxu1 %v13747_v28 }
 0x234   :  { %3900 = vmatmul.mubr.f32.gmra.mrb[48].mxu0 %v8490_v15  ;;  %4061 = vmatmul.mubr.f32.gmra.mrb[48].mxu1 %v8490_v15  ;;  %v8495_v15 = vld [vmem:[#allocation2 + $0x68] sm:$0xff] }
 0x235   :  { %3905 = vmatprep.mubr.f32.mxu0 %v13747_v28  ;;  %4066 = vmatprep.mubr.f32.mxu1 %v13747_v28 }
 0x238   :  { %3906 = vmatmul.mubr.f32.gmra.mrb[50].mxu0 %v8491_v37  ;;  %4067 = vmatmul.mubr.f32.gmra.mrb[50].mxu1 %v8491_v37  ;;  %v8496_v37 = vld [vmem:[#allocation2 + $0x70] sm:$0xff] }
 0x239   :  { %3911 = vmatprep.mubr.f32.mxu0 %v13747_v28  ;;  %4072 = vmatprep.mubr.f32.mxu1 %v13747_v28 }
 0x23c   :  { %3912 = vmatmul.mubr.f32.gmra.mrb[52].mxu0 %v8492_v18  ;;  %4073 = vmatmul.mubr.f32.gmra.mrb[52].mxu1 %v8492_v18  ;;  %v8497_v18 = vld [vmem:[#allocation2 + $0x78] sm:$0xff] }
 0x23d   :  { %3917 = vmatprep.mubr.f32.mxu0 %v13747_v28  ;;  %4078 = vmatprep.mubr.f32.mxu1 %v13747_v28 }
 0x240   :  { %3918 = vmatmul.mubr.f32.gmra.mrb[54].mxu0 %v8493_v21  ;;  %4079 = vmatmul.mubr.f32.gmra.mrb[54].mxu1 %v8493_v21  ;;  %v10779_v21 = vstv %s8182_s22 }
 0x241   :  { %3923 = vmatprep.mubr.f32.mxu0 %v13747_v28  ;;  %4084 = vmatprep.mubr.f32.mxu1 %v13747_v28  ;;  %v10791_v60 = vmul.f32 %v10779_v21, %v13767_v6  ;;  %v10799_v20 = vmul.f32 %v10779_v21, %v13769_v52  ;;  %v10803_v59 = vmul.f32 %v10779_v21, %v13770_v41  ;;  %v13775_v52 = vld [vmem:[#allocation68_spill] sm:$0xff] }
 0x242   :  { %v10807_v61 = vmul.f32 %v10779_v21, %v13771_v8  ;;  %v10811_v55 = vmul.f32 %v10779_v21, %v13772_v0  ;;  %v10815_v38 = vmul.f32 %v10779_v21, %v13773_v14  ;;  %v10819_v24 = vmul.f32 %v10779_v21, %v13774_v23  ;;  %v13777_v6 = vld [vmem:[#allocation20_spill] sm:$0xff] }
 0x243   :  { %v10823_v41 = vmul.f32 %v10779_v21, %v13775_v52  ;;  %v10831_v0 = vmul.f32 %v10779_v21, %v13777_v6  ;;  %v10839_v23 = vmul.f32 %v10779_v21, %v13780_v56  ;;  %v10851_v6 = vmul.f32 %v10779_v21, %v9913_v27  ;;  %v13790_v27 = vld [vmem:[#allocation76_spill] sm:$0xff] }
 0x244   :  { %3924 = vmatmul.mubr.f32.gmra.mrb[56].mxu0 %v8494_v39  ;;  %4085 = vmatmul.mubr.f32.gmra.mrb[56].mxu1 %v8494_v39  ;;  %v13765_v39 = vld [vmem:[#allocation56_spill] sm:$0xff] }
 0x245   :  { %3929 = vmatprep.mubr.f32.mxu0 %v13747_v28  ;;  %4090 = vmatprep.mubr.f32.mxu1 %v13747_v28  ;;  %13784 = vst [vmem:[#allocation53_spill] sm:$0xff] %v10851_v6  ;;  %v10873_v6 = vmul.f32 %v10779_v21, %v13790_v27  ;;  %v10893_v27 = vmul.f32 %v10779_v21, %v10105_v9 }
 0x246   :  { %v10915_v9 = vmul.f32 %v10779_v21, %v10218_v1 }
 0x247   :  { %13795 = vst [vmem:[#allocation93_spill] sm:$0xff] %v10893_v27 }
 0x248   :  { %3930 = vmatmul.mubr.f32.gmra.mrb[58].mxu0 %v8495_v15  ;;  %4091 = vmatmul.mubr.f32.gmra.mrb[58].mxu1 %v8495_v15  ;;  %v10783_v15 = vmul.f32 %v10779_v21, %v13765_v39  ;;  %v13781_v39 = vld [vmem:[#allocation23_spill] sm:$0xff]  ;;  %13800 = vst [vmem:[#allocation98_spill] sm:$0xff] %v10915_v9 }
 0x249   :  { %3935 = vmatprep.mubr.f32.mxu0 %v13747_v28  ;;  %4096 = vmatprep.mubr.f32.mxu1 %v13747_v28  ;;  %v10843_v52 = vmul.f32 %v10779_v21, %v13781_v39  ;;  %v13788_v39 = vld [vmem:[#allocation27_spill] sm:$0xff] }
 0x24a   :  { %v13807_v9 = vld [vmem:[#allocation91_spill] sm:$0xff] }
 0x24b   :  { %13782 = vst [vmem:[#allocation52_spill] sm:$0xff] %v10843_v52  ;;  %v10865_v52 = vmul.f32 %v10779_v21, %v13788_v39  ;;  %v10885_v39 = vmul.f32 %v10779_v21, %v10082_v57  ;;  %v10905_v57 = vmul.f32 %v10779_v21, %v10116_v54  ;;  %v10927_v54 = vmul.f32 %v10779_v21, %v10227_v44 }
 0x24c   :  { %3936 = vmatmul.mubr.f32.gmra.mrb[60].mxu0 %v8496_v37  ;;  %4097 = vmatmul.mubr.f32.gmra.mrb[60].mxu1 %v8496_v37  ;;  %v10787_v37 = vmul.f32 %v10779_v21, %v13766_v43  ;;  %v13778_v43 = vld [vmem:[#allocation21_spill] sm:$0xff]  ;;  %v10947_v44 = vmul.f32 %v10779_v21, %v10335_v63  ;;  %v10967_v63 = vmul.f32 %v10779_v21, %v10352_v45 }
 0x24d   :  { %3941 = vmatprep.mubr.f32.mxu0 %v13747_v28  ;;  %4102 = vmatprep.mubr.f32.mxu1 %v13747_v28  ;;  %v10835_v14 = vmul.f32 %v10779_v21, %v13778_v43  ;;  %13793 = vst [vmem:[#allocation57_spill] sm:$0xff] %v10885_v39  ;;  %13798 = vst [vmem:[#allocation96_spill] sm:$0xff] %v10905_v57  ;;  %v10987_v45 = vmul.f32 %v10779_v21, %v10460_v35  ;;  %v8527_v57 = vld [vmem:[#allocation6 + $0xf0] sm:$0xff] }
 0x24e   :  { %13803 = vst [vmem:[#allocation101_spill] sm:$0xff] %v10927_v54  ;;  %13811 = vst [vmem:[#allocation106_spill] sm:$0xff] %v10947_v44  ;;  %v11010_v35 = vmul.f32 %v10779_v21, %v10489_v19  ;;  %v11030_v19 = vmul.f32 %v10779_v21, %v10592_v58  ;;  %v11051_v58 = vmul.f32 %v10779_v21, %v10605_v25  ;;  %v8520_v44 = vld [vmem:[#allocation6 + $0xa8] sm:$0xff]  ;;  %v8525_v54 = vld [vmem:[#allocation6 + $0xd8] sm:$0xff] }
 0x24f   :  { %13779 = vst [vmem:[#allocation51_spill] sm:$0xff] %v10835_v14  ;;  %v13787_v14 = vld [vmem:[#allocation71_spill] sm:$0xff]  ;;  %13816 = vst [vmem:[#allocation111_spill] sm:$0xff] %v10967_v63  ;;  %v8515_v63 = vld [vmem:[#allocation6 + $0x90] sm:$0xff] }
 0x250   :  { %3942 = vmatmul.mubr.f32.gmra.mrb[62].mxu0 %v8497_v18  ;;  %4103 = vmatmul.mubr.f32.gmra.mrb[62].mxu1 %v8497_v18  ;;  %v13768_v18 = vld [vmem:[#allocation60_spill] sm:$0xff]  ;;  %v10859_v56 = vmul.f32 %v10779_v21, %v13787_v14  ;;  %v10881_v14 = vmul.f32 %v10779_v21, %v10057_v53  ;;  %v10901_v53 = vmul.f32 %v10779_v21, %v10113_v50 }
 0x251   :  { %6035 = vmatprep.mubr.f32.mxu0 %v13747_v28  ;;  %6196 = vmatprep.mubr.f32.mxu1 %v13747_v28  ;;  %v10795_v3 = vmul.f32 %v10779_v21, %v13768_v18  ;;  %v13776_v18 = vld [vmem:[#allocation69_spill] sm:$0xff]  ;;  %v13785_v28 = vld [vmem:[#allocation70_spill] sm:$0xff]  ;;  %v10923_v50 = vmul.f32 %v10779_v21, %v10224_v11  ;;  %13821 = vst [vmem:[#allocation116_spill] sm:$0xff] %v10987_v45  ;;  %13826 = vst [vmem:[#allocation121_spill] sm:$0xff] %v11010_v35 }
 0x252   :  { %v10827_v8 = vmul.f32 %v10779_v21, %v13776_v18  ;;  %v10847_v18 = vmul.f32 %v10779_v21, %v9893_v42  ;;  %v10855_v43 = vmul.f32 %v10779_v21, %v13785_v28  ;;  %v13789_v42 = vld [vmem:[#allocation75_spill] sm:$0xff]  ;;  %v13791_v28 = vld [vmem:[#allocation77_spill] sm:$0xff]  ;;  %13792 = vst [vmem:[#allocation55_spill] sm:$0xff] %v10881_v14  ;;  %13797 = vst [vmem:[#allocation95_spill] sm:$0xff] %v10901_v53 }
 0x253   :  { %13802 = vst [vmem:[#allocation100_spill] sm:$0xff] %v10923_v50  ;;  %13831 = vst [vmem:[#allocation126_spill] sm:$0xff] %v11030_v19  ;;  %v8502_v19 = vld [vmem:[#allocation6 + $0x20] sm:$0xff]  ;;  %v8504_v35 = vld [vmem:[#allocation6 + $0x28] sm:$0xff] }
 0x254   :  { %13783 = vst [vmem:[#allocation88_spill] sm:$0xff] %v10847_v18  ;;  %13786 = vst [vmem:[#allocation54_spill] sm:$0xff] %v10855_v43  ;;  %v10869_v18 = vmul.f32 %v10779_v21, %v13789_v42  ;;  %v10877_v43 = vmul.f32 %v10779_v21, %v13791_v28  ;;  %v10889_v42 = vmul.f32 %v10779_v21, %v10085_v26  ;;  %v8511_v45 = vld [vmem:[#allocation6 + $0x70] sm:$0xff]  ;;  %v8526_v50 = vld [vmem:[#allocation6 + $0xe0] sm:$0xff] }
 0x255   :  { %v10897_v28 = vmul.f32 %v10779_v21, %v10110_v22  ;;  %v10909_v26 = vmul.f32 %v10779_v21, %v10119_v30  ;;  %v10919_v22 = vmul.f32 %v10779_v21, %v10221_v32  ;;  %v10931_v30 = vmul.f32 %v10779_v21, %v10230_v51  ;;  %13834 = vst [vmem:[#allocation129_spill] sm:$0xff] %v11051_v58  ;;  %v8506_v58 = vld [vmem:[#allocation6 + $0x40] sm:$0xff] }
 0x256   :  { %13794 = vst [vmem:[#allocation61_spill] sm:$0xff] %v10889_v42  ;;  %v10939_v32 = vmul.f32 %v10779_v21, %v13807_v9  ;;  %v10951_v51 = vmul.f32 %v10779_v21, %v10338_v17  ;;  %v10959_v9 = vmul.f32 %v10779_v21, %v10346_v49  ;;  %v10971_v17 = vmul.f32 %v10779_v21, %v10355_v48 }
 0x257   :  { %13796 = vst [vmem:[#allocation94_spill] sm:$0xff] %v10897_v28  ;;  %13799 = vst [vmem:[#allocation97_spill] sm:$0xff] %v10909_v26  ;;  %v13805_v26 = vld [vmem:[#allocation90_spill] sm:$0xff]  ;;  %v10979_v49 = vmul.f32 %v10779_v21, %v10435_v16  ;;  %v10991_v48 = vmul.f32 %v10779_v21, %v10463_v62  ;;  %v11002_v16 = vmul.f32 %v10779_v21, %v10483_v46 }
 0x258   :  { %13801 = vst [vmem:[#allocation99_spill] sm:$0xff] %v10919_v22  ;;  %13804 = vst [vmem:[#allocation102_spill] sm:$0xff] %v10931_v30  ;;  %v10935_v1 = vmul.f32 %v10779_v21, %v13805_v26  ;;  %v13809_v22 = vld [vmem:[#allocation92_spill] sm:$0xff]  ;;  %v10955_v26 = vmul.f32 %v10779_v21, %v10341_v29  ;;  %v10975_v29 = vmul.f32 %v10779_v21, %v10375_v2  ;;  %v8524_v30 = vld [vmem:[#allocation6 + $0xc8] sm:$0xff] }
 0x259   :  { %13808 = vst [vmem:[#allocation104_spill] sm:$0xff] %v10939_v32  ;;  %v10943_v11 = vmul.f32 %v10779_v21, %v13809_v22  ;;  %13812 = vst [vmem:[#allocation107_spill] sm:$0xff] %v10951_v51  ;;  %v10963_v22 = vmul.f32 %v10779_v21, %v10349_v33  ;;  %v10983_v33 = vmul.f32 %v10779_v21, %v10457_v4  ;;  %v8519_v51 = vld [vmem:[#allocation6 + $0xb0] sm:$0xff]  ;;  %v8522_v32 = vld [vmem:[#allocation6 + $0xc0] sm:$0xff] }
 0x25a   :  { %13806 = vst [vmem:[#allocation103_spill] sm:$0xff] %v10935_v1  ;;  %13813 = vst [vmem:[#allocation108_spill] sm:$0xff] %v10955_v26  ;;  %v10998_v2 = vmul.f32 %v10779_v21, %v10480_v10  ;;  %v11006_v4 = vmul.f32 %v10779_v21, %v10486_v36  ;;  %v11014_v62 = vmul.f32 %v10779_v21, %v10569_v34  ;;  %v8518_v26 = vld [vmem:[#allocation6 + $0xa0] sm:$0xff]  ;;  %v8523_v1 = vld [vmem:[#allocation6 + $0xd0] sm:$0xff] }
 0x25b   :  { %13810 = vst [vmem:[#allocation105_spill] sm:$0xff] %v10943_v11  ;;  %13814 = vst [vmem:[#allocation109_spill] sm:$0xff] %v10959_v9  ;;  %v11018_v10 = vmul.f32 %v10779_v21, %v10580_v7  ;;  %v11022_v46 = vmul.f32 %v10779_v21, %v10583_v31  ;;  %v11026_v36 = vmul.f32 %v10779_v21, %v10589_v12  ;;  %v8498_v31 = vld [vmem:[#allocation6] sm:$0xff]  ;;  %v8499_v12 = vld [vmem:[#allocation6 + $0x10] sm:$0xff] }
 0x25c   :  { %13815 = vst [vmem:[#allocation110_spill] sm:$0xff] %v10963_v22  ;;  %13817 = vst [vmem:[#allocation112_spill] sm:$0xff] %v10971_v17  ;;  %v10994_v17 = vstv %s10861_s23  ;;  %v11034_v34 = vmul.f32 %v10779_v21, %v10595_v5  ;;  %v11038_v7 = vmul.f32 %v10779_v21, %v10598_v40  ;;  %v8500_v5 = vld [vmem:[#allocation6 + $0x8] sm:$0xff]  ;;  %v8501_v40 = vld [vmem:[#allocation6 + $0x18] sm:$0xff] }
 0x25d   :  { %13818 = vst [vmem:[#allocation113_spill] sm:$0xff] %v10975_v29  ;;  %13819 = vst [vmem:[#allocation114_spill] sm:$0xff] %v10979_v49  ;;  %v11066_v25 = vmul.f32 %v8504_v35, %v10994_v17  ;;  %v8505_v21 = vld [vmem:[#allocation6 + $0x38] sm:$0xff]  ;;  %v8514_v29 = vld [vmem:[#allocation6 + $0x80] sm:$0xff] }
 0x25e   :  { %13820 = vst [vmem:[#allocation115_spill] sm:$0xff] %v10983_v33  ;;  %13822 = vst [vmem:[#allocation117_spill] sm:$0xff] %v10991_v48  ;;  %v8510_v48 = vld [vmem:[#allocation6 + $0x60] sm:$0xff]  ;;  %v8512_v33 = vld [vmem:[#allocation6 + $0x68] sm:$0xff] }
 0x25f   :  { %13823 = vst [vmem:[#allocation118_spill] sm:$0xff] %v10998_v2  ;;  %13824 = vst [vmem:[#allocation119_spill] sm:$0xff] %v11002_v16  ;;  %v8508_v16 = vld [vmem:[#allocation6 + $0x48] sm:$0xff]  ;;  %v8509_v2 = vld [vmem:[#allocation6 + $0x58] sm:$0xff] }
 0x260   :  { %13825 = vst [vmem:[#allocation120_spill] sm:$0xff] %v11006_v4  ;;  %13827 = vst [vmem:[#allocation122_spill] sm:$0xff] %v11014_v62  ;;  %v8503_v62 = vld [vmem:[#allocation6 + $0x30] sm:$0xff]  ;;  %v11081_v35 = vmul.f32 %v8509_v2, %v10994_v17  ;;  %v8513_v49 = vld [vmem:[#allocation6 + $0x78] sm:$0xff]  ;;  %v11096_v2 = vmul.f32 %v8514_v29, %v10994_v17  ;;  %v11111_v29 = vmul.f32 %v8519_v51, %v10994_v17 }
 0x261   :  { %13828 = vst [vmem:[#allocation123_spill] sm:$0xff] %v11018_v10  ;;  %13829 = vst [vmem:[#allocation124_spill] sm:$0xff] %v11022_v46  ;;  %v11041_v10 = vstv %s10911_s24  ;;  %v11044_v46 = vmul.f32 %v8498_v31, %v10994_v17  ;;  %v11060_v31 = vmul.f32 %v8502_v19, %v10994_v17  ;;  %v8507_v4 = vld [vmem:[#allocation6 + $0x50] sm:$0xff]  ;;  %v8516_v22 = vld [vmem:[#allocation6 + $0x88] sm:$0xff]  ;;  %v11126_v51 = vmul.f32 %v8524_v30, %v10994_v17 }
 0x262   :  { %13830 = vst [vmem:[#allocation125_spill] sm:$0xff] %v11026_v36  ;;  %13832 = vst [vmem:[#allocation127_spill] sm:$0xff] %v11034_v34  ;;  %v11047_v36 = vmul.f32 %v8499_v12, %v10994_v17  ;;  %v11054_v34 = vmul.f32 %v8500_v5, %v10994_v17  ;;  %v11063_v12 = vmul.f32 %v8503_v62, %v10994_v17  ;;  %v8517_v9 = vld [vmem:[#allocation6 + $0x98] sm:$0xff] }
 0x263   :  { %13833 = vst [vmem:[#allocation128_spill] sm:$0xff] %v11038_v7  ;;  %v11057_v7 = vmul.f32 %v8501_v40, %v10994_v17  ;;  %v11069_v5 = vmul.f32 %v8505_v21, %v10994_v17  ;;  %v11072_v40 = vmul.f32 %v8506_v58, %v10994_v17  ;;  %v11075_v19 = vmul.f32 %v8507_v4, %v10994_v17  ;;  %v8521_v11 = vld [vmem:[#allocation6 + $0xb8] sm:$0xff] }
 0x264   :  { %v11078_v62 = vmul.f32 %v8508_v16, %v10994_v17  ;;  %v11084_v21 = vmul.f32 %v8510_v48, %v10994_v17  ;;  %v11087_v58 = vmul.f32 %v8511_v45, %v10994_v17  ;;  %v11090_v4 = vmul.f32 %v8512_v33, %v10994_v17  ;;  %13839 = vst [vmem:[#allocation134_spill] sm:$0xff] %v11126_v51  ;;  %v8530_v51 = vld [vmem:[#allocation6 + $0x100] sm:$0xff] }
 0x265   :  { %v11093_v16 = vmul.f32 %v8513_v49, %v10994_v17  ;;  %v11099_v48 = vmul.f32 %v8515_v63, %v10994_v17  ;;  %v11102_v45 = vmul.f32 %v8516_v22, %v10994_v17  ;;  %v11105_v33 = vmul.f32 %v8517_v9, %v10994_v17 }
 0x266   :  { %v11108_v49 = vmul.f32 %v8518_v26, %v10994_v17  ;;  %v11114_v63 = vmul.f32 %v8520_v44, %v10994_v17  ;;  %v11117_v22 = vmul.f32 %v8521_v11, %v10994_v17  ;;  %v11120_v9 = vmul.f32 %v8522_v32, %v10994_v17 }
 0x267   :  { %v11123_v26 = vmul.f32 %v8523_v1, %v10994_v17  ;;  %v11129_v44 = vmul.f32 %v8525_v54, %v10994_v17  ;;  %v11132_v11 = vmul.f32 %v8526_v50, %v10994_v17  ;;  %v11135_v32 = vmul.f32 %v8527_v57, %v10994_v17 }
 0x268   :  { %13835 = vst [vmem:[#allocation130_spill] sm:$0xff] %v11114_v63  ;;  %13836 = vst [vmem:[#allocation131_spill] sm:$0xff] %v11117_v22  ;;  %v11144_v54 = vmul.f32 %v8530_v51, %v10994_v17 }
 0x269   :  { %13837 = vst [vmem:[#allocation132_spill] sm:$0xff] %v11120_v9  ;;  %13838 = vst [vmem:[#allocation133_spill] sm:$0xff] %v11123_v26  ;;  %v8528_v9 = vld [vmem:[#allocation6 + $0xe8] sm:$0xff]  ;;  %v8529_v26 = vld [vmem:[#allocation6 + $0xf8] sm:$0xff] }
 0x26a   :  { %13840 = vst [vmem:[#allocation135_spill] sm:$0xff] %v11129_v44  ;;  %13841 = vst [vmem:[#allocation136_spill] sm:$0xff] %v11132_v11  ;;  %v11138_v1 = vmul.f32 %v8528_v9, %v10994_v17  ;;  %v11141_v30 = vmul.f32 %v8529_v26, %v10994_v17  ;;  %v8531_v44 = vld [vmem:[#allocation6 + $0x110] sm:$0xff]  ;;  %v8532_v11 = vld [vmem:[#allocation6 + $0x108] sm:$0xff] }
 0x26b   :  { %13842 = vst [vmem:[#allocation137_spill] sm:$0xff] %v11135_v32  ;;  %13845 = vst [vmem:[#allocation140_spill] sm:$0xff] %v11144_v54  ;;  %v11147_v50 = vmul.f32 %v8531_v44, %v10994_v17  ;;  %v11150_v57 = vmul.f32 %v8532_v11, %v10994_v17  ;;  %v8533_v32 = vld [vmem:[#allocation6 + $0x118] sm:$0xff]  ;;  %v8536_v54 = vld [vmem:[#allocation6 + $0x128] sm:$0xff] }
 0x26c   :  { %13843 = vst [vmem:[#allocation138_spill] sm:$0xff] %v11138_v1  ;;  %13844 = vst [vmem:[#allocation139_spill] sm:$0xff] %v11141_v30  ;;  %v11153_v9 = vmul.f32 %v8533_v32, %v10994_v17  ;;  %v8534_v1 = vld [vmem:[#allocation6 + $0x120] sm:$0xff]  ;;  %v8535_v30 = vld [vmem:[#allocation6 + $0x130] sm:$0xff]  ;;  %v11162_v44 = vmul.f32 %v8536_v54, %v10994_v17 }
 0x26d   :  { %13846 = vst [vmem:[#allocation141_spill] sm:$0xff] %v11147_v50  ;;  %13847 = vst [vmem:[#allocation142_spill] sm:$0xff] %v11150_v57  ;;  %v11156_v26 = vmul.f32 %v8534_v1, %v10994_v17  ;;  %v11159_v51 = vmul.f32 %v8535_v30, %v10994_v17  ;;  %v8537_v50 = vld [vmem:[#allocation6 + $0x138] sm:$0xff]  ;;  %v8538_v57 = vld [vmem:[#allocation6 + $0x140] sm:$0xff] }
 0x26e   :  { %13848 = vst [vmem:[#allocation143_spill] sm:$0xff] %v11153_v9  ;;  %13851 = vst [vmem:[#allocation146_spill] sm:$0xff] %v11162_v44  ;;  %v11165_v11 = vmul.f32 %v8537_v50, %v10994_v17  ;;  %v11168_v32 = vmul.f32 %v8538_v57, %v10994_v17  ;;  %v8539_v9 = vld [vmem:[#allocation6 + $0x150] sm:$0xff]  ;;  %v8542_v44 = vld [vmem:[#allocation6 + $0x160] sm:$0xff] }
 0x26f   :  { %13849 = vst [vmem:[#allocation144_spill] sm:$0xff] %v11156_v26  ;;  %13850 = vst [vmem:[#allocation145_spill] sm:$0xff] %v11159_v51  ;;  %v11171_v1 = vmul.f32 %v8539_v9, %v10994_v17  ;;  %v8540_v26 = vld [vmem:[#allocation6 + $0x148] sm:$0xff]  ;;  %v8541_v51 = vld [vmem:[#allocation6 + $0x158] sm:$0xff]  ;;  %v11180_v50 = vmul.f32 %v8542_v44, %v10994_v17 }
 0x270   :  { %13852 = vst [vmem:[#allocation147_spill] sm:$0xff] %v11165_v11  ;;  %13853 = vst [vmem:[#allocation148_spill] sm:$0xff] %v11168_v32  ;;  %v11174_v30 = vmul.f32 %v8540_v26, %v10994_v17  ;;  %v11177_v54 = vmul.f32 %v8541_v51, %v10994_v17  ;;  %v8543_v11 = vld [vmem:[#allocation6 + $0x170] sm:$0xff]  ;;  %v8544_v32 = vld [vmem:[#allocation6 + $0x168] sm:$0xff] }
 0x271   :  { %13854 = vst [vmem:[#allocation149_spill] sm:$0xff] %v11171_v1  ;;  %13857 = vst [vmem:[#allocation152_spill] sm:$0xff] %v11180_v50  ;;  %v11183_v57 = vmul.f32 %v8543_v11, %v10994_v17  ;;  %v11186_v9 = vmul.f32 %v8544_v32, %v10994_v17  ;;  %v8545_v1 = vld [vmem:[#allocation6 + $0x178] sm:$0xff]  ;;  %v8548_v11 = vld [vmem:[#allocation6 + $0x188] sm:$0xff] }
 0x272   :  { %13855 = vst [vmem:[#allocation150_spill] sm:$0xff] %v11174_v30  ;;  %13856 = vst [vmem:[#allocation151_spill] sm:$0xff] %v11177_v54  ;;  %v11189_v26 = vmul.f32 %v8545_v1, %v10994_v17  ;;  %v8546_v30 = vld [vmem:[#allocation6 + $0x180] sm:$0xff]  ;;  %v8547_v54 = vld [vmem:[#allocation6 + $0x190] sm:$0xff] }
 0x273   :  { %13858 = vst [vmem:[#allocation153_spill] sm:$0xff] %v11183_v57  ;;  %13859 = vst [vmem:[#allocation154_spill] sm:$0xff] %v11186_v9  ;;  %v11192_v51 = vmul.f32 %v8546_v30, %v10994_v17  ;;  %v11195_v44 = vmul.f32 %v8547_v54, %v10994_v17  ;;  %v11198_v57 = vmul.f32 %v8548_v11, %v10994_v17  ;;  %v8549_v32 = vld [vmem:[#allocation6 + $0x198] sm:$0xff]  ;;  %v8550_v1 = vld [vmem:[#allocation6 + $0x1a0] sm:$0xff] }
 0x274   :  { %13860 = vst [vmem:[#allocation155_spill] sm:$0xff] %v11189_v26  ;;  %v11201_v9 = vmul.f32 %v8549_v32, %v10994_v17  ;;  %v11204_v26 = vmul.f32 %v8550_v1, %v10994_v17  ;;  %v8551_v30 = vld [vmem:[#allocation6 + $0x1b0] sm:$0xff]  ;;  %v8552_v11 = vld [vmem:[#allocation6 + $0x1a8] sm:$0xff]  ;;  %v8553_v32 = vld [vmem:[#allocation6 + $0x1b8] sm:$0xff] }
 0x275   :  { %13861 = vst [vmem:[#allocation156_spill] sm:$0xff] %v11192_v51  ;;  %13862 = vst [vmem:[#allocation157_spill] sm:$0xff] %v11195_v44  ;;  %v11207_v51 = vmul.f32 %v8551_v30, %v10994_v17  ;;  %v8554_v30 = vld [vmem:[#allocation6 + $0x1c0] sm:$0xff] }
 0x276   :  { %13863 = vst [vmem:[#allocation158_spill] sm:$0xff] %v11198_v57  ;;  %13864 = vst [vmem:[#allocation159_spill] sm:$0xff] %v11201_v9  ;;  %v11212_v57 = vmul.f32 %v8552_v11, %v10994_v17  ;;  %v11215_v9 = vmul.f32 %v8553_v32, %v10994_v17 }
 0x277   :  { %13865 = vst [vmem:[#allocation160_spill] sm:$0xff] %v11204_v26  ;;  %13866 = vst [vmem:[#allocation161_spill] sm:$0xff] %v11207_v51  ;;  %v11220_v51 = vmul.f32 %v8554_v30, %v10994_v17 }
 0x278   :  { %13867 = vst [vmem:[#allocation162_spill] sm:$0xff] %v11212_v57  ;;  %13868 = vst [vmem:[#allocation163_spill] sm:$0xff] %v11215_v9  ;;  %v8556_v57 = vld [vmem:[#allocation6 + $0x1c8] sm:$0xff]  ;;  %v8557_v9 = vld [vmem:[#allocation6 + $0x1d8] sm:$0xff] }
 0x279   :  { %13869 = vst [vmem:[#allocation164_spill] sm:$0xff] %v11220_v51  ;;  %v11228_v32 = vmul.f32 %v8556_v57, %v10994_v17 }
 0x27b   :  { %13871 = vst [vmem:[#allocation166_spill] sm:$0xff] %v11228_v32 }
 0x2e7   :  { %v3853_v50 = vpop.f32.mrb[32].mxu0  ;;  %v4014_v53 = vpop.f32.mrb[32].mxu1 }
 0x2e8   :  { %v4113_v54 = vmul.f32 %v11041_v10, %v3853_v50  ;;  %v4115_v44 = vmul.f32 %v11041_v10, %v4014_v53  ;;  %v3855_v28 = vpop.f32.mrb[33].mxu0  ;;  %v4016_v27 = vpop.f32.mrb[33].mxu1  ;;  %v8555_v50 = vld [vmem:[#allocation6 + $0x1d0] sm:$0xff] }
 0x2e9   :  { %v4114_v1 = vmul.f32 %v11041_v10, %v3855_v28  ;;  %v4116_v26 = vmul.f32 %v11041_v10, %v4016_v27  ;;  %v11223_v53 = vmul.f32 %v8555_v50, %v10994_v17  ;;  %v11231_v28 = vmul.f32 %v8557_v9, %v10994_v17  ;;  %v8558_v50 = vld [vmem:[#allocation6 + $0x1e0] sm:$0xff] }
 0x2ea   :  { %v4242_v42 = vadd.f32 %v10783_v15, %v4113_v54  ;;  %v4244_v11 = vadd.f32 %v10787_v37, %v4115_v44  ;;  %v8559_v15 = vld [vmem:[#allocation6 + $0x1f0] sm:$0xff] }
 0x2eb   :  { %13870 = vst [vmem:[#allocation165_spill] sm:$0xff] %v11223_v53  ;;  %13872 = vst [vmem:[#allocation167_spill] sm:$0xff] %v11231_v28  ;;  %v4243_v27 = vadd.f32 %v10791_v60, %v4114_v1  ;;  %v4245_v30 = vadd.f32 %v10795_v3, %v4116_v26  ;;  %v3859_v51 = vpop.f32.mrb[34].mxu0  ;;  %v4020_v39 = vpop.f32.mrb[34].mxu1  ;;  %v11236_v53 = vmul.f32 %v8558_v50, %v10994_v17 }
 0x2ec   :  { %v11239_v37 = vmul.f32 %v8559_v15, %v10994_v17  ;;  %v11242_v57 = vadd.f32 %v11044_v46, %v4242_v42  ;;  %v11245_v9 = vadd.f32 %v11047_v36, %v4244_v11  ;;  %v4117_v60 = vmul.f32 %v11041_v10, %v3859_v51  ;;  %v3861_v26 = vpop.f32.mrb[35].mxu0  ;;  %v4022_v44 = vpop.f32.mrb[35].mxu1  ;;  %v8560_v11 = vld [vmem:[#allocation6 + $0x1e8] sm:$0xff] }
 0x2ed   :  { %13873 = vst [vmem:[#allocation168_spill] sm:$0xff] %v11236_v53  ;;  %v4119_v3 = vmul.f32 %v11041_v10, %v4020_v39  ;;  %v11250_v54 = vadd.f32 %v11054_v34, %v4243_v27  ;;  %v11253_v1 = vadd.f32 %v11057_v7, %v4245_v30  ;;  %v4118_v50 = vmul.f32 %v11041_v10, %v3861_v26  ;;  %v8561_v39 = vld [vmem:[#allocation6 + $0x1f8] sm:$0xff] }
 0x2ee   :  { %13874 = vst [vmem:[#allocation169_spill] sm:$0xff] %v11239_v37  ;;  %13875 = vst [vmem:[#allocation170_spill] sm:$0xff] %v11242_v57  ;;  %v4120_v42 = vmul.f32 %v11041_v10, %v4022_v44  ;;  %v4246_v46 = vadd.f32 %v10799_v20, %v4117_v60  ;;  %v11260_v51 = vmul.f32 %v8560_v11, %v10994_v17 }
 0x2ef   :  { %13876 = vst [vmem:[#allocation171_spill] sm:$0xff] %v11245_v9  ;;  %13877 = vst [vmem:[#allocation172_spill] sm:$0xff] %v11250_v54  ;;  %v4248_v36 = vadd.f32 %v10803_v59, %v4119_v3  ;;  %v11263_v15 = vmul.f32 %v8561_v39, %v10994_v17  ;;  %v4499_v34 = vcombine.low %v11242_v57, %v11250_v54  ;;  %v3865_v20 = vpop.f32.mrb[36].mxu0  ;;  %v4026_v30 = vpop.f32.mrb[36].mxu1 }
 0x2f0   :  { %13878 = vst [vmem:[#allocation173_spill] sm:$0xff] %v11253_v1  ;;  %13879 = vst [vmem:[#allocation174_spill] sm:$0xff] %v11260_v51  ;;  %v4500_v7 = vcombine.high %v11242_v57, %v11250_v54  ;;  %v4501_v27 = vcombine.low %v11245_v9, %v11253_v1  ;;  %v4502_v59 = vcombine.high %v11245_v9, %v11253_v1  ;;  %v3867_v44 = vpop.f32.mrb[37].mxu0  ;;  %v4028_v11 = vpop.f32.mrb[37].mxu1 }
 0x2f1   :  { %13880 = vst [vmem:[#allocation175_spill] sm:$0xff] %v11263_v15  ;;  %v11274_v60 = vadd.f32 %v11060_v31, %v4246_v46  ;;  %v11277_v17 = vadd.f32 %v11063_v12, %v4248_v36  ;;  %v4247_v3 = vadd.f32 %v10807_v61, %v4118_v50  ;;  %v4249_v26 = vadd.f32 %v10811_v55, %v4120_v42 }
 0x2f2   :  { %v4509_v39 = vrot.slane %v4499_v34, %v8730_v13  ;;  %v4516_v15 = vrot.slane %v4500_v7, %v8730_v13  ;;  %v4523_v51 = vrot.slane %v4501_v27, %v8730_v13  ;;  %v4530_v37 = vrot.slane %v4502_v59, %v8730_v13 }
 0x2f3   :  { %13881 = vst [vmem:[#allocation176_spill] sm:$0xff] %v11274_v60  ;;  %13882 = vst [vmem:[#allocation177_spill] sm:$0xff] %v11277_v17  ;;  %v11286_v31 = vadd.f32 %v11066_v25, %v4247_v3  ;;  %v11289_v12 = vadd.f32 %v11069_v5, %v4249_v26  ;;  %v4121_v61 = vmul.f32 %v11041_v10, %v3865_v20  ;;  %v3871_v34 = vpop.f32.mrb[38].mxu0  ;;  %v4032_v7 = vpop.f32.mrb[38].mxu1 }
 0x2f4   :  { %v4123_v55 = vmul.f32 %v11041_v10, %v4026_v30  ;;  %v4531_v50 = vcombine.low %v4509_v39, %v4523_v51  ;;  %v4532_v42 = vcombine.high %v4509_v39, %v4523_v51  ;;  %v4533_v46 = vcombine.low %v4516_v15, %v4530_v37  ;;  %v3873_v20 = vpop.f32.mrb[39].mxu0  ;;  %v4034_v30 = vpop.f32.mrb[39].mxu1 }
 0x2f5   :  { %13883 = vst [vmem:[#allocation178_spill] sm:$0xff] %v11286_v31  ;;  %13884 = vst [vmem:[#allocation179_spill] sm:$0xff] %v11289_v12  ;;  %v4534_v36 = vcombine.high %v4516_v15, %v4530_v37  ;;  %v4567_v27 = vcombine.low %v11274_v60, %v11286_v31  ;;  %v4568_v25 = vcombine.high %v11274_v60, %v11286_v31 }
 0x2f6   :  { %v4569_v5 = vcombine.low %v11277_v17, %v11289_v12  ;;  %v4570_v59 = vcombine.high %v11277_v17, %v11289_v12  ;;  %v4541_v51 = vrot.slane %v4531_v50, %v8730_v13  ;;  %v4548_v37 = vrot.slane %v4533_v46, %v8730_v13 }
 0x2f7   :  { %v4555_v15 = vrot.slane %v4532_v42, %v8730_v13  ;;  %v4562_v3 = vrot.slane %v4534_v36, %v8730_v13  ;;  %v4577_v26 = vrot.slane %v4567_v27, %v8730_v13  ;;  %v4584_v39 = vrot.slane %v4568_v25, %v8730_v13  ;;  %v11317_v50 = vpop.f32.mrb[40].mxu0  ;;  %v11319_v42 = vpop.f32.mrb[40].mxu1 }
 0x2f8   :  { %v4591_v53 = vrot.slane %v4569_v5, %v8730_v13  ;;  %v4598_v28 = vrot.slane %v4570_v59, %v8730_v13  ;;  %v4563_v32 = vcombine.high %v4541_v51, %v4541_v51  ;;  %v4564_v14 = vcombine.high %v4548_v37, %v4548_v37  ;;  %5716 = vst.msk [vmem:[#allocation9 + $0x2] ss:$4 sm:$0xf] %vm8752_vm0, %v4541_v51  ;;  %v11321_v5 = vpop.f32.mrb[41].mxu0  ;;  %v11323_v59 = vpop.f32.mrb[41].mxu1 }
 0x2f9   :  { %v4565_v22 = vcombine.high %v4555_v15, %v4555_v15  ;;  %v4566_v63 = vcombine.high %v4562_v3, %v4562_v3  ;;  %5718 = vst.msk [vmem:[#allocation9 + $0x12] ss:$4 sm:$0xf] %vm8752_vm0, %v4555_v15  ;;  %5724 = vst.msk [vmem:[#allocation9 + $0x42] ss:$4 sm:$0xf] %vm8752_vm0, %v4548_v37  ;;  %v4122_v51 = vmul.f32 %v11041_v10, %v3867_v44 }
 0x2fa   :  { %5726 = vst.msk [vmem:[#allocation9 + $0x52] ss:$4 sm:$0xf] %vm8752_vm0, %v4562_v3  ;;  %v4599_v46 = vcombine.low %v4577_v26, %v4591_v53  ;;  %v4600_v36 = vcombine.high %v4577_v26, %v4591_v53  ;;  %v4601_v27 = vcombine.low %v4584_v39, %v4598_v28  ;;  %v4602_v25 = vcombine.high %v4584_v39, %v4598_v28 }
 0x2fb   :  { %5720 = vst.msk [vmem:[#allocation9 + $0x22] ss:$4 sm:$0xf] %vm8752_vm0, %v4563_v32  ;;  %5722 = vst.msk [vmem:[#allocation9 + $0x32] ss:$4 sm:$0xf] %vm8752_vm0, %v4565_v22  ;;  %v4250_v53 = vadd.f32 %v10815_v38, %v4121_v61  ;;  %v4252_v28 = vadd.f32 %v10819_v24, %v4123_v55  ;;  %v4124_v37 = vmul.f32 %v11041_v10, %v4028_v11 }
 0x2fc   :  { %5728 = vst.msk [vmem:[#allocation9 + $0x62] ss:$4 sm:$0xf] %vm8752_vm0, %v4564_v14  ;;  %5730 = vst.msk [vmem:[#allocation9 + $0x72] ss:$4 sm:$0xf] %vm8752_vm0, %v4566_v63  ;;  %v4609_v15 = vrot.slane %v4599_v46, %v8730_v13  ;;  %v4616_v32 = vrot.slane %v4601_v27, %v8730_v13  ;;  %v4623_v22 = vrot.slane %v4600_v36, %v8730_v13 }
 0x2fd   :  { %v4630_v3 = vrot.slane %v4602_v25, %v8730_v13  ;;  %v11342_v14 = vadd.f32 %v11072_v40, %v4250_v53  ;;  %v11345_v63 = vadd.f32 %v11075_v19, %v4252_v28  ;;  %v4251_v24 = vadd.f32 %v10823_v41, %v4122_v51  ;;  %v11349_v44 = vpop.f32.mrb[42].mxu0  ;;  %v11351_v11 = vpop.f32.mrb[42].mxu1 }
 0x2fe   :  { %v4253_v38 = vadd.f32 %v10827_v8, %v4124_v37  ;;  %v4631_v61 = vcombine.high %v4609_v15, %v4609_v15  ;;  %v4632_v55 = vcombine.high %v4616_v32, %v4616_v32  ;;  %v4633_v26 = vcombine.high %v4623_v22, %v4623_v22  ;;  %5732 = vst.msk [vmem:[#allocation9 + $0x82] ss:$4 sm:$0xf] %vm8752_vm0, %v4609_v15  ;;  %v11361_v8 = vpop.f32.mrb[43].mxu0  ;;  %v11363_v41 = vpop.f32.mrb[43].mxu1  ;;  %v13889_v37 = vld [vmem:[#allocation51_spill] sm:$0xff] }
 0x2ff   :  { %13885 = vst [vmem:[#allocation180_spill] sm:$0xff] %v11342_v14  ;;  %13886 = vst [vmem:[#allocation181_spill] sm:$0xff] %v11345_v63  ;;  %v4634_v39 = vcombine.high %v4630_v3, %v4630_v3  ;;  %v11366_v40 = vadd.f32 %v11078_v62, %v4251_v24  ;;  %v4125_v46 = vmul.f32 %v11041_v10, %v3871_v34  ;;  %v11395_v28 = vpop.f32.mrb[44].mxu0 }
 0x300   :  { %5734 = vst.msk [vmem:[#allocation9 + $0x92] ss:$4 sm:$0xf] %vm8752_vm0, %v4623_v22  ;;  %5740 = vst.msk [vmem:[#allocation9 + $0xc2] ss:$4 sm:$0xf] %vm8752_vm0, %v4616_v32  ;;  %v11369_v19 = vadd.f32 %v11081_v35, %v4253_v38  ;;  %v4127_v36 = vmul.f32 %v11041_v10, %v4032_v7  ;;  %v4126_v62 = vmul.f32 %v11041_v10, %v3873_v20 }
 0x301   :  { %5742 = vst.msk [vmem:[#allocation9 + $0xd2] ss:$4 sm:$0xf] %vm8752_vm0, %v4630_v3  ;;  %13887 = vst [vmem:[#allocation182_spill] sm:$0xff] %v11366_v40  ;;  %v4128_v35 = vmul.f32 %v11041_v10, %v4034_v30  ;;  %v8316_v34 = vpack.c.bf16 %v11286_v31, %v11250_v54  ;;  %v8348_v7 = vpack.c.bf16 %v11289_v12, %v11253_v1  ;;  %v11397_v30 = vpop.f32.mrb[44].mxu1  ;;  %v13890_v22 = vld [vmem:[#allocation52_spill] sm:$0xff] }
 0x302   :  { %13888 = vst [vmem:[#allocation183_spill] sm:$0xff] %v11369_v19  ;;  %5736 = vst.msk [vmem:[#allocation9 + $0xa2] ss:$4 sm:$0xf] %vm8752_vm0, %v4631_v61  ;;  %v4635_v27 = vcombine.low %v11342_v14, %v11366_v40  ;;  %v4636_v25 = vcombine.high %v11342_v14, %v11366_v40  ;;  %v4637_v53 = vcombine.low %v11345_v63, %v11369_v19  ;;  %v11403_v24 = vpop.f32.mrb[45].mxu0  ;;  %v11405_v38 = vpop.f32.mrb[45].mxu1 }
 0x303   :  { %5738 = vst.msk [vmem:[#allocation9 + $0xb2] ss:$4 sm:$0xf] %vm8752_vm0, %v4633_v26  ;;  %5744 = vst.msk [vmem:[#allocation9 + $0xe2] ss:$4 sm:$0xf] %vm8752_vm0, %v4632_v55  ;;  %v4638_v20 = vcombine.high %v11345_v63, %v11369_v19  ;;  %v4254_v51 = vadd.f32 %v10831_v0, %v4125_v46  ;;  %v4256_v15 = vadd.f32 %v13889_v37, %v4127_v36  ;;  %8317 = vmatprep.subr.bf16.mxu0 %v8316_v34 }
 0x304   :  { %5746 = vst.msk [vmem:[#allocation9 + $0xf2] ss:$4 sm:$0xf] %vm8752_vm0, %v4634_v39  ;;  %v4255_v32 = vadd.f32 %v10839_v23, %v4126_v62  ;;  %v4257_v3 = vadd.f32 %v13890_v22, %v4128_v35  ;;  %v4645_v61 = vrot.slane %v4635_v27, %v8730_v13  ;;  %v4652_v55 = vrot.slane %v4636_v25, %v8730_v13  ;;  %v11423_v25 = vpop.f32.mrb[46].mxu0 }
 0x305   :  { %v4659_v26 = vrot.slane %v4637_v53, %v8730_v13  ;;  %v4666_v39 = vrot.slane %v4638_v20, %v8730_v13  ;;  %8349 = vmatprep.subr.bf16.mxu1 %v8348_v7  ;;  %v11412_v0 = vadd.f32 %v11084_v21, %v4254_v51  ;;  %v11415_v23 = vadd.f32 %v11087_v58, %v4256_v15  ;;  %v11425_v53 = vpop.f32.mrb[46].mxu1  ;;  %v11435_v7 = vpop.f32.mrb[47].mxu0 }
 0x306   :  { %v11418_v46 = vadd.f32 %v11090_v4, %v4255_v32  ;;  %v11421_v36 = vadd.f32 %v11093_v16, %v4257_v3  ;;  %v11437_v20 = vpop.f32.mrb[47].mxu1 }
 0x307   :  { %13891 = vst [vmem:[#allocation51_spill] sm:$0xff] %v11412_v0  ;;  %13892 = vst [vmem:[#allocation52_spill] sm:$0xff] %v11415_v23  ;;  %v4667_v62 = vcombine.low %v4645_v61, %v4659_v26  ;;  %v4668_v35 = vcombine.high %v4645_v61, %v4659_v26  ;;  %v4669_v34 = vcombine.low %v4652_v55, %v4666_v39 }
 0x308   :  { %13893 = vst [vmem:[#allocation184_spill] sm:$0xff] %v11418_v46  ;;  %13894 = vst [vmem:[#allocation185_spill] sm:$0xff] %v11421_v36  ;;  %v4670_v27 = vcombine.high %v4652_v55, %v4666_v39  ;;  %v4703_v21 = vcombine.low %v11412_v0, %v11418_v46  ;;  %v4704_v58 = vcombine.high %v11412_v0, %v11418_v46 }
 0x309   :  { %v4705_v4 = vcombine.low %v11415_v23, %v11421_v36  ;;  %v4706_v16 = vcombine.high %v11415_v23, %v11421_v36  ;;  %v4677_v51 = vrot.slane %v4667_v62, %v8730_v13  ;;  %v4684_v37 = vrot.slane %v4669_v34, %v8730_v13  ;;  %v11455_v62 = vpop.f32.mrb[48].mxu0 }
 0x30a   :  { %v4691_v15 = vrot.slane %v4668_v35, %v8730_v13  ;;  %v4698_v32 = vrot.slane %v4670_v27, %v8730_v13  ;;  %v4713_v22 = vrot.slane %v4703_v21, %v8730_v13  ;;  %v4720_v3 = vrot.slane %v4704_v58, %v8730_v13  ;;  %v11457_v35 = vpop.f32.mrb[48].mxu1 }
 0x30b   :  { %v4727_v61 = vrot.slane %v4705_v4, %v8730_v13  ;;  %v4734_v55 = vrot.slane %v4706_v16, %v8730_v13  ;;  %v4699_v26 = vcombine.high %v4677_v51, %v4677_v51  ;;  %v4700_v39 = vcombine.high %v4684_v37, %v4684_v37  ;;  %5748 = vst.msk [vmem:[#allocation9 + $0x102] ss:$4 sm:$0xf] %vm8752_vm0, %v4677_v51  ;;  %v11459_v4 = vpop.f32.mrb[49].mxu0  ;;  %v11461_v16 = vpop.f32.mrb[49].mxu1 }
 0x30c   :  { %v4701_v12 = vcombine.high %v4691_v15, %v4691_v15  ;;  %v4702_v31 = vcombine.high %v4698_v32, %v4698_v32  ;;  %5750 = vst.msk [vmem:[#allocation9 + $0x112] ss:$4 sm:$0xf] %vm8752_vm0, %v4691_v15  ;;  %5756 = vst.msk [vmem:[#allocation9 + $0x142] ss:$4 sm:$0xf] %vm8752_vm0, %v4684_v37  ;;  %v8318_v51 = vpack.c.bf16 %v11274_v60, %v11242_v57 }
 0x30d   :  { %5758 = vst.msk [vmem:[#allocation9 + $0x152] ss:$4 sm:$0xf] %vm8752_vm0, %v4698_v32  ;;  %v4735_v34 = vcombine.low %v4713_v22, %v4727_v61  ;;  %v4736_v27 = vcombine.high %v4713_v22, %v4727_v61  ;;  %v4737_v21 = vcombine.low %v4720_v3, %v4734_v55  ;;  %v4738_v58 = vcombine.high %v4720_v3, %v4734_v55  ;;  %v13895_v61 = vld [vmem:[#allocation88_spill] sm:$0xff] }
 0x30e   :  { %5752 = vst.msk [vmem:[#allocation9 + $0x122] ss:$4 sm:$0xf] %vm8752_vm0, %v4699_v26  ;;  %5754 = vst.msk [vmem:[#allocation9 + $0x132] ss:$4 sm:$0xf] %vm8752_vm0, %v4701_v12  ;;  %v8350_v37 = vpack.c.bf16 %v11277_v17, %v11245_v9  ;;  %v4129_v15 = vmul.f32 %v11041_v10, %v11317_v50  ;;  %v4131_v32 = vmul.f32 %v11041_v10, %v11319_v42  ;;  %8319 = vmatpush1.bf16.msra.mxu0 %v8318_v51 }
 0x30f   :  { %5760 = vst.msk [vmem:[#allocation9 + $0x162] ss:$4 sm:$0xf] %vm8752_vm0, %v4700_v39  ;;  %5762 = vst.msk [vmem:[#allocation9 + $0x172] ss:$4 sm:$0xf] %vm8752_vm0, %v4702_v31  ;;  %v4745_v12 = vrot.slane %v4735_v34, %v8730_v13  ;;  %v4752_v22 = vrot.slane %v4737_v21, %v8730_v13  ;;  %v4759_v3 = vrot.slane %v4736_v27, %v8730_v13 }
 0x310   :  { %v4766_v31 = vrot.slane %v4738_v58, %v8730_v13  ;;  %8351 = vmatpush1.bf16.msra.mxu1 %v8350_v37  ;;  %v4258_v55 = vadd.f32 %v13895_v61, %v4129_v15  ;;  %v13896_v26 = vld [vmem:[#allocation53_spill] sm:$0xff]  ;;  %v4130_v50 = vmul.f32 %v11041_v10, %v11321_v5  ;;  %v11487_v17 = vpop.f32.mrb[50].mxu0  ;;  %v11489_v42 = vpop.f32.mrb[50].mxu1  ;;  %v13897_v37 = vld [vmem:[#allocation54_spill] sm:$0xff] }
 0x311   :  { %v4260_v39 = vadd.f32 %v13896_v26, %v4131_v32  ;;  %v4767_v34 = vcombine.high %v4745_v12, %v4745_v12  ;;  %v4768_v60 = vcombine.high %v4752_v22, %v4752_v22  ;;  %v4769_v21 = vcombine.high %v4759_v3, %v4759_v3  ;;  %5764 = vst.msk [vmem:[#allocation9 + $0x182] ss:$4 sm:$0xf] %vm8752_vm0, %v4745_v12  ;;  %v11499_v5 = vpop.f32.mrb[51].mxu0  ;;  %v11501_v27 = vpop.f32.mrb[51].mxu1 }
 0x312   :  { %v4770_v1 = vcombine.high %v4766_v31, %v4766_v31  ;;  %5766 = vst.msk [vmem:[#allocation9 + $0x192] ss:$4 sm:$0xf] %vm8752_vm0, %v4759_v3  ;;  %5772 = vst.msk [vmem:[#allocation9 + $0x1c2] ss:$4 sm:$0xf] %vm8752_vm0, %v4752_v22  ;;  %v11504_v58 = vadd.f32 %v11096_v2, %v4258_v55  ;;  %v4259_v15 = vadd.f32 %v13897_v37, %v4130_v50 }
 0x313   :  { %5774 = vst.msk [vmem:[#allocation9 + $0x1d2] ss:$4 sm:$0xf] %vm8752_vm0, %v4766_v31  ;;  %v11507_v51 = vadd.f32 %v11099_v48, %v4260_v39  ;;  %v4132_v32 = vmul.f32 %v11041_v10, %v11323_v59  ;;  %5768 = vst.msk [vmem:[#allocation9 + $0x1a2] ss:$4 sm:$0xf] %vm8752_vm0, %v4767_v34  ;;  %v4133_v2 = vmul.f32 %v11041_v10, %v11349_v44 }
 0x314   :  { %5770 = vst.msk [vmem:[#allocation9 + $0x1b2] ss:$4 sm:$0xf] %vm8752_vm0, %v4769_v21  ;;  %5776 = vst.msk [vmem:[#allocation9 + $0x1e2] ss:$4 sm:$0xf] %vm8752_vm0, %v4768_v60  ;;  %v4135_v48 = vmul.f32 %v11041_v10, %v11351_v11  ;;  %v4134_v59 = vmul.f32 %v11041_v10, %v11361_v8  ;;  %v4136_v12 = vmul.f32 %v11041_v10, %v11363_v41 }
 0x315   :  { %5778 = vst.msk [vmem:[#allocation9 + $0x1f2] ss:$4 sm:$0xf] %vm8752_vm0, %v4770_v1  ;;  %v11529_v22 = vadd.f32 %v11102_v45, %v4259_v15  ;;  %v4261_v60 = vadd.f32 %v10859_v56, %v4132_v32  ;;  %v8320_v1 = vpack.c.bf16 %v11418_v46, %v11366_v40  ;;  %v8352_v44 = vpack.c.bf16 %v11421_v36, %v11369_v19  ;;  %v11536_v3 = vpop.f32.mrb[52].mxu0  ;;  %v11538_v11 = vpop.f32.mrb[52].mxu1  ;;  %v13899_v50 = vld [vmem:[#allocation131_spill] sm:$0xff] }
 0x316   :  { %v4262_v8 = vadd.f32 %v10865_v52, %v4133_v2  ;;  %v4264_v31 = vadd.f32 %v10869_v18, %v4135_v48  ;;  %v4263_v41 = vadd.f32 %v10873_v6, %v4134_v59  ;;  %v4265_v45 = vadd.f32 %v10877_v43, %v4136_v12  ;;  %v11544_v61 = vpop.f32.mrb[53].mxu0  ;;  %v11546_v56 = vpop.f32.mrb[53].mxu1  ;;  %v13898_v43 = vld [vmem:[#allocation130_spill] sm:$0xff] }
 0x317   :  { %v4771_v55 = vcombine.low %v11504_v58, %v11529_v22  ;;  %v4772_v26 = vcombine.high %v11504_v58, %v11529_v22  ;;  %v11553_v39 = vadd.f32 %v11105_v33, %v4261_v60  ;;  %8321 = vmatprep.subr.bf16.mxu0 %v8320_v1  ;;  %8353 = vmatprep.subr.bf16.mxu1 %v8352_v44  ;;  %v11573_v15 = vpop.f32.mrb[54].mxu0 }
 0x318   :  { %v11556_v52 = vadd.f32 %v11108_v49, %v4262_v8  ;;  %v11559_v6 = vadd.f32 %v11111_v29, %v4264_v31  ;;  %v11562_v18 = vadd.f32 %v13898_v43, %v4263_v41  ;;  %v11565_v34 = vadd.f32 %v13899_v50, %v4265_v45  ;;  %v11575_v29 = vpop.f32.mrb[54].mxu1  ;;  %v11585_v12 = vpop.f32.mrb[55].mxu0 }
 0x319   :  { %v4781_v21 = vrot.slane %v4771_v55, %v8730_v13  ;;  %v4788_v37 = vrot.slane %v4772_v26, %v8730_v13  ;;  %v4773_v33 = vcombine.low %v11507_v51, %v11553_v39  ;;  %v4774_v49 = vcombine.high %v11507_v51, %v11553_v39  ;;  %v11587_v60 = vpop.f32.mrb[55].mxu1 }
 0x31a   :  { %v4839_v32 = vcombine.low %v11556_v52, %v11562_v18  ;;  %v4840_v2 = vcombine.high %v11556_v52, %v11562_v18  ;;  %v4841_v48 = vcombine.low %v11559_v6, %v11565_v34  ;;  %v4842_v59 = vcombine.high %v11559_v6, %v11565_v34  ;;  %v11601_v46 = vpop.f32.mrb[56].mxu1 }
 0x31b   :  { %v4795_v1 = vrot.slane %v4773_v33, %v8730_v13  ;;  %v4802_v44 = vrot.slane %v4774_v49, %v8730_v13  ;;  %v8322_v8 = vpack.c.bf16 %v11412_v0, %v11342_v14  ;;  %v8354_v31 = vpack.c.bf16 %v11415_v23, %v11345_v63  ;;  %v11599_v49 = vpop.f32.mrb[56].mxu0  ;;  %v13910_v14 = vld [vmem:[#allocation97_spill] sm:$0xff] }
 0x31c   :  { %v4849_v41 = vrot.slane %v4839_v32, %v8730_v13  ;;  %v4856_v45 = vrot.slane %v4840_v2, %v8730_v13  ;;  %v4863_v55 = vrot.slane %v4841_v48, %v8730_v13  ;;  %v4870_v26 = vrot.slane %v4842_v59, %v8730_v13  ;;  %v11603_v32 = vpop.f32.mrb[57].mxu0  ;;  %v11605_v2 = vpop.f32.mrb[57].mxu1 }
 0x31d   :  { %v4803_v43 = vcombine.low %v4781_v21, %v4795_v1  ;;  %v4804_v50 = vcombine.high %v4781_v21, %v4795_v1  ;;  %v4805_v36 = vcombine.low %v4788_v37, %v4802_v44  ;;  %v4806_v33 = vcombine.high %v4788_v37, %v4802_v44  ;;  %8323 = vmatpush1.bf16.msra.mxu0 %v8322_v8 }
 0x31e   :  { %v4871_v0 = vcombine.low %v4849_v41, %v4863_v55  ;;  %v4872_v19 = vcombine.high %v4849_v41, %v4863_v55  ;;  %v4873_v23 = vcombine.low %v4856_v45, %v4870_v26  ;;  %v4874_v40 = vcombine.high %v4856_v45, %v4870_v26  ;;  %8355 = vmatpush1.bf16.msra.mxu1 %v8354_v31 }
 0x31f   :  { %v4813_v48 = vrot.slane %v4803_v43, %v8730_v13  ;;  %v4820_v21 = vrot.slane %v4805_v36, %v8730_v13  ;;  %v4827_v37 = vrot.slane %v4804_v50, %v8730_v13  ;;  %v4834_v59 = vrot.slane %v4806_v33, %v8730_v13 }
 0x320   :  { %v4881_v1 = vrot.slane %v4871_v0, %v8730_v13  ;;  %v4888_v44 = vrot.slane %v4873_v23, %v8730_v13  ;;  %v4895_v8 = vrot.slane %v4872_v19, %v8730_v13  ;;  %v4902_v31 = vrot.slane %v4874_v40, %v8730_v13  ;;  %v11623_v0 = vpop.f32.mrb[58].mxu0  ;;  %v11625_v19 = vpop.f32.mrb[58].mxu1 }
 0x321   :  { %v4835_v41 = vcombine.high %v4813_v48, %v4813_v48  ;;  %v4836_v45 = vcombine.high %v4820_v21, %v4820_v21  ;;  %v4837_v55 = vcombine.high %v4827_v37, %v4827_v37  ;;  %v4838_v26 = vcombine.high %v4834_v59, %v4834_v59  ;;  %5780 = vst.msk [vmem:[#allocation9 + $0x202] ss:$4 sm:$0xf] %vm8752_vm0, %v4813_v48  ;;  %v11635_v50 = vpop.f32.mrb[59].mxu0  ;;  %v11637_v33 = vpop.f32.mrb[59].mxu1 }
 0x322   :  { %5782 = vst.msk [vmem:[#allocation9 + $0x212] ss:$4 sm:$0xf] %vm8752_vm0, %v4827_v37  ;;  %5788 = vst.msk [vmem:[#allocation9 + $0x242] ss:$4 sm:$0xf] %vm8752_vm0, %v4820_v21  ;;  %v4903_v40 = vcombine.high %v4881_v1, %v4881_v1  ;;  %v4904_v23 = vcombine.high %v4888_v44, %v4888_v44  ;;  %v4905_v36 = vcombine.high %v4895_v8, %v4895_v8 }
 0x323   :  { %5790 = vst.msk [vmem:[#allocation9 + $0x252] ss:$4 sm:$0xf] %vm8752_vm0, %v4834_v59  ;;  %v4906_v43 = vcombine.high %v4902_v31, %v4902_v31  ;;  %5796 = vst.msk [vmem:[#allocation9 + $0x282] ss:$4 sm:$0xf] %vm8752_vm0, %v4881_v1  ;;  %v4137_v48 = vmul.f32 %v11041_v10, %v11395_v28  ;;  %v4139_v21 = vmul.f32 %v11041_v10, %v11397_v30 }
 0x324   :  { %5798 = vst.msk [vmem:[#allocation9 + $0x292] ss:$4 sm:$0xf] %vm8752_vm0, %v4895_v8  ;;  %5804 = vst.msk [vmem:[#allocation9 + $0x2c2] ss:$4 sm:$0xf] %vm8752_vm0, %v4888_v44  ;;  %v4138_v37 = vmul.f32 %v11041_v10, %v11403_v24  ;;  %v4140_v59 = vmul.f32 %v11041_v10, %v11405_v38  ;;  %v4141_v28 = vmul.f32 %v11041_v10, %v11423_v25 }
 0x325   :  { %5806 = vst.msk [vmem:[#allocation9 + $0x2d2] ss:$4 sm:$0xf] %vm8752_vm0, %v4902_v31  ;;  %13900 = vst [vmem:[#allocation88_spill] sm:$0xff] %v11637_v33  ;;  %v4143_v30 = vmul.f32 %v11041_v10, %v11425_v53  ;;  %v4142_v24 = vmul.f32 %v11041_v10, %v11435_v7  ;;  %v4144_v38 = vmul.f32 %v11041_v10, %v11437_v20  ;;  %v13901_v1 = vld [vmem:[#allocation55_spill] sm:$0xff]  ;;  %v13902_v8 = vld [vmem:[#allocation57_spill] sm:$0xff] }
 0x326   :  { %5784 = vst.msk [vmem:[#allocation9 + $0x222] ss:$4 sm:$0xf] %vm8752_vm0, %v4835_v41  ;;  %5786 = vst.msk [vmem:[#allocation9 + $0x232] ss:$4 sm:$0xf] %vm8752_vm0, %v4837_v55  ;;  %v4266_v44 = vadd.f32 %v13901_v1, %v4137_v48  ;;  %v4268_v31 = vadd.f32 %v13902_v8, %v4139_v21 }
 0x327   :  { %5792 = vst.msk [vmem:[#allocation9 + $0x262] ss:$4 sm:$0xf] %vm8752_vm0, %v4836_v45  ;;  %5794 = vst.msk [vmem:[#allocation9 + $0x272] ss:$4 sm:$0xf] %vm8752_vm0, %v4838_v26  ;;  %v4273_v20 = vadd.f32 %v13910_v14, %v4144_v38 }
 0x328   :  { %5800 = vst.msk [vmem:[#allocation9 + $0x2a2] ss:$4 sm:$0xf] %vm8752_vm0, %v4903_v40  ;;  %5802 = vst.msk [vmem:[#allocation9 + $0x2b2] ss:$4 sm:$0xf] %vm8752_vm0, %v4905_v36 }
 0x329   :  { %5808 = vst.msk [vmem:[#allocation9 + $0x2e2] ss:$4 sm:$0xf] %vm8752_vm0, %v4904_v23  ;;  %5810 = vst.msk [vmem:[#allocation9 + $0x2f2] ss:$4 sm:$0xf] %vm8752_vm0, %v4906_v43 }
 0x32a   :  { %v13903_v41 = vld [vmem:[#allocation61_spill] sm:$0xff]  ;;  %v11675_v40 = vpop.f32.mrb[60].mxu0  ;;  %v11677_v25 = vpop.f32.mrb[60].mxu1  ;;  %v13907_v23 = vld [vmem:[#allocation94_spill] sm:$0xff]  ;;  %v13908_v36 = vld [vmem:[#allocation95_spill] sm:$0xff] }
 0x32b   :  { %v4267_v45 = vadd.f32 %v13903_v41, %v4138_v37  ;;  %v13904_v55 = vld [vmem:[#allocation93_spill] sm:$0xff]  ;;  %13905 = vst [vmem:[#allocation53_spill] sm:$0xff] %v11675_v40  ;;  %13906 = vst [vmem:[#allocation54_spill] sm:$0xff] %v11677_v25  ;;  %v4270_v53 = vadd.f32 %v13907_v23, %v4141_v28  ;;  %v4272_v43 = vadd.f32 %v13908_v36, %v4143_v30  ;;  %v13909_v7 = vld [vmem:[#allocation96_spill] sm:$0xff]  ;;  %v11683_v54 = vpop.f32.mrb[61].mxu0  ;;  %v11685_v48 = vpop.f32.mrb[61].mxu1 }
 0x32c   :  { %v4269_v26 = vadd.f32 %v13904_v55, %v4140_v59  ;;  %v4271_v63 = vadd.f32 %v13909_v7, %v4142_v24  ;;  %13911 = vst [vmem:[#allocation130_spill] sm:$0xff] %v11683_v54  ;;  %13912 = vst [vmem:[#allocation131_spill] sm:$0xff] %v11685_v48  ;;  %v13913_v21 = vld [vmem:[#allocation132_spill] sm:$0xff]  ;;  %v13914_v59 = vld [vmem:[#allocation133_spill] sm:$0xff] }
 0x32d   :  { %v11688_v37 = vadd.f32 %v13913_v21, %v4266_v44  ;;  %v11691_v1 = vadd.f32 %v13914_v59, %v4268_v31  ;;  %v13915_v8 = vld [vmem:[#allocation134_spill] sm:$0xff]  ;;  %v13916_v28 = vld [vmem:[#allocation135_spill] sm:$0xff]  ;;  %v13917_v30 = vld [vmem:[#allocation136_spill] sm:$0xff]  ;;  %v11721_v21 = vpop.f32.mrb[62].mxu1 }
 0x32e   :  { %v11694_v41 = vadd.f32 %v13915_v8, %v4267_v45  ;;  %v11697_v55 = vadd.f32 %v13916_v28, %v4269_v26  ;;  %v11700_v24 = vadd.f32 %v13917_v30, %v4270_v53  ;;  %v13918_v14 = vld [vmem:[#allocation137_spill] sm:$0xff]  ;;  %v13919_v23 = vld [vmem:[#allocation138_spill] sm:$0xff]  ;;  %v13920_v44 = vld [vmem:[#allocation139_spill] sm:$0xff]  ;;  %13922 = vst [vmem:[#allocation57_spill] sm:$0xff] %v11721_v21  ;;  %v11733_v30 = vpop.f32.mrb[63].mxu1 }
 0x32f   :  { %v11703_v38 = vadd.f32 %v13918_v14, %v4272_v43  ;;  %v11706_v36 = vadd.f32 %v13919_v23, %v4271_v63  ;;  %v11709_v7 = vadd.f32 %v13920_v44, %v4273_v20  ;;  %v11719_v43 = vpop.f32.mrb[62].mxu0  ;;  %13924 = vst [vmem:[#allocation93_spill] sm:$0xff] %v11733_v30 }
 0x330   :  { %v4907_v31 = vcombine.low %v11688_v37, %v11694_v41  ;;  %v4908_v45 = vcombine.high %v11688_v37, %v11694_v41  ;;  %v4909_v26 = vcombine.low %v11691_v1, %v11697_v55  ;;  %v4910_v53 = vcombine.high %v11691_v1, %v11697_v55  ;;  %13921 = vst [vmem:[#allocation55_spill] sm:$0xff] %v11719_v43  ;;  %v11731_v28 = vpop.f32.mrb[63].mxu0 }
 0x331   :  { %v4975_v63 = vcombine.low %v11700_v24, %v11706_v36  ;;  %v4976_v20 = vcombine.high %v11700_v24, %v11706_v36  ;;  %v4977_v59 = vcombine.low %v11703_v38, %v11709_v7  ;;  %v4978_v8 = vcombine.high %v11703_v38, %v11709_v7  ;;  %13923 = vst [vmem:[#allocation61_spill] sm:$0xff] %v11731_v28 }
 0x332   :  { %v4917_v14 = vrot.slane %v4907_v31, %v8730_v13  ;;  %v4924_v23 = vrot.slane %v4908_v45, %v8730_v13  ;;  %v4931_v44 = vrot.slane %v4909_v26, %v8730_v13  ;;  %v4938_v9 = vrot.slane %v4910_v53, %v8730_v13 }
 0x333   :  { %v4985_v57 = vrot.slane %v4975_v63, %v8730_v13  ;;  %v4992_v21 = vrot.slane %v4976_v20, %v8730_v13  ;;  %v4999_v43 = vrot.slane %v4977_v59, %v8730_v13  ;;  %v5006_v48 = vrot.slane %v4978_v8, %v8730_v13 }
 0x334   :  { %v4939_v54 = vcombine.low %v4917_v14, %v4931_v44  ;;  %v4940_v28 = vcombine.high %v4917_v14, %v4931_v44  ;;  %v4941_v25 = vcombine.low %v4924_v23, %v4938_v9  ;;  %v4942_v30 = vcombine.high %v4924_v23, %v4938_v9 }
 0x335   :  { %v5007_v40 = vcombine.low %v4985_v57, %v4999_v43  ;;  %v5008_v31 = vcombine.high %v4985_v57, %v4999_v43  ;;  %v5009_v33 = vcombine.low %v4992_v21, %v5006_v48  ;;  %v5010_v45 = vcombine.high %v4992_v21, %v5006_v48 }
 0x336   :  { %v4949_v26 = vrot.slane %v4939_v54, %v8730_v13  ;;  %v4956_v53 = vrot.slane %v4941_v25, %v8730_v13  ;;  %v4963_v63 = vrot.slane %v4940_v28, %v8730_v13  ;;  %v4970_v20 = vrot.slane %v4942_v30, %v8730_v13 }
 0x337   :  { %v5017_v59 = vrot.slane %v5007_v40, %v8730_v13  ;;  %v5024_v8 = vrot.slane %v5009_v33, %v8730_v13  ;;  %v5031_v14 = vrot.slane %v5008_v31, %v8730_v13  ;;  %v5038_v9 = vrot.slane %v5010_v45, %v8730_v13 }
 0x338   :  { %v4971_v23 = vcombine.high %v4949_v26, %v4949_v26  ;;  %v4972_v57 = vcombine.high %v4956_v53, %v4956_v53  ;;  %v4973_v43 = vcombine.high %v4963_v63, %v4963_v63  ;;  %v4974_v48 = vcombine.high %v4970_v20, %v4970_v20  ;;  %5812 = vst.msk [vmem:[#allocation9 + $0x302] ss:$4 sm:$0xf] %vm8752_vm0, %v4949_v26 }
 0x339   :  { %5814 = vst.msk [vmem:[#allocation9 + $0x312] ss:$4 sm:$0xf] %vm8752_vm0, %v4963_v63  ;;  %5820 = vst.msk [vmem:[#allocation9 + $0x342] ss:$4 sm:$0xf] %vm8752_vm0, %v4956_v53  ;;  %v5039_v54 = vcombine.high %v5017_v59, %v5017_v59  ;;  %v5040_v33 = vcombine.high %v5024_v8, %v5024_v8  ;;  %v5041_v40 = vcombine.high %v5031_v14, %v5031_v14 }
 0x33a   :  { %5822 = vst.msk [vmem:[#allocation9 + $0x352] ss:$4 sm:$0xf] %vm8752_vm0, %v4970_v20  ;;  %v5042_v25 = vcombine.high %v5038_v9, %v5038_v9  ;;  %5828 = vst.msk [vmem:[#allocation9 + $0x382] ss:$4 sm:$0xf] %vm8752_vm0, %v5017_v59  ;;  %v8324_v21 = vpack.c.bf16 %v11562_v18, %v11529_v22  ;;  %v8356_v28 = vpack.c.bf16 %v11565_v34, %v11553_v39 }
 0x33b   :  { %5830 = vst.msk [vmem:[#allocation9 + $0x392] ss:$4 sm:$0xf] %vm8752_vm0, %v5031_v14  ;;  %5836 = vst.msk [vmem:[#allocation9 + $0x3c2] ss:$4 sm:$0xf] %vm8752_vm0, %v5024_v8  ;;  %v8326_v30 = vpack.c.bf16 %v11556_v52, %v11504_v58  ;;  %v8358_v44 = vpack.c.bf16 %v11559_v6, %v11507_v51  ;;  %v4145_v31 = vmul.f32 %v11041_v10, %v11455_v62 }
 0x33c   :  { %5838 = vst.msk [vmem:[#allocation9 + $0x3d2] ss:$4 sm:$0xf] %vm8752_vm0, %v5038_v9  ;;  %5816 = vst.msk [vmem:[#allocation9 + $0x322] ss:$4 sm:$0xf] %vm8752_vm0, %v4971_v23  ;;  %v4147_v45 = vmul.f32 %v11041_v10, %v11457_v35  ;;  %v4146_v26 = vmul.f32 %v11041_v10, %v11459_v4  ;;  %v4148_v53 = vmul.f32 %v11041_v10, %v11461_v16  ;;  %8325 = vmatprep.subr.bf16.mxu0 %v8324_v21 }
 0x33d   :  { %5818 = vst.msk [vmem:[#allocation9 + $0x332] ss:$4 sm:$0xf] %vm8752_vm0, %v4973_v43  ;;  %5824 = vst.msk [vmem:[#allocation9 + $0x362] ss:$4 sm:$0xf] %vm8752_vm0, %v4972_v57  ;;  %8357 = vmatprep.subr.bf16.mxu1 %v8356_v28  ;;  %v4149_v63 = vmul.f32 %v11041_v10, %v11487_v17  ;;  %v4151_v20 = vmul.f32 %v11041_v10, %v11489_v42  ;;  %v4150_v62 = vmul.f32 %v11041_v10, %v11499_v5 }
 0x33e   :  { %5826 = vst.msk [vmem:[#allocation9 + $0x372] ss:$4 sm:$0xf] %vm8752_vm0, %v4974_v48  ;;  %5832 = vst.msk [vmem:[#allocation9 + $0x3a2] ss:$4 sm:$0xf] %vm8752_vm0, %v5039_v54  ;;  %8327 = vmatpush1.bf16.msra.mxu0 %v8326_v30  ;;  %8359 = vmatpush1.bf16.msra.mxu1 %v8358_v44  ;;  %v4152_v30 = vmul.f32 %v11041_v10, %v11501_v27 }
 0x33f   :  { %5834 = vst.msk [vmem:[#allocation9 + $0x3b2] ss:$4 sm:$0xf] %vm8752_vm0, %v5041_v40  ;;  %5840 = vst.msk [vmem:[#allocation9 + $0x3e2] ss:$4 sm:$0xf] %vm8752_vm0, %v5040_v33 }
 0x340   :  { %5842 = vst.msk [vmem:[#allocation9 + $0x3f2] ss:$4 sm:$0xf] %vm8752_vm0, %v5042_v25  ;;  %v13925_v35 = vld [vmem:[#allocation98_spill] sm:$0xff]  ;;  %v13926_v8 = vld [vmem:[#allocation99_spill] sm:$0xff]  ;;  %v13927_v14 = vld [vmem:[#allocation100_spill] sm:$0xff] }
 0x341   :  { %v4274_v59 = vadd.f32 %v13925_v35, %v4145_v31  ;;  %v4276_v4 = vadd.f32 %v13926_v8, %v4147_v45  ;;  %v4275_v9 = vadd.f32 %v13927_v14, %v4146_v26  ;;  %v13928_v16 = vld [vmem:[#allocation101_spill] sm:$0xff]  ;;  %v13929_v57 = vld [vmem:[#allocation102_spill] sm:$0xff]  ;;  %v13930_v48 = vld [vmem:[#allocation103_spill] sm:$0xff] }
 0x342   :  { %v4277_v23 = vadd.f32 %v13928_v16, %v4148_v53  ;;  %v4278_v43 = vadd.f32 %v13929_v57, %v4149_v63  ;;  %v4280_v17 = vadd.f32 %v13930_v48, %v4151_v20  ;;  %v13931_v54 = vld [vmem:[#allocation104_spill] sm:$0xff]  ;;  %v13933_v5 = vld [vmem:[#allocation141_spill] sm:$0xff]  ;;  %v13934_v21 = vld [vmem:[#allocation142_spill] sm:$0xff] }
 0x343   :  { %v4279_v33 = vadd.f32 %v13931_v54, %v4150_v62  ;;  %v13932_v42 = vld [vmem:[#allocation140_spill] sm:$0xff]  ;;  %v11816_v25 = vadd.f32 %v13933_v5, %v4276_v4  ;;  %v11819_v28 = vadd.f32 %v13934_v21, %v4275_v9  ;;  %v13935_v44 = vld [vmem:[#allocation143_spill] sm:$0xff]  ;;  %v13937_v53 = vld [vmem:[#allocation145_spill] sm:$0xff]  ;;  %v8328_v4 = vpack.c.bf16 %v11706_v36, %v11694_v41 }
 0x344   :  { %v11813_v40 = vadd.f32 %v13932_v42, %v4274_v59  ;;  %v11824_v31 = vadd.f32 %v13935_v44, %v4277_v23  ;;  %v13936_v45 = vld [vmem:[#allocation144_spill] sm:$0xff]  ;;  %v11830_v63 = vadd.f32 %v13937_v53, %v4280_v17  ;;  %v13938_v20 = vld [vmem:[#allocation146_spill] sm:$0xff]  ;;  %v13939_v8 = vld [vmem:[#allocation105_spill] sm:$0xff]  ;;  %v8360_v54 = vpack.c.bf16 %v11709_v7, %v11697_v55 }
 0x345   :  { %v11827_v26 = vadd.f32 %v13936_v45, %v4278_v43  ;;  %v11833_v62 = vadd.f32 %v13938_v20, %v4279_v33  ;;  %v4281_v27 = vadd.f32 %v13939_v8, %v4152_v30  ;;  %v13940_v48 = vld [vmem:[#allocation147_spill] sm:$0xff]  ;;  %8329 = vmatprep.subr.bf16.mxu0 %v8328_v4  ;;  %v8330_v45 = vpack.c.bf16 %v11700_v24, %v11688_v37 }
 0x346   :  { %v5043_v35 = vcombine.low %v11813_v40, %v11819_v28  ;;  %v5044_v59 = vcombine.high %v11813_v40, %v11819_v28  ;;  %v5045_v14 = vcombine.low %v11816_v25, %v11824_v31  ;;  %v5046_v9 = vcombine.high %v11816_v25, %v11824_v31  ;;  %8361 = vmatprep.subr.bf16.mxu1 %v8360_v54 }
 0x347   :  { %v5111_v16 = vcombine.low %v11827_v26, %v11833_v62  ;;  %v5112_v23 = vcombine.high %v11827_v26, %v11833_v62  ;;  %v11853_v17 = vadd.f32 %v13940_v48, %v4281_v27  ;;  %v8362_v53 = vpack.c.bf16 %v11703_v38, %v11691_v1  ;;  %8331 = vmatpush1.bf16.msra.mxu0 %v8330_v45 }
 0x348   :  { %v5053_v57 = vrot.slane %v5043_v35, %v8730_v13  ;;  %v5060_v43 = vrot.slane %v5044_v59, %v8730_v13  ;;  %v5067_v33 = vrot.slane %v5045_v14, %v8730_v13  ;;  %v5074_v42 = vrot.slane %v5046_v9, %v8730_v13 }
 0x349   :  { %v5121_v5 = vrot.slane %v5111_v16, %v8730_v13  ;;  %v5128_v21 = vrot.slane %v5112_v23, %v8730_v13  ;;  %v5113_v30 = vcombine.low %v11830_v63, %v11853_v17  ;;  %v5114_v44 = vcombine.high %v11830_v63, %v11853_v17  ;;  %8363 = vmatpush1.bf16.msra.mxu1 %v8362_v53 }
 0x34a   :  { %v5075_v20 = vcombine.low %v5053_v57, %v5067_v33  ;;  %v5076_v35 = vcombine.high %v5053_v57, %v5067_v33  ;;  %v5077_v59 = vcombine.low %v5060_v43, %v5074_v42  ;;  %v5078_v8 = vcombine.high %v5060_v43, %v5074_v42 }
 0x34b   :  { %v5135_v27 = vrot.slane %v5113_v30, %v8730_v13  ;;  %v5142_v4 = vrot.slane %v5114_v44, %v8730_v13  ;;  %v4153_v14 = vmul.f32 %v11041_v10, %v11536_v3 }
 0x34c   :  { %v5085_v9 = vrot.slane %v5075_v20, %v8730_v13  ;;  %v5092_v16 = vrot.slane %v5077_v59, %v8730_v13  ;;  %v5099_v23 = vrot.slane %v5076_v35, %v8730_v13  ;;  %v5106_v48 = vrot.slane %v5078_v8, %v8730_v13  ;;  %v13941_v20 = vld [vmem:[#allocation106_spill] sm:$0xff] }
 0x34d   :  { %v5143_v57 = vcombine.low %v5121_v5, %v5135_v27  ;;  %v5144_v54 = vcombine.high %v5121_v5, %v5135_v27  ;;  %v5145_v43 = vcombine.low %v5128_v21, %v5142_v4  ;;  %v5146_v33 = vcombine.high %v5128_v21, %v5142_v4 }
 0x34e   :  { %v5107_v42 = vcombine.high %v5085_v9, %v5085_v9  ;;  %v5108_v30 = vcombine.high %v5092_v16, %v5092_v16  ;;  %v5109_v44 = vcombine.high %v5099_v23, %v5099_v23  ;;  %v5110_v45 = vcombine.high %v5106_v48, %v5106_v48  ;;  %5844 = vst.msk [vmem:[#allocation9 + $0x402] ss:$4 sm:$0xf] %vm8752_vm0, %v5085_v9 }
 0x34f   :  { %5846 = vst.msk [vmem:[#allocation9 + $0x412] ss:$4 sm:$0xf] %vm8752_vm0, %v5099_v23  ;;  %5852 = vst.msk [vmem:[#allocation9 + $0x442] ss:$4 sm:$0xf] %vm8752_vm0, %v5092_v16  ;;  %v5153_v3 = vrot.slane %v5143_v57, %v8730_v13  ;;  %v5160_v5 = vrot.slane %v5145_v43, %v8730_v13  ;;  %v5167_v21 = vrot.slane %v5144_v54, %v8730_v13 }
 0x350   :  { %5854 = vst.msk [vmem:[#allocation9 + $0x452] ss:$4 sm:$0xf] %vm8752_vm0, %v5106_v48  ;;  %v5174_v53 = vrot.slane %v5146_v33, %v8730_v13  ;;  %5848 = vst.msk [vmem:[#allocation9 + $0x422] ss:$4 sm:$0xf] %vm8752_vm0, %v5107_v42  ;;  %v4282_v35 = vadd.f32 %v13941_v20, %v4153_v14  ;;  %v4155_v59 = vmul.f32 %v11041_v10, %v11538_v11 }
 0x351   :  { %5850 = vst.msk [vmem:[#allocation9 + $0x432] ss:$4 sm:$0xf] %vm8752_vm0, %v5109_v44  ;;  %5856 = vst.msk [vmem:[#allocation9 + $0x462] ss:$4 sm:$0xf] %vm8752_vm0, %v5108_v30  ;;  %v4154_v8 = vmul.f32 %v11041_v10, %v11544_v61  ;;  %v4156_v27 = vmul.f32 %v11041_v10, %v11546_v56  ;;  %v5175_v4 = vcombine.high %v5153_v3, %v5153_v3 }
 0x352   :  { %5858 = vst.msk [vmem:[#allocation9 + $0x472] ss:$4 sm:$0xf] %vm8752_vm0, %v5110_v45  ;;  %v5176_v9 = vcombine.high %v5160_v5, %v5160_v5  ;;  %v5177_v16 = vcombine.high %v5167_v21, %v5167_v21  ;;  %v5178_v23 = vcombine.high %v5174_v53, %v5174_v53  ;;  %5860 = vst.msk [vmem:[#allocation9 + $0x482] ss:$4 sm:$0xf] %vm8752_vm0, %v5153_v3 }
 0x353   :  { %5862 = vst.msk [vmem:[#allocation9 + $0x492] ss:$4 sm:$0xf] %vm8752_vm0, %v5167_v21  ;;  %5868 = vst.msk [vmem:[#allocation9 + $0x4c2] ss:$4 sm:$0xf] %vm8752_vm0, %v5160_v5  ;;  %v4157_v33 = vmul.f32 %v11041_v10, %v11573_v15  ;;  %v4159_v42 = vmul.f32 %v11041_v10, %v11575_v29  ;;  %v4158_v30 = vmul.f32 %v11041_v10, %v11585_v12 }
 0x354   :  { %5870 = vst.msk [vmem:[#allocation9 + $0x4d2] ss:$4 sm:$0xf] %vm8752_vm0, %v5174_v53  ;;  %v13942_v11 = vld [vmem:[#allocation148_spill] sm:$0xff]  ;;  %v13944_v56 = vld [vmem:[#allocation107_spill] sm:$0xff]  ;;  %v13946_v54 = vld [vmem:[#allocation109_spill] sm:$0xff]  ;;  %v4160_v44 = vmul.f32 %v11041_v10, %v11587_v60  ;;  %v8332_v15 = vpack.c.bf16 %v11833_v62, %v11819_v28 }
 0x355   :  { %v11913_v61 = vadd.f32 %v13942_v11, %v4282_v35  ;;  %v4284_v14 = vadd.f32 %v13944_v56, %v4155_v59  ;;  %v13945_v48 = vld [vmem:[#allocation108_spill] sm:$0xff]  ;;  %v4285_v43 = vadd.f32 %v13946_v54, %v4156_v27  ;;  %5864 = vst.msk [vmem:[#allocation9 + $0x4a2] ss:$4 sm:$0xf] %vm8752_vm0, %v5175_v4  ;;  %v13947_v45 = vld [vmem:[#allocation149_spill] sm:$0xff]  ;;  %v13949_v5 = vld [vmem:[#allocation150_spill] sm:$0xff] }
 0x356   :  { %v4283_v57 = vadd.f32 %v13945_v48, %v4154_v8  ;;  %5866 = vst.msk [vmem:[#allocation9 + $0x4b2] ss:$4 sm:$0xf] %vm8752_vm0, %v5177_v16  ;;  %5872 = vst.msk [vmem:[#allocation9 + $0x4e2] ss:$4 sm:$0xf] %vm8752_vm0, %v5176_v9  ;;  %8333 = vmatprep.subr.bf16.mxu0 %v8332_v15 }
 0x357   :  { %13943 = vst [vmem:[#allocation94_spill] sm:$0xff] %v11913_v61  ;;  %5874 = vst.msk [vmem:[#allocation9 + $0x4f2] ss:$4 sm:$0xf] %vm8752_vm0, %v5178_v23  ;;  %v11935_v3 = vadd.f32 %v13947_v45, %v4284_v14  ;;  %v13951_v53 = vld [vmem:[#allocation151_spill] sm:$0xff]  ;;  %v13953_v35 = vld [vmem:[#allocation110_spill] sm:$0xff] }
 0x358   :  { %v11938_v21 = vadd.f32 %v13949_v5, %v4283_v57  ;;  %v11941_v20 = vadd.f32 %v13951_v53, %v4285_v43  ;;  %v4286_v29 = vadd.f32 %v13953_v35, %v4157_v33  ;;  %v13954_v59 = vld [vmem:[#allocation111_spill] sm:$0xff]  ;;  %v13955_v12 = vld [vmem:[#allocation112_spill] sm:$0xff]  ;;  %v13956_v4 = vld [vmem:[#allocation113_spill] sm:$0xff] }
 0x359   :  { %13948 = vst [vmem:[#allocation95_spill] sm:$0xff] %v11935_v3  ;;  %v4288_v8 = vadd.f32 %v13954_v59, %v4159_v42  ;;  %v4287_v27 = vadd.f32 %v13955_v12, %v4158_v30  ;;  %v4289_v60 = vadd.f32 %v13956_v4, %v4160_v44  ;;  %v13957_v56 = vld [vmem:[#allocation152_spill] sm:$0xff]  ;;  %v13959_v48 = vld [vmem:[#allocation153_spill] sm:$0xff]  ;;  %v13961_v54 = vld [vmem:[#allocation154_spill] sm:$0xff] }
 0x35a   :  { %13950 = vst [vmem:[#allocation96_spill] sm:$0xff] %v11938_v21  ;;  %13952 = vst [vmem:[#allocation97_spill] sm:$0xff] %v11941_v20  ;;  %v5179_v9 = vcombine.low %v11913_v61, %v11938_v21  ;;  %v5180_v16 = vcombine.high %v11913_v61, %v11938_v21  ;;  %v5181_v23 = vcombine.low %v11935_v3, %v11941_v20  ;;  %v13963_v33 = vld [vmem:[#allocation155_spill] sm:$0xff] }
 0x35b   :  { %v5182_v11 = vcombine.high %v11935_v3, %v11941_v20  ;;  %v11958_v14 = vadd.f32 %v13957_v56, %v4286_v29  ;;  %v11961_v57 = vadd.f32 %v13959_v48, %v4288_v8  ;;  %v11964_v43 = vadd.f32 %v13961_v54, %v4287_v27 }
 0x35c   :  { %v11967_v42 = vadd.f32 %v13963_v33, %v4289_v60  ;;  %v5189_v30 = vrot.slane %v5179_v9, %v8730_v13  ;;  %v5196_v44 = vrot.slane %v5180_v16, %v8730_v13  ;;  %v5203_v45 = vrot.slane %v5181_v23, %v8730_v13 }
 0x35d   :  { %13958 = vst [vmem:[#allocation132_spill] sm:$0xff] %v11958_v14  ;;  %13960 = vst [vmem:[#allocation133_spill] sm:$0xff] %v11961_v57  ;;  %v5210_v5 = vrot.slane %v5182_v11, %v8730_v13  ;;  %v5247_v53 = vcombine.low %v11958_v14, %v11964_v43  ;;  %v5248_v15 = vcombine.high %v11958_v14, %v11964_v43 }
 0x35e   :  { %13962 = vst [vmem:[#allocation134_spill] sm:$0xff] %v11964_v43  ;;  %13964 = vst [vmem:[#allocation135_spill] sm:$0xff] %v11967_v42  ;;  %v5249_v35 = vcombine.low %v11961_v57, %v11967_v42  ;;  %v5250_v29 = vcombine.high %v11961_v57, %v11967_v42  ;;  %v5211_v59 = vcombine.low %v5189_v30, %v5203_v45 }
 0x35f   :  { %v5212_v8 = vcombine.high %v5189_v30, %v5203_v45  ;;  %v5213_v12 = vcombine.low %v5196_v44, %v5210_v5  ;;  %v5214_v27 = vcombine.high %v5196_v44, %v5210_v5  ;;  %v5257_v4 = vrot.slane %v5247_v53, %v8730_v13 }
 0x360   :  { %v5264_v60 = vrot.slane %v5248_v15, %v8730_v13  ;;  %v5271_v9 = vrot.slane %v5249_v35, %v8730_v13  ;;  %v5278_v16 = vrot.slane %v5250_v29, %v8730_v13  ;;  %v5221_v23 = vrot.slane %v5211_v59, %v8730_v13 }
 0x361   :  { %v5228_v11 = vrot.slane %v5213_v12, %v8730_v13  ;;  %v5235_v56 = vrot.slane %v5212_v8, %v8730_v13  ;;  %v5242_v48 = vrot.slane %v5214_v27, %v8730_v13  ;;  %v8364_v12 = vpack.c.bf16 %v11853_v17, %v11824_v31 }
 0x362   :  { %v5279_v54 = vcombine.low %v5257_v4, %v5271_v9  ;;  %v5280_v33 = vcombine.high %v5257_v4, %v5271_v9  ;;  %v5281_v30 = vcombine.low %v5264_v60, %v5278_v16  ;;  %v5282_v44 = vcombine.high %v5264_v60, %v5278_v16  ;;  %5876 = vst.msk [vmem:[#allocation9 + $0x502] ss:$4 sm:$0xf] %vm8752_vm0, %v5221_v23 }
 0x363   :  { %v5243_v45 = vcombine.high %v5221_v23, %v5221_v23  ;;  %v5244_v5 = vcombine.high %v5228_v11, %v5228_v11  ;;  %v5245_v53 = vcombine.high %v5235_v56, %v5235_v56  ;;  %v5246_v15 = vcombine.high %v5242_v48, %v5242_v48  ;;  %5878 = vst.msk [vmem:[#allocation9 + $0x512] ss:$4 sm:$0xf] %vm8752_vm0, %v5235_v56  ;;  %v13965_v56 = vld [vmem:[#allocation114_spill] sm:$0xff] }
 0x364   :  { %5884 = vst.msk [vmem:[#allocation9 + $0x542] ss:$4 sm:$0xf] %vm8752_vm0, %v5228_v11  ;;  %5886 = vst.msk [vmem:[#allocation9 + $0x552] ss:$4 sm:$0xf] %vm8752_vm0, %v5242_v48  ;;  %v5289_v35 = vrot.slane %v5279_v54, %v8730_v13  ;;  %v5296_v29 = vrot.slane %v5281_v30, %v8730_v13  ;;  %v5303_v59 = vrot.slane %v5280_v33, %v8730_v13  ;;  %8365 = vmatprep.subr.bf16.mxu1 %v8364_v12 }
 0x365   :  { %v5310_v8 = vrot.slane %v5282_v44, %v8730_v13  ;;  %5880 = vst.msk [vmem:[#allocation9 + $0x522] ss:$4 sm:$0xf] %vm8752_vm0, %v5243_v45  ;;  %5882 = vst.msk [vmem:[#allocation9 + $0x532] ss:$4 sm:$0xf] %vm8752_vm0, %v5245_v53  ;;  %v8334_v27 = vpack.c.bf16 %v11827_v26, %v11813_v40  ;;  %v8366_v4 = vpack.c.bf16 %v11830_v63, %v11816_v25 }
 0x366   :  { %5888 = vst.msk [vmem:[#allocation9 + $0x562] ss:$4 sm:$0xf] %vm8752_vm0, %v5244_v5  ;;  %5890 = vst.msk [vmem:[#allocation9 + $0x572] ss:$4 sm:$0xf] %vm8752_vm0, %v5246_v15  ;;  %v4161_v60 = vmul.f32 %v11041_v10, %v11599_v49  ;;  %v5311_v9 = vcombine.high %v5289_v35, %v5289_v35  ;;  %v5312_v16 = vcombine.high %v5296_v29, %v5296_v29 }
 0x367   :  { %v5313_v23 = vcombine.high %v5303_v59, %v5303_v59  ;;  %v5314_v11 = vcombine.high %v5310_v8, %v5310_v8  ;;  %5892 = vst.msk [vmem:[#allocation9 + $0x582] ss:$4 sm:$0xf] %vm8752_vm0, %v5289_v35  ;;  %5894 = vst.msk [vmem:[#allocation9 + $0x592] ss:$4 sm:$0xf] %vm8752_vm0, %v5303_v59  ;;  %8335 = vmatpush1.bf16.msra.mxu0 %v8334_v27  ;;  %v4163_v48 = vmul.f32 %v11041_v10, %v11601_v46 }
 0x368   :  { %5900 = vst.msk [vmem:[#allocation9 + $0x5c2] ss:$4 sm:$0xf] %vm8752_vm0, %v5296_v29  ;;  %5902 = vst.msk [vmem:[#allocation9 + $0x5d2] ss:$4 sm:$0xf] %vm8752_vm0, %v5310_v8  ;;  %v4290_v49 = vadd.f32 %v13965_v56, %v4161_v60  ;;  %v4162_v54 = vmul.f32 %v11041_v10, %v11603_v32  ;;  %8367 = vmatpush1.bf16.msra.mxu1 %v8366_v4  ;;  %v4164_v33 = vmul.f32 %v11041_v10, %v11605_v2 }
 0x369   :  { %5896 = vst.msk [vmem:[#allocation9 + $0x5a2] ss:$4 sm:$0xf] %vm8752_vm0, %v5311_v9  ;;  %5898 = vst.msk [vmem:[#allocation9 + $0x5b2] ss:$4 sm:$0xf] %vm8752_vm0, %v5313_v23  ;;  %v4165_v46 = vmul.f32 %v11041_v10, %v11623_v0  ;;  %v4167_v32 = vmul.f32 %v11041_v10, %v11625_v19  ;;  %v4166_v30 = vmul.f32 %v11041_v10, %v11635_v50 }
 0x36a   :  { %5904 = vst.msk [vmem:[#allocation9 + $0x5e2] ss:$4 sm:$0xf] %vm8752_vm0, %v5312_v16  ;;  %5906 = vst.msk [vmem:[#allocation9 + $0x5f2] ss:$4 sm:$0xf] %vm8752_vm0, %v5314_v11 }
 0x36b   :  { %v13966_v44 = vld [vmem:[#allocation156_spill] sm:$0xff]  ;;  %v13967_v5 = vld [vmem:[#allocation115_spill] sm:$0xff]  ;;  %v13970_v2 = vld [vmem:[#allocation117_spill] sm:$0xff] }
 0x36c   :  { %v12047_v45 = vadd.f32 %v13966_v44, %v4290_v49  ;;  %v4292_v53 = vadd.f32 %v13967_v5, %v4163_v48  ;;  %v13968_v15 = vld [vmem:[#allocation116_spill] sm:$0xff]  ;;  %v4293_v8 = vadd.f32 %v13970_v2, %v4164_v33  ;;  %v13971_v12 = vld [vmem:[#allocation118_spill] sm:$0xff]  ;;  %v13972_v27 = vld [vmem:[#allocation119_spill] sm:$0xff]  ;;  %v8336_v49 = vpack.c.bf16 %v11964_v43, %v11938_v21 }
 0x36d   :  { %v4291_v35 = vadd.f32 %v13968_v15, %v4162_v54  ;;  %v13969_v29 = vld [vmem:[#allocation88_spill] sm:$0xff]  ;;  %v4294_v0 = vadd.f32 %v13971_v12, %v4165_v46  ;;  %v4296_v4 = vadd.f32 %v13972_v27, %v4167_v32  ;;  %v13974_v9 = vld [vmem:[#allocation157_spill] sm:$0xff]  ;;  %v13975_v16 = vld [vmem:[#allocation158_spill] sm:$0xff] }
 0x36e   :  { %v4168_v59 = vmul.f32 %v11041_v10, %v13969_v29  ;;  %v13973_v19 = vld [vmem:[#allocation120_spill] sm:$0xff]  ;;  %v12058_v50 = vadd.f32 %v13974_v9, %v4292_v53  ;;  %v13976_v11 = vld [vmem:[#allocation121_spill] sm:$0xff]  ;;  %v13977_v48 = vld [vmem:[#allocation159_spill] sm:$0xff]  ;;  %8337 = vmatprep.subr.bf16.mxu0 %v8336_v49 }
 0x36f   :  { %v4295_v60 = vadd.f32 %v13973_v19, %v4166_v30  ;;  %v12061_v23 = vadd.f32 %v13975_v16, %v4291_v35  ;;  %v12067_v54 = vadd.f32 %v13977_v48, %v4293_v8  ;;  %v13978_v33 = vld [vmem:[#allocation160_spill] sm:$0xff]  ;;  %v13979_v32 = vld [vmem:[#allocation161_spill] sm:$0xff]  ;;  %v13980_v30 = vld [vmem:[#allocation162_spill] sm:$0xff] }
 0x370   :  { %v4297_v56 = vadd.f32 %v13976_v11, %v4168_v59  ;;  %v12070_v46 = vadd.f32 %v13978_v33, %v4294_v0  ;;  %v12073_v44 = vadd.f32 %v13979_v32, %v4296_v4  ;;  %v13981_v35 = vld [vmem:[#allocation163_spill] sm:$0xff]  ;;  %v8368_v59 = vpack.c.bf16 %v11967_v42, %v11941_v20 }
 0x371   :  { %v12076_v5 = vadd.f32 %v13980_v30, %v4295_v60  ;;  %v5315_v53 = vcombine.low %v12047_v45, %v12061_v23  ;;  %v5316_v15 = vcombine.high %v12047_v45, %v12061_v23  ;;  %v5317_v2 = vcombine.low %v12058_v50, %v12067_v54 }
 0x372   :  { %v12083_v29 = vadd.f32 %v13981_v35, %v4297_v56  ;;  %v5318_v8 = vcombine.high %v12058_v50, %v12067_v54  ;;  %8369 = vmatprep.subr.bf16.mxu1 %v8368_v59  ;;  %v8338_v33 = vpack.c.bf16 %v11958_v14, %v11913_v61  ;;  %v8370_v32 = vpack.c.bf16 %v11961_v57, %v11935_v3  ;;  %v13996_v57 = vld [vmem:[#allocation128_spill] sm:$0xff]  ;;  %v13997_v14 = vld [vmem:[#allocation129_spill] sm:$0xff] }
 0x373   :  { %v5383_v12 = vcombine.low %v12070_v46, %v12076_v5  ;;  %v5384_v0 = vcombine.high %v12070_v46, %v12076_v5  ;;  %v5325_v27 = vrot.slane %v5315_v53, %v8730_v13  ;;  %v5332_v4 = vrot.slane %v5316_v15, %v8730_v13 }
 0x374   :  { %v5385_v19 = vcombine.low %v12073_v44, %v12083_v29  ;;  %v5386_v60 = vcombine.high %v12073_v44, %v12083_v29  ;;  %v5339_v9 = vrot.slane %v5317_v2, %v8730_v13  ;;  %v5346_v16 = vrot.slane %v5318_v8, %v8730_v13  ;;  %8339 = vmatpush1.bf16.msra.mxu0 %v8338_v33 }
 0x375   :  { %v5393_v11 = vrot.slane %v5383_v12, %v8730_v13  ;;  %v5400_v56 = vrot.slane %v5384_v0, %v8730_v13  ;;  %8371 = vmatpush1.bf16.msra.mxu1 %v8370_v32 }
 0x376   :  { %v5407_v49 = vrot.slane %v5385_v19, %v8730_v13  ;;  %v5414_v48 = vrot.slane %v5386_v60, %v8730_v13  ;;  %v5347_v30 = vcombine.low %v5325_v27, %v5339_v9  ;;  %v5348_v53 = vcombine.high %v5325_v27, %v5339_v9 }
 0x377   :  { %v5349_v15 = vcombine.low %v5332_v4, %v5346_v16  ;;  %v5350_v35 = vcombine.high %v5332_v4, %v5346_v16 }
 0x378   :  { %v5415_v59 = vcombine.low %v5393_v11, %v5407_v49  ;;  %v5416_v2 = vcombine.high %v5393_v11, %v5407_v49  ;;  %v5417_v8 = vcombine.low %v5400_v56, %v5414_v48  ;;  %v5418_v12 = vcombine.high %v5400_v56, %v5414_v48 }
 0x379   :  { %v5357_v0 = vrot.slane %v5347_v30, %v8730_v13  ;;  %v5364_v19 = vrot.slane %v5349_v15, %v8730_v13  ;;  %v5371_v60 = vrot.slane %v5348_v53, %v8730_v13  ;;  %v5378_v42 = vrot.slane %v5350_v35, %v8730_v13  ;;  %v13983_v53 = vld [vmem:[#allocation54_spill] sm:$0xff] }
 0x37a   :  { %v5425_v43 = vrot.slane %v5415_v59, %v8730_v13  ;;  %v5432_v27 = vrot.slane %v5417_v8, %v8730_v13  ;;  %v5439_v4 = vrot.slane %v5416_v2, %v8730_v13  ;;  %v5446_v9 = vrot.slane %v5418_v12, %v8730_v13  ;;  %v13984_v35 = vld [vmem:[#allocation130_spill] sm:$0xff]  ;;  %v13985_v2 = vld [vmem:[#allocation131_spill] sm:$0xff] }
 0x37b   :  { %v5379_v16 = vcombine.high %v5357_v0, %v5357_v0  ;;  %v5380_v11 = vcombine.high %v5364_v19, %v5364_v19  ;;  %v5381_v56 = vcombine.high %v5371_v60, %v5371_v60  ;;  %v5382_v49 = vcombine.high %v5378_v42, %v5378_v42  ;;  %5908 = vst.msk [vmem:[#allocation9 + $0x602] ss:$4 sm:$0xf] %vm8752_vm0, %v5357_v0  ;;  %v13986_v12 = vld [vmem:[#allocation55_spill] sm:$0xff] }
 0x37c   :  { %5910 = vst.msk [vmem:[#allocation9 + $0x612] ss:$4 sm:$0xf] %vm8752_vm0, %v5371_v60  ;;  %5916 = vst.msk [vmem:[#allocation9 + $0x642] ss:$4 sm:$0xf] %vm8752_vm0, %v5364_v19  ;;  %v5447_v48 = vcombine.high %v5425_v43, %v5425_v43  ;;  %v5448_v33 = vcombine.high %v5432_v27, %v5432_v27  ;;  %v5449_v32 = vcombine.high %v5439_v4, %v5439_v4 }
 0x37d   :  { %5918 = vst.msk [vmem:[#allocation9 + $0x652] ss:$4 sm:$0xf] %vm8752_vm0, %v5378_v42  ;;  %v5450_v30 = vcombine.high %v5446_v9, %v5446_v9  ;;  %5924 = vst.msk [vmem:[#allocation9 + $0x682] ss:$4 sm:$0xf] %vm8752_vm0, %v5425_v43  ;;  %v4171_v15 = vmul.f32 %v11041_v10, %v13983_v53  ;;  %v4170_v59 = vmul.f32 %v11041_v10, %v13984_v35 }
 0x37e   :  { %5926 = vst.msk [vmem:[#allocation9 + $0x692] ss:$4 sm:$0xf] %vm8752_vm0, %v5439_v4  ;;  %5932 = vst.msk [vmem:[#allocation9 + $0x6c2] ss:$4 sm:$0xf] %vm8752_vm0, %v5432_v27  ;;  %v4172_v8 = vmul.f32 %v11041_v10, %v13985_v2  ;;  %v4173_v0 = vmul.f32 %v11041_v10, %v13986_v12 }
 0x37f   :  { %5934 = vst.msk [vmem:[#allocation9 + $0x6d2] ss:$4 sm:$0xf] %vm8752_vm0, %v5446_v9  ;;  %5912 = vst.msk [vmem:[#allocation9 + $0x622] ss:$4 sm:$0xf] %vm8752_vm0, %v5379_v16 }
 0x380   :  { %5914 = vst.msk [vmem:[#allocation9 + $0x632] ss:$4 sm:$0xf] %vm8752_vm0, %v5381_v56  ;;  %5920 = vst.msk [vmem:[#allocation9 + $0x662] ss:$4 sm:$0xf] %vm8752_vm0, %v5380_v11 }
 0x381   :  { %5922 = vst.msk [vmem:[#allocation9 + $0x672] ss:$4 sm:$0xf] %vm8752_vm0, %v5382_v49  ;;  %v13982_v43 = vld [vmem:[#allocation53_spill] sm:$0xff]  ;;  %v13990_v11 = vld [vmem:[#allocation122_spill] sm:$0xff]  ;;  %v13991_v49 = vld [vmem:[#allocation123_spill] sm:$0xff] }
 0x382   :  { %v4169_v42 = vmul.f32 %v11041_v10, %v13982_v43  ;;  %5928 = vst.msk [vmem:[#allocation9 + $0x6a2] ss:$4 sm:$0xf] %vm8752_vm0, %v5447_v48  ;;  %5930 = vst.msk [vmem:[#allocation9 + $0x6b2] ss:$4 sm:$0xf] %vm8752_vm0, %v5449_v32  ;;  %v4300_v48 = vadd.f32 %v13991_v49, %v4171_v15 }
 0x383   :  { %5936 = vst.msk [vmem:[#allocation9 + $0x6e2] ss:$4 sm:$0xf] %vm8752_vm0, %v5448_v33  ;;  %5938 = vst.msk [vmem:[#allocation9 + $0x6f2] ss:$4 sm:$0xf] %vm8752_vm0, %v5450_v30 }
 0x384   :  { %v13987_v19 = vld [vmem:[#allocation57_spill] sm:$0xff]  ;;  %v4298_v56 = vadd.f32 %v13990_v11, %v4169_v42  ;;  %v13992_v33 = vld [vmem:[#allocation124_spill] sm:$0xff]  ;;  %v13994_v53 = vld [vmem:[#allocation126_spill] sm:$0xff] }
 0x385   :  { %v4175_v60 = vmul.f32 %v11041_v10, %v13987_v19  ;;  %v13988_v27 = vld [vmem:[#allocation61_spill] sm:$0xff]  ;;  %v4299_v32 = vadd.f32 %v13992_v33, %v4170_v59  ;;  %v4302_v35 = vadd.f32 %v13994_v53, %v4173_v0  ;;  %v13995_v2 = vld [vmem:[#allocation127_spill] sm:$0xff]  ;;  %v14000_v42 = vld [vmem:[#allocation166_spill] sm:$0xff] }
 0x386   :  { %v4174_v4 = vmul.f32 %v11041_v10, %v13988_v27  ;;  %v13989_v9 = vld [vmem:[#allocation93_spill] sm:$0xff]  ;;  %v13998_v27 = vld [vmem:[#allocation164_spill] sm:$0xff]  ;;  %v14001_v59 = vld [vmem:[#allocation167_spill] sm:$0xff] }
 0x387   :  { %v4176_v16 = vmul.f32 %v11041_v10, %v13989_v9  ;;  %v13993_v43 = vld [vmem:[#allocation125_spill] sm:$0xff]  ;;  %v4304_v12 = vadd.f32 %v13995_v2, %v4175_v60  ;;  %v12176_v21 = vadd.f32 %v13998_v27, %v4298_v56  ;;  %v12182_v15 = vadd.f32 %v14000_v42, %v4299_v32 }
 0x388   :  { %v4301_v30 = vadd.f32 %v13993_v43, %v4172_v8  ;;  %v4303_v19 = vadd.f32 %v13996_v57, %v4174_v4  ;;  %v13999_v10 = vld [vmem:[#allocation165_spill] sm:$0xff]  ;;  %v14002_v8 = vld [vmem:[#allocation168_spill] sm:$0xff]  ;;  %v14004_v57 = vld [vmem:[#allocation174_spill] sm:$0xff] }
 0x389   :  { %v4305_v20 = vadd.f32 %v13997_v14, %v4176_v16  ;;  %v12179_v9 = vadd.f32 %v13999_v10, %v4300_v48  ;;  %v12188_v0 = vadd.f32 %v14002_v8, %v4302_v35  ;;  %v14003_v60 = vld [vmem:[#allocation169_spill] sm:$0xff]  ;;  %v14006_v4 = vld [vmem:[#allocation175_spill] sm:$0xff]  ;;  %v5451_v56 = vcombine.low %v12176_v21, %v12182_v15 }
 0x38a   :  { %v12185_v11 = vadd.f32 %v14001_v59, %v4301_v30  ;;  %v12191_v49 = vadd.f32 %v14003_v60, %v4304_v12  ;;  %v12194_v14 = vadd.f32 %v14004_v57, %v4303_v19  ;;  %v5452_v48 = vcombine.high %v12176_v21, %v12182_v15 }
 0x38b   :  { %v12197_v16 = vadd.f32 %v14006_v4, %v4305_v20  ;;  %v5461_v35 = vrot.slane %v5451_v56, %v8730_v13 }
 0x38c   :  { %14005 = vst [vmem:[#allocation136_spill] sm:$0xff] %v12194_v14  ;;  %v5453_v33 = vcombine.low %v12179_v9, %v12185_v11  ;;  %v5454_v32 = vcombine.high %v12179_v9, %v12185_v11  ;;  %v5519_v43 = vcombine.low %v12188_v0, %v12194_v14  ;;  %v5520_v30 = vcombine.high %v12188_v0, %v12194_v14 }
 0x38d   :  { %14007 = vst [vmem:[#allocation137_spill] sm:$0xff] %v12197_v16  ;;  %v5521_v20 = vcombine.low %v12191_v49, %v12197_v16  ;;  %v5522_v53 = vcombine.high %v12191_v49, %v12197_v16  ;;  %v5468_v2 = vrot.slane %v5452_v48, %v8730_v13 }
 0x38e   :  { %v5475_v12 = vrot.slane %v5453_v33, %v8730_v13  ;;  %v5482_v19 = vrot.slane %v5454_v32, %v8730_v13  ;;  %v5529_v27 = vrot.slane %v5519_v43, %v8730_v13  ;;  %v5536_v10 = vrot.slane %v5520_v30, %v8730_v13 }
 0x38f   :  { %v5543_v42 = vrot.slane %v5521_v20, %v8730_v13  ;;  %v5550_v59 = vrot.slane %v5522_v53, %v8730_v13 }
 0x390   :  { %v5483_v8 = vcombine.low %v5461_v35, %v5475_v12  ;;  %v5484_v60 = vcombine.high %v5461_v35, %v5475_v12  ;;  %v5485_v57 = vcombine.low %v5468_v2, %v5482_v19  ;;  %v5486_v4 = vcombine.high %v5468_v2, %v5482_v19 }
 0x391   :  { %v5551_v3 = vcombine.low %v5529_v27, %v5543_v42  ;;  %v5552_v56 = vcombine.high %v5529_v27, %v5543_v42  ;;  %v5553_v61 = vcombine.low %v5536_v10, %v5550_v59  ;;  %v5554_v48 = vcombine.high %v5536_v10, %v5550_v59 }
 0x392   :  { %v5493_v33 = vrot.slane %v5483_v8, %v8730_v13  ;;  %v5500_v32 = vrot.slane %v5485_v57, %v8730_v13  ;;  %v5507_v43 = vrot.slane %v5484_v60, %v8730_v13  ;;  %v5514_v30 = vrot.slane %v5486_v4, %v8730_v13 }
 0x393   :  { %v5561_v20 = vrot.slane %v5551_v3, %v8730_v13  ;;  %v5568_v53 = vrot.slane %v5553_v61, %v8730_v13  ;;  %v5575_v35 = vrot.slane %v5552_v56, %v8730_v13  ;;  %v5582_v2 = vrot.slane %v5554_v48, %v8730_v13  ;;  %v14117_v13 = vld [vmem:[#allocation184_spill] sm:$0xff] }
 0x394   :  { %v5515_v12 = vcombine.high %v5493_v33, %v5493_v33  ;;  %v5516_v19 = vcombine.high %v5500_v32, %v5500_v32  ;;  %v5517_v27 = vcombine.high %v5507_v43, %v5507_v43  ;;  %v5518_v10 = vcombine.high %v5514_v30, %v5514_v30  ;;  %5940 = vst.msk [vmem:[#allocation9 + $0x702] ss:$4 sm:$0xf] %vm8752_vm0, %v5493_v33 }
 0x395   :  { %5942 = vst.msk [vmem:[#allocation9 + $0x712] ss:$4 sm:$0xf] %vm8752_vm0, %v5507_v43  ;;  %5948 = vst.msk [vmem:[#allocation9 + $0x742] ss:$4 sm:$0xf] %vm8752_vm0, %v5500_v32  ;;  %v5583_v61 = vcombine.high %v5561_v20, %v5561_v20  ;;  %v5584_v3 = vcombine.high %v5568_v53, %v5568_v53  ;;  %v5585_v42 = vcombine.high %v5575_v35, %v5575_v35 }
 0x396   :  { %5950 = vst.msk [vmem:[#allocation9 + $0x752] ss:$4 sm:$0xf] %vm8752_vm0, %v5514_v30  ;;  %v5586_v59 = vcombine.high %v5582_v2, %v5582_v2  ;;  %5956 = vst.msk [vmem:[#allocation9 + $0x782] ss:$4 sm:$0xf] %vm8752_vm0, %v5561_v20  ;;  %v8340_v8 = vpack.c.bf16 %v12076_v5, %v12061_v23  ;;  %v8372_v60 = vpack.c.bf16 %v12083_v29, %v12067_v54 }
 0x397   :  { %5958 = vst.msk [vmem:[#allocation9 + $0x792] ss:$4 sm:$0xf] %vm8752_vm0, %v5575_v35  ;;  %5964 = vst.msk [vmem:[#allocation9 + $0x7c2] ss:$4 sm:$0xf] %vm8752_vm0, %v5568_v53  ;;  %v8342_v57 = vpack.c.bf16 %v12070_v46, %v12047_v45  ;;  %v8374_v4 = vpack.c.bf16 %v12073_v44, %v12058_v50  ;;  %v8344_v56 = vpack.c.bf16 %v12194_v14, %v12182_v15 }
 0x398   :  { %5966 = vst.msk [vmem:[#allocation9 + $0x7d2] ss:$4 sm:$0xf] %vm8752_vm0, %v5582_v2  ;;  %5944 = vst.msk [vmem:[#allocation9 + $0x722] ss:$4 sm:$0xf] %vm8752_vm0, %v5515_v12  ;;  %v8376_v48 = vpack.c.bf16 %v12197_v16, %v12185_v11  ;;  %v8346_v33 = vpack.c.bf16 %v12188_v0, %v12176_v21  ;;  %v8378_v32 = vpack.c.bf16 %v12191_v49, %v12179_v9  ;;  %8341 = vmatprep.subr.bf16.mxu0 %v8340_v8 }
 0x399   :  { %5946 = vst.msk [vmem:[#allocation9 + $0x732] ss:$4 sm:$0xf] %vm8752_vm0, %v5517_v27  ;;  %5952 = vst.msk [vmem:[#allocation9 + $0x762] ss:$4 sm:$0xf] %vm8752_vm0, %v5516_v19  ;;  %8373 = vmatprep.subr.bf16.mxu1 %v8372_v60  ;;  %8343 = vmatpush1.bf16.msra.mxu0 %v8342_v57 }
 0x39a   :  { %5954 = vst.msk [vmem:[#allocation9 + $0x772] ss:$4 sm:$0xf] %vm8752_vm0, %v5518_v10  ;;  %5960 = vst.msk [vmem:[#allocation9 + $0x7a2] ss:$4 sm:$0xf] %vm8752_vm0, %v5583_v61  ;;  %8375 = vmatpush1.bf16.msra.mxu1 %v8374_v4  ;;  %8345 = vmatprep.subr.bf16.mxu0 %v8344_v56 }
 0x39b   :  { %5962 = vst.msk [vmem:[#allocation9 + $0x7b2] ss:$4 sm:$0xf] %vm8752_vm0, %v5585_v42  ;;  %5968 = vst.msk [vmem:[#allocation9 + $0x7e2] ss:$4 sm:$0xf] %vm8752_vm0, %v5584_v3  ;;  %8377 = vmatprep.subr.bf16.mxu1 %v8376_v48 }
 0x39c   :  { %5970 = vst.msk [vmem:[#allocation9 + $0x7f2] ss:$4 sm:$0xf] %vm8752_vm0, %v5586_v59  ;;  %v8562_v43 = vld [vmem:[#allocation2] sm:$0xff]  ;;  %v14008_v30 = vmov 0.0   ;;  %v8563_v20 = vld [vmem:[#allocation2 + $0x8] sm:$0xff] }
 0x39d   :  { %8347 = vmatpush1.bf16.msra.mxu0 %v8346_v33  ;;  %v8564_v53 = vld [vmem:[#allocation2 + $0x10] sm:$0xff]  ;;  %v8565_v35 = vld [vmem:[#allocation2 + $0x18] sm:$0xff]  ;;  %v8566_v2 = vld [vmem:[#allocation2 + $0x20] sm:$0xff] }
 0x39e   :  { %8379 = vmatpush1.bf16.msra.mxu1 %v8378_v32  ;;  %v8567_v12 = vld [vmem:[#allocation2 + $0x28] sm:$0xff]  ;;  %v8568_v19 = vld [vmem:[#allocation2 + $0x30] sm:$0xff]  ;;  %v8569_v27 = vld [vmem:[#allocation2 + $0x38] sm:$0xff] }
 0x39f   :  { %v8570_v10 = vld [vmem:[#allocation2 + $0x40] sm:$0xff]  ;;  %v8571_v61 = vld [vmem:[#allocation2 + $0x48] sm:$0xff]  ;;  %v8572_v3 = vld [vmem:[#allocation2 + $0x50] sm:$0xff] }
 0x3a0   :  { %6036 = vmatmul.mubr.f32.vlgmr.msra.gmra.mrb[64].mxu0 %v8562_v43  ;;  %v8573_v42 = vld [vmem:[#allocation2 + $0x58] sm:$0xff]  ;;  %v8574_v59 = vld [vmem:[#allocation2 + $0x60] sm:$0xff]  ;;  %v8575_v8 = vld [vmem:[#allocation2 + $0x68] sm:$0xff] }
 0x3a1   :  { %6197 = vmatmul.mubr.f32.vlgmr.msra.gmra.mrb[64].mxu1 %v8562_v43  ;;  %6041 = vmatprep.mubr.f32.mxu0 %v14008_v30  ;;  %v8576_v60 = vld [vmem:[#allocation2 + $0x70] sm:$0xff]  ;;  %v8577_v57 = vld [vmem:[#allocation2 + $0x78] sm:$0xff]  ;;  %v14010_v56 = vld [vmem:[#allocation35_spill] sm:$0xff] }
 0x3a2   :  { %6202 = vmatprep.mubr.f32.mxu1 %v14008_v30  ;;  %v14009_v4 = vld [vmem:[#allocation56_spill] sm:$0xff]  ;;  %v14011_v33 = vld [vmem:[#allocation58_spill] sm:$0xff]  ;;  %v14012_v43 = vld [vmem:[#allocation59_spill] sm:$0xff] }
 0x3a3   :  { %v12311_v48 = vmul.f32 %v14010_v56, %v14009_v4  ;;  %v12315_v32 = vmul.f32 %v14010_v56, %v14011_v33  ;;  %v14026_v33 = vld [vmem:[#allocation69_spill] sm:$0xff]  ;;  %v14036_v16 = vld [vmem:[#allocation24_spill] sm:$0xff] }
 0x3a4   :  { %6042 = vmatmul.mubr.f32.gmra.mrb[66].mxu0 %v8563_v20  ;;  %v14038_v14 = vld [vmem:[#allocation25_spill] sm:$0xff] }
 0x3a5   :  { %6203 = vmatmul.mubr.f32.gmra.mrb[66].mxu1 %v8563_v20  ;;  %6047 = vmatprep.mubr.f32.mxu0 %v14008_v30  ;;  %v12321_v20 = vmul.f32 %v14010_v56, %v14012_v43  ;;  %v12357_v43 = vmul.f32 %v14010_v56, %v14026_v33  ;;  %v12377_v33 = vmul.f32 %v14010_v56, %v14036_v16 }
 0x3a6   :  { %6208 = vmatprep.mubr.f32.mxu1 %v14008_v30 }
 0x3a7   :  { %14027 = vst [vmem:[#allocation101_spill] sm:$0xff] %v12357_v43  ;;  %14037 = vst [vmem:[#allocation141_spill] sm:$0xff] %v12377_v33  ;;  %v14048_v33 = vld [vmem:[#allocation76_spill] sm:$0xff] }
 0x3a8   :  { %6048 = vmatmul.mubr.f32.gmra.mrb[68].mxu0 %v8564_v53  ;;  %v14083_v43 = vld [vmem:[#allocation92_spill] sm:$0xff] }
 0x3a9   :  { %6209 = vmatmul.mubr.f32.gmra.mrb[68].mxu1 %v8564_v53  ;;  %6053 = vmatprep.mubr.f32.mxu0 %v14008_v30  ;;  %v14013_v53 = vld [vmem:[#allocation60_spill] sm:$0xff] }
 0x3aa   :  { %6214 = vmatprep.mubr.f32.mxu1 %v14008_v30 }
 0x3ac   :  { %6054 = vmatmul.mubr.f32.gmra.mrb[70].mxu0 %v8565_v35 }
 0x3ad   :  { %6215 = vmatmul.mubr.f32.gmra.mrb[70].mxu1 %v8565_v35  ;;  %6059 = vmatprep.mubr.f32.mxu0 %v14008_v30  ;;  %v14014_v35 = vld [vmem:[#allocation62_spill] sm:$0xff] }
 0x3ae   :  { %6220 = vmatprep.mubr.f32.mxu1 %v14008_v30 }
 0x3b0   :  { %6060 = vmatmul.mubr.f32.gmra.mrb[72].mxu0 %v8566_v2 }
 0x3b1   :  { %6221 = vmatmul.mubr.f32.gmra.mrb[72].mxu1 %v8566_v2  ;;  %6065 = vmatprep.mubr.f32.mxu0 %v14008_v30  ;;  %v12329_v2 = vmul.f32 %v14010_v56, %v14014_v35 }
 0x3b2   :  { %6226 = vmatprep.mubr.f32.mxu1 %v14008_v30 }
 0x3b4   :  { %6066 = vmatmul.mubr.f32.gmra.mrb[74].mxu0 %v8567_v12 }
 0x3b5   :  { %6227 = vmatmul.mubr.f32.gmra.mrb[74].mxu1 %v8567_v12  ;;  %6071 = vmatprep.mubr.f32.mxu0 %v14008_v30  ;;  %v14015_v12 = vld [vmem:[#allocation63_spill] sm:$0xff] }
 0x3b6   :  { %6232 = vmatprep.mubr.f32.mxu1 %v14008_v30 }
 0x3b8   :  { %6072 = vmatmul.mubr.f32.gmra.mrb[76].mxu0 %v8568_v19 }
 0x3b9   :  { %6233 = vmatmul.mubr.f32.gmra.mrb[76].mxu1 %v8568_v19  ;;  %6077 = vmatprep.mubr.f32.mxu0 %v14008_v30  ;;  %v12333_v19 = vmul.f32 %v14010_v56, %v14015_v12  ;;  %v14030_v12 = vld [vmem:[#allocation21_spill] sm:$0xff] }
 0x3ba   :  { %6238 = vmatprep.mubr.f32.mxu1 %v14008_v30 }
 0x3bc   :  { %6078 = vmatmul.mubr.f32.gmra.mrb[78].mxu0 %v8569_v27 }
 0x3bd   :  { %6239 = vmatmul.mubr.f32.gmra.mrb[78].mxu1 %v8569_v27  ;;  %6083 = vmatprep.mubr.f32.mxu0 %v14008_v30  ;;  %v14016_v27 = vld [vmem:[#allocation64_spill] sm:$0xff] }
 0x3be   :  { %6244 = vmatprep.mubr.f32.mxu1 %v14008_v30 }
 0x3c0   :  { %6084 = vmatmul.mubr.f32.gmra.mrb[80].mxu0 %v8570_v10 }
 0x3c1   :  { %6245 = vmatmul.mubr.f32.gmra.mrb[80].mxu1 %v8570_v10  ;;  %6089 = vmatprep.mubr.f32.mxu0 %v14008_v30  ;;  %v12337_v10 = vmul.f32 %v14010_v56, %v14016_v27  ;;  %v12365_v27 = vmul.f32 %v14010_v56, %v14030_v12 }
 0x3c2   :  { %6250 = vmatprep.mubr.f32.mxu1 %v14008_v30 }
 0x3c3   :  { %14017 = vst [vmem:[#allocation138_spill] sm:$0xff] %v12337_v10  ;;  %14031 = vst [vmem:[#allocation103_spill] sm:$0xff] %v12365_v27  ;;  %v14042_v27 = vld [vmem:[#allocation71_spill] sm:$0xff] }
 0x3c4   :  { %6090 = vmatmul.mubr.f32.gmra.mrb[82].mxu0 %v8571_v61 }
 0x3c5   :  { %6251 = vmatmul.mubr.f32.gmra.mrb[82].mxu1 %v8571_v61  ;;  %6095 = vmatprep.mubr.f32.mxu0 %v14008_v30  ;;  %v14018_v61 = vld [vmem:[#allocation65_spill] sm:$0xff] }
 0x3c6   :  { %6256 = vmatprep.mubr.f32.mxu1 %v14008_v30 }
 0x3c8   :  { %6096 = vmatmul.mubr.f32.gmra.mrb[84].mxu0 %v8572_v3 }
 0x3c9   :  { %6257 = vmatmul.mubr.f32.gmra.mrb[84].mxu1 %v8572_v3  ;;  %6101 = vmatprep.mubr.f32.mxu0 %v14008_v30  ;;  %v12341_v3 = vmul.f32 %v14010_v56, %v14018_v61  ;;  %v14032_v61 = vld [vmem:[#allocation22_spill] sm:$0xff] }
 0x3ca   :  { %6262 = vmatprep.mubr.f32.mxu1 %v14008_v30 }
 0x3cb   :  { %14019 = vst [vmem:[#allocation139_spill] sm:$0xff] %v12341_v3 }
 0x3cc   :  { %6102 = vmatmul.mubr.f32.gmra.mrb[86].mxu0 %v8573_v42 }
 0x3cd   :  { %6263 = vmatmul.mubr.f32.gmra.mrb[86].mxu1 %v8573_v42  ;;  %6107 = vmatprep.mubr.f32.mxu0 %v14008_v30  ;;  %v14020_v42 = vld [vmem:[#allocation66_spill] sm:$0xff] }
 0x3ce   :  { %6268 = vmatprep.mubr.f32.mxu1 %v14008_v30 }
 0x3d0   :  { %6108 = vmatmul.mubr.f32.gmra.mrb[88].mxu0 %v8574_v59 }
 0x3d1   :  { %6269 = vmatmul.mubr.f32.gmra.mrb[88].mxu1 %v8574_v59  ;;  %6113 = vmatprep.mubr.f32.mxu0 %v14008_v30  ;;  %v12345_v59 = vmul.f32 %v14010_v56, %v14020_v42  ;;  %v12369_v42 = vmul.f32 %v14010_v56, %v14032_v61  ;;  %v12389_v61 = vmul.f32 %v14010_v56, %v14042_v27 }
 0x3d2   :  { %6274 = vmatprep.mubr.f32.mxu1 %v14008_v30 }
 0x3d3   :  { %14021 = vst [vmem:[#allocation98_spill] sm:$0xff] %v12345_v59  ;;  %14033 = vst [vmem:[#allocation104_spill] sm:$0xff] %v12369_v42  ;;  %v14044_v42 = vld [vmem:[#allocation27_spill] sm:$0xff] }
 0x3d4   :  { %6114 = vmatmul.mubr.f32.gmra.mrb[90].mxu0 %v8575_v8  ;;  %14043 = vst [vmem:[#allocation144_spill] sm:$0xff] %v12389_v61  ;;  %v14054_v61 = vld [vmem:[#allocation29_spill] sm:$0xff] }
 0x3d5   :  { %6275 = vmatmul.mubr.f32.gmra.mrb[90].mxu1 %v8575_v8  ;;  %6119 = vmatprep.mubr.f32.mxu0 %v14008_v30  ;;  %v14022_v8 = vld [vmem:[#allocation67_spill] sm:$0xff] }
 0x3d6   :  { %6280 = vmatprep.mubr.f32.mxu1 %v14008_v30 }
 0x3d8   :  { %6120 = vmatmul.mubr.f32.gmra.mrb[92].mxu0 %v8576_v60 }
 0x3d9   :  { %6281 = vmatmul.mubr.f32.gmra.mrb[92].mxu1 %v8576_v60  ;;  %6125 = vmatprep.mubr.f32.mxu0 %v14008_v30  ;;  %v12349_v60 = vmul.f32 %v14010_v56, %v14022_v8  ;;  %v14034_v8 = vld [vmem:[#allocation23_spill] sm:$0xff] }
 0x3da   :  { %6286 = vmatprep.mubr.f32.mxu1 %v14008_v30  ;;  %v12325_v30 = vmul.f32 %v14010_v56, %v14013_v53  ;;  %v14028_v53 = vld [vmem:[#allocation20_spill] sm:$0xff] }
 0x3db   :  { %14023 = vst [vmem:[#allocation99_spill] sm:$0xff] %v12349_v60  ;;  %v12361_v35 = vmul.f32 %v14010_v56, %v14028_v53  ;;  %v12381_v53 = vmul.f32 %v14010_v56, %v14038_v14  ;;  %v12401_v14 = vmul.f32 %v14010_v56, %v14048_v33  ;;  %v14109_v60 = vld [vmem:[#allocation180_spill] sm:$0xff] }
 0x3dc   :  { %6126 = vmatmul.mubr.f32.gmra.mrb[94].mxu0 %v8577_v57 }
 0x3dd   :  { %6287 = vmatmul.mubr.f32.gmra.mrb[94].mxu1 %v8577_v57  ;;  %v14024_v57 = vld [vmem:[#allocation68_spill] sm:$0xff]  ;;  %14029 = vst [vmem:[#allocation102_spill] sm:$0xff] %v12361_v35  ;;  %14039 = vst [vmem:[#allocation142_spill] sm:$0xff] %v12381_v53  ;;  %v14040_v35 = vld [vmem:[#allocation70_spill] sm:$0xff] }
 0x3de   :  { %v12353_v4 = vmul.f32 %v14010_v56, %v14024_v57  ;;  %v12373_v57 = vmul.f32 %v14010_v56, %v14034_v8  ;;  %v12385_v12 = vmul.f32 %v14010_v56, %v14040_v35  ;;  %v12393_v8 = vmul.f32 %v14010_v56, %v14044_v42  ;;  %14049 = vst [vmem:[#allocation105_spill] sm:$0xff] %v12401_v14  ;;  %v14050_v53 = vld [vmem:[#allocation77_spill] sm:$0xff]  ;;  %v14060_v14 = vld [vmem:[#allocation84_spill] sm:$0xff] }
 0x3df   :  { %v12405_v35 = vmul.f32 %v14010_v56, %v14050_v53  ;;  %v12413_v42 = vmul.f32 %v14010_v56, %v14054_v61  ;;  %v12425_v53 = vmul.f32 %v14010_v56, %v14060_v14 }
 0x3e0   :  { %14025 = vst [vmem:[#allocation100_spill] sm:$0xff] %v12353_v4  ;;  %14035 = vst [vmem:[#allocation140_spill] sm:$0xff] %v12373_v57  ;;  %v14046_v57 = vld [vmem:[#allocation75_spill] sm:$0xff]  ;;  %v14104_v4 = vld [vmem:[#allocation173_spill] sm:$0xff] }
 0x3e1   :  { %14041 = vst [vmem:[#allocation143_spill] sm:$0xff] %v12385_v12  ;;  %14045 = vst [vmem:[#allocation145_spill] sm:$0xff] %v12393_v8  ;;  %v12397_v16 = vmul.f32 %v14010_v56, %v14046_v57  ;;  %v14052_v12 = vld [vmem:[#allocation28_spill] sm:$0xff]  ;;  %v14056_v8 = vld [vmem:[#allocation82_spill] sm:$0xff] }
 0x3e2   :  { %14051 = vst [vmem:[#allocation147_spill] sm:$0xff] %v12405_v35  ;;  %v12409_v27 = vmul.f32 %v14010_v56, %v14052_v12  ;;  %14055 = vst [vmem:[#allocation148_spill] sm:$0xff] %v12413_v42  ;;  %v12417_v57 = vmul.f32 %v14010_v56, %v14056_v8  ;;  %v14062_v35 = vld [vmem:[#allocation85_spill] sm:$0xff]  ;;  %v14066_v42 = vld [vmem:[#allocation87_spill] sm:$0xff] }
 0x3e3   :  { %14047 = vst [vmem:[#allocation146_spill] sm:$0xff] %v12397_v16  ;;  %v14058_v16 = vld [vmem:[#allocation83_spill] sm:$0xff]  ;;  %14061 = vst [vmem:[#allocation109_spill] sm:$0xff] %v12425_v53  ;;  %v12429_v12 = vmul.f32 %v14010_v56, %v14062_v35  ;;  %v12437_v8 = vmul.f32 %v14010_v56, %v14066_v42  ;;  %v12448_v53 = vstv %s12317_s25  ;;  %v14073_v35 = vld [vmem:[#allocation32_spill] sm:$0xff] }
 0x3e4   :  { %14053 = vst [vmem:[#allocation106_spill] sm:$0xff] %v12409_v27  ;;  %14057 = vst [vmem:[#allocation107_spill] sm:$0xff] %v12417_v57  ;;  %v12421_v33 = vmul.f32 %v14010_v56, %v14058_v16  ;;  %v14064_v27 = vld [vmem:[#allocation86_spill] sm:$0xff]  ;;  %v14077_v42 = vld [vmem:[#allocation89_spill] sm:$0xff] }
 0x3e5   :  { %14063 = vst [vmem:[#allocation149_spill] sm:$0xff] %v12429_v12  ;;  %v12433_v61 = vmul.f32 %v14010_v56, %v14064_v27  ;;  %14067 = vst [vmem:[#allocation151_spill] sm:$0xff] %v12437_v8  ;;  %v14068_v57 = vld [vmem:[#allocation30_spill] sm:$0xff]  ;;  %v12452_v12 = vmul.f32 %v14010_v56, %v14073_v35  ;;  %v14075_v27 = vld [vmem:[#allocation33_spill] sm:$0xff]  ;;  %v12460_v8 = vmul.f32 %v14010_v56, %v14077_v42 }
 0x3e6   :  { %14059 = vst [vmem:[#allocation108_spill] sm:$0xff] %v12421_v33  ;;  %v12441_v16 = vmul.f32 %v14010_v56, %v14068_v57  ;;  %v14070_v33 = vld [vmem:[#allocation31_spill] sm:$0xff]  ;;  %14072 = vst [vmem:[#allocation112_spill] sm:$0xff] %v12448_v53  ;;  %v14079_v57 = vld [vmem:[#allocation90_spill] sm:$0xff]  ;;  %v12472_v35 = vmul.f32 %v14010_v56, %v14083_v43 }
 0x3e7   :  { %14065 = vst [vmem:[#allocation150_spill] sm:$0xff] %v12433_v61  ;;  %v12445_v14 = vmul.f32 %v14010_v56, %v14070_v33  ;;  %14074 = vst [vmem:[#allocation113_spill] sm:$0xff] %v12452_v12  ;;  %v12456_v61 = vmul.f32 %v14010_v56, %v14075_v27  ;;  %v14081_v33 = vld [vmem:[#allocation91_spill] sm:$0xff]  ;;  %v14085_v12 = vld [vmem:[#allocation72_spill] sm:$0xff] }
 0x3e8   :  { %14069 = vst [vmem:[#allocation110_spill] sm:$0xff] %v12441_v16  ;;  %14078 = vst [vmem:[#allocation153_spill] sm:$0xff] %v12460_v8  ;;  %v12464_v16 = vmul.f32 %v14010_v56, %v14079_v57  ;;  %v12476_v27 = vmul.f32 %v14010_v56, %v14085_v12  ;;  %v14089_v8 = vld [vmem:[#allocation74_spill] sm:$0xff] }
 0x3e9   :  { %14071 = vst [vmem:[#allocation111_spill] sm:$0xff] %v12445_v14  ;;  %14076 = vst [vmem:[#allocation152_spill] sm:$0xff] %v12456_v61  ;;  %v12468_v14 = vmul.f32 %v14010_v56, %v14081_v33  ;;  %v14087_v61 = vld [vmem:[#allocation73_spill] sm:$0xff]  ;;  %v12484_v57 = vmul.f32 %v14010_v56, %v14089_v8 }
 0x3ea   :  { %14080 = vst [vmem:[#allocation154_spill] sm:$0xff] %v12464_v16  ;;  %14084 = vst [vmem:[#allocation114_spill] sm:$0xff] %v12472_v35  ;;  %v12480_v42 = vmul.f32 %v14010_v56, %v14087_v61  ;;  %v14091_v16 = vld [vmem:[#allocation26_spill] sm:$0xff] }
 0x3eb   :  { %14082 = vst [vmem:[#allocation155_spill] sm:$0xff] %v12468_v14  ;;  %14086 = vst [vmem:[#allocation156_spill] sm:$0xff] %v12476_v27  ;;  %v12488_v33 = vmul.f32 %v14010_v56, %v14091_v16  ;;  %v14093_v14 = vld [vmem:[#allocation78_spill] sm:$0xff]  ;;  %v14096_v27 = vld [vmem:[#allocation79_spill] sm:$0xff] }
 0x3ec   :  { %14088 = vst [vmem:[#allocation115_spill] sm:$0xff] %v12480_v42  ;;  %14090 = vst [vmem:[#allocation116_spill] sm:$0xff] %v12484_v57  ;;  %v12492_v43 = vmul.f32 %v14010_v56, %v14093_v14  ;;  %v14095_v35 = vld [vmem:[#allocation170_spill] sm:$0xff]  ;;  %v12500_v61 = vmul.f32 %v14010_v56, %v14096_v27  ;;  %v14098_v42 = vld [vmem:[#allocation80_spill] sm:$0xff]  ;;  %v12520_v27 = vmul.f32 %v12448_v53, %v14104_v4 }
 0x3ed   :  { %14092 = vst [vmem:[#allocation88_spill] sm:$0xff] %v12488_v33  ;;  %v12496_v12 = vmul.f32 %v12448_v53, %v14095_v35  ;;  %v12504_v8 = vmul.f32 %v14010_v56, %v14098_v42  ;;  %v14100_v57 = vld [vmem:[#allocation34_spill] sm:$0xff]  ;;  %v14102_v33 = vld [vmem:[#allocation171_spill] sm:$0xff]  ;;  %v12540_v4 = vmul.f32 %v12448_v53, %v14109_v60  ;;  %v14116_v60 = vld [vmem:[#allocation52_spill] sm:$0xff] }
 0x3ee   :  { %14094 = vst [vmem:[#allocation117_spill] sm:$0xff] %v12492_v43  ;;  %14097 = vst [vmem:[#allocation118_spill] sm:$0xff] %v12500_v61  ;;  %v12508_v16 = vmul.f32 %v14010_v56, %v14100_v57  ;;  %v12512_v14 = vmul.f32 %v12448_v53, %v14102_v33  ;;  %v14103_v43 = vld [vmem:[#allocation172_spill] sm:$0xff]  ;;  %v14107_v57 = vld [vmem:[#allocation178_spill] sm:$0xff] }
 0x3ef   :  { %14099 = vst [vmem:[#allocation119_spill] sm:$0xff] %v12504_v8  ;;  %v12516_v35 = vmul.f32 %v12448_v53, %v14103_v43  ;;  %v14105_v61 = vld [vmem:[#allocation176_spill] sm:$0xff]  ;;  %v14106_v8 = vld [vmem:[#allocation177_spill] sm:$0xff]  ;;  %v12532_v33 = vmul.f32 %v12448_v53, %v14107_v57  ;;  %14110 = vst [vmem:[#allocation157_spill] sm:$0xff] %v12540_v4  ;;  %v12562_v4 = vmul.f32 %v12448_v53, %v14116_v60 }
 0x3f0   :  { %14101 = vst [vmem:[#allocation120_spill] sm:$0xff] %v12508_v16  ;;  %v12524_v42 = vmul.f32 %v12448_v53, %v14105_v61  ;;  %v12528_v56 = vmul.f32 %v12448_v53, %v14106_v8  ;;  %v14108_v16 = vld [vmem:[#allocation179_spill] sm:$0xff]  ;;  %v14111_v61 = vld [vmem:[#allocation181_spill] sm:$0xff]  ;;  %v14113_v8 = vld [vmem:[#allocation182_spill] sm:$0xff]  ;;  %v12582_v60 = vmul.f32 %v12448_v53, %v11529_v22  ;;  %v12602_v22 = vmul.f32 %v12448_v53, %v11565_v34 }
 0x3f1   :  { %v12536_v43 = vmul.f32 %v12448_v53, %v14108_v16  ;;  %v12546_v59 = vmul.f32 %v12448_v53, %v14111_v61  ;;  %v12550_v47 = vmul.f32 %v12448_v53, %v14113_v8  ;;  %v14114_v57 = vld [vmem:[#allocation183_spill] sm:$0xff]  ;;  %v12566_v61 = vmul.f32 %v12448_v53, %v14117_v13 }
 0x3f2   :  { %v12554_v3 = vmul.f32 %v12448_v53, %v14114_v57  ;;  %v14115_v16 = vld [vmem:[#allocation51_spill] sm:$0xff]  ;;  %v12574_v57 = vmul.f32 %v12448_v53, %v11504_v58  ;;  %v12586_v13 = vmul.f32 %v12448_v53, %v11553_v39  ;;  %v12594_v58 = vmul.f32 %v12448_v53, %v11559_v6 }
 0x3f3   :  { %14112 = vst [vmem:[#allocation158_spill] sm:$0xff] %v12546_v59  ;;  %v12558_v10 = vmul.f32 %v12448_v53, %v14115_v16  ;;  %v14118_v59 = vld [vmem:[#allocation185_spill] sm:$0xff]  ;;  %v12578_v16 = vmul.f32 %v12448_v53, %v11507_v51  ;;  %v12598_v51 = vmul.f32 %v12448_v53, %v11562_v18  ;;  %v12606_v39 = vmul.f32 %v12448_v53, %v11688_v37 }
 0x3f4   :  { %v12570_v8 = vmul.f32 %v12448_v53, %v14118_v59  ;;  %v12590_v59 = vmul.f32 %v12448_v53, %v11556_v52  ;;  %v12610_v52 = vmul.f32 %v12448_v53, %v11691_v1  ;;  %v12614_v6 = vmul.f32 %v12448_v53, %v11694_v41 }
 0x3f5   :  { %v12618_v18 = vmul.f32 %v12448_v53, %v11697_v55  ;;  %v12622_v34 = vmul.f32 %v12448_v53, %v11700_v24  ;;  %v12626_v37 = vmul.f32 %v12448_v53, %v11703_v38  ;;  %v12630_v1 = vmul.f32 %v12448_v53, %v11706_v36 }
 0x3f6   :  { %v12634_v41 = vmul.f32 %v12448_v53, %v11709_v7  ;;  %v12638_v55 = vmul.f32 %v12448_v53, %v11813_v40  ;;  %v12642_v24 = vmul.f32 %v12448_v53, %v11816_v25  ;;  %v12646_v38 = vmul.f32 %v12448_v53, %v11819_v28 }
 0x3f7   :  { %v12650_v36 = vmul.f32 %v12448_v53, %v11824_v31  ;;  %v12654_v7 = vmul.f32 %v12448_v53, %v11827_v26  ;;  %v12658_v40 = vmul.f32 %v12448_v53, %v11830_v63  ;;  %v12662_v25 = vmul.f32 %v12448_v53, %v11833_v62  ;;  %v14129_v26 = vld [vmem:[#allocation95_spill] sm:$0xff]  ;;  %v14131_v63 = vld [vmem:[#allocation96_spill] sm:$0xff]  ;;  %v14133_v62 = vld [vmem:[#allocation97_spill] sm:$0xff] }
 0x3f8   :  { %14119 = vst [vmem:[#allocation121_spill] sm:$0xff] %v12638_v55  ;;  %14120 = vst [vmem:[#allocation159_spill] sm:$0xff] %v12642_v24  ;;  %v12666_v28 = vmul.f32 %v12448_v53, %v11853_v17  ;;  %v14134_v17 = vld [vmem:[#allocation132_spill] sm:$0xff]  ;;  %v14137_v24 = vld [vmem:[#allocation134_spill] sm:$0xff] }
 0x3f9   :  { %14121 = vst [vmem:[#allocation160_spill] sm:$0xff] %v12646_v38  ;;  %14122 = vst [vmem:[#allocation161_spill] sm:$0xff] %v12650_v36  ;;  %v14127_v38 = vld [vmem:[#allocation94_spill] sm:$0xff]  ;;  %v12673_v36 = vstv %s12542_s26 }
 0x3fa   :  { %14123 = vst [vmem:[#allocation162_spill] sm:$0xff] %v12654_v7  ;;  %14124 = vst [vmem:[#allocation163_spill] sm:$0xff] %v12658_v40  ;;  %v12670_v31 = vmul.f32 %v12448_v53, %v14127_v38  ;;  %v12677_v7 = vmul.f32 %v12448_v53, %v14129_v26  ;;  %v12681_v40 = vmul.f32 %v12448_v53, %v14131_v63  ;;  %v14135_v38 = vld [vmem:[#allocation133_spill] sm:$0xff] }
 0x3fb   :  { %14125 = vst [vmem:[#allocation53_spill] sm:$0xff] %v12662_v25  ;;  %14126 = vst [vmem:[#allocation54_spill] sm:$0xff] %v12666_v28  ;;  %v12685_v25 = vmul.f32 %v12448_v53, %v14133_v62  ;;  %v12689_v28 = vmul.f32 %v12448_v53, %v14134_v17  ;;  %v12697_v26 = vmul.f32 %v12448_v53, %v14137_v24 }
 0x3fc   :  { %14128 = vst [vmem:[#allocation130_spill] sm:$0xff] %v12670_v31  ;;  %14130 = vst [vmem:[#allocation131_spill] sm:$0xff] %v12677_v7  ;;  %v12693_v31 = vmul.f32 %v12448_v53, %v14135_v38  ;;  %v14139_v7 = vld [vmem:[#allocation135_spill] sm:$0xff]  ;;  %v12705_v62 = vmul.f32 %v12448_v53, %v12047_v45  ;;  %v12709_v17 = vmul.f32 %v12448_v53, %v12058_v50 }
 0x3fd   :  { %14132 = vst [vmem:[#allocation55_spill] sm:$0xff] %v12681_v40  ;;  %14138 = vst [vmem:[#allocation61_spill] sm:$0xff] %v12697_v26  ;;  %v12701_v63 = vmul.f32 %v12448_v53, %v14139_v7  ;;  %v12713_v38 = vmul.f32 %v12448_v53, %v12061_v23  ;;  %v12717_v24 = vmul.f32 %v12448_v53, %v12067_v54 }
 0x3fe   :  { %14136 = vst [vmem:[#allocation57_spill] sm:$0xff] %v12693_v31  ;;  %v12723_v45 = vmul.f32 %v12448_v53, %v12070_v46  ;;  %v12727_v50 = vmul.f32 %v12448_v53, %v12073_v44  ;;  %v12733_v54 = vmul.f32 %v12448_v53, %v12076_v5  ;;  %v12743_v44 = vmul.f32 %v12448_v53, %v12176_v21 }
 0x3ff   :  { %14140 = vst [vmem:[#allocation93_spill] sm:$0xff] %v12701_v63  ;;  %14141 = vst [vmem:[#allocation122_spill] sm:$0xff] %v12713_v38 }
 0x400   :  { %14142 = vst [vmem:[#allocation123_spill] sm:$0xff] %v12727_v50  ;;  %14143 = vst [vmem:[#allocation124_spill] sm:$0xff] %v12733_v54 }
 0x401   :  { %14145 = vst [vmem:[#allocation126_spill] sm:$0xff] %v12743_v44 }
 0x473   :  { %v6037_v40 = vpop.f32.mrb[64].mxu0 }
 0x474   :  { %v6198_v55 = vpop.f32.mrb[64].mxu1  ;;  %v6297_v7 = vmul.f32 %v12673_v36, %v6037_v40  ;;  %v6039_v26 = vpop.f32.mrb[65].mxu0 }
 0x475   :  { %v6299_v63 = vmul.f32 %v12673_v36, %v6198_v55  ;;  %v6200_v31 = vpop.f32.mrb[65].mxu1  ;;  %v6298_v23 = vmul.f32 %v12673_v36, %v6039_v26  ;;  %v12737_v55 = vmul.f32 %v12448_v53, %v12083_v29  ;;  %v12747_v26 = vmul.f32 %v12448_v53, %v12179_v9 }
 0x476   :  { %v6300_v38 = vmul.f32 %v12673_v36, %v6200_v31  ;;  %v6426_v40 = vadd.f32 %v12496_v12, %v6297_v7  ;;  %v12753_v29 = vmul.f32 %v12448_v53, %v12182_v15  ;;  %v12757_v12 = vmul.f32 %v12448_v53, %v12185_v11 }
 0x477   :  { %14144 = vst [vmem:[#allocation125_spill] sm:$0xff] %v12737_v55  ;;  %v6428_v46 = vadd.f32 %v12512_v14, %v6299_v63  ;;  %14146 = vst [vmem:[#allocation127_spill] sm:$0xff] %v12747_v26  ;;  %v6427_v31 = vadd.f32 %v12516_v35, %v6298_v23  ;;  %v6043_v54 = vpop.f32.mrb[66].mxu0 }
 0x478   :  { %v6429_v5 = vadd.f32 %v12520_v27, %v6300_v38  ;;  %v6204_v50 = vpop.f32.mrb[66].mxu1  ;;  %14147 = vst [vmem:[#allocation128_spill] sm:$0xff] %v12753_v29  ;;  %14148 = vst [vmem:[#allocation129_spill] sm:$0xff] %v12757_v12  ;;  %v6555_v21 = vadd.f32 %v12311_v48, %v6426_v40  ;;  %v6301_v9 = vmul.f32 %v12673_v36, %v6043_v54  ;;  %v6045_v63 = vpop.f32.mrb[67].mxu0  ;;  %v14158_v29 = vld [vmem:[#allocation99_spill] sm:$0xff] }
 0x479   :  { %v6557_v14 = vadd.f32 %v12315_v32, %v6428_v46  ;;  %v6303_v35 = vmul.f32 %v12673_v36, %v6204_v50  ;;  %v6206_v27 = vpop.f32.mrb[67].mxu1  ;;  %v6556_v38 = vadd.f32 %v12321_v20, %v6427_v31  ;;  %v6302_v15 = vmul.f32 %v12673_v36, %v6045_v63  ;;  %v14151_v63 = vld [vmem:[#allocation18_spill] sm:$0xff] }
 0x47a   :  { %v6558_v7 = vadd.f32 %v12325_v30, %v6429_v5  ;;  %v6304_v23 = vmul.f32 %v12673_v36, %v6206_v27  ;;  %v6430_v11 = vadd.f32 %v12524_v42, %v6301_v9  ;;  %v12771_v32 = vmul.f32 %v12448_v53, %v12188_v0 }
 0x47b   :  { %v6432_v48 = vadd.f32 %v12528_v56, %v6303_v35  ;;  %v12775_v50 = vmul.f32 %v12448_v53, %v12191_v49  ;;  %v6683_v54 = vcombine.low %v6555_v21, %v6556_v38  ;;  %v6684_v20 = vcombine.high %v6555_v21, %v6556_v38  ;;  %v6049_v46 = vpop.f32.mrb[68].mxu0  ;;  %v14152_v38 = vld [vmem:[#allocation138_spill] sm:$0xff] }
 0x47c   :  { %14149 = vst [vmem:[#allocation164_spill] sm:$0xff] %v12771_v32  ;;  %v6685_v40 = vcombine.low %v6557_v14, %v6558_v7  ;;  %v6686_v30 = vcombine.high %v6557_v14, %v6558_v7  ;;  %v6210_v31 = vpop.f32.mrb[68].mxu1  ;;  %v6559_v5 = vadd.f32 %v12329_v2, %v6430_v11  ;;  %v6431_v56 = vadd.f32 %v12532_v33, %v6302_v15  ;;  %v6051_v0 = vpop.f32.mrb[69].mxu0 }
 0x47d   :  { %14150 = vst [vmem:[#allocation165_spill] sm:$0xff] %v12775_v50  ;;  %v6561_v42 = vadd.f32 %v12333_v19, %v6432_v48  ;;  %v6433_v9 = vadd.f32 %v12536_v43, %v6304_v23  ;;  %v6212_v35 = vpop.f32.mrb[69].mxu1  ;;  %v6693_v27 = vrot.slane %v6683_v54, %v14151_v63  ;;  %v6700_v49 = vrot.slane %v6684_v20, %v14151_v63  ;;  %v14153_v50 = vld [vmem:[#allocation139_spill] sm:$0xff] }
 0x47e   :  { %v6707_v21 = vrot.slane %v6685_v40, %v14151_v63  ;;  %v6714_v14 = vrot.slane %v6686_v30, %v14151_v63  ;;  %v6560_v7 = vadd.f32 %v14152_v38, %v6431_v56  ;;  %v6305_v19 = vmul.f32 %v12673_v36, %v6049_v46 }
 0x47f   :  { %v6562_v2 = vadd.f32 %v14153_v50, %v6433_v9  ;;  %v6307_v33 = vmul.f32 %v12673_v36, %v6210_v31  ;;  %v6055_v48 = vpop.f32.mrb[70].mxu0 }
 0x480   :  { %v6715_v15 = vcombine.low %v6693_v27, %v6707_v21  ;;  %v6716_v43 = vcombine.high %v6693_v27, %v6707_v21  ;;  %v6717_v23 = vcombine.low %v6700_v49, %v6714_v14  ;;  %v6718_v11 = vcombine.high %v6700_v49, %v6714_v14  ;;  %v6216_v54 = vpop.f32.mrb[70].mxu1  ;;  %v6057_v12 = vpop.f32.mrb[71].mxu0 }
 0x481   :  { %v6751_v32 = vcombine.low %v6559_v5, %v6560_v7  ;;  %v6752_v20 = vcombine.high %v6559_v5, %v6560_v7  ;;  %v6753_v53 = vcombine.low %v6561_v42, %v6562_v2  ;;  %v6754_v40 = vcombine.high %v6561_v42, %v6562_v2  ;;  %v6218_v30 = vpop.f32.mrb[71].mxu1 }
 0x482   :  { %v6725_v56 = vrot.slane %v6715_v15, %v14151_v63  ;;  %v6732_v50 = vrot.slane %v6717_v23, %v14151_v63  ;;  %v6739_v46 = vrot.slane %v6716_v43, %v14151_v63  ;;  %v6746_v31 = vrot.slane %v6718_v11, %v14151_v63 }
 0x483   :  { %v6761_v9 = vrot.slane %v6751_v32, %v14151_v63  ;;  %v6768_v27 = vrot.slane %v6752_v20, %v14151_v63  ;;  %v6775_v49 = vrot.slane %v6753_v53, %v14151_v63  ;;  %v6782_v5 = vrot.slane %v6754_v40, %v14151_v63  ;;  %v6061_v32 = vpop.f32.mrb[72].mxu0  ;;  %v14155_v40 = vld [vmem:[#allocation157_spill] sm:$0xff] }
 0x484   :  { %v6747_v21 = vcombine.high %v6725_v56, %v6725_v56  ;;  %v6748_v42 = vcombine.high %v6732_v50, %v6732_v50  ;;  %v6749_v14 = vcombine.high %v6739_v46, %v6739_v46  ;;  %v6750_v38 = vcombine.high %v6746_v31, %v6746_v31  ;;  %7900 = vst.msk [vmem:[#allocation9 + $0x3] ss:$4 sm:$0xf] %vm8752_vm0, %v6725_v56  ;;  %v6222_v53 = vpop.f32.mrb[72].mxu1  ;;  %v12805_v11 = vpop.f32.mrb[73].mxu0 }
 0x485   :  { %7902 = vst.msk [vmem:[#allocation9 + $0x13] ss:$4 sm:$0xf] %vm8752_vm0, %v6739_v46  ;;  %7908 = vst.msk [vmem:[#allocation9 + $0x43] ss:$4 sm:$0xf] %vm8752_vm0, %v6732_v50  ;;  %v6783_v2 = vcombine.low %v6761_v9, %v6775_v49  ;;  %v6784_v15 = vcombine.high %v6761_v9, %v6775_v49  ;;  %v6785_v43 = vcombine.low %v6768_v27, %v6782_v5 }
 0x486   :  { %7910 = vst.msk [vmem:[#allocation9 + $0x53] ss:$4 sm:$0xf] %vm8752_vm0, %v6746_v31  ;;  %v6786_v23 = vcombine.high %v6768_v27, %v6782_v5  ;;  %v12807_v20 = vpop.f32.mrb[73].mxu1  ;;  %v6434_v56 = vadd.f32 %v14155_v40, %v6305_v19  ;;  %v14156_v50 = vld [vmem:[#allocation158_spill] sm:$0xff]  ;;  %v6306_v31 = vmul.f32 %v12673_v36, %v6051_v0  ;;  %v6308_v9 = vmul.f32 %v12673_v36, %v6212_v35 }
 0x487   :  { %7904 = vst.msk [vmem:[#allocation9 + $0x23] ss:$4 sm:$0xf] %vm8752_vm0, %v6747_v21  ;;  %7906 = vst.msk [vmem:[#allocation9 + $0x33] ss:$4 sm:$0xf] %vm8752_vm0, %v6749_v14  ;;  %v6436_v46 = vadd.f32 %v14156_v50, %v6307_v33  ;;  %v6793_v27 = vrot.slane %v6783_v2, %v14151_v63  ;;  %v6800_v49 = vrot.slane %v6785_v43, %v14151_v63 }
 0x488   :  { %7912 = vst.msk [vmem:[#allocation9 + $0x63] ss:$4 sm:$0xf] %vm8752_vm0, %v6748_v42  ;;  %7914 = vst.msk [vmem:[#allocation9 + $0x73] ss:$4 sm:$0xf] %vm8752_vm0, %v6750_v38  ;;  %v6807_v5 = vrot.slane %v6784_v15, %v14151_v63  ;;  %v6814_v21 = vrot.slane %v6786_v23, %v14151_v63  ;;  %v6435_v19 = vadd.f32 %v12550_v47, %v6306_v31 }
 0x489   :  { %v14157_v42 = vld [vmem:[#allocation98_spill] sm:$0xff]  ;;  %v6565_v38 = vadd.f32 %v14158_v29, %v6436_v46  ;;  %v6437_v33 = vadd.f32 %v12554_v3, %v6308_v9  ;;  %v12829_v40 = vpop.f32.mrb[74].mxu0  ;;  %v12831_v0 = vpop.f32.mrb[74].mxu1  ;;  %v6815_v35 = vcombine.high %v6793_v27, %v6793_v27  ;;  %v6816_v2 = vcombine.high %v6800_v49, %v6800_v49  ;;  %7916 = vst.msk [vmem:[#allocation9 + $0x83] ss:$4 sm:$0xf] %vm8752_vm0, %v6793_v27 }
 0x48a   :  { %v6563_v14 = vadd.f32 %v14157_v42, %v6434_v56  ;;  %v6817_v50 = vcombine.high %v6807_v5, %v6807_v5  ;;  %v6818_v43 = vcombine.high %v6814_v21, %v6814_v21  ;;  %7918 = vst.msk [vmem:[#allocation9 + $0x93] ss:$4 sm:$0xf] %vm8752_vm0, %v6807_v5  ;;  %7924 = vst.msk [vmem:[#allocation9 + $0xc3] ss:$4 sm:$0xf] %vm8752_vm0, %v6800_v49 }
 0x48b   :  { %7926 = vst.msk [vmem:[#allocation9 + $0xd3] ss:$4 sm:$0xf] %vm8752_vm0, %v6814_v21  ;;  %v12841_v47 = vpop.f32.mrb[75].mxu0  ;;  %v12843_v3 = vpop.f32.mrb[75].mxu1  ;;  %v14159_v29 = vld [vmem:[#allocation100_spill] sm:$0xff]  ;;  %v6309_v46 = vmul.f32 %v12673_v36, %v6055_v48  ;;  %v6311_v31 = vmul.f32 %v12673_v36, %v6216_v54  ;;  %v6310_v9 = vmul.f32 %v12673_v36, %v6057_v12  ;;  %v6312_v27 = vmul.f32 %v12673_v36, %v6218_v30 }
 0x48c   :  { %v6564_v15 = vadd.f32 %v14159_v29, %v6435_v19  ;;  %v14160_v23 = vld [vmem:[#allocation101_spill] sm:$0xff]  ;;  %7920 = vst.msk [vmem:[#allocation9 + $0xa3] ss:$4 sm:$0xf] %vm8752_vm0, %v6815_v35  ;;  %v6313_v48 = vmul.f32 %v12673_v36, %v6061_v32  ;;  %v6315_v54 = vmul.f32 %v12673_v36, %v6222_v53  ;;  %v12861_v19 = vpop.f32.mrb[76].mxu0  ;;  %v14161_v29 = vld [vmem:[#allocation102_spill] sm:$0xff] }
 0x48d   :  { %v6566_v56 = vadd.f32 %v14160_v23, %v6437_v33  ;;  %7922 = vst.msk [vmem:[#allocation9 + $0xb3] ss:$4 sm:$0xf] %vm8752_vm0, %v6817_v50  ;;  %7928 = vst.msk [vmem:[#allocation9 + $0xe3] ss:$4 sm:$0xf] %vm8752_vm0, %v6816_v2  ;;  %v6438_v35 = vadd.f32 %v12558_v10, %v6309_v46  ;;  %v6440_v2 = vadd.f32 %v12562_v4, %v6311_v31 }
 0x48e   :  { %7930 = vst.msk [vmem:[#allocation9 + $0xf3] ss:$4 sm:$0xf] %vm8752_vm0, %v6818_v43  ;;  %v6819_v49 = vcombine.low %v6563_v14, %v6564_v15  ;;  %v6820_v5 = vcombine.high %v6563_v14, %v6564_v15  ;;  %v12863_v33 = vpop.f32.mrb[76].mxu1  ;;  %v6439_v12 = vadd.f32 %v12566_v61, %v6310_v9  ;;  %v6441_v30 = vadd.f32 %v12570_v8, %v6312_v27  ;;  %v12869_v50 = vpop.f32.mrb[77].mxu0  ;;  %v14162_v15 = vld [vmem:[#allocation103_spill] sm:$0xff] }
 0x48f   :  { %v6821_v21 = vcombine.low %v6565_v38, %v6566_v56  ;;  %v6822_v42 = vcombine.high %v6565_v38, %v6566_v56  ;;  %v12871_v32 = vpop.f32.mrb[77].mxu1  ;;  %v6567_v10 = vadd.f32 %v14161_v29, %v6438_v35  ;;  %v6569_v4 = vadd.f32 %v14162_v15, %v6440_v2  ;;  %v14163_v23 = vld [vmem:[#allocation104_spill] sm:$0xff]  ;;  %v12881_v26 = vpop.f32.mrb[78].mxu0 }
 0x490   :  { %v6829_v53 = vrot.slane %v6819_v49, %v14151_v63  ;;  %v6836_v14 = vrot.slane %v6820_v5, %v14151_v63  ;;  %v6568_v61 = vadd.f32 %v14163_v23, %v6439_v12  ;;  %v14164_v56 = vld [vmem:[#allocation140_spill] sm:$0xff]  ;;  %v12883_v49 = vpop.f32.mrb[78].mxu1  ;;  %v12885_v55 = vpop.f32.mrb[79].mxu0 }
 0x491   :  { %v6843_v38 = vrot.slane %v6821_v21, %v14151_v63  ;;  %v6850_v43 = vrot.slane %v6822_v42, %v14151_v63  ;;  %v6570_v8 = vadd.f32 %v14164_v56, %v6441_v30  ;;  %v12887_v35 = vpop.f32.mrb[79].mxu1 }
 0x492   :  { %v6887_v5 = vcombine.low %v6567_v10, %v6568_v61  ;;  %v6888_v21 = vcombine.high %v6567_v10, %v6568_v61 }
 0x493   :  { %v6851_v46 = vcombine.low %v6829_v53, %v6843_v38  ;;  %v6852_v31 = vcombine.high %v6829_v53, %v6843_v38  ;;  %v6853_v9 = vcombine.low %v6836_v14, %v6850_v43  ;;  %v6854_v27 = vcombine.high %v6836_v14, %v6850_v43  ;;  %v12905_v61 = vpop.f32.mrb[80].mxu0 }
 0x494   :  { %v6889_v44 = vcombine.low %v6569_v4, %v6570_v8  ;;  %v6890_v42 = vcombine.high %v6569_v4, %v6570_v8  ;;  %v6897_v14 = vrot.slane %v6887_v5, %v14151_v63  ;;  %v6904_v38 = vrot.slane %v6888_v21, %v14151_v63 }
 0x495   :  { %v6861_v2 = vrot.slane %v6851_v46, %v14151_v63  ;;  %v6868_v12 = vrot.slane %v6853_v9, %v14151_v63  ;;  %v6875_v30 = vrot.slane %v6852_v31, %v14151_v63  ;;  %v6882_v53 = vrot.slane %v6854_v27, %v14151_v63  ;;  %v12909_v9 = vpop.f32.mrb[81].mxu0 }
 0x496   :  { %v6911_v43 = vrot.slane %v6889_v44, %v14151_v63  ;;  %v6918_v29 = vrot.slane %v6890_v42, %v14151_v63  ;;  %v12907_v44 = vpop.f32.mrb[80].mxu1  ;;  %v6442_v5 = vadd.f32 %v12574_v57, %v6313_v48  ;;  %v6444_v21 = vadd.f32 %v12578_v16, %v6315_v54 }
 0x497   :  { %v6883_v10 = vcombine.high %v6861_v2, %v6861_v2  ;;  %v6884_v15 = vcombine.high %v6868_v12, %v6868_v12  ;;  %v6885_v4 = vcombine.high %v6875_v30, %v6875_v30  ;;  %v6886_v23 = vcombine.high %v6882_v53, %v6882_v53  ;;  %7932 = vst.msk [vmem:[#allocation9 + $0x103] ss:$4 sm:$0xf] %vm8752_vm0, %v6861_v2  ;;  %v12911_v27 = vpop.f32.mrb[81].mxu1 }
 0x498   :  { %7934 = vst.msk [vmem:[#allocation9 + $0x113] ss:$4 sm:$0xf] %vm8752_vm0, %v6875_v30  ;;  %7940 = vst.msk [vmem:[#allocation9 + $0x143] ss:$4 sm:$0xf] %vm8752_vm0, %v6868_v12  ;;  %v6919_v56 = vcombine.low %v6897_v14, %v6911_v43  ;;  %v6920_v8 = vcombine.high %v6897_v14, %v6911_v43  ;;  %v6921_v46 = vcombine.low %v6904_v38, %v6918_v29 }
 0x499   :  { %7942 = vst.msk [vmem:[#allocation9 + $0x153] ss:$4 sm:$0xf] %vm8752_vm0, %v6882_v53  ;;  %v6922_v31 = vcombine.high %v6904_v38, %v6918_v29  ;;  %7936 = vst.msk [vmem:[#allocation9 + $0x123] ss:$4 sm:$0xf] %vm8752_vm0, %v6883_v10  ;;  %v6314_v42 = vmul.f32 %v12673_v36, %v12805_v11  ;;  %v6316_v2 = vmul.f32 %v12673_v36, %v12807_v20 }
 0x49a   :  { %7938 = vst.msk [vmem:[#allocation9 + $0x133] ss:$4 sm:$0xf] %vm8752_vm0, %v6885_v4  ;;  %7944 = vst.msk [vmem:[#allocation9 + $0x163] ss:$4 sm:$0xf] %vm8752_vm0, %v6884_v15  ;;  %v6929_v12 = vrot.slane %v6919_v56, %v14151_v63  ;;  %v6936_v30 = vrot.slane %v6921_v46, %v14151_v63  ;;  %v6943_v53 = vrot.slane %v6920_v8, %v14151_v63 }
 0x49b   :  { %7946 = vst.msk [vmem:[#allocation9 + $0x173] ss:$4 sm:$0xf] %vm8752_vm0, %v6886_v23  ;;  %v6950_v14 = vrot.slane %v6922_v31, %v14151_v63  ;;  %v14165_v38 = vld [vmem:[#allocation141_spill] sm:$0xff]  ;;  %v14166_v29 = vld [vmem:[#allocation142_spill] sm:$0xff]  ;;  %v6443_v16 = vadd.f32 %v12582_v60, %v6314_v42  ;;  %v6445_v48 = vadd.f32 %v12586_v13, %v6316_v2  ;;  %v12935_v11 = vpop.f32.mrb[82].mxu0  ;;  %v6317_v31 = vmul.f32 %v12673_v36, %v12829_v40 }
 0x49c   :  { %v6571_v43 = vadd.f32 %v14165_v38, %v6442_v5  ;;  %v6573_v57 = vadd.f32 %v14166_v29, %v6444_v21  ;;  %v12937_v54 = vpop.f32.mrb[82].mxu1  ;;  %v6951_v20 = vcombine.high %v6929_v12, %v6929_v12  ;;  %v6952_v10 = vcombine.high %v6936_v30, %v6936_v30  ;;  %7948 = vst.msk [vmem:[#allocation9 + $0x183] ss:$4 sm:$0xf] %vm8752_vm0, %v6929_v12  ;;  %v12947_v60 = vpop.f32.mrb[83].mxu0  ;;  %v14167_v23 = vld [vmem:[#allocation143_spill] sm:$0xff] }
 0x49d   :  { %v6953_v15 = vcombine.high %v6943_v53, %v6943_v53  ;;  %v6954_v4 = vcombine.high %v6950_v14, %v6950_v14  ;;  %7950 = vst.msk [vmem:[#allocation9 + $0x193] ss:$4 sm:$0xf] %vm8752_vm0, %v6943_v53  ;;  %7956 = vst.msk [vmem:[#allocation9 + $0x1c3] ss:$4 sm:$0xf] %vm8752_vm0, %v6936_v30  ;;  %v6572_v56 = vadd.f32 %v14167_v23, %v6443_v16 }
 0x49e   :  { %7958 = vst.msk [vmem:[#allocation9 + $0x1d3] ss:$4 sm:$0xf] %vm8752_vm0, %v6950_v14  ;;  %v12949_v13 = vpop.f32.mrb[83].mxu1  ;;  %v14168_v8 = vld [vmem:[#allocation144_spill] sm:$0xff]  ;;  %v6319_v5 = vmul.f32 %v12673_v36, %v12831_v0  ;;  %v6318_v21 = vmul.f32 %v12673_v36, %v12841_v47  ;;  %v6320_v40 = vmul.f32 %v12673_v36, %v12843_v3  ;;  %v6321_v0 = vmul.f32 %v12673_v36, %v12861_v19  ;;  %v12973_v14 = vpop.f32.mrb[84].mxu0 }
 0x49f   :  { %v6574_v46 = vadd.f32 %v14168_v8, %v6445_v48  ;;  %7952 = vst.msk [vmem:[#allocation9 + $0x1a3] ss:$4 sm:$0xf] %vm8752_vm0, %v6951_v20  ;;  %7954 = vst.msk [vmem:[#allocation9 + $0x1b3] ss:$4 sm:$0xf] %vm8752_vm0, %v6953_v15  ;;  %v6323_v42 = vmul.f32 %v12673_v36, %v12863_v33  ;;  %v6955_v2 = vcombine.low %v6571_v43, %v6572_v56 }
 0x4a0   :  { %7960 = vst.msk [vmem:[#allocation9 + $0x1e3] ss:$4 sm:$0xf] %vm8752_vm0, %v6952_v10  ;;  %7962 = vst.msk [vmem:[#allocation9 + $0x1f3] ss:$4 sm:$0xf] %vm8752_vm0, %v6954_v4  ;;  %v6956_v12 = vcombine.high %v6571_v43, %v6572_v56  ;;  %v6446_v29 = vadd.f32 %v12590_v59, %v6317_v31  ;;  %v6448_v47 = vadd.f32 %v12594_v58, %v6319_v5 }
 0x4a1   :  { %v6957_v30 = vcombine.low %v6573_v57, %v6574_v46  ;;  %v6958_v53 = vcombine.high %v6573_v57, %v6574_v46  ;;  %v12975_v38 = vpop.f32.mrb[84].mxu1  ;;  %v6447_v3 = vadd.f32 %v12598_v51, %v6318_v21  ;;  %v6449_v16 = vadd.f32 %v12602_v22, %v6320_v40  ;;  %v12981_v19 = vpop.f32.mrb[85].mxu0  ;;  %v14169_v10 = vld [vmem:[#allocation145_spill] sm:$0xff]  ;;  %v14170_v15 = vld [vmem:[#allocation146_spill] sm:$0xff]  ;;  %v14172_v23 = vld [vmem:[#allocation147_spill] sm:$0xff] }
 0x4a2   :  { %v12983_v48 = vpop.f32.mrb[85].mxu1  ;;  %v6965_v33 = vrot.slane %v6955_v2, %v14151_v63  ;;  %v6972_v43 = vrot.slane %v6956_v12, %v14151_v63  ;;  %v6575_v59 = vadd.f32 %v14169_v10, %v6446_v29  ;;  %v6577_v58 = vadd.f32 %v14170_v15, %v6448_v47  ;;  %v14171_v4 = vld [vmem:[#allocation105_spill] sm:$0xff]  ;;  %v12993_v5 = vpop.f32.mrb[86].mxu0 }
 0x4a3   :  { %v6979_v57 = vrot.slane %v6957_v30, %v14151_v63  ;;  %v6986_v20 = vrot.slane %v6958_v53, %v14151_v63  ;;  %v6576_v51 = vadd.f32 %v14171_v4, %v6447_v3  ;;  %v6578_v22 = vadd.f32 %v14172_v23, %v6449_v16  ;;  %v12995_v21 = vpop.f32.mrb[86].mxu1  ;;  %v12997_v53 = vpop.f32.mrb[87].mxu0 }
 0x4a4   :  { %v12999_v29 = vpop.f32.mrb[87].mxu1 }
 0x4a5   :  { %v6987_v56 = vcombine.low %v6965_v33, %v6979_v57  ;;  %v6988_v8 = vcombine.high %v6965_v33, %v6979_v57  ;;  %v6989_v46 = vcombine.low %v6972_v43, %v6986_v20  ;;  %v6990_v31 = vcombine.high %v6972_v43, %v6986_v20  ;;  %v13019_v23 = vpop.f32.mrb[88].mxu1 }
 0x4a6   :  { %v7023_v40 = vcombine.low %v6575_v59, %v6576_v51  ;;  %v7024_v2 = vcombine.high %v6575_v59, %v6576_v51  ;;  %v7025_v12 = vcombine.low %v6577_v58, %v6578_v22  ;;  %v7026_v30 = vcombine.high %v6577_v58, %v6578_v22  ;;  %v13017_v51 = vpop.f32.mrb[88].mxu0 }
 0x4a7   :  { %v6997_v47 = vrot.slane %v6987_v56, %v14151_v63  ;;  %v7004_v3 = vrot.slane %v6989_v46, %v14151_v63  ;;  %v7011_v16 = vrot.slane %v6988_v8, %v14151_v63  ;;  %v7018_v33 = vrot.slane %v6990_v31, %v14151_v63  ;;  %v13021_v31 = vpop.f32.mrb[89].mxu0 }
 0x4a8   :  { %v7033_v43 = vrot.slane %v7023_v40, %v14151_v63  ;;  %v7040_v57 = vrot.slane %v7024_v2, %v14151_v63  ;;  %v7047_v20 = vrot.slane %v7025_v12, %v14151_v63  ;;  %v7054_v10 = vrot.slane %v7026_v30, %v14151_v63  ;;  %v13023_v40 = vpop.f32.mrb[89].mxu1 }
 0x4a9   :  { %v7019_v59 = vcombine.high %v6997_v47, %v6997_v47  ;;  %v7020_v15 = vcombine.high %v7004_v3, %v7004_v3  ;;  %v7021_v58 = vcombine.high %v7011_v16, %v7011_v16  ;;  %v7022_v4 = vcombine.high %v7018_v33, %v7018_v33  ;;  %7964 = vst.msk [vmem:[#allocation9 + $0x203] ss:$4 sm:$0xf] %vm8752_vm0, %v6997_v47 }
 0x4aa   :  { %7966 = vst.msk [vmem:[#allocation9 + $0x213] ss:$4 sm:$0xf] %vm8752_vm0, %v7011_v16  ;;  %7972 = vst.msk [vmem:[#allocation9 + $0x243] ss:$4 sm:$0xf] %vm8752_vm0, %v7004_v3  ;;  %v7055_v22 = vcombine.low %v7033_v43, %v7047_v20  ;;  %v7056_v56 = vcombine.high %v7033_v43, %v7047_v20  ;;  %v7057_v8 = vcombine.low %v7040_v57, %v7054_v10 }
 0x4ab   :  { %7974 = vst.msk [vmem:[#allocation9 + $0x253] ss:$4 sm:$0xf] %vm8752_vm0, %v7018_v33  ;;  %v7058_v46 = vcombine.high %v7040_v57, %v7054_v10  ;;  %7968 = vst.msk [vmem:[#allocation9 + $0x223] ss:$4 sm:$0xf] %vm8752_vm0, %v7019_v59  ;;  %v6450_v2 = vadd.f32 %v12606_v39, %v6321_v0  ;;  %v6452_v12 = vadd.f32 %v12610_v52, %v6323_v42 }
 0x4ac   :  { %7970 = vst.msk [vmem:[#allocation9 + $0x233] ss:$4 sm:$0xf] %vm8752_vm0, %v7021_v58  ;;  %7976 = vst.msk [vmem:[#allocation9 + $0x263] ss:$4 sm:$0xf] %vm8752_vm0, %v7020_v15  ;;  %v6322_v30 = vmul.f32 %v12673_v36, %v12869_v50  ;;  %v6324_v47 = vmul.f32 %v12673_v36, %v12871_v32  ;;  %v7065_v3 = vrot.slane %v7055_v22, %v14151_v63 }
 0x4ad   :  { %7978 = vst.msk [vmem:[#allocation9 + $0x273] ss:$4 sm:$0xf] %vm8752_vm0, %v7022_v4  ;;  %v7072_v16 = vrot.slane %v7057_v8, %v14151_v63  ;;  %v7079_v33 = vrot.slane %v7056_v56, %v14151_v63  ;;  %v7086_v43 = vrot.slane %v7058_v46, %v14151_v63  ;;  %v14173_v57 = vld [vmem:[#allocation106_spill] sm:$0xff]  ;;  %v14174_v10 = vld [vmem:[#allocation148_spill] sm:$0xff]  ;;  %v13047_v50 = vpop.f32.mrb[90].mxu0  ;;  %v6325_v46 = vmul.f32 %v12673_v36, %v12881_v26 }
 0x4ae   :  { %v6579_v20 = vadd.f32 %v14173_v57, %v6450_v2  ;;  %v6581_v39 = vadd.f32 %v14174_v10, %v6452_v12  ;;  %v6451_v52 = vadd.f32 %v12614_v6, %v6322_v30  ;;  %v6453_v0 = vadd.f32 %v12618_v18, %v6324_v47  ;;  %v13049_v42 = vpop.f32.mrb[90].mxu1  ;;  %7980 = vst.msk [vmem:[#allocation9 + $0x283] ss:$4 sm:$0xf] %vm8752_vm0, %v7065_v3  ;;  %v13059_v6 = vpop.f32.mrb[91].mxu0  ;;  %v14175_v4 = vld [vmem:[#allocation107_spill] sm:$0xff] }
 0x4af   :  { %v7087_v32 = vcombine.high %v7065_v3, %v7065_v3  ;;  %v7088_v59 = vcombine.high %v7072_v16, %v7072_v16  ;;  %v7089_v15 = vcombine.high %v7079_v33, %v7079_v33  ;;  %v7090_v58 = vcombine.high %v7086_v43, %v7086_v43  ;;  %7982 = vst.msk [vmem:[#allocation9 + $0x293] ss:$4 sm:$0xf] %vm8752_vm0, %v7079_v33  ;;  %v13061_v18 = vpop.f32.mrb[91].mxu1  ;;  %v14176_v56 = vld [vmem:[#allocation108_spill] sm:$0xff] }
 0x4b0   :  { %7988 = vst.msk [vmem:[#allocation9 + $0x2c3] ss:$4 sm:$0xf] %vm8752_vm0, %v7072_v16  ;;  %7990 = vst.msk [vmem:[#allocation9 + $0x2d3] ss:$4 sm:$0xf] %vm8752_vm0, %v7086_v43  ;;  %v6580_v22 = vadd.f32 %v14175_v4, %v6451_v52  ;;  %v6582_v8 = vadd.f32 %v14176_v56, %v6453_v0  ;;  %v6327_v2 = vmul.f32 %v12673_v36, %v12883_v49 }
 0x4b1   :  { %7984 = vst.msk [vmem:[#allocation9 + $0x2a3] ss:$4 sm:$0xf] %vm8752_vm0, %v7087_v32  ;;  %7986 = vst.msk [vmem:[#allocation9 + $0x2b3] ss:$4 sm:$0xf] %vm8752_vm0, %v7089_v15  ;;  %v6326_v12 = vmul.f32 %v12673_v36, %v12885_v55  ;;  %v6328_v26 = vmul.f32 %v12673_v36, %v12887_v35  ;;  %v6329_v49 = vmul.f32 %v12673_v36, %v12905_v61 }
 0x4b2   :  { %7992 = vst.msk [vmem:[#allocation9 + $0x2e3] ss:$4 sm:$0xf] %vm8752_vm0, %v7088_v59  ;;  %7994 = vst.msk [vmem:[#allocation9 + $0x2f3] ss:$4 sm:$0xf] %vm8752_vm0, %v7090_v58  ;;  %v6331_v30 = vmul.f32 %v12673_v36, %v12907_v44  ;;  %v7091_v47 = vcombine.low %v6579_v20, %v6580_v22  ;;  %v7092_v3 = vcombine.high %v6579_v20, %v6580_v22 }
 0x4b3   :  { %v7093_v16 = vcombine.low %v6581_v39, %v6582_v8  ;;  %v7094_v33 = vcombine.high %v6581_v39, %v6582_v8  ;;  %v13085_v43 = vpop.f32.mrb[92].mxu0  ;;  %v13087_v57 = vpop.f32.mrb[92].mxu1  ;;  %v6454_v10 = vadd.f32 %v12622_v34, %v6325_v46  ;;  %v6456_v55 = vadd.f32 %v12626_v37, %v6327_v2  ;;  %v14177_v59 = vld [vmem:[#allocation109_spill] sm:$0xff]  ;;  %v14179_v58 = vld [vmem:[#allocation150_spill] sm:$0xff]  ;;  %v14180_v4 = vld [vmem:[#allocation151_spill] sm:$0xff] }
 0x4b4   :  { %v6455_v35 = vadd.f32 %v12630_v1, %v6326_v12  ;;  %v6457_v52 = vadd.f32 %v12634_v41, %v6328_v26  ;;  %v13093_v61 = vpop.f32.mrb[93].mxu0  ;;  %v13095_v0 = vpop.f32.mrb[93].mxu1  ;;  %v7101_v44 = vrot.slane %v7091_v47, %v14151_v63  ;;  %v7108_v20 = vrot.slane %v7092_v3, %v14151_v63  ;;  %v14178_v15 = vld [vmem:[#allocation149_spill] sm:$0xff] }
 0x4b5   :  { %v7115_v39 = vrot.slane %v7093_v16, %v14151_v63  ;;  %v7122_v32 = vrot.slane %v7094_v33, %v14151_v63  ;;  %v6583_v34 = vadd.f32 %v14177_v59, %v6454_v10  ;;  %v6585_v37 = vadd.f32 %v14178_v15, %v6456_v55  ;;  %v13105_v2 = vpop.f32.mrb[94].mxu0  ;;  %v13107_v12 = vpop.f32.mrb[94].mxu1 }
 0x4b6   :  { %v6584_v1 = vadd.f32 %v14179_v58, %v6455_v35  ;;  %v6586_v41 = vadd.f32 %v14180_v4, %v6457_v52  ;;  %v13109_v33 = vpop.f32.mrb[95].mxu0  ;;  %v13111_v10 = vpop.f32.mrb[95].mxu1 }
 0x4b7   :  { %v7123_v22 = vcombine.low %v7101_v44, %v7115_v39  ;;  %v7124_v56 = vcombine.high %v7101_v44, %v7115_v39  ;;  %v7125_v8 = vcombine.low %v7108_v20, %v7122_v32  ;;  %v7126_v46 = vcombine.high %v7108_v20, %v7122_v32 }
 0x4b8   :  { %v7159_v26 = vcombine.low %v6583_v34, %v6584_v1  ;;  %v7160_v47 = vcombine.high %v6583_v34, %v6584_v1  ;;  %v7161_v3 = vcombine.low %v6585_v37, %v6586_v41  ;;  %v7162_v16 = vcombine.high %v6585_v37, %v6586_v41 }
 0x4b9   :  { %v7133_v55 = vrot.slane %v7123_v22, %v14151_v63  ;;  %v7140_v35 = vrot.slane %v7125_v8, %v14151_v63  ;;  %v7147_v52 = vrot.slane %v7124_v56, %v14151_v63  ;;  %v7154_v44 = vrot.slane %v7126_v46, %v14151_v63  ;;  %v14181_v56 = vld [vmem:[#allocation121_spill] sm:$0xff]  ;;  %v14182_v46 = vld [vmem:[#allocation159_spill] sm:$0xff] }
 0x4ba   :  { %v7169_v20 = vrot.slane %v7159_v26, %v14151_v63  ;;  %v7176_v39 = vrot.slane %v7160_v47, %v14151_v63  ;;  %v7183_v32 = vrot.slane %v7161_v3, %v14151_v63  ;;  %v7190_v59 = vrot.slane %v7162_v16, %v14151_v63 }
 0x4bb   :  { %v7155_v34 = vcombine.high %v7133_v55, %v7133_v55  ;;  %v7156_v15 = vcombine.high %v7140_v35, %v7140_v35  ;;  %v7157_v37 = vcombine.high %v7147_v52, %v7147_v52  ;;  %v7158_v58 = vcombine.high %v7154_v44, %v7154_v44  ;;  %7996 = vst.msk [vmem:[#allocation9 + $0x303] ss:$4 sm:$0xf] %vm8752_vm0, %v7133_v55 }
 0x4bc   :  { %7998 = vst.msk [vmem:[#allocation9 + $0x313] ss:$4 sm:$0xf] %vm8752_vm0, %v7147_v52  ;;  %8004 = vst.msk [vmem:[#allocation9 + $0x343] ss:$4 sm:$0xf] %vm8752_vm0, %v7140_v35  ;;  %v7191_v1 = vcombine.low %v7169_v20, %v7183_v32  ;;  %v7192_v4 = vcombine.high %v7169_v20, %v7183_v32  ;;  %v7193_v41 = vcombine.low %v7176_v39, %v7190_v59 }
 0x4bd   :  { %8006 = vst.msk [vmem:[#allocation9 + $0x353] ss:$4 sm:$0xf] %vm8752_vm0, %v7154_v44  ;;  %v7194_v22 = vcombine.high %v7176_v39, %v7190_v59  ;;  %8000 = vst.msk [vmem:[#allocation9 + $0x323] ss:$4 sm:$0xf] %vm8752_vm0, %v7155_v34  ;;  %v6458_v8 = vadd.f32 %v14181_v56, %v6329_v49  ;;  %v6460_v26 = vadd.f32 %v14182_v46, %v6331_v30 }
 0x4be   :  { %8002 = vst.msk [vmem:[#allocation9 + $0x333] ss:$4 sm:$0xf] %vm8752_vm0, %v7157_v37  ;;  %8008 = vst.msk [vmem:[#allocation9 + $0x363] ss:$4 sm:$0xf] %vm8752_vm0, %v7156_v15  ;;  %v6330_v47 = vmul.f32 %v12673_v36, %v12909_v9  ;;  %v6332_v3 = vmul.f32 %v12673_v36, %v12911_v27  ;;  %v7201_v16 = vrot.slane %v7191_v1, %v14151_v63 }
 0x4bf   :  { %8010 = vst.msk [vmem:[#allocation9 + $0x373] ss:$4 sm:$0xf] %vm8752_vm0, %v7158_v58  ;;  %v7208_v55 = vrot.slane %v7193_v41, %v14151_v63  ;;  %v7215_v35 = vrot.slane %v7192_v4, %v14151_v63  ;;  %v7222_v52 = vrot.slane %v7194_v22, %v14151_v63  ;;  %v14183_v44 = vld [vmem:[#allocation110_spill] sm:$0xff]  ;;  %v14184_v39 = vld [vmem:[#allocation111_spill] sm:$0xff]  ;;  %v14185_v32 = vld [vmem:[#allocation160_spill] sm:$0xff]  ;;  %v6333_v22 = vmul.f32 %v12673_v36, %v12935_v11 }
 0x4c0   :  { %v6587_v20 = vadd.f32 %v14183_v44, %v6458_v8  ;;  %v6589_v49 = vadd.f32 %v14184_v39, %v6460_v26  ;;  %v6459_v30 = vadd.f32 %v14185_v32, %v6330_v47  ;;  %v14186_v59 = vld [vmem:[#allocation161_spill] sm:$0xff]  ;;  %v7223_v9 = vcombine.high %v7201_v16, %v7201_v16  ;;  %8012 = vst.msk [vmem:[#allocation9 + $0x383] ss:$4 sm:$0xf] %vm8752_vm0, %v7201_v16  ;;  %v14188_v4 = vld [vmem:[#allocation152_spill] sm:$0xff] }
 0x4c1   :  { %v6461_v34 = vadd.f32 %v14186_v59, %v6332_v3  ;;  %v7224_v15 = vcombine.high %v7208_v55, %v7208_v55  ;;  %v7225_v37 = vcombine.high %v7215_v35, %v7215_v35  ;;  %v7226_v27 = vcombine.high %v7222_v52, %v7222_v52  ;;  %8014 = vst.msk [vmem:[#allocation9 + $0x393] ss:$4 sm:$0xf] %vm8752_vm0, %v7215_v35  ;;  %v14187_v58 = vld [vmem:[#allocation113_spill] sm:$0xff] }
 0x4c2   :  { %8020 = vst.msk [vmem:[#allocation9 + $0x3c3] ss:$4 sm:$0xf] %vm8752_vm0, %v7208_v55  ;;  %8022 = vst.msk [vmem:[#allocation9 + $0x3d3] ss:$4 sm:$0xf] %vm8752_vm0, %v7222_v52  ;;  %v6588_v1 = vadd.f32 %v14187_v58, %v6459_v30  ;;  %v6335_v56 = vmul.f32 %v12673_v36, %v12937_v54  ;;  %v6334_v8 = vmul.f32 %v12673_v36, %v12947_v60 }
 0x4c3   :  { %v6590_v41 = vadd.f32 %v14188_v4, %v6461_v34  ;;  %8016 = vst.msk [vmem:[#allocation9 + $0x3a3] ss:$4 sm:$0xf] %vm8752_vm0, %v7223_v9  ;;  %8018 = vst.msk [vmem:[#allocation9 + $0x3b3] ss:$4 sm:$0xf] %vm8752_vm0, %v7225_v37  ;;  %v6336_v11 = vmul.f32 %v12673_v36, %v12949_v13  ;;  %v6337_v54 = vmul.f32 %v12673_v36, %v12973_v14 }
 0x4c4   :  { %8024 = vst.msk [vmem:[#allocation9 + $0x3e3] ss:$4 sm:$0xf] %vm8752_vm0, %v7224_v15  ;;  %8026 = vst.msk [vmem:[#allocation9 + $0x3f3] ss:$4 sm:$0xf] %vm8752_vm0, %v7226_v27  ;;  %v6339_v46 = vmul.f32 %v12673_v36, %v12975_v38  ;;  %v7227_v26 = vcombine.low %v6587_v20, %v6588_v1  ;;  %v7228_v47 = vcombine.high %v6587_v20, %v6588_v1 }
 0x4c5   :  { %v7229_v3 = vcombine.low %v6589_v49, %v6590_v41  ;;  %v7230_v16 = vcombine.high %v6589_v49, %v6590_v41  ;;  %v14189_v55 = vld [vmem:[#allocation162_spill] sm:$0xff]  ;;  %v14190_v52 = vld [vmem:[#allocation163_spill] sm:$0xff]  ;;  %v14191_v39 = vld [vmem:[#allocation53_spill] sm:$0xff] }
 0x4c6   :  { %v6462_v35 = vadd.f32 %v14189_v55, %v6333_v22  ;;  %v6464_v44 = vadd.f32 %v14190_v52, %v6335_v56  ;;  %v6463_v32 = vadd.f32 %v14191_v39, %v6334_v8  ;;  %v14192_v60 = vld [vmem:[#allocation54_spill] sm:$0xff]  ;;  %v7237_v13 = vrot.slane %v7227_v26, %v14151_v63  ;;  %v14193_v34 = vld [vmem:[#allocation153_spill] sm:$0xff]  ;;  %v14195_v15 = vld [vmem:[#allocation155_spill] sm:$0xff] }
 0x4c7   :  { %v6465_v30 = vadd.f32 %v14192_v60, %v6336_v11  ;;  %v7244_v59 = vrot.slane %v7228_v47, %v14151_v63  ;;  %v7251_v14 = vrot.slane %v7229_v3, %v14151_v63  ;;  %v7258_v38 = vrot.slane %v7230_v16, %v14151_v63  ;;  %v14194_v9 = vld [vmem:[#allocation154_spill] sm:$0xff] }
 0x4c8   :  { %v6591_v20 = vadd.f32 %v14193_v34, %v6462_v35  ;;  %v6593_v49 = vadd.f32 %v14194_v9, %v6464_v44  ;;  %v6592_v37 = vadd.f32 %v14195_v15, %v6463_v32  ;;  %v14196_v27 = vld [vmem:[#allocation114_spill] sm:$0xff] }
 0x4c9   :  { %v6594_v58 = vadd.f32 %v14196_v27, %v6465_v30  ;;  %v7259_v1 = vcombine.low %v7237_v13, %v7251_v14  ;;  %v7260_v4 = vcombine.high %v7237_v13, %v7251_v14  ;;  %v7261_v41 = vcombine.low %v7244_v59, %v7258_v38 }
 0x4ca   :  { %v7262_v22 = vcombine.high %v7244_v59, %v7258_v38  ;;  %v7295_v56 = vcombine.low %v6591_v20, %v6592_v37  ;;  %v7296_v8 = vcombine.high %v6591_v20, %v6592_v37  ;;  %v14197_v20 = vld [vmem:[#allocation130_spill] sm:$0xff]  ;;  %v6338_v37 = vmul.f32 %v12673_v36, %v12981_v19 }
 0x4cb   :  { %v7297_v11 = vcombine.low %v6593_v49, %v6594_v58  ;;  %v7298_v26 = vcombine.high %v6593_v49, %v6594_v58  ;;  %v7269_v47 = vrot.slane %v7259_v1, %v14151_v63  ;;  %v7276_v3 = vrot.slane %v7261_v41, %v14151_v63  ;;  %v14198_v49 = vld [vmem:[#allocation131_spill] sm:$0xff] }
 0x4cc   :  { %v7283_v16 = vrot.slane %v7260_v4, %v14151_v63  ;;  %v7290_v55 = vrot.slane %v7262_v22, %v14151_v63  ;;  %v7305_v35 = vrot.slane %v7295_v56, %v14151_v63  ;;  %v7312_v52 = vrot.slane %v7296_v8, %v14151_v63  ;;  %v14199_v22 = vld [vmem:[#allocation156_spill] sm:$0xff]  ;;  %v14200_v8 = vld [vmem:[#allocation115_spill] sm:$0xff] }
 0x4cd   :  { %v7319_v44 = vrot.slane %v7297_v11, %v14151_v63  ;;  %v7326_v39 = vrot.slane %v7298_v26, %v14151_v63  ;;  %v7291_v32 = vcombine.high %v7269_v47, %v7269_v47  ;;  %v7292_v60 = vcombine.high %v7276_v3, %v7276_v3  ;;  %8028 = vst.msk [vmem:[#allocation9 + $0x403] ss:$4 sm:$0xf] %vm8752_vm0, %v7269_v47  ;;  %v14201_v11 = vld [vmem:[#allocation55_spill] sm:$0xff] }
 0x4ce   :  { %v7293_v30 = vcombine.high %v7283_v16, %v7283_v16  ;;  %v7294_v13 = vcombine.high %v7290_v55, %v7290_v55  ;;  %8030 = vst.msk [vmem:[#allocation9 + $0x413] ss:$4 sm:$0xf] %vm8752_vm0, %v7283_v16  ;;  %8036 = vst.msk [vmem:[#allocation9 + $0x443] ss:$4 sm:$0xf] %vm8752_vm0, %v7276_v3  ;;  %v6466_v9 = vadd.f32 %v14197_v20, %v6337_v54 }
 0x4cf   :  { %8038 = vst.msk [vmem:[#allocation9 + $0x453] ss:$4 sm:$0xf] %vm8752_vm0, %v7290_v55  ;;  %v7327_v59 = vcombine.low %v7305_v35, %v7319_v44  ;;  %v7328_v14 = vcombine.high %v7305_v35, %v7319_v44  ;;  %v7329_v38 = vcombine.low %v7312_v52, %v7326_v39  ;;  %v7330_v34 = vcombine.high %v7312_v52, %v7326_v39  ;;  %v14202_v16 = vld [vmem:[#allocation116_spill] sm:$0xff]  ;;  %v14205_v20 = vld [vmem:[#allocation61_spill] sm:$0xff] }
 0x4d0   :  { %8032 = vst.msk [vmem:[#allocation9 + $0x423] ss:$4 sm:$0xf] %vm8752_vm0, %v7291_v32  ;;  %8034 = vst.msk [vmem:[#allocation9 + $0x433] ss:$4 sm:$0xf] %vm8752_vm0, %v7293_v30  ;;  %v6468_v15 = vadd.f32 %v14198_v49, %v6339_v46  ;;  %v6340_v27 = vmul.f32 %v12673_v36, %v12983_v48  ;;  %v6595_v56 = vadd.f32 %v14199_v22, %v6466_v9 }
 0x4d1   :  { %8040 = vst.msk [vmem:[#allocation9 + $0x463] ss:$4 sm:$0xf] %vm8752_vm0, %v7292_v60  ;;  %8042 = vst.msk [vmem:[#allocation9 + $0x473] ss:$4 sm:$0xf] %vm8752_vm0, %v7294_v13  ;;  %v7337_v58 = vrot.slane %v7327_v59, %v14151_v63  ;;  %v7344_v1 = vrot.slane %v7329_v38, %v14151_v63  ;;  %v7351_v4 = vrot.slane %v7328_v14, %v14151_v63 }
 0x4d2   :  { %v7358_v41 = vrot.slane %v7330_v34, %v14151_v63  ;;  %v6597_v54 = vadd.f32 %v14200_v8, %v6468_v15  ;;  %v6467_v46 = vadd.f32 %v14201_v11, %v6338_v37  ;;  %v6469_v26 = vadd.f32 %v12685_v25, %v6340_v27  ;;  %v14203_v35 = vld [vmem:[#allocation88_spill] sm:$0xff]  ;;  %v14204_v38 = vld [vmem:[#allocation57_spill] sm:$0xff] }
 0x4d3   :  { %v7359_v19 = vcombine.high %v7337_v58, %v7337_v58  ;;  %v7360_v47 = vcombine.high %v7344_v1, %v7344_v1  ;;  %v7361_v3 = vcombine.high %v7351_v4, %v7351_v4  ;;  %8044 = vst.msk [vmem:[#allocation9 + $0x483] ss:$4 sm:$0xf] %vm8752_vm0, %v7337_v58  ;;  %8046 = vst.msk [vmem:[#allocation9 + $0x493] ss:$4 sm:$0xf] %vm8752_vm0, %v7351_v4 }
 0x4d4   :  { %v7362_v48 = vcombine.high %v7358_v41, %v7358_v41  ;;  %8052 = vst.msk [vmem:[#allocation9 + $0x4c3] ss:$4 sm:$0xf] %vm8752_vm0, %v7344_v1  ;;  %8054 = vst.msk [vmem:[#allocation9 + $0x4d3] ss:$4 sm:$0xf] %vm8752_vm0, %v7358_v41  ;;  %v6596_v55 = vadd.f32 %v14202_v16, %v6467_v46  ;;  %v6598_v25 = vadd.f32 %v14203_v35, %v6469_v26 }
 0x4d5   :  { %v6341_v52 = vmul.f32 %v12673_v36, %v12993_v5  ;;  %v6343_v44 = vmul.f32 %v12673_v36, %v12995_v21  ;;  %8048 = vst.msk [vmem:[#allocation9 + $0x4a3] ss:$4 sm:$0xf] %vm8752_vm0, %v7359_v19  ;;  %8050 = vst.msk [vmem:[#allocation9 + $0x4b3] ss:$4 sm:$0xf] %vm8752_vm0, %v7361_v3  ;;  %v6342_v39 = vmul.f32 %v12673_v36, %v12997_v53 }
 0x4d6   :  { %8056 = vst.msk [vmem:[#allocation9 + $0x4e3] ss:$4 sm:$0xf] %vm8752_vm0, %v7360_v47  ;;  %8058 = vst.msk [vmem:[#allocation9 + $0x4f3] ss:$4 sm:$0xf] %vm8752_vm0, %v7362_v48  ;;  %v6344_v5 = vmul.f32 %v12673_v36, %v12999_v29  ;;  %v6345_v21 = vmul.f32 %v12673_v36, %v13017_v51  ;;  %v6347_v32 = vmul.f32 %v12673_v36, %v13019_v23 }
 0x4d7   :  { %v7363_v60 = vcombine.low %v6595_v56, %v6596_v55  ;;  %v7364_v30 = vcombine.high %v6595_v56, %v6596_v55  ;;  %v7365_v13 = vcombine.low %v6597_v54, %v6598_v25  ;;  %v7366_v59 = vcombine.high %v6597_v54, %v6598_v25  ;;  %v14206_v53 = vld [vmem:[#allocation93_spill] sm:$0xff]  ;;  %v14208_v58 = vld [vmem:[#allocation118_spill] sm:$0xff]  ;;  %v14209_v4 = vld [vmem:[#allocation119_spill] sm:$0xff] }
 0x4d8   :  { %v6470_v14 = vadd.f32 %v12689_v28, %v6341_v52  ;;  %v6472_v34 = vadd.f32 %v14204_v38, %v6343_v44  ;;  %v6471_v9 = vadd.f32 %v14205_v20, %v6342_v39  ;;  %v6473_v49 = vadd.f32 %v14206_v53, %v6344_v5  ;;  %v14207_v37 = vld [vmem:[#allocation117_spill] sm:$0xff]  ;;  %v14210_v41 = vld [vmem:[#allocation120_spill] sm:$0xff] }
 0x4d9   :  { %v7373_v29 = vrot.slane %v7363_v60, %v14151_v63  ;;  %v7380_v15 = vrot.slane %v7364_v30, %v14151_v63  ;;  %v7387_v51 = vrot.slane %v7365_v13, %v14151_v63  ;;  %v7394_v23 = vrot.slane %v7366_v59, %v14151_v63 }
 0x4da   :  { %v6599_v27 = vadd.f32 %v14207_v37, %v6470_v14  ;;  %v6601_v1 = vadd.f32 %v14208_v58, %v6472_v34  ;;  %v6600_v28 = vadd.f32 %v14209_v4, %v6471_v9  ;;  %v6602_v22 = vadd.f32 %v14210_v41, %v6473_v49  ;;  %v14214_v4 = vld [vmem:[#allocation38_spill] sm:$0xff]  ;;  %v14215_v41 = vld [vmem:[#allocation39_spill] sm:$0xff] }
 0x4db   :  { %v7395_v56 = vcombine.low %v7373_v29, %v7387_v51  ;;  %v7396_v8 = vcombine.high %v7373_v29, %v7387_v51  ;;  %v7397_v54 = vcombine.low %v7380_v15, %v7394_v23  ;;  %v7398_v11 = vcombine.high %v7380_v15, %v7394_v23  ;;  %v14211_v23 = vld [vmem:[#allocation36_spill] sm:$0xff] }
 0x4dc   :  { %v7431_v46 = vcombine.low %v6599_v27, %v6600_v28  ;;  %v7432_v26 = vcombine.high %v6599_v27, %v6600_v28  ;;  %v7433_v19 = vcombine.low %v6601_v1, %v6602_v22  ;;  %v7434_v47 = vcombine.high %v6601_v1, %v6602_v22  ;;  %v14212_v27 = vld [vmem:[#allocation37_spill] sm:$0xff] }
 0x4dd   :  { %v7405_v3 = vrot.slane %v7395_v56, %v14151_v63  ;;  %v7412_v48 = vrot.slane %v7397_v54, %v14151_v63  ;;  %v7419_v16 = vrot.slane %v7396_v8, %v14151_v63  ;;  %v7426_v55 = vrot.slane %v7398_v11, %v14151_v63 }
 0x4de   :  { %v7441_v35 = vrot.slane %v7431_v46, %v14151_v63  ;;  %v7448_v25 = vrot.slane %v7432_v26, %v14151_v63  ;;  %v7455_v52 = vrot.slane %v7433_v19, %v14151_v63  ;;  %v7462_v44 = vrot.slane %v7434_v47, %v14151_v63 }
 0x4df   :  { %v7427_v39 = vcombine.high %v7405_v3, %v7405_v3  ;;  %v7428_v5 = vcombine.high %v7412_v48, %v7412_v48  ;;  %v7429_v60 = vcombine.high %v7419_v16, %v7419_v16  ;;  %v7430_v30 = vcombine.high %v7426_v55, %v7426_v55  ;;  %8060 = vst.msk [vmem:[#allocation9 + $0x503] ss:$4 sm:$0xf] %vm8752_vm0, %v7405_v3  ;;  %v14216_v3 = vld [vmem:[#allocation123_spill] sm:$0xff] }
 0x4e0   :  { %8062 = vst.msk [vmem:[#allocation9 + $0x513] ss:$4 sm:$0xf] %vm8752_vm0, %v7419_v16  ;;  %8068 = vst.msk [vmem:[#allocation9 + $0x543] ss:$4 sm:$0xf] %vm8752_vm0, %v7412_v48  ;;  %v7463_v13 = vcombine.low %v7441_v35, %v7455_v52  ;;  %v7464_v59 = vcombine.high %v7441_v35, %v7455_v52  ;;  %v7465_v14 = vcombine.low %v7448_v25, %v7462_v44 }
 0x4e1   :  { %8070 = vst.msk [vmem:[#allocation9 + $0x553] ss:$4 sm:$0xf] %vm8752_vm0, %v7426_v55  ;;  %v7466_v38 = vcombine.high %v7448_v25, %v7462_v44  ;;  %8064 = vst.msk [vmem:[#allocation9 + $0x523] ss:$4 sm:$0xf] %vm8752_vm0, %v7427_v39  ;;  %v6474_v34 = vadd.f32 %v12705_v62, %v6345_v21  ;;  %v6476_v20 = vadd.f32 %v12709_v17, %v6347_v32 }
 0x4e2   :  { %8066 = vst.msk [vmem:[#allocation9 + $0x533] ss:$4 sm:$0xf] %vm8752_vm0, %v7429_v60  ;;  %8072 = vst.msk [vmem:[#allocation9 + $0x563] ss:$4 sm:$0xf] %vm8752_vm0, %v7428_v5  ;;  %v6346_v9 = vmul.f32 %v12673_v36, %v13021_v31  ;;  %v6348_v53 = vmul.f32 %v12673_v36, %v13023_v40  ;;  %v7473_v49 = vrot.slane %v7463_v13, %v14151_v63 }
 0x4e3   :  { %8074 = vst.msk [vmem:[#allocation9 + $0x573] ss:$4 sm:$0xf] %vm8752_vm0, %v7430_v30  ;;  %v7480_v29 = vrot.slane %v7465_v14, %v14151_v63  ;;  %v7487_v15 = vrot.slane %v7464_v59, %v14151_v63  ;;  %v7494_v51 = vrot.slane %v7466_v38, %v14151_v63  ;;  %v6603_v37 = vadd.f32 %v14211_v23, %v6474_v34  ;;  %v14213_v21 = vld [vmem:[#allocation122_spill] sm:$0xff]  ;;  %v14217_v16 = vld [vmem:[#allocation124_spill] sm:$0xff]  ;;  %v14220_v39 = vld [vmem:[#allocation81_spill] sm:$0xff] }
 0x4e4   :  { %v6605_v62 = vadd.f32 %v14212_v27, %v6476_v20  ;;  %v6475_v17 = vadd.f32 %v14213_v21, %v6346_v9  ;;  %v6477_v32 = vadd.f32 %v12717_v24, %v6348_v53  ;;  %v7495_v31 = vcombine.high %v7473_v49, %v7473_v49  ;;  %8076 = vst.msk [vmem:[#allocation9 + $0x583] ss:$4 sm:$0xf] %vm8752_vm0, %v7473_v49  ;;  %v14219_v52 = vld [vmem:[#allocation40_spill] sm:$0xff]  ;;  %v14221_v60 = vld [vmem:[#allocation41_spill] sm:$0xff]  ;;  %v14222_v30 = vld [vmem:[#allocation42_spill] sm:$0xff] }
 0x4e5   :  { %v7496_v58 = vcombine.high %v7480_v29, %v7480_v29  ;;  %v7497_v1 = vcombine.high %v7487_v15, %v7487_v15  ;;  %v7498_v40 = vcombine.high %v7494_v51, %v7494_v51  ;;  %8078 = vst.msk [vmem:[#allocation9 + $0x593] ss:$4 sm:$0xf] %vm8752_vm0, %v7487_v15  ;;  %8084 = vst.msk [vmem:[#allocation9 + $0x5c3] ss:$4 sm:$0xf] %vm8752_vm0, %v7480_v29 }
 0x4e6   :  { %8086 = vst.msk [vmem:[#allocation9 + $0x5d3] ss:$4 sm:$0xf] %vm8752_vm0, %v7494_v51  ;;  %v6604_v28 = vadd.f32 %v14214_v4, %v6475_v17  ;;  %v6606_v24 = vadd.f32 %v14215_v41, %v6477_v32  ;;  %v6349_v22 = vmul.f32 %v12673_v36, %v13047_v50  ;;  %v6351_v56 = vmul.f32 %v12673_v36, %v13049_v42  ;;  %v14223_v41 = vld [vmem:[#allocation126_spill] sm:$0xff] }
 0x4e7   :  { %8080 = vst.msk [vmem:[#allocation9 + $0x5a3] ss:$4 sm:$0xf] %vm8752_vm0, %v7495_v31  ;;  %8082 = vst.msk [vmem:[#allocation9 + $0x5b3] ss:$4 sm:$0xf] %vm8752_vm0, %v7497_v1  ;;  %v6350_v8 = vmul.f32 %v12673_v36, %v13059_v6  ;;  %v6352_v50 = vmul.f32 %v12673_v36, %v13061_v18  ;;  %v6353_v42 = vmul.f32 %v12673_v36, %v13085_v43 }
 0x4e8   :  { %8088 = vst.msk [vmem:[#allocation9 + $0x5e3] ss:$4 sm:$0xf] %vm8752_vm0, %v7496_v58  ;;  %8090 = vst.msk [vmem:[#allocation9 + $0x5f3] ss:$4 sm:$0xf] %vm8752_vm0, %v7498_v40  ;;  %v6355_v54 = vmul.f32 %v12673_v36, %v13087_v57  ;;  %v7499_v11 = vcombine.low %v6603_v37, %v6604_v28  ;;  %v7500_v46 = vcombine.high %v6603_v37, %v6604_v28 }
 0x4e9   :  { %v7501_v26 = vcombine.low %v6605_v62, %v6606_v24  ;;  %v7502_v19 = vcombine.high %v6605_v62, %v6606_v24  ;;  %v6478_v47 = vadd.f32 %v12723_v45, %v6349_v22  ;;  %v6480_v48 = vadd.f32 %v14216_v3, %v6351_v56  ;;  %v14218_v6 = vld [vmem:[#allocation125_spill] sm:$0xff]  ;;  %v14224_v22 = vld [vmem:[#allocation127_spill] sm:$0xff] }
 0x4ea   :  { %v6479_v55 = vadd.f32 %v14217_v16, %v6350_v8  ;;  %v6481_v35 = vadd.f32 %v14218_v6, %v6352_v50  ;;  %v7509_v18 = vrot.slane %v7499_v11, %v14151_v63  ;;  %v7516_v25 = vrot.slane %v7500_v46, %v14151_v63  ;;  %v14227_v16 = vld [vmem:[#allocation128_spill] sm:$0xff] }
 0x4eb   :  { %v7523_v43 = vrot.slane %v7501_v26, %v14151_v63  ;;  %v7530_v57 = vrot.slane %v7502_v19, %v14151_v63  ;;  %v6607_v44 = vadd.f32 %v14219_v52, %v6478_v47  ;;  %v6609_v5 = vadd.f32 %v14220_v39, %v6480_v48  ;;  %v14225_v47 = vld [vmem:[#allocation43_spill] sm:$0xff]  ;;  %v14226_v48 = vld [vmem:[#allocation44_spill] sm:$0xff] }
 0x4ec   :  { %v6608_v45 = vadd.f32 %v14221_v60, %v6479_v55  ;;  %v6610_v13 = vadd.f32 %v14222_v30, %v6481_v35  ;;  %v6482_v24 = vadd.f32 %v14223_v41, %v6353_v42  ;;  %v6484_v56 = vadd.f32 %v14224_v22, %v6355_v54  ;;  %v14228_v55 = vld [vmem:[#allocation129_spill] sm:$0xff]  ;;  %v14231_v60 = vld [vmem:[#allocation136_spill] sm:$0xff] }
 0x4ed   :  { %v7531_v59 = vcombine.low %v7509_v18, %v7523_v43  ;;  %v7532_v14 = vcombine.high %v7509_v18, %v7523_v43  ;;  %v7533_v38 = vcombine.low %v7516_v25, %v7530_v57  ;;  %v7534_v34 = vcombine.high %v7516_v25, %v7530_v57  ;;  %v14229_v25 = vld [vmem:[#allocation45_spill] sm:$0xff]  ;;  %v14230_v57 = vld [vmem:[#allocation46_spill] sm:$0xff] }
 0x4ee   :  { %v7567_v20 = vcombine.low %v6607_v44, %v6608_v45  ;;  %v7568_v9 = vcombine.high %v6607_v44, %v6608_v45  ;;  %v7569_v53 = vcombine.low %v6609_v5, %v6610_v13  ;;  %v7570_v49 = vcombine.high %v6609_v5, %v6610_v13  ;;  %v14233_v30 = vld [vmem:[#allocation137_spill] sm:$0xff] }
 0x4ef   :  { %v7541_v29 = vrot.slane %v7531_v59, %v14151_v63  ;;  %v7548_v15 = vrot.slane %v7533_v38, %v14151_v63  ;;  %v7555_v51 = vrot.slane %v7532_v14, %v14151_v63  ;;  %v7562_v23 = vrot.slane %v7534_v34, %v14151_v63 }
 0x4f0   :  { %v7577_v37 = vrot.slane %v7567_v20, %v14151_v63  ;;  %v7584_v27 = vrot.slane %v7568_v9, %v14151_v63  ;;  %v7591_v62 = vrot.slane %v7569_v53, %v14151_v63  ;;  %v7598_v21 = vrot.slane %v7570_v49, %v14151_v63  ;;  %v14234_v20 = vld [vmem:[#allocation164_spill] sm:$0xff]  ;;  %v14235_v53 = vld [vmem:[#allocation165_spill] sm:$0xff] }
 0x4f1   :  { %v7563_v17 = vcombine.high %v7541_v29, %v7541_v29  ;;  %v7564_v32 = vcombine.high %v7548_v15, %v7548_v15  ;;  %v7565_v31 = vcombine.high %v7555_v51, %v7555_v51  ;;  %v7566_v58 = vcombine.high %v7562_v23, %v7562_v23  ;;  %8092 = vst.msk [vmem:[#allocation9 + $0x603] ss:$4 sm:$0xf] %vm8752_vm0, %v7541_v29 }
 0x4f2   :  { %8094 = vst.msk [vmem:[#allocation9 + $0x613] ss:$4 sm:$0xf] %vm8752_vm0, %v7555_v51  ;;  %8100 = vst.msk [vmem:[#allocation9 + $0x643] ss:$4 sm:$0xf] %vm8752_vm0, %v7548_v15  ;;  %v7599_v1 = vcombine.low %v7577_v37, %v7591_v62  ;;  %v7600_v40 = vcombine.high %v7577_v37, %v7591_v62  ;;  %v7601_v4 = vcombine.low %v7584_v27, %v7598_v21 }
 0x4f3   :  { %8102 = vst.msk [vmem:[#allocation9 + $0x653] ss:$4 sm:$0xf] %vm8752_vm0, %v7562_v23  ;;  %v7602_v28 = vcombine.high %v7584_v27, %v7598_v21  ;;  %8096 = vst.msk [vmem:[#allocation9 + $0x623] ss:$4 sm:$0xf] %vm8752_vm0, %v7563_v17  ;;  %v6354_v8 = vmul.f32 %v12673_v36, %v13093_v61  ;;  %v6356_v50 = vmul.f32 %v12673_v36, %v13095_v0 }
 0x4f4   :  { %8098 = vst.msk [vmem:[#allocation9 + $0x633] ss:$4 sm:$0xf] %vm8752_vm0, %v7565_v31  ;;  %8104 = vst.msk [vmem:[#allocation9 + $0x663] ss:$4 sm:$0xf] %vm8752_vm0, %v7564_v32  ;;  %v7609_v11 = vrot.slane %v7599_v1, %v14151_v63  ;;  %v7616_v46 = vrot.slane %v7601_v4, %v14151_v63  ;;  %v7623_v26 = vrot.slane %v7600_v40, %v14151_v63 }
 0x4f5   :  { %8106 = vst.msk [vmem:[#allocation9 + $0x673] ss:$4 sm:$0xf] %vm8752_vm0, %v7566_v58  ;;  %v7630_v19 = vrot.slane %v7602_v28, %v14151_v63  ;;  %v6611_v3 = vadd.f32 %v14225_v47, %v6482_v24  ;;  %v6613_v42 = vadd.f32 %v14226_v48, %v6484_v56  ;;  %v6483_v54 = vadd.f32 %v14227_v16, %v6354_v8  ;;  %v14237_v27 = vld [vmem:[#allocation48_spill] sm:$0xff]  ;;  %v14238_v21 = vld [vmem:[#allocation49_spill] sm:$0xff]  ;;  %v14239_v32 = vld [vmem:[#allocation50_spill] sm:$0xff] }
 0x4f6   :  { %v6485_v6 = vadd.f32 %v14228_v55, %v6356_v50  ;;  %v7631_v61 = vcombine.high %v7609_v11, %v7609_v11  ;;  %v7632_v35 = vcombine.high %v7616_v46, %v7616_v46  ;;  %v7633_v18 = vcombine.high %v7623_v26, %v7623_v26  ;;  %8108 = vst.msk [vmem:[#allocation9 + $0x683] ss:$4 sm:$0xf] %vm8752_vm0, %v7609_v11 }
 0x4f7   :  { %v7634_v0 = vcombine.high %v7630_v19, %v7630_v19  ;;  %8110 = vst.msk [vmem:[#allocation9 + $0x693] ss:$4 sm:$0xf] %vm8752_vm0, %v7623_v26  ;;  %8116 = vst.msk [vmem:[#allocation9 + $0x6c3] ss:$4 sm:$0xf] %vm8752_vm0, %v7616_v46  ;;  %v6612_v43 = vadd.f32 %v14229_v25, %v6483_v54  ;;  %v6357_v44 = vmul.f32 %v12673_v36, %v13105_v2 }
 0x4f8   :  { %8118 = vst.msk [vmem:[#allocation9 + $0x6d3] ss:$4 sm:$0xf] %vm8752_vm0, %v7630_v19  ;;  %v6614_v52 = vadd.f32 %v14230_v57, %v6485_v6  ;;  %v6359_v39 = vmul.f32 %v12673_v36, %v13107_v12  ;;  %8112 = vst.msk [vmem:[#allocation9 + $0x6a3] ss:$4 sm:$0xf] %vm8752_vm0, %v7631_v61  ;;  %v6358_v5 = vmul.f32 %v12673_v36, %v13109_v33 }
 0x4f9   :  { %8114 = vst.msk [vmem:[#allocation9 + $0x6b3] ss:$4 sm:$0xf] %vm8752_vm0, %v7633_v18  ;;  %8120 = vst.msk [vmem:[#allocation9 + $0x6e3] ss:$4 sm:$0xf] %vm8752_vm0, %v7632_v35  ;;  %v6360_v12 = vmul.f32 %v12673_v36, %v13111_v10  ;;  %v7635_v59 = vcombine.low %v6611_v3, %v6612_v43  ;;  %v7636_v14 = vcombine.high %v6611_v3, %v6612_v43 }
 0x4fa   :  { %8122 = vst.msk [vmem:[#allocation9 + $0x6f3] ss:$4 sm:$0xf] %vm8752_vm0, %v7634_v0  ;;  %v14232_v2 = vld [vmem:[#allocation112_spill] sm:$0xff]  ;;  %v7637_v38 = vcombine.low %v6613_v42, %v6614_v52  ;;  %v7638_v34 = vcombine.high %v6613_v42, %v6614_v52  ;;  %v6486_v9 = vadd.f32 %v14234_v20, %v6357_v44  ;;  %v6488_v49 = vadd.f32 %v14235_v53, %v6359_v39  ;;  %v14236_v10 = vld [vmem:[#allocation47_spill] sm:$0xff] }
 0x4fb   :  { %v6423_v45 = vmul.f32 %v14232_v2, %v14231_v60  ;;  %v6425_v13 = vmul.f32 %v14232_v2, %v14233_v30  ;;  %v7645_v33 = vrot.slane %v7635_v59, %v14151_v63  ;;  %v7652_v51 = vrot.slane %v7636_v14, %v14151_v63 }
 0x4fc   :  { %v7659_v23 = vrot.slane %v7637_v38, %v14151_v63  ;;  %v7666_v36 = vrot.slane %v7638_v34, %v14151_v63  ;;  %v6615_v37 = vadd.f32 %v14236_v10, %v6486_v9  ;;  %v6617_v62 = vadd.f32 %v14237_v27, %v6488_v49 }
 0x4fd   :  { %v6487_v29 = vadd.f32 %v6423_v45, %v6358_v5  ;;  %v6489_v15 = vadd.f32 %v6425_v13, %v6360_v12 }
 0x4fe   :  { %v7667_v58 = vcombine.low %v7645_v33, %v7659_v23  ;;  %v7668_v1 = vcombine.high %v7645_v33, %v7659_v23  ;;  %v7669_v40 = vcombine.low %v7652_v51, %v7666_v36  ;;  %v7670_v4 = vcombine.high %v7652_v51, %v7666_v36 }
 0x4ff   :  { %v6616_v17 = vadd.f32 %v14238_v21, %v6487_v29  ;;  %v6618_v31 = vadd.f32 %v14239_v32, %v6489_v15 }
 0x500   :  { %v7677_v56 = vrot.slane %v7667_v58, %v14151_v63  ;;  %v7684_v8 = vrot.slane %v7669_v40, %v14151_v63  ;;  %v7691_v50 = vrot.slane %v7668_v1, %v14151_v63  ;;  %v7698_v11 = vrot.slane %v7670_v4, %v14151_v63 }
 0x501   :  { %v7703_v28 = vcombine.low %v6615_v37, %v6616_v17  ;;  %v7704_v41 = vcombine.high %v6615_v37, %v6616_v17  ;;  %v7705_v24 = vcombine.low %v6617_v62, %v6618_v31  ;;  %v7706_v22 = vcombine.high %v6617_v62, %v6618_v31 }
 0x502   :  { %v7699_v3 = vcombine.high %v7677_v56, %v7677_v56  ;;  %v7700_v48 = vcombine.high %v7684_v8, %v7684_v8  ;;  %v7701_v42 = vcombine.high %v7691_v50, %v7691_v50  ;;  %v7702_v16 = vcombine.high %v7698_v11, %v7698_v11  ;;  %8124 = vst.msk [vmem:[#allocation9 + $0x703] ss:$4 sm:$0xf] %vm8752_vm0, %v7677_v56 }
 0x503   :  { %v7713_v46 = vrot.slane %v7703_v28, %v14151_v63  ;;  %v7720_v26 = vrot.slane %v7704_v41, %v14151_v63  ;;  %v7727_v19 = vrot.slane %v7705_v24, %v14151_v63  ;;  %v7734_v47 = vrot.slane %v7706_v22, %v14151_v63  ;;  %8126 = vst.msk [vmem:[#allocation9 + $0x713] ss:$4 sm:$0xf] %vm8752_vm0, %v7691_v50 }
 0x504   :  { %8132 = vst.msk [vmem:[#allocation9 + $0x743] ss:$4 sm:$0xf] %vm8752_vm0, %v7684_v8  ;;  %8134 = vst.msk [vmem:[#allocation9 + $0x753] ss:$4 sm:$0xf] %vm8752_vm0, %v7698_v11 }
 0x505   :  { %v7735_v54 = vcombine.low %v7713_v46, %v7727_v19  ;;  %v7736_v55 = vcombine.high %v7713_v46, %v7727_v19  ;;  %v7737_v6 = vcombine.low %v7720_v26, %v7734_v47  ;;  %v7738_v61 = vcombine.high %v7720_v26, %v7734_v47  ;;  %8128 = vst.msk [vmem:[#allocation9 + $0x723] ss:$4 sm:$0xf] %vm8752_vm0, %v7699_v3 }
 0x506   :  { %8130 = vst.msk [vmem:[#allocation9 + $0x733] ss:$4 sm:$0xf] %vm8752_vm0, %v7701_v42  ;;  %8136 = vst.msk [vmem:[#allocation9 + $0x763] ss:$4 sm:$0xf] %vm8752_vm0, %v7700_v48 }
 0x507   :  { %8138 = vst.msk [vmem:[#allocation9 + $0x773] ss:$4 sm:$0xf] %vm8752_vm0, %v7702_v16  ;;  %v7745_v35 = vrot.slane %v7735_v54, %v14151_v63  ;;  %v7752_v18 = vrot.slane %v7737_v6, %v14151_v63  ;;  %v7759_v0 = vrot.slane %v7736_v55, %v14151_v63  ;;  %v7766_v25 = vrot.slane %v7738_v61, %v14151_v63 }
 0x509   :  { %v7767_v43 = vcombine.high %v7745_v35, %v7745_v35  ;;  %v7768_v57 = vcombine.high %v7752_v18, %v7752_v18  ;;  %v7769_v52 = vcombine.high %v7759_v0, %v7759_v0  ;;  %v7770_v44 = vcombine.high %v7766_v25, %v7766_v25  ;;  %8140 = vst.msk [vmem:[#allocation9 + $0x783] ss:$4 sm:$0xf] %vm8752_vm0, %v7745_v35 }
 0x50a   :  { %8142 = vst.msk [vmem:[#allocation9 + $0x793] ss:$4 sm:$0xf] %vm8752_vm0, %v7759_v0  ;;  %8148 = vst.msk [vmem:[#allocation9 + $0x7c3] ss:$4 sm:$0xf] %vm8752_vm0, %v7752_v18 }
 0x50b   :  { %8150 = vst.msk [vmem:[#allocation9 + $0x7d3] ss:$4 sm:$0xf] %vm8752_vm0, %v7766_v25  ;;  %8144 = vst.msk [vmem:[#allocation9 + $0x7a3] ss:$4 sm:$0xf] %vm8752_vm0, %v7767_v43 }
 0x50c   :  { %8146 = vst.msk [vmem:[#allocation9 + $0x7b3] ss:$4 sm:$0xf] %vm8752_vm0, %v7769_v52  ;;  %8152 = vst.msk [vmem:[#allocation9 + $0x7e3] ss:$4 sm:$0xf] %vm8752_vm0, %v7768_v57 }
 0x50d   :  { %8154 = vst.msk [vmem:[#allocation9 + $0x7f3] ss:$4 sm:$0xf] %vm8752_vm0, %v7770_v44 }
 0x50e   :  { %8643 = shalt.err (!%p8640_p9)
}
 0x50f   :  { %s8644_s4 = scalar_lea.hbm %s13490_s3, 32768 }
 0x510   :  { %p8645_p10 = scmp.ne.s32.totalorder %s13490_s3, %s8644_s4  ;;  %p8648_p11 = scmp.lt.u32.totalorder %s8644_s4, %s13490_s3 }
 0x512   :  { %p8650_p12 = pnand %p8648_p11, %p8645_p10 }
 0x514   :  { %8653 = shalt.err (!%p8650_p12)
}
 0x515   :  { %s8670_s9 = smov 256   ;;  %s8671_s10 = smov 16  }
 0x516   :  { %8166 = dma.vmem_to_hbm [thread:$0]  %s8161_s28, 32768, %s13490_s3, [#allocation8], %s8670_s9, %s8670_s9, %s8671_s10  }
 0x517   :  { %8660 = dma.done.wait [#allocation8], 32768  }
 0x518   :  { %8661 = vsyncadd [#allocation8], 4294934528 }
 0x519   :  { %8170 = vsyncpa [#allocation7], 1 }
 0x51a   :  { %8171 = vsyncpa [#allocation8], 1 }
 0x51b   :  { %8172 = vsyncmov [#allocation3] }
 0x51e   :  { %s8173_s13 = vpop.sfrf %8172 }
 0x51f   :  { %p8187_p13 = scmp.ne.s32.totalorder %s8173_s13, 0 }
 0x521   :  { %8177 = shalt.err (%p8187_p13)  }

</bundles_post_ra>
